<compile_context>
chip_gen: v7x
topology: tpu7x:2x2x1
jax: 0.10.0
libtpu: 0.0.40
codegen_flags: <defaults>
</compile_context>

<pallas_src>
import math
from functools import partial

import jax
import jax.numpy as jnp
import numpy as np
from jax.experimental import pallas as pl
from jax.experimental.pallas import tpu as pltpu


# ---------------------------------------------------------------------------
# Guessed SpherePad / SphereTrim semantics (shape preserving margin refresh):
# overwrite the outer k-pixel margin with spherically consistent values from the
# interior (longitude wrap along W, pole flip + half-width roll along H).
# TODO(synk): exact SpherePad/SphereTrim pole handling unknown (module source not
# provided); kernel and reference share this interpretation.


# ---------------------------------------------------------------------------
# In-kernel helpers (all work on a flattened (H*W, C) spatial-major tile).
def _sphere_refresh_flat(y, k, H, W, col):
    """Margin refresh of the outer k pixels on a flat (H*W, C) tile."""
    HW, C = y.shape
    s = W - 2 * k                                     # longitude-wrap shift
    z = jnp.zeros((W, C), y.dtype)
    ypad = jnp.concatenate([z, y, z], axis=0)         # sublane-aligned concat
    plus = ypad[W + s:W + s + HW, :]                  # value at column w + s
    minus = ypad[W - s:W - s + HW, :]                 # value at column w - s
    xww = jnp.where(col < k, plus, jnp.where(col >= W - k, minus, y))

    half = W // 2

    def rolled_row(r):                                # image row r rolled by W/2
        base = r * W
        return jnp.concatenate([xww[base + half:base + W, :],
                                xww[base:base + half, :]], axis=0)

    top = [rolled_row(2 * k - 1 - j) for j in range(k)]
    bot = [rolled_row(H - k - 1 - j) for j in range(k)]
    mid = xww[k * W:(H - k) * W, :]
    return jnp.concatenate(top + [mid] + bot, axis=0)


def _conv3x3_prelu_flat(y, w_ref, b, alpha, col, W, cdt):
    """3x3 conv (stride 1, zero pad 1) + bias + per-channel PReLU on a flat tile.

    y: (H*W, C) f32.  w_ref: (9, C, C) tap-major weights (cdt).  b/alpha: (1, C) f32.
    Each tap is a shifted sublane slice of a row-zero-padded flat buffer; the
    dx=0 / dx=2 taps mask the column that wrapped across a row boundary.
    """
    HW, C = y.shape
    z = jnp.zeros((2 * W, C), jnp.float32)
    ypad = jnp.concatenate([z, y, z], axis=0)         # (HW + 4W, C), f32
    left_ok = col > 0                                  # dx = 0 valid columns
    right_ok = col < W - 1                             # dx = 2 valid columns

    acc = jnp.zeros((HW, C), jnp.float32)
    # NOTE: for large C these 9 K=C matmuls should be fused into one K=9C im2col
    # matmul; at C=4 the MXU is latency-bound either way and this form needs no
    # lane-axis concatenation.
    for dy in range(3):
        for dx in range(3):
            start = (dy + 1) * W + (dx - 1)
            patch = ypad[start:start + HW, :]          # shifted sublane slice
            if dx == 0:
                patch = jnp.where(left_ok, patch, jnp.zeros_like(patch))
            elif dx == 2:
                patch = jnp.where(right_ok, patch, jnp.zeros_like(patch))
            acc = acc + jnp.dot(patch.astype(cdt), w_ref[dy * 3 + dx],
                                preferred_element_type=jnp.float32)
    acc = acc + b
    return jnp.where(acc > 0, acc, alpha * acc)


def _residual_block_kernel(x_ref, col_ref, w1_ref, b1_ref, a1_ref,
                           w2_ref, b2_ref, a2_ref, o_ref, *, H, W, cdt):
    # x_ref / o_ref: (1, C, H*W) lane-dense tiles; w*: (9, C, C); b*/a*: (1, C).
    x_t = x_ref[0].astype(jnp.float32)                 # (C, HW) lane-dense
    x = jnp.transpose(x_t)                             # (HW, C) spatial-major
    col = col_ref[...]                                 # (HW, 1) column index

    y = _sphere_refresh_flat(x, 2, H, W, col)                                # pad
    y = _conv3x3_prelu_flat(y, w1_ref, b1_ref[...], a1_ref[...], col, W, cdt)
    y = _sphere_refresh_flat(y, 1, H, W, col)                                # trim1
    y = _conv3x3_prelu_flat(y, w2_ref, b2_ref[...], a2_ref[...], col, W, cdt)
    y = _sphere_refresh_flat(y, 2, H, W, col)                                # trim2

    # residual add + lane-dense (C, HW) store
    o_ref[0] = (x_t + jnp.transpose(y)).astype(o_ref.dtype)


# ---------------------------------------------------------------------------
# Parameters and wrapper.
def init_params(channels, key):
    C = channels
    bound = 1.0 / math.sqrt(C * 3 * 3)                 # PyTorch conv default init
    ks = jax.random.split(key, 4)
    w1 = jax.random.uniform(ks[0], (C, C, 3, 3), jnp.float32, -bound, bound)
    b1 = jax.random.uniform(ks[1], (C,), jnp.float32, -bound, bound)
    w2 = jax.random.uniform(ks[2], (C, C, 3, 3), jnp.float32, -bound, bound)
    b2 = jax.random.uniform(ks[3], (C,), jnp.float32, -bound, bound)
    a1 = jnp.full((C,), 0.25, jnp.float32)             # PReLU default init
    a2 = jnp.full((C,), 0.25, jnp.float32)
    return dict(w1=w1, b1=b1, a1=a1, w2=w2, b2=b2, a2=a2)


def prepare_params(params, compute_dtype=jnp.bfloat16):
    """Pack params into the kernel layout ONCE (hoisted out of the forward)."""
    C = params["b1"].shape[0]

    def tap_major(w):  # PyTorch (Cout, Cin, 3, 3) -> (9, Cin, Cout)
        return jnp.transpose(w, (2, 3, 1, 0)).reshape(9, C, C).astype(compute_dtype)

    f32 = jnp.float32
    return dict(
        w1=tap_major(params["w1"]), b1=params["b1"].reshape(1, C).astype(f32),
        a1=params["a1"].reshape(1, C).astype(f32),
        w2=tap_major(params["w2"]), b2=params["b2"].reshape(1, C).astype(f32),
        a2=params["a2"].reshape(1, C).astype(f32))


def residual_block_v2(x_nchw, prepared):
    """PyTorch-facing forward: NCHW in, NCHW out (single fused Pallas call)."""
    N, C, H, W = x_nchw.shape
    HW = H * W
    x_flat = x_nchw.reshape(N, C, HW).astype(jnp.float32)
    col = (jnp.arange(HW, dtype=jnp.int32) % W).reshape(HW, 1)
    kernel = partial(_residual_block_kernel, H=H, W=W, cdt=prepared["w1"].dtype)
    out = pl.pallas_call(
        kernel,
        out_shape=jax.ShapeDtypeStruct((N, C, HW), jnp.float32),
        grid=(N,),
        in_specs=[
            pl.BlockSpec((1, C, HW), lambda n: (n, 0, 0)),
            pl.BlockSpec((HW, 1), lambda n: (0, 0)),
            pl.BlockSpec((9, C, C), lambda n: (0, 0, 0)),
            pl.BlockSpec((1, C), lambda n: (0, 0)),
            pl.BlockSpec((1, C), lambda n: (0, 0)),
            pl.BlockSpec((9, C, C), lambda n: (0, 0, 0)),
            pl.BlockSpec((1, C), lambda n: (0, 0)),
            pl.BlockSpec((1, C), lambda n: (0, 0)),
        ],
        out_specs=pl.BlockSpec((1, C, HW), lambda n: (n, 0, 0)),
        compiler_params=pltpu.CompilerParams(
            dimension_semantics=("parallel",),         # megacore shards the batch
            vmem_limit_bytes=32 * 1024 * 1024),
    )(x_flat, col, prepared["w1"], prepared["b1"], prepared["a1"],
      prepared["w2"], prepared["b2"], prepared["a2"])
    return out.reshape(N, C, H, W)


# ---------------------------------------------------------------------------
# Pure-JAX reference (numerical verification of the fused Pallas path).
def sphere_refresh_ref(x, k):
    """Same guessed SpherePad/SphereTrim semantics, on the last two axes (H, W)."""
    if k == 0:
        return x
    H, W = x.shape[-2], x.shape[-1]
    core = x[..., k:H - k, k:W - k]
    xw = jnp.concatenate([core[..., -k:], core, core[..., :k]], axis=-1)
    top = jnp.roll(jnp.flip(xw[..., :k, :], axis=-2), W // 2, axis=-1)
    bot = jnp.roll(jnp.flip(xw[..., -k:, :], axis=-2), W // 2, axis=-1)
    return jnp.concatenate([top, xw, bot], axis=-2)


def _conv3x3_prelu_ref(x, w_pt, b, alpha):
    y = jax.lax.conv_general_dilated(
        x, w_pt, window_strides=(1, 1), padding=((1, 1), (1, 1)),
        dimension_numbers=("NCHW", "OIHW", "NCHW"))
    y = y + b.reshape(1, -1, 1, 1)
    a = alpha.reshape(1, -1, 1, 1)
    return jnp.where(y > 0, y, a * y)


def residual_block_v2_ref(x, params):
    x = x.astype(jnp.float32)
    y = sphere_refresh_ref(x, 2)
    y = _conv3x3_prelu_ref(y, params["w1"], params["b1"], params["a1"])
    y = sphere_refresh_ref(y, 1)
    y = _conv3x3_prelu_ref(y, params["w2"], params["b2"], params["a2"])
    y = sphere_refresh_ref(y, 2)
    return x + y


if __name__ == "__main__":
    N, C, H, W = 2, 4, 16, 16
    key = jax.random.PRNGKey(0)
    kx, kp = jax.random.split(key)
    x = jax.random.normal(kx, (N, C, H, W), jnp.float32)
    params = init_params(C, kp)
    prepared = prepare_params(params)                 # weight packing hoisted

    fwd = jax.jit(residual_block_v2)
    out = jax.block_until_ready(fwd(x, prepared))
    ref = jax.block_until_ready(residual_block_v2_ref(x, params))

    assert out.shape == (N, C, H, W) and out.dtype == jnp.float32
    np.testing.assert_allclose(np.asarray(out), np.asarray(ref), rtol=2e-2, atol=2e-2)
    print("KERNEL_OK")
</pallas_src>

<mosaic_0001>
module attributes {stable_mosaic.version = 11 : i64} {
  func.func @_residual_block_kernel(%arg0: i32, %arg1: memref<1x4x256xf32, #tpu.memory_space<vmem>>, %arg2: memref<256x1xi32, #tpu.memory_space<vmem>>, %arg3: memref<9x4x4xbf16, #tpu.memory_space<vmem>>, %arg4: memref<1x4xf32, #tpu.memory_space<vmem>>, %arg5: memref<1x4xf32, #tpu.memory_space<vmem>>, %arg6: memref<9x4x4xbf16, #tpu.memory_space<vmem>>, %arg7: memref<1x4xf32, #tpu.memory_space<vmem>>, %arg8: memref<1x4xf32, #tpu.memory_space<vmem>>, %arg9: memref<1x4x256xf32, #tpu.memory_space<vmem>>) attributes {dimension_semantics = [#tpu.dimension_semantics<parallel>], iteration_bounds = array<i64: 2>, scalar_prefetch = 0 : i64, scratch_operands = 0 : i64, tpu.core_type = #tpu.core_type<tc>, window_params = [{transform_indices = @transform_0, window_bounds = array<i64: 1, 4, 256>}, {pipeline_mode = #tpu.pipeline_mode<synchronous>, transform_indices = @transform_1, window_bounds = array<i64: 256, 1>}, {pipeline_mode = #tpu.pipeline_mode<synchronous>, transform_indices = @transform_2, window_bounds = array<i64: 9, 4, 4>}, {pipeline_mode = #tpu.pipeline_mode<synchronous>, transform_indices = @transform_3, window_bounds = array<i64: 1, 4>}, {pipeline_mode = #tpu.pipeline_mode<synchronous>, transform_indices = @transform_4, window_bounds = array<i64: 1, 4>}, {pipeline_mode = #tpu.pipeline_mode<synchronous>, transform_indices = @transform_5, window_bounds = array<i64: 9, 4, 4>}, {pipeline_mode = #tpu.pipeline_mode<synchronous>, transform_indices = @transform_6, window_bounds = array<i64: 1, 4>}, {pipeline_mode = #tpu.pipeline_mode<synchronous>, transform_indices = @transform_7, window_bounds = array<i64: 1, 4>}, {transform_indices = @transform_8, window_bounds = array<i64: 1, 4, 256>}]} {
    %c0 = arith.constant 0 : index
    %c0_0 = arith.constant 0 : index
    %c0_1 = arith.constant 0 : index
    %0 = vector.load %arg1[%c0, %c0_0, %c0_1] : memref<1x4x256xf32, #tpu.memory_space<vmem>>, vector<1x4x256xf32>
    %1 = vector.shape_cast %0 : vector<1x4x256xf32> to vector<4x256xf32>
    %2 = tpu.transpose %1, [1, 0] : vector<4x256xf32> -> vector<256x4xf32>
    %c0_2 = arith.constant 0 : index
    %c0_3 = arith.constant 0 : index
    %3 = vector.load %arg2[%c0_2, %c0_3] : memref<256x1xi32, #tpu.memory_space<vmem>>, vector<256x1xi32>
    %cst = arith.constant 0.000000e+00 : f32
    %4 = vector.broadcast %cst : f32 to vector<16x4xf32>
    %5 = tpu.concatenate %4, %2, %4 in 0 : vector<16x4xf32>, vector<256x4xf32>, vector<16x4xf32> -> vector<288x4xf32>
    %6 = vector.extract_strided_slice %5 {offsets = [28, 0], sizes = [256, 4], strides = [1, 1]} : vector<288x4xf32> to vector<256x4xf32>
    %7 = vector.extract_strided_slice %5 {offsets = [4, 0], sizes = [256, 4], strides = [1, 1]} : vector<288x4xf32> to vector<256x4xf32>
    %c2_i32 = arith.constant 2 : i32
    %8 = vector.broadcast %c2_i32 : i32 to vector<256x1xi32>
    %9 = arith.cmpi slt, %3, %8 : vector<256x1xi32>
    %c14_i32 = arith.constant 14 : i32
    %10 = vector.broadcast %c14_i32 : i32 to vector<256x1xi32>
    %11 = arith.cmpi sge, %3, %10 : vector<256x1xi32>
    %12 = vector.shape_cast %11 : vector<256x1xi1> to vector<256x1xi1>
    %13 = vector.broadcast %12 : vector<256x1xi1> to vector<256x4xi1>
    %14 = arith.select %13, %7, %2 : vector<256x4xi1>, vector<256x4xf32>
    %15 = vector.shape_cast %9 : vector<256x1xi1> to vector<256x1xi1>
    %16 = vector.broadcast %15 : vector<256x1xi1> to vector<256x4xi1>
    %17 = arith.select %16, %6, %14 : vector<256x4xi1>, vector<256x4xf32>
    %18 = vector.extract_strided_slice %17 {offsets = [56, 0], sizes = [8, 4], strides = [1, 1]} : vector<256x4xf32> to vector<8x4xf32>
    %19 = vector.extract_strided_slice %17 {offsets = [48, 0], sizes = [8, 4], strides = [1, 1]} : vector<256x4xf32> to vector<8x4xf32>
    %20 = tpu.concatenate %18, %19 in 0 : vector<8x4xf32>, vector<8x4xf32> -> vector<16x4xf32>
    %21 = vector.extract_strided_slice %17 {offsets = [40, 0], sizes = [8, 4], strides = [1, 1]} : vector<256x4xf32> to vector<8x4xf32>
    %22 = vector.extract_strided_slice %17 {offsets = [32, 0], sizes = [8, 4], strides = [1, 1]} : vector<256x4xf32> to vector<8x4xf32>
    %23 = tpu.concatenate %21, %22 in 0 : vector<8x4xf32>, vector<8x4xf32> -> vector<16x4xf32>
    %24 = vector.extract_strided_slice %17 {offsets = [216, 0], sizes = [8, 4], strides = [1, 1]} : vector<256x4xf32> to vector<8x4xf32>
    %25 = vector.extract_strided_slice %17 {offsets = [208, 0], sizes = [8, 4], strides = [1, 1]} : vector<256x4xf32> to vector<8x4xf32>
    %26 = tpu.concatenate %24, %25 in 0 : vector<8x4xf32>, vector<8x4xf32> -> vector<16x4xf32>
    %27 = vector.extract_strided_slice %17 {offsets = [200, 0], sizes = [8, 4], strides = [1, 1]} : vector<256x4xf32> to vector<8x4xf32>
    %28 = vector.extract_strided_slice %17 {offsets = [192, 0], sizes = [8, 4], strides = [1, 1]} : vector<256x4xf32> to vector<8x4xf32>
    %29 = tpu.concatenate %27, %28 in 0 : vector<8x4xf32>, vector<8x4xf32> -> vector<16x4xf32>
    %30 = vector.extract_strided_slice %17 {offsets = [32, 0], sizes = [192, 4], strides = [1, 1]} : vector<256x4xf32> to vector<192x4xf32>
    %31 = tpu.concatenate %20, %23, %30, %26, %29 in 0 : vector<16x4xf32>, vector<16x4xf32>, vector<192x4xf32>, vector<16x4xf32>, vector<16x4xf32> -> vector<256x4xf32>
    %c0_4 = arith.constant 0 : index
    %c0_5 = arith.constant 0 : index
    %32 = vector.load %arg4[%c0_4, %c0_5] : memref<1x4xf32, #tpu.memory_space<vmem>>, vector<1x4xf32>
    %c0_6 = arith.constant 0 : index
    %c0_7 = arith.constant 0 : index
    %33 = vector.load %arg5[%c0_6, %c0_7] : memref<1x4xf32, #tpu.memory_space<vmem>>, vector<1x4xf32>
    %cst_8 = arith.constant 0.000000e+00 : f32
    %34 = vector.broadcast %cst_8 : f32 to vector<32x4xf32>
    %35 = tpu.concatenate %34, %31, %34 in 0 : vector<32x4xf32>, vector<256x4xf32>, vector<32x4xf32> -> vector<320x4xf32>
    %c0_i32 = arith.constant 0 : i32
    %36 = vector.broadcast %c0_i32 : i32 to vector<256x1xi32>
    %37 = arith.cmpi sgt, %3, %36 : vector<256x1xi32>
    %c15_i32 = arith.constant 15 : i32
    %38 = vector.broadcast %c15_i32 : i32 to vector<256x1xi32>
    %39 = arith.cmpi slt, %3, %38 : vector<256x1xi32>
    %cst_9 = arith.constant 0.000000e+00 : f32
    %40 = vector.broadcast %cst_9 : f32 to vector<256x4xf32>
    %41 = vector.extract_strided_slice %35 {offsets = [15, 0], sizes = [256, 4], strides = [1, 1]} : vector<320x4xf32> to vector<256x4xf32>
    %cst_10 = arith.constant 0.000000e+00 : f32
    %42 = vector.broadcast %cst_10 : f32 to vector<256x4xf32>
    %43 = vector.shape_cast %37 : vector<256x1xi1> to vector<256x1xi1>
    %44 = vector.broadcast %43 : vector<256x1xi1> to vector<256x4xi1>
    %45 = arith.select %44, %41, %42 : vector<256x4xi1>, vector<256x4xf32>
    %46 = arith.truncf %45 : vector<256x4xf32> to vector<256x4xbf16>
    %c0_11 = arith.constant 0 : index
    %c0_12 = arith.constant 0 : index
    %c0_13 = arith.constant 0 : index
    %47 = vector.load %arg3[%c0_11, %c0_12, %c0_13] : memref<9x4x4xbf16, #tpu.memory_space<vmem>>, vector<1x4x4xbf16>
    %48 = vector.shape_cast %47 : vector<1x4x4xbf16> to vector<4x4xbf16>
    %cst_14 = arith.constant dense<0.000000e+00> : vector<256x4xf32>
    %49 = tpu.matmul %46, %48, %cst_14 {dimension_numbers = #tpu.dot_dimension_numbers<[1], [0], [0], [1], [0, 0, 1, 1], [], []>} : vector<256x4xbf16>, vector<4x4xbf16>, vector<256x4xf32> -> vector<256x4xf32>
    %50 = arith.addf %40, %49 : vector<256x4xf32>
    %51 = vector.extract_strided_slice %35 {offsets = [16, 0], sizes = [256, 4], strides = [1, 1]} : vector<320x4xf32> to vector<256x4xf32>
    %52 = arith.truncf %51 : vector<256x4xf32> to vector<256x4xbf16>
    %c1 = arith.constant 1 : index
    %c0_15 = arith.constant 0 : index
    %c0_16 = arith.constant 0 : index
    %53 = vector.load %arg3[%c1, %c0_15, %c0_16] : memref<9x4x4xbf16, #tpu.memory_space<vmem>>, vector<1x4x4xbf16>
    %54 = vector.shape_cast %53 : vector<1x4x4xbf16> to vector<4x4xbf16>
    %cst_17 = arith.constant dense<0.000000e+00> : vector<256x4xf32>
    %55 = tpu.matmul %52, %54, %cst_17 {dimension_numbers = #tpu.dot_dimension_numbers<[1], [0], [0], [1], [0, 0, 1, 1], [], []>} : vector<256x4xbf16>, vector<4x4xbf16>, vector<256x4xf32> -> vector<256x4xf32>
    %56 = arith.addf %50, %55 : vector<256x4xf32>
    %57 = vector.extract_strided_slice %35 {offsets = [17, 0], sizes = [256, 4], strides = [1, 1]} : vector<320x4xf32> to vector<256x4xf32>
    %cst_18 = arith.constant 0.000000e+00 : f32
    %58 = vector.broadcast %cst_18 : f32 to vector<256x4xf32>
    %59 = vector.shape_cast %39 : vector<256x1xi1> to vector<256x1xi1>
    %60 = vector.broadcast %59 : vector<256x1xi1> to vector<256x4xi1>
    %61 = arith.select %60, %57, %58 : vector<256x4xi1>, vector<256x4xf32>
    %62 = arith.truncf %61 : vector<256x4xf32> to vector<256x4xbf16>
    %c2 = arith.constant 2 : index
    %c0_19 = arith.constant 0 : index
    %c0_20 = arith.constant 0 : index
    %63 = vector.load %arg3[%c2, %c0_19, %c0_20] : memref<9x4x4xbf16, #tpu.memory_space<vmem>>, vector<1x4x4xbf16>
    %64 = vector.shape_cast %63 : vector<1x4x4xbf16> to vector<4x4xbf16>
    %cst_21 = arith.constant dense<0.000000e+00> : vector<256x4xf32>
    %65 = tpu.matmul %62, %64, %cst_21 {dimension_numbers = #tpu.dot_dimension_numbers<[1], [0], [0], [1], [0, 0, 1, 1], [], []>} : vector<256x4xbf16>, vector<4x4xbf16>, vector<256x4xf32> -> vector<256x4xf32>
    %66 = arith.addf %56, %65 : vector<256x4xf32>
    %67 = vector.extract_strided_slice %35 {offsets = [31, 0], sizes = [256, 4], strides = [1, 1]} : vector<320x4xf32> to vector<256x4xf32>
    %cst_22 = arith.constant 0.000000e+00 : f32
    %68 = vector.broadcast %cst_22 : f32 to vector<256x4xf32>
    %69 = vector.shape_cast %37 : vector<256x1xi1> to vector<256x1xi1>
    %70 = vector.broadcast %69 : vector<256x1xi1> to vector<256x4xi1>
    %71 = arith.select %70, %67, %68 : vector<256x4xi1>, vector<256x4xf32>
    %72 = arith.truncf %71 : vector<256x4xf32> to vector<256x4xbf16>
    %c3 = arith.constant 3 : index
    %c0_23 = arith.constant 0 : index
    %c0_24 = arith.constant 0 : index
    %73 = vector.load %arg3[%c3, %c0_23, %c0_24] : memref<9x4x4xbf16, #tpu.memory_space<vmem>>, vector<1x4x4xbf16>
    %74 = vector.shape_cast %73 : vector<1x4x4xbf16> to vector<4x4xbf16>
    %cst_25 = arith.constant dense<0.000000e+00> : vector<256x4xf32>
    %75 = tpu.matmul %72, %74, %cst_25 {dimension_numbers = #tpu.dot_dimension_numbers<[1], [0], [0], [1], [0, 0, 1, 1], [], []>} : vector<256x4xbf16>, vector<4x4xbf16>, vector<256x4xf32> -> vector<256x4xf32>
    %76 = arith.addf %66, %75 : vector<256x4xf32>
    %77 = vector.extract_strided_slice %35 {offsets = [32, 0], sizes = [256, 4], strides = [1, 1]} : vector<320x4xf32> to vector<256x4xf32>
    %78 = arith.truncf %77 : vector<256x4xf32> to vector<256x4xbf16>
    %c4 = arith.constant 4 : index
    %c0_26 = arith.constant 0 : index
    %c0_27 = arith.constant 0 : index
    %79 = vector.load %arg3[%c4, %c0_26, %c0_27] : memref<9x4x4xbf16, #tpu.memory_space<vmem>>, vector<1x4x4xbf16>
    %80 = vector.shape_cast %79 : vector<1x4x4xbf16> to vector<4x4xbf16>
    %cst_28 = arith.constant dense<0.000000e+00> : vector<256x4xf32>
    %81 = tpu.matmul %78, %80, %cst_28 {dimension_numbers = #tpu.dot_dimension_numbers<[1], [0], [0], [1], [0, 0, 1, 1], [], []>} : vector<256x4xbf16>, vector<4x4xbf16>, vector<256x4xf32> -> vector<256x4xf32>
    %82 = arith.addf %76, %81 : vector<256x4xf32>
    %83 = vector.extract_strided_slice %35 {offsets = [33, 0], sizes = [256, 4], strides = [1, 1]} : vector<320x4xf32> to vector<256x4xf32>
    %cst_29 = arith.constant 0.000000e+00 : f32
    %84 = vector.broadcast %cst_29 : f32 to vector<256x4xf32>
    %85 = vector.shape_cast %39 : vector<256x1xi1> to vector<256x1xi1>
    %86 = vector.broadcast %85 : vector<256x1xi1> to vector<256x4xi1>
    %87 = arith.select %86, %83, %84 : vector<256x4xi1>, vector<256x4xf32>
    %88 = arith.truncf %87 : vector<256x4xf32> to vector<256x4xbf16>
    %c5 = arith.constant 5 : index
    %c0_30 = arith.constant 0 : index
    %c0_31 = arith.constant 0 : index
    %89 = vector.load %arg3[%c5, %c0_30, %c0_31] : memref<9x4x4xbf16, #tpu.memory_space<vmem>>, vector<1x4x4xbf16>
    %90 = vector.shape_cast %89 : vector<1x4x4xbf16> to vector<4x4xbf16>
    %cst_32 = arith.constant dense<0.000000e+00> : vector<256x4xf32>
    %91 = tpu.matmul %88, %90, %cst_32 {dimension_numbers = #tpu.dot_dimension_numbers<[1], [0], [0], [1], [0, 0, 1, 1], [], []>} : vector<256x4xbf16>, vector<4x4xbf16>, vector<256x4xf32> -> vector<256x4xf32>
    %92 = arith.addf %82, %91 : vector<256x4xf32>
    %93 = vector.extract_strided_slice %35 {offsets = [47, 0], sizes = [256, 4], strides = [1, 1]} : vector<320x4xf32> to vector<256x4xf32>
    %cst_33 = arith.constant 0.000000e+00 : f32
    %94 = vector.broadcast %cst_33 : f32 to vector<256x4xf32>
    %95 = vector.shape_cast %37 : vector<256x1xi1> to vector<256x1xi1>
    %96 = vector.broadcast %95 : vector<256x1xi1> to vector<256x4xi1>
    %97 = arith.select %96, %93, %94 : vector<256x4xi1>, vector<256x4xf32>
    %98 = arith.truncf %97 : vector<256x4xf32> to vector<256x4xbf16>
    %c6 = arith.constant 6 : index
    %c0_34 = arith.constant 0 : index
    %c0_35 = arith.constant 0 : index
    %99 = vector.load %arg3[%c6, %c0_34, %c0_35] : memref<9x4x4xbf16, #tpu.memory_space<vmem>>, vector<1x4x4xbf16>
    %100 = vector.shape_cast %99 : vector<1x4x4xbf16> to vector<4x4xbf16>
    %cst_36 = arith.constant dense<0.000000e+00> : vector<256x4xf32>
    %101 = tpu.matmul %98, %100, %cst_36 {dimension_numbers = #tpu.dot_dimension_numbers<[1], [0], [0], [1], [0, 0, 1, 1], [], []>} : vector<256x4xbf16>, vector<4x4xbf16>, vector<256x4xf32> -> vector<256x4xf32>
    %102 = arith.addf %92, %101 : vector<256x4xf32>
    %103 = vector.extract_strided_slice %35 {offsets = [48, 0], sizes = [256, 4], strides = [1, 1]} : vector<320x4xf32> to vector<256x4xf32>
    %104 = arith.truncf %103 : vector<256x4xf32> to vector<256x4xbf16>
    %c7 = arith.constant 7 : index
    %c0_37 = arith.constant 0 : index
    %c0_38 = arith.constant 0 : index
    %105 = vector.load %arg3[%c7, %c0_37, %c0_38] : memref<9x4x4xbf16, #tpu.memory_space<vmem>>, vector<1x4x4xbf16>
    %106 = vector.shape_cast %105 : vector<1x4x4xbf16> to vector<4x4xbf16>
    %cst_39 = arith.constant dense<0.000000e+00> : vector<256x4xf32>
    %107 = tpu.matmul %104, %106, %cst_39 {dimension_numbers = #tpu.dot_dimension_numbers<[1], [0], [0], [1], [0, 0, 1, 1], [], []>} : vector<256x4xbf16>, vector<4x4xbf16>, vector<256x4xf32> -> vector<256x4xf32>
    %108 = arith.addf %102, %107 : vector<256x4xf32>
    %109 = vector.extract_strided_slice %35 {offsets = [49, 0], sizes = [256, 4], strides = [1, 1]} : vector<320x4xf32> to vector<256x4xf32>
    %cst_40 = arith.constant 0.000000e+00 : f32
    %110 = vector.broadcast %cst_40 : f32 to vector<256x4xf32>
    %111 = vector.shape_cast %39 : vector<256x1xi1> to vector<256x1xi1>
    %112 = vector.broadcast %111 : vector<256x1xi1> to vector<256x4xi1>
    %113 = arith.select %112, %109, %110 : vector<256x4xi1>, vector<256x4xf32>
    %114 = arith.truncf %113 : vector<256x4xf32> to vector<256x4xbf16>
    %c8 = arith.constant 8 : index
    %c0_41 = arith.constant 0 : index
    %c0_42 = arith.constant 0 : index
    %115 = vector.load %arg3[%c8, %c0_41, %c0_42] : memref<9x4x4xbf16, #tpu.memory_space<vmem>>, vector<1x4x4xbf16>
    %116 = vector.shape_cast %115 : vector<1x4x4xbf16> to vector<4x4xbf16>
    %cst_43 = arith.constant dense<0.000000e+00> : vector<256x4xf32>
    %117 = tpu.matmul %114, %116, %cst_43 {dimension_numbers = #tpu.dot_dimension_numbers<[1], [0], [0], [1], [0, 0, 1, 1], [], []>} : vector<256x4xbf16>, vector<4x4xbf16>, vector<256x4xf32> -> vector<256x4xf32>
    %118 = arith.addf %108, %117 : vector<256x4xf32>
    %119 = vector.broadcast %32 : vector<1x4xf32> to vector<256x4xf32>
    %120 = arith.addf %118, %119 : vector<256x4xf32>
    %cst_44 = arith.constant 0.000000e+00 : f32
    %121 = vector.broadcast %cst_44 : f32 to vector<256x4xf32>
    %122 = arith.cmpf ogt, %120, %121 : vector<256x4xf32>
    %123 = vector.broadcast %33 : vector<1x4xf32> to vector<256x4xf32>
    %124 = arith.mulf %123, %120 : vector<256x4xf32>
    %125 = arith.select %122, %120, %124 : vector<256x4xi1>, vector<256x4xf32>
    %cst_45 = arith.constant 0.000000e+00 : f32
    %126 = vector.broadcast %cst_45 : f32 to vector<16x4xf32>
    %127 = tpu.concatenate %126, %125, %126 in 0 : vector<16x4xf32>, vector<256x4xf32>, vector<16x4xf32> -> vector<288x4xf32>
    %128 = vector.extract_strided_slice %127 {offsets = [30, 0], sizes = [256, 4], strides = [1, 1]} : vector<288x4xf32> to vector<256x4xf32>
    %129 = vector.extract_strided_slice %127 {offsets = [2, 0], sizes = [256, 4], strides = [1, 1]} : vector<288x4xf32> to vector<256x4xf32>
    %c1_i32 = arith.constant 1 : i32
    %130 = vector.broadcast %c1_i32 : i32 to vector<256x1xi32>
    %131 = arith.cmpi slt, %3, %130 : vector<256x1xi32>
    %c15_i32_46 = arith.constant 15 : i32
    %132 = vector.broadcast %c15_i32_46 : i32 to vector<256x1xi32>
    %133 = arith.cmpi sge, %3, %132 : vector<256x1xi32>
    %134 = vector.shape_cast %133 : vector<256x1xi1> to vector<256x1xi1>
    %135 = vector.broadcast %134 : vector<256x1xi1> to vector<256x4xi1>
    %136 = arith.select %135, %129, %125 : vector<256x4xi1>, vector<256x4xf32>
    %137 = vector.shape_cast %131 : vector<256x1xi1> to vector<256x1xi1>
    %138 = vector.broadcast %137 : vector<256x1xi1> to vector<256x4xi1>
    %139 = arith.select %138, %128, %136 : vector<256x4xi1>, vector<256x4xf32>
    %140 = vector.extract_strided_slice %139 {offsets = [24, 0], sizes = [8, 4], strides = [1, 1]} : vector<256x4xf32> to vector<8x4xf32>
    %141 = vector.extract_strided_slice %139 {offsets = [16, 0], sizes = [8, 4], strides = [1, 1]} : vector<256x4xf32> to vector<8x4xf32>
    %142 = tpu.concatenate %140, %141 in 0 : vector<8x4xf32>, vector<8x4xf32> -> vector<16x4xf32>
    %143 = vector.extract_strided_slice %139 {offsets = [232, 0], sizes = [8, 4], strides = [1, 1]} : vector<256x4xf32> to vector<8x4xf32>
    %144 = vector.extract_strided_slice %139 {offsets = [224, 0], sizes = [8, 4], strides = [1, 1]} : vector<256x4xf32> to vector<8x4xf32>
    %145 = tpu.concatenate %143, %144 in 0 : vector<8x4xf32>, vector<8x4xf32> -> vector<16x4xf32>
    %146 = vector.extract_strided_slice %139 {offsets = [16, 0], sizes = [224, 4], strides = [1, 1]} : vector<256x4xf32> to vector<224x4xf32>
    %147 = tpu.concatenate %142, %146, %145 in 0 : vector<16x4xf32>, vector<224x4xf32>, vector<16x4xf32> -> vector<256x4xf32>
    %c0_47 = arith.constant 0 : index
    %c0_48 = arith.constant 0 : index
    %148 = vector.load %arg7[%c0_47, %c0_48] : memref<1x4xf32, #tpu.memory_space<vmem>>, vector<1x4xf32>
    %c0_49 = arith.constant 0 : index
    %c0_50 = arith.constant 0 : index
    %149 = vector.load %arg8[%c0_49, %c0_50] : memref<1x4xf32, #tpu.memory_space<vmem>>, vector<1x4xf32>
    %cst_51 = arith.constant 0.000000e+00 : f32
    %150 = vector.broadcast %cst_51 : f32 to vector<32x4xf32>
    %151 = tpu.concatenate %150, %147, %150 in 0 : vector<32x4xf32>, vector<256x4xf32>, vector<32x4xf32> -> vector<320x4xf32>
    %c0_i32_52 = arith.constant 0 : i32
    %152 = vector.broadcast %c0_i32_52 : i32 to vector<256x1xi32>
    %153 = arith.cmpi sgt, %3, %152 : vector<256x1xi32>
    %c15_i32_53 = arith.constant 15 : i32
    %154 = vector.broadcast %c15_i32_53 : i32 to vector<256x1xi32>
    %155 = arith.cmpi slt, %3, %154 : vector<256x1xi32>
    %cst_54 = arith.constant 0.000000e+00 : f32
    %156 = vector.broadcast %cst_54 : f32 to vector<256x4xf32>
    %157 = vector.extract_strided_slice %151 {offsets = [15, 0], sizes = [256, 4], strides = [1, 1]} : vector<320x4xf32> to vector<256x4xf32>
    %cst_55 = arith.constant 0.000000e+00 : f32
    %158 = vector.broadcast %cst_55 : f32 to vector<256x4xf32>
    %159 = vector.shape_cast %153 : vector<256x1xi1> to vector<256x1xi1>
    %160 = vector.broadcast %159 : vector<256x1xi1> to vector<256x4xi1>
    %161 = arith.select %160, %157, %158 : vector<256x4xi1>, vector<256x4xf32>
    %162 = arith.truncf %161 : vector<256x4xf32> to vector<256x4xbf16>
    %c0_56 = arith.constant 0 : index
    %c0_57 = arith.constant 0 : index
    %c0_58 = arith.constant 0 : index
    %163 = vector.load %arg6[%c0_56, %c0_57, %c0_58] : memref<9x4x4xbf16, #tpu.memory_space<vmem>>, vector<1x4x4xbf16>
    %164 = vector.shape_cast %163 : vector<1x4x4xbf16> to vector<4x4xbf16>
    %cst_59 = arith.constant dense<0.000000e+00> : vector<256x4xf32>
    %165 = tpu.matmul %162, %164, %cst_59 {dimension_numbers = #tpu.dot_dimension_numbers<[1], [0], [0], [1], [0, 0, 1, 1], [], []>} : vector<256x4xbf16>, vector<4x4xbf16>, vector<256x4xf32> -> vector<256x4xf32>
    %166 = arith.addf %156, %165 : vector<256x4xf32>
    %167 = vector.extract_strided_slice %151 {offsets = [16, 0], sizes = [256, 4], strides = [1, 1]} : vector<320x4xf32> to vector<256x4xf32>
    %168 = arith.truncf %167 : vector<256x4xf32> to vector<256x4xbf16>
    %c1_60 = arith.constant 1 : index
    %c0_61 = arith.constant 0 : index
    %c0_62 = arith.constant 0 : index
    %169 = vector.load %arg6[%c1_60, %c0_61, %c0_62] : memref<9x4x4xbf16, #tpu.memory_space<vmem>>, vector<1x4x4xbf16>
    %170 = vector.shape_cast %169 : vector<1x4x4xbf16> to vector<4x4xbf16>
    %cst_63 = arith.constant dense<0.000000e+00> : vector<256x4xf32>
    %171 = tpu.matmul %168, %170, %cst_63 {dimension_numbers = #tpu.dot_dimension_numbers<[1], [0], [0], [1], [0, 0, 1, 1], [], []>} : vector<256x4xbf16>, vector<4x4xbf16>, vector<256x4xf32> -> vector<256x4xf32>
    %172 = arith.addf %166, %171 : vector<256x4xf32>
    %173 = vector.extract_strided_slice %151 {offsets = [17, 0], sizes = [256, 4], strides = [1, 1]} : vector<320x4xf32> to vector<256x4xf32>
    %cst_64 = arith.constant 0.000000e+00 : f32
    %174 = vector.broadcast %cst_64 : f32 to vector<256x4xf32>
    %175 = vector.shape_cast %155 : vector<256x1xi1> to vector<256x1xi1>
    %176 = vector.broadcast %175 : vector<256x1xi1> to vector<256x4xi1>
    %177 = arith.select %176, %173, %174 : vector<256x4xi1>, vector<256x4xf32>
    %178 = arith.truncf %177 : vector<256x4xf32> to vector<256x4xbf16>
    %c2_65 = arith.constant 2 : index
    %c0_66 = arith.constant 0 : index
    %c0_67 = arith.constant 0 : index
    %179 = vector.load %arg6[%c2_65, %c0_66, %c0_67] : memref<9x4x4xbf16, #tpu.memory_space<vmem>>, vector<1x4x4xbf16>
    %180 = vector.shape_cast %179 : vector<1x4x4xbf16> to vector<4x4xbf16>
    %cst_68 = arith.constant dense<0.000000e+00> : vector<256x4xf32>
    %181 = tpu.matmul %178, %180, %cst_68 {dimension_numbers = #tpu.dot_dimension_numbers<[1], [0], [0], [1], [0, 0, 1, 1], [], []>} : vector<256x4xbf16>, vector<4x4xbf16>, vector<256x4xf32> -> vector<256x4xf32>
    %182 = arith.addf %172, %181 : vector<256x4xf32>
    %183 = vector.extract_strided_slice %151 {offsets = [31, 0], sizes = [256, 4], strides = [1, 1]} : vector<320x4xf32> to vector<256x4xf32>
    %cst_69 = arith.constant 0.000000e+00 : f32
    %184 = vector.broadcast %cst_69 : f32 to vector<256x4xf32>
    %185 = vector.shape_cast %153 : vector<256x1xi1> to vector<256x1xi1>
    %186 = vector.broadcast %185 : vector<256x1xi1> to vector<256x4xi1>
    %187 = arith.select %186, %183, %184 : vector<256x4xi1>, vector<256x4xf32>
    %188 = arith.truncf %187 : vector<256x4xf32> to vector<256x4xbf16>
    %c3_70 = arith.constant 3 : index
    %c0_71 = arith.constant 0 : index
    %c0_72 = arith.constant 0 : index
    %189 = vector.load %arg6[%c3_70, %c0_71, %c0_72] : memref<9x4x4xbf16, #tpu.memory_space<vmem>>, vector<1x4x4xbf16>
    %190 = vector.shape_cast %189 : vector<1x4x4xbf16> to vector<4x4xbf16>
    %cst_73 = arith.constant dense<0.000000e+00> : vector<256x4xf32>
    %191 = tpu.matmul %188, %190, %cst_73 {dimension_numbers = #tpu.dot_dimension_numbers<[1], [0], [0], [1], [0, 0, 1, 1], [], []>} : vector<256x4xbf16>, vector<4x4xbf16>, vector<256x4xf32> -> vector<256x4xf32>
    %192 = arith.addf %182, %191 : vector<256x4xf32>
    %193 = vector.extract_strided_slice %151 {offsets = [32, 0], sizes = [256, 4], strides = [1, 1]} : vector<320x4xf32> to vector<256x4xf32>
    %194 = arith.truncf %193 : vector<256x4xf32> to vector<256x4xbf16>
    %c4_74 = arith.constant 4 : index
    %c0_75 = arith.constant 0 : index
    %c0_76 = arith.constant 0 : index
    %195 = vector.load %arg6[%c4_74, %c0_75, %c0_76] : memref<9x4x4xbf16, #tpu.memory_space<vmem>>, vector<1x4x4xbf16>
    %196 = vector.shape_cast %195 : vector<1x4x4xbf16> to vector<4x4xbf16>
    %cst_77 = arith.constant dense<0.000000e+00> : vector<256x4xf32>
    %197 = tpu.matmul %194, %196, %cst_77 {dimension_numbers = #tpu.dot_dimension_numbers<[1], [0], [0], [1], [0, 0, 1, 1], [], []>} : vector<256x4xbf16>, vector<4x4xbf16>, vector<256x4xf32> -> vector<256x4xf32>
    %198 = arith.addf %192, %197 : vector<256x4xf32>
    %199 = vector.extract_strided_slice %151 {offsets = [33, 0], sizes = [256, 4], strides = [1, 1]} : vector<320x4xf32> to vector<256x4xf32>
    %cst_78 = arith.constant 0.000000e+00 : f32
    %200 = vector.broadcast %cst_78 : f32 to vector<256x4xf32>
    %201 = vector.shape_cast %155 : vector<256x1xi1> to vector<256x1xi1>
    %202 = vector.broadcast %201 : vector<256x1xi1> to vector<256x4xi1>
    %203 = arith.select %202, %199, %200 : vector<256x4xi1>, vector<256x4xf32>
    %204 = arith.truncf %203 : vector<256x4xf32> to vector<256x4xbf16>
    %c5_79 = arith.constant 5 : index
    %c0_80 = arith.constant 0 : index
    %c0_81 = arith.constant 0 : index
    %205 = vector.load %arg6[%c5_79, %c0_80, %c0_81] : memref<9x4x4xbf16, #tpu.memory_space<vmem>>, vector<1x4x4xbf16>
    %206 = vector.shape_cast %205 : vector<1x4x4xbf16> to vector<4x4xbf16>
    %cst_82 = arith.constant dense<0.000000e+00> : vector<256x4xf32>
    %207 = tpu.matmul %204, %206, %cst_82 {dimension_numbers = #tpu.dot_dimension_numbers<[1], [0], [0], [1], [0, 0, 1, 1], [], []>} : vector<256x4xbf16>, vector<4x4xbf16>, vector<256x4xf32> -> vector<256x4xf32>
    %208 = arith.addf %198, %207 : vector<256x4xf32>
    %209 = vector.extract_strided_slice %151 {offsets = [47, 0], sizes = [256, 4], strides = [1, 1]} : vector<320x4xf32> to vector<256x4xf32>
    %cst_83 = arith.constant 0.000000e+00 : f32
    %210 = vector.broadcast %cst_83 : f32 to vector<256x4xf32>
    %211 = vector.shape_cast %153 : vector<256x1xi1> to vector<256x1xi1>
    %212 = vector.broadcast %211 : vector<256x1xi1> to vector<256x4xi1>
    %213 = arith.select %212, %209, %210 : vector<256x4xi1>, vector<256x4xf32>
    %214 = arith.truncf %213 : vector<256x4xf32> to vector<256x4xbf16>
    %c6_84 = arith.constant 6 : index
    %c0_85 = arith.constant 0 : index
    %c0_86 = arith.constant 0 : index
    %215 = vector.load %arg6[%c6_84, %c0_85, %c0_86] : memref<9x4x4xbf16, #tpu.memory_space<vmem>>, vector<1x4x4xbf16>
    %216 = vector.shape_cast %215 : vector<1x4x4xbf16> to vector<4x4xbf16>
    %cst_87 = arith.constant dense<0.000000e+00> : vector<256x4xf32>
    %217 = tpu.matmul %214, %216, %cst_87 {dimension_numbers = #tpu.dot_dimension_numbers<[1], [0], [0], [1], [0, 0, 1, 1], [], []>} : vector<256x4xbf16>, vector<4x4xbf16>, vector<256x4xf32> -> vector<256x4xf32>
    %218 = arith.addf %208, %217 : vector<256x4xf32>
    %219 = vector.extract_strided_slice %151 {offsets = [48, 0], sizes = [256, 4], strides = [1, 1]} : vector<320x4xf32> to vector<256x4xf32>
    %220 = arith.truncf %219 : vector<256x4xf32> to vector<256x4xbf16>
    %c7_88 = arith.constant 7 : index
    %c0_89 = arith.constant 0 : index
    %c0_90 = arith.constant 0 : index
    %221 = vector.load %arg6[%c7_88, %c0_89, %c0_90] : memref<9x4x4xbf16, #tpu.memory_space<vmem>>, vector<1x4x4xbf16>
    %222 = vector.shape_cast %221 : vector<1x4x4xbf16> to vector<4x4xbf16>
    %cst_91 = arith.constant dense<0.000000e+00> : vector<256x4xf32>
    %223 = tpu.matmul %220, %222, %cst_91 {dimension_numbers = #tpu.dot_dimension_numbers<[1], [0], [0], [1], [0, 0, 1, 1], [], []>} : vector<256x4xbf16>, vector<4x4xbf16>, vector<256x4xf32> -> vector<256x4xf32>
    %224 = arith.addf %218, %223 : vector<256x4xf32>
    %225 = vector.extract_strided_slice %151 {offsets = [49, 0], sizes = [256, 4], strides = [1, 1]} : vector<320x4xf32> to vector<256x4xf32>
    %cst_92 = arith.constant 0.000000e+00 : f32
    %226 = vector.broadcast %cst_92 : f32 to vector<256x4xf32>
    %227 = vector.shape_cast %155 : vector<256x1xi1> to vector<256x1xi1>
    %228 = vector.broadcast %227 : vector<256x1xi1> to vector<256x4xi1>
    %229 = arith.select %228, %225, %226 : vector<256x4xi1>, vector<256x4xf32>
    %230 = arith.truncf %229 : vector<256x4xf32> to vector<256x4xbf16>
    %c8_93 = arith.constant 8 : index
    %c0_94 = arith.constant 0 : index
    %c0_95 = arith.constant 0 : index
    %231 = vector.load %arg6[%c8_93, %c0_94, %c0_95] : memref<9x4x4xbf16, #tpu.memory_space<vmem>>, vector<1x4x4xbf16>
    %232 = vector.shape_cast %231 : vector<1x4x4xbf16> to vector<4x4xbf16>
    %cst_96 = arith.constant dense<0.000000e+00> : vector<256x4xf32>
    %233 = tpu.matmul %230, %232, %cst_96 {dimension_numbers = #tpu.dot_dimension_numbers<[1], [0], [0], [1], [0, 0, 1, 1], [], []>} : vector<256x4xbf16>, vector<4x4xbf16>, vector<256x4xf32> -> vector<256x4xf32>
    %234 = arith.addf %224, %233 : vector<256x4xf32>
    %235 = vector.broadcast %148 : vector<1x4xf32> to vector<256x4xf32>
    %236 = arith.addf %234, %235 : vector<256x4xf32>
    %cst_97 = arith.constant 0.000000e+00 : f32
    %237 = vector.broadcast %cst_97 : f32 to vector<256x4xf32>
    %238 = arith.cmpf ogt, %236, %237 : vector<256x4xf32>
    %239 = vector.broadcast %149 : vector<1x4xf32> to vector<256x4xf32>
    %240 = arith.mulf %239, %236 : vector<256x4xf32>
    %241 = arith.select %238, %236, %240 : vector<256x4xi1>, vector<256x4xf32>
    %cst_98 = arith.constant 0.000000e+00 : f32
    %242 = vector.broadcast %cst_98 : f32 to vector<16x4xf32>
    %243 = tpu.concatenate %242, %241, %242 in 0 : vector<16x4xf32>, vector<256x4xf32>, vector<16x4xf32> -> vector<288x4xf32>
    %244 = vector.extract_strided_slice %243 {offsets = [28, 0], sizes = [256, 4], strides = [1, 1]} : vector<288x4xf32> to vector<256x4xf32>
    %245 = vector.extract_strided_slice %243 {offsets = [4, 0], sizes = [256, 4], strides = [1, 1]} : vector<288x4xf32> to vector<256x4xf32>
    %c2_i32_99 = arith.constant 2 : i32
    %246 = vector.broadcast %c2_i32_99 : i32 to vector<256x1xi32>
    %247 = arith.cmpi slt, %3, %246 : vector<256x1xi32>
    %c14_i32_100 = arith.constant 14 : i32
    %248 = vector.broadcast %c14_i32_100 : i32 to vector<256x1xi32>
    %249 = arith.cmpi sge, %3, %248 : vector<256x1xi32>
    %250 = vector.shape_cast %249 : vector<256x1xi1> to vector<256x1xi1>
    %251 = vector.broadcast %250 : vector<256x1xi1> to vector<256x4xi1>
    %252 = arith.select %251, %245, %241 : vector<256x4xi1>, vector<256x4xf32>
    %253 = vector.shape_cast %247 : vector<256x1xi1> to vector<256x1xi1>
    %254 = vector.broadcast %253 : vector<256x1xi1> to vector<256x4xi1>
    %255 = arith.select %254, %244, %252 : vector<256x4xi1>, vector<256x4xf32>
    %256 = vector.extract_strided_slice %255 {offsets = [56, 0], sizes = [8, 4], strides = [1, 1]} : vector<256x4xf32> to vector<8x4xf32>
    %257 = vector.extract_strided_slice %255 {offsets = [48, 0], sizes = [8, 4], strides = [1, 1]} : vector<256x4xf32> to vector<8x4xf32>
    %258 = tpu.concatenate %256, %257 in 0 : vector<8x4xf32>, vector<8x4xf32> -> vector<16x4xf32>
    %259 = vector.extract_strided_slice %255 {offsets = [40, 0], sizes = [8, 4], strides = [1, 1]} : vector<256x4xf32> to vector<8x4xf32>
    %260 = vector.extract_strided_slice %255 {offsets = [32, 0], sizes = [8, 4], strides = [1, 1]} : vector<256x4xf32> to vector<8x4xf32>
    %261 = tpu.concatenate %259, %260 in 0 : vector<8x4xf32>, vector<8x4xf32> -> vector<16x4xf32>
    %262 = vector.extract_strided_slice %255 {offsets = [216, 0], sizes = [8, 4], strides = [1, 1]} : vector<256x4xf32> to vector<8x4xf32>
    %263 = vector.extract_strided_slice %255 {offsets = [208, 0], sizes = [8, 4], strides = [1, 1]} : vector<256x4xf32> to vector<8x4xf32>
    %264 = tpu.concatenate %262, %263 in 0 : vector<8x4xf32>, vector<8x4xf32> -> vector<16x4xf32>
    %265 = vector.extract_strided_slice %255 {offsets = [200, 0], sizes = [8, 4], strides = [1, 1]} : vector<256x4xf32> to vector<8x4xf32>
    %266 = vector.extract_strided_slice %255 {offsets = [192, 0], sizes = [8, 4], strides = [1, 1]} : vector<256x4xf32> to vector<8x4xf32>
    %267 = tpu.concatenate %265, %266 in 0 : vector<8x4xf32>, vector<8x4xf32> -> vector<16x4xf32>
    %268 = vector.extract_strided_slice %255 {offsets = [32, 0], sizes = [192, 4], strides = [1, 1]} : vector<256x4xf32> to vector<192x4xf32>
    %269 = tpu.concatenate %258, %261, %268, %264, %267 in 0 : vector<16x4xf32>, vector<16x4xf32>, vector<192x4xf32>, vector<16x4xf32>, vector<16x4xf32> -> vector<256x4xf32>
    %270 = tpu.transpose %269, [1, 0] : vector<256x4xf32> -> vector<4x256xf32>
    %271 = arith.addf %1, %270 : vector<4x256xf32>
    %c0_101 = arith.constant 0 : index
    %c0_102 = arith.constant 0 : index
    %c0_103 = arith.constant 0 : index
    %272 = vector.load %arg9[%c0_101, %c0_102, %c0_103] : memref<1x4x256xf32, #tpu.memory_space<vmem>>, vector<1x4x256xf32>
    %273 = vector.shape_cast %272 : vector<1x4x256xf32> to vector<4x256xf32>
    %274 = vector.shape_cast %271 : vector<4x256xf32> to vector<1x4x256xf32>
    tpu.vector_store %arg9[%c0_101, %c0_102, %c0_103], %274 {strides = array<i32>} : memref<1x4x256xf32, #tpu.memory_space<vmem>>, vector<1x4x256xf32>,
    return
  }
  func.func @transform_0(%arg0: i32) -> (i32, i32, i32) {
    %c0_i32 = arith.constant 0 : i32
    %c0_i32_0 = arith.constant 0 : i32
    %c0_i32_1 = arith.constant 0 : i32
    return %arg0, %c0_i32, %c0_i32_0 : i32, i32, i32
  }
  func.func @transform_1(%arg0: i32) -> (i32, i32) {
    %c0_i32 = arith.constant 0 : i32
    %c0_i32_0 = arith.constant 0 : i32
    %c0_i32_1 = arith.constant 0 : i32
    return %c0_i32, %c0_i32_0 : i32, i32
  }
  func.func @transform_2(%arg0: i32) -> (i32, i32, i32) {
    %c0_i32 = arith.constant 0 : i32
    %c0_i32_0 = arith.constant 0 : i32
    %c0_i32_1 = arith.constant 0 : i32
    %c0_i32_2 = arith.constant 0 : i32
    return %c0_i32, %c0_i32_0, %c0_i32_1 : i32, i32, i32
  }
  func.func @transform_3(%arg0: i32) -> (i32, i32) {
    %c0_i32 = arith.constant 0 : i32
    %c0_i32_0 = arith.constant 0 : i32
    %c0_i32_1 = arith.constant 0 : i32
    return %c0_i32, %c0_i32_0 : i32, i32
  }
  func.func @transform_4(%arg0: i32) -> (i32, i32) {
    %c0_i32 = arith.constant 0 : i32
    %c0_i32_0 = arith.constant 0 : i32
    %c0_i32_1 = arith.constant 0 : i32
    return %c0_i32, %c0_i32_0 : i32, i32
  }
  func.func @transform_5(%arg0: i32) -> (i32, i32, i32) {
    %c0_i32 = arith.constant 0 : i32
    %c0_i32_0 = arith.constant 0 : i32
    %c0_i32_1 = arith.constant 0 : i32
    %c0_i32_2 = arith.constant 0 : i32
    return %c0_i32, %c0_i32_0, %c0_i32_1 : i32, i32, i32
  }
  func.func @transform_6(%arg0: i32) -> (i32, i32) {
    %c0_i32 = arith.constant 0 : i32
    %c0_i32_0 = arith.constant 0 : i32
    %c0_i32_1 = arith.constant 0 : i32
    return %c0_i32, %c0_i32_0 : i32, i32
  }
  func.func @transform_7(%arg0: i32) -> (i32, i32) {
    %c0_i32 = arith.constant 0 : i32
    %c0_i32_0 = arith.constant 0 : i32
    %c0_i32_1 = arith.constant 0 : i32
    return %c0_i32, %c0_i32_0 : i32, i32
  }
  func.func @transform_8(%arg0: i32) -> (i32, i32, i32) {
    %c0_i32 = arith.constant 0 : i32
    %c0_i32_0 = arith.constant 0 : i32
    %c0_i32_1 = arith.constant 0 : i32
    return %arg0, %c0_i32, %c0_i32_0 : i32, i32, i32
  }
}

</mosaic_0001>

<bundles_post_ra>
// kernel: residual_block_v2.1
= control target key start
LH: loop header
LB: loop body
LE: loop exit
PB: predicated region body
PF: predicated region fallthrough
CT: control target
= control target key end

     0   :  { %s9254_s27 = smov 0   ;;  %s15192_s0 = inlined_call_operand.vmem [shape: f32[2,4,256], index: 0, kind: input, shape index: {}]   ;;  %s15193_s1 = inlined_call_operand.vmem [shape: s32[256,1], index: 1, kind: input, shape index: {}]   ;;  %s15194_s2 = inlined_call_operand.vmem [shape: bf16[9,4,4], index: 2, kind: input, shape index: {}]   ;;  %s15195_s3 = inlined_call_operand.vmem [shape: f32[1,4], index: 3, kind: input, shape index: {}]   ;;  %s15196_s4 = inlined_call_operand.vmem [shape: f32[1,4], index: 4, kind: input, shape index: {}]   ;;  %s15197_s5 = inlined_call_operand.vmem [shape: bf16[9,4,4], index: 5, kind: input, shape index: {}]   ;;  %s15198_s6 = inlined_call_operand.vmem [shape: f32[1,4], index: 6, kind: input, shape index: {}]   ;;  %s15199_s7 = inlined_call_operand.vmem [shape: f32[1,4], index: 7, kind: input, shape index: {}]   ;;  %s15200_s8 = inlined_call_operand.vmem [shape: f32[2,4,256], index: 8, kind: output, shape index: {}]  }
   0x1 LB: > { %s7455_s28 = sadd.s32 4294967295, %s9204_s27   ;;  %p7459_p0 = scmp.ge.s32.totalorder %s9204_s27, 1  ;;  %s9204_s27 = sphi %s9254_s27, %s18_s27  }
   0x2   : > { %p262_p1 = scmp.lt.s32.totalorder %s9204_s27, 3 }
   0x4   : > { %p263_p2 = pnand %p7459_p0, %p262_p1 }
   0x6   : > { %266 = sbr.rel (%p263_p2) target bundleno = 2068 (0x814), region = 52 }
   0xd   : > { %v9265_v0 = vld [vmem:[%s15193_s1 + $0x30] sm:$0xff]  ;;  %v9270_v1 = vld [vmem:[%s15193_s1 + $0x38] sm:$0xff]  ;;  %v15211_v2 = vmov 0   ;;  %v9283_v5 = vld [vmem:[%s15193_s1 + $0x28] sm:$0xff]  ;;  %p296_p3 = scmp.lt.s32.totalorder %s7455_s28, 1  ;;  %v15201_v52 = vmov 0.0|0.0  }
   0xe   : > { %9168 = vset.pattern.permute.xlu1 %v15211_v2  ;;  %9167 = vset.pattern.permute.xlu0 %v15211_v2  ;;  %vm433_vm0 = vcmp.ge.s32.totalorder %v9265_v0, 14  ;;  %vm409_vm1 = vcmp.lt.s32.totalorder %v9265_v0, 2  ;;  %vm434_vm2 = vcmp.ge.s32.totalorder %v9270_v1, 14  ;;  %vm410_vm3 = vcmp.lt.s32.totalorder %v9270_v1, 2  ;;  %v9288_v6 = vld [vmem:[%s15193_s1 + $0x20] sm:$0xff]  ;;  %v9306_v12 = vld [vmem:[%s15193_s1 + $0x50] sm:$0xff] }
   0xf   : > { %v457_v3 = vsel %vm433_vm0, 1, %v15211_v2  ;;  %v700_v4 = vsel %vm409_vm1, 1, %v15211_v2  ;;  %v458_v7 = vsel %vm434_vm2, 1, %v15211_v2  ;;  %v701_v8 = vsel %vm410_vm3, 1, %v15211_v2  ;;  %v9301_v11 = vld [vmem:[%s15193_s1 + $0x40] sm:$0xff]  ;;  %v9315_v15 = vld [vmem:[%s15193_s1 + $0x48] sm:$0xff]  ;;  %8080 = vmatprep.mubr.bf16.mxu0 %v15201_v52  ;;  %8386 = vmatprep.mubr.bf16.mxu1 %v15201_v52 }
  0x10   : > { %486 = vperm.xlu0 %9167, %v457_v3   ;;  %729 = vperm.xlu1 %9168, %v700_v4   ;;  %vm432_vm4 = vcmp.ge.s32.totalorder %v9283_v5, 14  ;;  %vm431_vm5 = vcmp.ge.s32.totalorder %v9288_v6, 14  ;;  %vm408_vm6 = vcmp.lt.s32.totalorder %v9283_v5, 2  ;;  %vm407_vm7 = vcmp.lt.s32.totalorder %v9288_v6, 2  ;;  %v9320_v16 = vld [vmem:[%s15193_s1 + $0xc0] sm:$0xff]  ;;  %v9336_v23 = vld [vmem:[%s15193_s1 + $0x58] sm:$0xff] }
  0x11   : > { %v456_v9 = vsel %vm432_vm4, 1, %v15211_v2  ;;  %v455_v10 = vsel %vm431_vm5, 1, %v15211_v2  ;;  %v699_v13 = vsel %vm408_vm6, 1, %v15211_v2  ;;  %v698_v14 = vsel %vm407_vm7, 1, %v15211_v2  ;;  %15926 = vst [vmem:[#allocation2_spill] sm:$0xff] %v9320_v16  ;;  %v9343_v25 = vld [vmem:[%s15193_s1 + $0x60] sm:$0xff] }
  0x12   : > { %vm435_vm8 = vcmp.ge.s32.totalorder %v9301_v11, 14  ;;  %vm413_vm9 = vcmp.lt.s32.totalorder %v9306_v12, 2  ;;  %vm436_vm10 = vcmp.ge.s32.totalorder %v9315_v15, 14  ;;  %vm427_vm11 = vcmp.lt.s32.totalorder %v9320_v16, 2  ;;  %v9352_v27 = vld [vmem:[%s15193_s1 + $0x68] sm:$0xff]  ;;  %s17537_s28 = smov (!%p296_p3, %s7455_s28), 1 }
  0x13   : > { %v459_v17 = vsel %vm435_vm8, 1, %v15211_v2  ;;  %v704_v18 = vsel %vm413_vm9, 1, %v15211_v2  ;;  %v460_v19 = vsel %vm436_vm10, 1, %v15211_v2  ;;  %v718_v20 = vsel %vm427_vm11, 1, %v15211_v2  ;;  %s7770_s9 = sshll.u32 %s17537_s28, 3  ;;  %v9381_v33 = vld [vmem:[%s15193_s1 + $0x70] sm:$0xff] }
  0x14   : > { %489 = vperm.xlu0 %9167, %v458_v7   ;;  %732 = vperm.xlu1 %9168, %v701_v8   ;;  %vm411_vm12 = vcmp.lt.s32.totalorder %v9301_v11, 2  ;;  %vm412_vm13 = vcmp.lt.s32.totalorder %v9315_v15, 2  ;;  %vm437_vm14 = vcmp.ge.s32.totalorder %v9306_v12, 14  ;;  %vm438_vm15 = vcmp.ge.s32.totalorder %v9336_v23, 14  ;;  %s9368_s12 = scalar_lea.vmem %s15192_s0, %s7770_s9  ;;  %v9388_v35 = vld [vmem:[%s15193_s1 + $0x78] sm:$0xff]  ;;  %v9395_v37 = vld [vmem:[%s15193_s1 + $0x80] sm:$0xff]  ;;  %s305_s10 = scalar_lea.vmem %s15200_s8, %s7770_s9 }
  0x15   : > { %v702_v21 = vsel %vm411_vm12, 1, %v15211_v2  ;;  %v703_v22 = vsel %vm412_vm13, 1, %v15211_v2  ;;  %v461_v24 = vsel %vm437_vm14, 1, %v15211_v2  ;;  %v462_v26 = vsel %vm438_vm15, 1, %v15211_v2  ;;  %v9373_v31 = vld [vmem:[%s9368_s12] sm:$0xff]  ;;  %v9402_v39 = vld [vmem:[%s15193_s1 + $0x88] sm:$0xff] }
  0x16   : > { %vm439_vm0 = vcmp.ge.s32.totalorder %v9343_v25, 14  ;;  %vm440_vm1 = vcmp.ge.s32.totalorder %v9352_v27, 14  ;;  %vm414_vm2 = vcmp.lt.s32.totalorder %v9336_v23, 2  ;;  %vm415_vm3 = vcmp.lt.s32.totalorder %v9343_v25, 2  ;;  %v9417_v45 = vld [vmem:[%s15193_s1 + $0x90] sm:$0xff]  ;;  %v9424_v47 = vld [vmem:[%s15193_s1 + $0x98] sm:$0xff] }
  0x17   : > { %v463_v28 = vsel %vm439_vm0, 1, %v15211_v2  ;;  %v464_v29 = vsel %vm440_vm1, 1, %v15211_v2  ;;  %v705_v30 = vsel %vm414_vm2, 1, %v15211_v2  ;;  %v706_v32 = vsel %vm415_vm3, 1, %v15211_v2  ;;  %v7464_v48 = vld [vmem:[%s15194_s2 + $0x2] sm:$0x3] }
  0x18   : > { %483 = vperm.xlu1 %9168, %v456_v9   ;;  %480 = vperm.xlu0 %9167, %v455_v10   ;;  %vm416_vm4 = vcmp.lt.s32.totalorder %v9352_v27, 2  ;;  %vm441_vm5 = vcmp.ge.s32.totalorder %v9381_v33, 14  ;;  %vm442_vm6 = vcmp.ge.s32.totalorder %v9388_v35, 14  ;;  %vm443_vm7 = vcmp.ge.s32.totalorder %v9395_v37, 14  ;;  %v9436_v51 = vld [vmem:[%s15193_s1 + $0xa0] sm:$0xff]  ;;  %v9445_v54 = vld [vmem:[%s15193_s1 + $0xa8] sm:$0xff] }
  0x19   : > { %v707_v34 = vsel %vm416_vm4, 1, %v15211_v2  ;;  %v465_v36 = vsel %vm441_vm5, 1, %v15211_v2  ;;  %v466_v38 = vsel %vm442_vm6, 1, %v15211_v2  ;;  %v467_v40 = vsel %vm443_vm7, 1, %v15211_v2  ;;  %v9462_v61 = vld [vmem:[%s15193_s1 + $0xb0] sm:$0xff]  ;;  %v9469_v63 = vld [vmem:[%s15193_s1 + $0xb8] sm:$0xff] }
  0x1a   : > { %vm444_vm8 = vcmp.ge.s32.totalorder %v9402_v39, 14  ;;  %vm417_vm9 = vcmp.lt.s32.totalorder %v9381_v33, 2  ;;  %vm418_vm10 = vcmp.lt.s32.totalorder %v9388_v35, 2  ;;  %vm419_vm11 = vcmp.lt.s32.totalorder %v9395_v37, 2  ;;  %v9480_v8 = vld [vmem:[%s15193_s1 + $0xc8] sm:$0xff] }
  0x1b   : > { %v468_v41 = vsel %vm444_vm8, 1, %v15211_v2  ;;  %v708_v42 = vsel %vm417_vm9, 1, %v15211_v2  ;;  %v709_v43 = vsel %vm418_vm10, 1, %v15211_v2  ;;  %v710_v44 = vsel %vm419_vm11, 1, %v15211_v2  ;;  %15928 = vst [vmem:[#allocation4_spill] sm:$0xff] %v9480_v8 }
  0x1c   : > { %726 = vperm.xlu1 %9168, %v699_v13   ;;  %723 = vperm.xlu0 %9167, %v698_v14   ;;  %vm420_vm12 = vcmp.lt.s32.totalorder %v9402_v39, 2  ;;  %vm445_vm13 = vcmp.ge.s32.totalorder %v9417_v45, 14  ;;  %vm1309_vm14 = vcmask 1041408   ;;  %vm446_vm15 = vcmp.ge.s32.totalorder %v9424_v47, 14 }
  0x1d   : > { %v711_v46 = vsel %vm420_vm12, 1, %v15211_v2  ;;  %v469_v49 = vsel %vm445_vm13, 1, %v15211_v2  ;;  %9138 = vmatprep.subr.msk.bf16.mxu0 %vm1309_vm14, %v7464_v48  ;;  %v1311_v50 = vsel %vm1309_vm14, %v7464_v48, 0  ;;  %v470_v53 = vsel %vm446_vm15, 1, %v15211_v2 }
  0x1e   : > { %8079 = vmatpush3.bf16.msra.mxu0 %v1311_v50  ;;  %vm447_vm0 = vcmp.ge.s32.totalorder %v9436_v51, 14  ;;  %vm448_vm1 = vcmp.ge.s32.totalorder %v9445_v54, 14  ;;  %vm421_vm2 = vcmp.lt.s32.totalorder %v9417_v45, 2  ;;  %vm422_vm3 = vcmp.lt.s32.totalorder %v9424_v47, 2  ;;  %v9553_v50 = vld [vmem:[%s15193_s1 + $0x10] sm:$0xff] }
  0x1f   : > { %v471_v55 = vsel %vm447_vm0, 1, %v15211_v2  ;;  %v472_v56 = vsel %vm448_vm1, 1, %v15211_v2  ;;  %v712_v57 = vsel %vm421_vm2, 1, %v15211_v2  ;;  %v309_v58 = vcombine.high %v9373_v31, %v9373_v31  ;;  %15946 = vst [vmem:[#allocation22_spill] sm:$0xff] %v9553_v50 }
  0x20   : > { %492 = vperm.xlu1 %9168, %v459_v17   ;;  %741 = vperm.xlu0 %9167, %v704_v18   ;;  %v713_v59 = vsel %vm422_vm3, 1, %v15211_v2  ;;  %vm423_vm4 = vcmp.lt.s32.totalorder %v9436_v51, 2  ;;  %vm424_vm5 = vcmp.lt.s32.totalorder %v9445_v54, 2  ;;  %vm449_vm6 = vcmp.ge.s32.totalorder %v9462_v61, 14 }
  0x21   : > { %v714_v60 = vsel %vm423_vm4, 1, %v15211_v2  ;;  %v715_v62 = vsel %vm424_vm5, 1, %v15211_v2  ;;  %v473_v3 = vsel %vm449_vm6, 1, %v15211_v2  ;;  %vm450_vm7 = vcmp.ge.s32.totalorder %v9469_v63, 14 }
  0x22   : > { %v474_v4 = vsel %vm450_vm7, 1, %v15211_v2  ;;  %vm451_vm8 = vcmp.ge.s32.totalorder %v9320_v16, 14  ;;  %vm452_vm9 = vcmp.ge.s32.totalorder %v9480_v8, 14  ;;  %vm425_vm10 = vcmp.lt.s32.totalorder %v9462_v61, 2 }
  0x23   : > { %v475_v9 = vsel %vm451_vm8, 1, %v15211_v2  ;;  %v476_v13 = vsel %vm452_vm9, 1, %v15211_v2  ;;  %v716_v17 = vsel %vm425_vm10, 1, %v15211_v2  ;;  %vm426_vm11 = vcmp.lt.s32.totalorder %v9469_v63, 2 }
  0x24   : > { %495 = vperm.xlu1 %9168, %v460_v19   ;;  %783 = vperm.xlu0 %9167, %v718_v20   ;;  %v717_v19 = vsel %vm426_vm11, 1, %v15211_v2  ;;  %vm428_vm12 = vcmp.lt.s32.totalorder %v9480_v8, 2  ;;  %vm858_vm4 = vcmp.gt.s32.totalorder %v9553_v50, 0  ;;  %vm861_vm6 = vcmp.gt.s32.totalorder %v9283_v5, 0 }
  0x25   : > { %vm862_vm7 = vcmp.gt.s32.totalorder %v9265_v0, 0  ;;  %vm863_vm8 = vcmp.gt.s32.totalorder %v9270_v1, 0  ;;  %vm864_vm9 = vcmp.gt.s32.totalorder %v9301_v11, 0  ;;  %vm865_vm10 = vcmp.gt.s32.totalorder %v9315_v15, 0 }
  0x26   : > { %v927_v5 = vsel %vm863_vm8, 1, %v15211_v2  ;;  %v929_v1 = vsel %vm865_vm10, 1, %v15211_v2  ;;  %vm866_vm11 = vcmp.gt.s32.totalorder %v9306_v12, 0  ;;  %vm15493_vm8 = vcmask 1040384  }
  0x27   : > { %v930_v15 = vsel %vm866_vm11, 1, %v15211_v2  ;;  %vm15621_vm10 = vcmask 1046528  }
  0x28   : > { %735 = vperm.xlu1 %9168, %v702_v21   ;;  %v9501_v21 = vld [vmem:[%s15193_s1 + $0xd0] sm:$0xff] }
  0x29   : > { %15933 = vst [vmem:[#allocation9_spill] sm:$0xff] %v9501_v21  ;;  %vm453_vm13 = vcmp.ge.s32.totalorder %v9501_v21, 14  ;;  %vm429_vm0 = vcmp.lt.s32.totalorder %v9501_v21, 2 }
  0x2c   : > { %738 = vperm.xlu1 %9168, %v703_v22  }
  0x30   : > { %498 = vperm.xlu1 %9168, %v461_v24   ;;  %v719_v24 = vsel %vm428_vm12, 1, %v15211_v2  ;;  %vm860_vm12 = vcmp.gt.s32.totalorder %v9288_v6, 0 }
  0x34   : > { %501 = vperm.xlu1 %9168, %v462_v26  }
  0x38   : > { %504 = vperm.xlu1 %9168, %v463_v28   ;;  %v9512_v28 = vld [vmem:[%s15193_s1 + $0xd8] sm:$0xff] }
  0x39   : > { %15936 = vst [vmem:[#allocation12_spill] sm:$0xff] %v9512_v28  ;;  %vm454_vm15 = vcmp.ge.s32.totalorder %v9512_v28, 14  ;;  %vm430_vm1 = vcmp.lt.s32.totalorder %v9512_v28, 2 }
  0x3c   : > { %507 = vperm.xlu1 %9168, %v464_v29   ;;  %v477_v29 = vsel %vm453_vm13, 1, %v15211_v2  ;;  %vm867_vm13 = vcmp.gt.s32.totalorder %v9336_v23, 0 }
  0x3d   : > { %v931_v52 = vsel %vm867_vm13, 1, %v15211_v2  ;;  %vm1260_vm13 = vcmask 31744  }
  0x40   : > { %744 = vperm.xlu1 %9168, %v705_v30  }
  0x42   : > { %311 = vxpose.xlu0.b32.start.end [1/1] (short) %v9373_v31, 128 }
  0x44   : > { %747 = vperm.xlu1 %9168, %v706_v32   ;;  %v478_v32 = vsel %vm454_vm15, 1, %v15211_v2 }
  0x48   : > { %750 = vperm.xlu1 %9168, %v707_v34  }
  0x4c   : > { %510 = vperm.xlu1 %9168, %v465_v36  }
  0x50   : > { %513 = vperm.xlu1 %9168, %v466_v38   ;;  %v720_v38 = vsel %vm429_vm0, 1, %v15211_v2  ;;  %vm868_vm0 = vcmp.gt.s32.totalorder %v9343_v25, 0 }
  0x54   : > { %516 = vperm.xlu1 %9168, %v467_v40  }
  0x58   : > { %519 = vperm.xlu1 %9168, %v468_v41   ;;  %v9533_v41 = vld [vmem:[%s15193_s1] sm:$0xff] }
  0x59   : > { %vm856_vm2 = vcmp.gt.s32.totalorder %v9533_v41, 0 }
  0x5a   : > { %v920_v48 = vsel %vm856_vm2, 1, %v15211_v2 }
  0x5c   : > { %753 = vperm.xlu1 %9168, %v708_v42   ;;  %v721_v42 = vsel %vm430_vm1, 1, %v15211_v2  ;;  %vm15398_vm1 = vcmask 1043456  }
  0x60   : > { %756 = vperm.xlu1 %9168, %v709_v43  }
  0x64   : > { %759 = vperm.xlu1 %9168, %v710_v44  }
  0x68   : > { %762 = vperm.xlu1 %9168, %v711_v46   ;;  %v9544_v46 = vld [vmem:[%s15193_s1 + $0x8] sm:$0xff] }
  0x69   : > { %15944 = vst [vmem:[#allocation20_spill] sm:$0xff] %v9544_v46  ;;  %vm857_vm3 = vcmp.gt.s32.totalorder %v9544_v46, 0 }
  0x6c   : > { %522 = vperm.xlu1 %9168, %v469_v49  }
  0x70   : > { %525 = vperm.xlu1 %9168, %v470_v53   ;;  %v9558_v53 = vld [vmem:[%s15194_s2] sm:$0x3] }
  0x71   : > { %9139 = vmatprep.subr.msk.bf16.mxu0 %vm1309_vm14, %v9558_v53 }
  0x74   : > { %528 = vperm.xlu1 %9168, %v471_v55  }
  0x78   : > { %531 = vperm.xlu1 %9168, %v472_v56   ;;  %v921_v56 = vsel %vm857_vm3, 1, %v15211_v2  ;;  %vm869_vm3 = vcmp.gt.s32.totalorder %v9352_v27, 0 }
  0x7c   : > { %765 = vperm.xlu1 %9168, %v712_v57  }
  0x7f   : > { %343 = vxpose.xlu0.b32.start.end [1/1] (short) (narrow) %v309_v58, 112  ;;  %v9571_v58 = vld [vmem:[%s15193_s1 + $0x18] sm:$0xff] }
  0x80   : > { %768 = vperm.xlu1 %9168, %v713_v59   ;;  %15949 = vst [vmem:[#allocation25_spill] sm:$0xff] %v9571_v58  ;;  %v922_v59 = vsel %vm858_vm4, 1, %v15211_v2  ;;  %vm859_vm5 = vcmp.gt.s32.totalorder %v9571_v58, 0  ;;  %vm888_vm4 = vcmp.lt.s32.totalorder %v9533_v41, 15 }
  0x84   : > { %771 = vperm.xlu1 %9168, %v714_v60  }
  0x88   : > { %774 = vperm.xlu1 %9168, %v715_v62  }
  0x8c   : > { %534 = vperm.xlu1 %9168, %v473_v3   ;;  %v923_v3 = vsel %vm859_vm5, 1, %v15211_v2  ;;  %vm870_vm5 = vcmp.gt.s32.totalorder %v9381_v33, 0 }
  0x8f   : > { %v9475_v7 = vpop.permute.xlu1 %729  ;;  %v9503_v22 = vpop.permute.xlu0 %486 }
  0x90   : > { %15927 = vst [vmem:[#allocation3_spill] sm:$0xff] %v9475_v7  ;;  %537 = vperm.xlu1 %9168, %v474_v4   ;;  %15934 = vst [vmem:[#allocation10_spill] sm:$0xff] %v9503_v22 }
  0x93   : > { %v9484_v10 = vpop.permute.xlu1 %732  ;;  %v9515_v30 = vpop.permute.xlu0 %489 }
  0x94   : > { %15929 = vst [vmem:[#allocation5_spill] sm:$0xff] %v9484_v10  ;;  %540 = vperm.xlu1 %9168, %v475_v9   ;;  %15937 = vst [vmem:[#allocation13_spill] sm:$0xff] %v9515_v30 }
  0x97   : > { %v9488_v14 = vpop.permute.xlu1 %483  ;;  %v9524_v36 = vpop.permute.xlu0 %480 }
  0x98   : > { %15930 = vst [vmem:[#allocation6_spill] sm:$0xff] %v9488_v14  ;;  %543 = vperm.xlu1 %9168, %v476_v13   ;;  %15940 = vst [vmem:[#allocation16_spill] sm:$0xff] %v9524_v36  ;;  %v925_v13 = vsel %vm861_vm6, 1, %v15211_v2  ;;  %vm890_vm6 = vcmp.lt.s32.totalorder %v9553_v50, 15  ;;  %vm15386_vm11 = vcmp.eq.s32.totalorder %v9488_v14, 1 }
  0x9b   : > { %v9492_v18 = vpop.permute.xlu1 %726  ;;  %v9536_v43 = vpop.permute.xlu0 %723 }
  0x9c   : > { %15931 = vst [vmem:[#allocation7_spill] sm:$0xff] %v9492_v18  ;;  %777 = vperm.xlu1 %9168, %v716_v17   ;;  %15942 = vst [vmem:[#allocation18_spill] sm:$0xff] %v9536_v43 }
  0x9f   : > { %v9496_v20 = vpop.permute.xlu1 %492  ;;  %v9560_v55 = vpop.permute.xlu0 %741 }
  0xa0   : > { %15932 = vst [vmem:[#allocation8_spill] sm:$0xff] %v9496_v20  ;;  %780 = vperm.xlu1 %9168, %v717_v19   ;;  %15947 = vst [vmem:[#allocation23_spill] sm:$0xff] %v9560_v55 }
  0xa3   : > { %v9507_v26 = vpop.permute.xlu1 %495  ;;  %v9574_v60 = vpop.permute.xlu0 %783 }
  0xa4   : > { %15935 = vst [vmem:[#allocation11_spill] sm:$0xff] %v9507_v26  ;;  %786 = vperm.xlu1 %9168, %v719_v24   ;;  %15950 = vst [vmem:[#allocation26_spill] sm:$0xff] %v9574_v60  ;;  %v926_v24 = vsel %vm862_vm7, 1, %v15211_v2  ;;  %v932_v60 = vsel %vm868_vm0, 1, %v15211_v2  ;;  %vm871_vm7 = vcmp.gt.s32.totalorder %v9388_v35, 0  ;;  %vm15230_vm0 = vcmp.eq.s32.totalorder %v9475_v7, 1 }
  0xa7   : > { %v9518_v31 = vpop.permute.xlu1 %735 }
  0xa8   : > { %15938 = vst [vmem:[#allocation14_spill] sm:$0xff] %v9518_v31  ;;  %546 = vperm.xlu1 %9168, %v477_v29  }
  0xab   : > { %v9522_v34 = vpop.permute.xlu1 %738 }
  0xac   : > { %15939 = vst [vmem:[#allocation15_spill] sm:$0xff] %v9522_v34  ;;  %549 = vperm.xlu1 %9168, %v478_v32  }
  0xaf   : > { %v9528_v40 = vpop.permute.xlu1 %498 }
  0xb0   : > { %15941 = vst [vmem:[#allocation17_spill] sm:$0xff] %v9528_v40  ;;  %789 = vperm.xlu1 %9168, %v720_v38  }
  0xb3   : > { %v9539_v44 = vpop.permute.xlu1 %501 }
  0xb4   : > { %15943 = vst [vmem:[#allocation19_spill] sm:$0xff] %v9539_v44  ;;  %792 = vperm.xlu1 %9168, %v721_v42  }
  0xb7   : > { %v9548_v49 = vpop.permute.xlu1 %504 }
  0xb8   : > { %15945 = vst [vmem:[#allocation21_spill] sm:$0xff] %v9548_v49  ;;  %953 = vperm.xlu1 %9168, %v920_v48   ;;  %v928_v48 = vsel %vm864_vm9, 1, %v15211_v2  ;;  %vm892_vm9 = vcmp.lt.s32.totalorder %v9288_v6, 15 }
  0xbb   : > { %v9566_v57 = vpop.permute.xlu1 %507 }
  0xbc   : > { %15948 = vst [vmem:[#allocation24_spill] sm:$0xff] %v9566_v57  ;;  %956 = vperm.xlu1 %9168, %v921_v56  }
  0xbf   : > { %v9577_v62 = vpop.permute.xlu1 %744 }
  0xc0   : > { %15951 = vst [vmem:[#allocation27_spill] sm:$0xff] %v9577_v62  ;;  %959 = vperm.xlu1 %9168, %v922_v59  }
  0xc2   : > { %v327_v4 = vpop.trf.xlu0 }
  0xc3   : > { %v9581_v9 = vpop.permute.xlu1 %747 }
  0xc4   : > { %15952 = vst [vmem:[#allocation28_spill] sm:$0xff] %v9581_v9  ;;  %962 = vperm.xlu1 %9168, %v923_v3  }
  0xc6   : > { %v328_v17 = vpop.trf.xlu0 }
  0xc7   : > { %v9585_v19 = vpop.permute.xlu1 %750  ;;  %v924_v17 = vsel %vm860_vm12, 1, %v15211_v2  ;;  %vm15226_vm12 = vcmp.eq.s32.totalorder %v9492_v18, 1 }
  0xc8   : > { %15953 = vst [vmem:[#allocation29_spill] sm:$0xff] %v9585_v19  ;;  %968 = vperm.xlu1 %9168, %v925_v13   ;;  %v9615_v13 = vld [vmem:[%s15193_s1 + $0xe0] sm:$0xff] }
  0xc9   : > { %15958 = vst [vmem:[#allocation34_spill] sm:$0xff] %v9615_v13  ;;  %vm884_vm15 = vcmp.gt.s32.totalorder %v9615_v13, 0 }
  0xca   : > { %v9588_v29 = vpop.trf.xlu0  ;;  %v948_v23 = vsel %vm884_vm15, 1, %v15211_v2  ;;  %vm15298_vm15 = vcmp.eq.s32.totalorder %v9503_v22, 1 }
  0xcb   : > { %v9591_v32 = vpop.permute.xlu1 %510  ;;  %v601_v50 = vrot.slane %v9588_v29, 4 }
  0xcc   : > { %15954 = vst [vmem:[#allocation30_spill] sm:$0xff] %v9591_v32  ;;  %971 = vperm.xlu1 %9168, %v926_v24  }
  0xce   : > { %v9594_v38 = vpop.trf.xlu0 }
  0xcf   : > { %v9597_v42 = vpop.permute.xlu1 %513  ;;  %v602_v58 = vrot.slane %v9594_v38, 4  ;;  %v15962_v38 = vmov 0  }
  0xd0   : > { %15955 = vst [vmem:[#allocation31_spill] sm:$0xff] %v9597_v42  ;;  %974 = vperm.xlu1 %9168, %v927_v5   ;;  %v9627_v5 = vld [vmem:[%s15193_s1 + $0xf0] sm:$0xff]  ;;  %v933_v41 = vsel %vm869_vm3, 1, %v15962_v38  ;;  %v1686_v21 = vsel %vm888_vm4, 1, %v15962_v38  ;;  %v1688_v8 = vsel %vm890_vm6, 1, %v15962_v38  ;;  %vm872_vm3 = vcmp.gt.s32.totalorder %v9395_v37, 0 }
  0xd1   : > { %15959 = vst [vmem:[#allocation35_spill] sm:$0xff] %v9627_v5  ;;  %vm886_vm2 = vcmp.gt.s32.totalorder %v9627_v5, 0  ;;  %vm894_vm4 = vcmp.lt.s32.totalorder %v9265_v0, 15  ;;  %vm15385_vm6 = vcmp.eq.s32.totalorder %v9515_v30, 1 }
  0xd2   : > { %v9600_v56 = vpop.trf.xlu0  ;;  %v950_v5 = vsel %vm886_vm2, 1, %v15962_v38  ;;  %vm15237_vm2 = vcmp.eq.s32.totalorder %v9484_v10, 1 }
  0xd3   : > { %v9603_v59 = vpop.permute.xlu1 %516 }
  0xd4   : > { %15956 = vst [vmem:[#allocation32_spill] sm:$0xff] %v9603_v59  ;;  %977 = vperm.xlu1 %9168, %v928_v48  }
  0xd6   : > { %v9606_v3 = vpop.trf.xlu0 }
  0xd7   : > { %v9610_v4 = vpop.permute.xlu1 %519  ;;  %v606_v46 = vrot.slane %v9606_v3, 4 }
  0xd8   : > { %15957 = vst [vmem:[#allocation33_spill] sm:$0xff] %v9610_v4  ;;  %980 = vperm.xlu1 %9168, %v929_v1   ;;  %v604_v1 = vrot.slane %v9600_v56, 4 }
  0xda   : > { %v9619_v24 = vpop.trf.xlu0  ;;  %v605_v2 = vsel %vm15398_vm1, %v602_v58, %v604_v1  ;;  %v607_v4 = vsel %vm15398_vm1, %v604_v1, %v606_v46  ;;  %v9669_v1 = vsel %vm871_vm7, 1, %v15962_v38  ;;  %vm15395_vm7 = vcmp.eq.s32.totalorder %v9524_v36, 1 }
  0xdb   : > { %v9629_v48 = vpop.permute.xlu1 %753  ;;  %v675_v16 = vsel %vm15386_vm11, %v605_v2, %v9606_v3  ;;  %v1690_v2 = vsel %vm892_vm9, 1, %v15962_v38  ;;  %v676_v35 = vsel %vm15298_vm15, %v607_v4, %v9619_v24  ;;  %vm15384_vm9 = vcmp.eq.s32.totalorder %v9496_v20, 1 }
  0xdc   : > { %15960 = vst [vmem:[#allocation36_spill] sm:$0xff] %v9629_v48  ;;  %983 = vperm.xlu1 %9168, %v930_v15   ;;  %965 = vperm.xlu0 %9167, %v924_v17   ;;  %v608_v15 = vrot.slane %v9619_v24, 4 }
  0xde   : > { %v334_v13 = vpop.trf.xlu0  ;;  %v609_v6 = vsel %vm15398_vm1, %v606_v46, %v608_v15  ;;  %v603_v46 = vsel %vm15398_vm1, %v601_v50, %v602_v58 }
  0xdf   : > { %v610_v17 = vrot.slane %v334_v13, 4  ;;  %v9641_v28 = vpop.permute.xlu1 %756 }
  0xe0   : > { %15961 = vst [vmem:[#allocation37_spill] sm:$0xff] %v9641_v28  ;;  %986 = vperm.xlu1 %9168, %v931_v52   ;;  %1037 = vperm.xlu0 %9167, %v948_v23   ;;  %v934_v23 = vsel %vm870_vm5, 1, %v15962_v38  ;;  %vm873_vm5 = vcmp.gt.s32.totalorder %v9402_v39, 0 }
  0xe1   : > { %v611_v27 = vsel %vm15398_vm1, %v608_v15, %v610_v17 }
  0xe2   : > { %v335_v52 = vpop.trf.xlu0  ;;  %v9675_v42 = vsel %vm15226_vm12, %v611_v27, %v675_v16  ;;  %vm15241_vm12 = vcmp.eq.s32.totalorder %v9536_v43, 1  ;;  %v937_v43 = vsel %vm873_vm5, 1, %v15962_v38  ;;  %vm15249_vm5 = vcmp.eq.s32.totalorder %v9528_v40, 1 }
  0xe3   : > { %v612_v59 = vrot.slane %v335_v52, 4  ;;  %v9664_v28 = vpop.permute.xlu1 %759  ;;  %v9700_v3 = vrot.slane %v9675_v42, 7  ;;  %v9710_v15 = vrot.slane %v9675_v42, 1 }
  0xe4   : > { %15963 = vst [vmem:[#allocation38_spill] sm:$0xff] %v9664_v28  ;;  %989 = vperm.xlu1 %9168, %v932_v60   ;;  %1043 = vperm.xlu0 %9167, %v950_v5  }
  0xe5   : > { %v9686_v29 = vsel %vm15398_vm1, %v610_v17, %v612_v59  ;;  %15965 = vst [vmem:[#allocation40_spill] sm:$0xff] %v9710_v15 }
  0xe6   : > { %v9697_v16 = vsel %vm15230_vm0, %v9686_v29, %v676_v35  ;;  %v336_v60 = vpop.trf.xlu0  ;;  %v677_v35 = vsel %vm15385_vm6, %v609_v6, %v334_v13  ;;  %vm15238_vm0 = vcmp.eq.s32.totalorder %v9518_v31, 1  ;;  %v674_v13 = vsel %vm15395_vm7, %v603_v46, %v9600_v56 }
  0xe7   : > { %v1110_v4 = vrot.slane %v9697_v16, 7  ;;  %v1851_v24 = vrot.slane %v9697_v16, 1  ;;  %v614_v5 = vrot.slane %v336_v60, 4  ;;  %v9704_v17 = vpop.permute.xlu1 %762  ;;  %v1523_v56 = vsel %vm1309_vm14, %v9558_v53, 0 }
  0xe8   : > { %15964 = vst [vmem:[#allocation39_spill] sm:$0xff] %v9704_v17  ;;  %992 = vperm.xlu1 %9168, %v933_v41   ;;  %1719 = vperm.xlu0 %9167, %v1686_v21   ;;  %v1692_v31 = vsel %vm894_vm4, 1, %v15962_v38  ;;  %vm15252_vm4 = vcmp.eq.s32.totalorder %v9560_v55, 1 }
  0xe9   : > { %v615_v7 = vsel %vm15398_vm1, %v612_v59, %v614_v5  ;;  %v9717_v18 = vsel %vm15493_vm8, %v1110_v4, %v9700_v3  ;;  %v9721_v22 = vsel %vm15493_vm8, %v9700_v3, %v1110_v4  ;;  %v9728_v21 = vsel %vm15621_vm10, %v1851_v24, %v9710_v15 }
  0xea   : > { %v833_v50 = vsel %vm15237_vm2, %v615_v7, %v677_v35  ;;  %v337_v58 = vpop.trf.xlu0  ;;  %15966 = vst [vmem:[#allocation41_spill] sm:$0xff] %v9728_v21  ;;  %v9732_v59 = vsel %vm15621_vm10, %v9710_v15, %v1851_v24  ;;  %v9745_v35 = vsel %vm15241_vm12, %v609_v6, %v674_v13  ;;  %v678_v21 = vsel %vm15384_vm9, %v611_v27, %v335_v52 }
  0xeb   : > { %15967 = vst [vmem:[#allocation42_spill] sm:$0xff] %v9732_v59  ;;  %v9737_v41 = vrot.slane %v833_v50, 7  ;;  %v9739_v30 = vrot.slane %v833_v50, 1  ;;  %v616_v14 = vrot.slane %v337_v58, 4  ;;  %v9741_v10 = vpop.permute.xlu1 %522  ;;  %v9750_v59 = vpack.c.bf16 %v9697_v16, %v833_v50 }
  0xec   : > { %15968 = vst [vmem:[#allocation43_spill] sm:$0xff] %v9741_v10  ;;  %995 = vperm.xlu1 %9168, %v934_v23   ;;  %1725 = vperm.xlu0 %9167, %v1688_v8   ;;  %v9756_v46 = vpack.c.bf16 %v9745_v35, %v9675_v42  ;;  %vm896_vm2 = vcmp.lt.s32.totalorder %v9301_v11, 15  ;;  %vm15250_vm12 = vcmp.eq.s32.totalorder %v9522_v34, 1  ;;  %v680_v34 = vsel %vm15249_vm5, %v615_v7, %v337_v58 }
  0xed   : > { %15969 = vst [vmem:[#allocation44_spill] sm:$0xff] %v9750_v59  ;;  %v9759_v36 = vsel %vm15398_vm1, %v614_v5, %v616_v14  ;;  %v9763_v6 = vsel %vm15493_vm8, %v9737_v41, %v1110_v4  ;;  %v9767_v8 = vsel %vm15493_vm8, %v1110_v4, %v9737_v41  ;;  %8081 = vmatmul.mubr.msk.bf16.vlgmr.msra.gmra.mrb[0].mxu0 %vm1260_vm13, %v9750_v59  ;;  %v1694_v20 = vsel %vm896_vm2, 1, %v15962_v38 }
  0xee   : > { %15970 = vst [vmem:[#allocation45_spill] sm:$0xff] %v9756_v46  ;;  %v9774_v53 = vsel %vm15238_vm0, %v9759_v36, %v678_v21  ;;  %v338_v27 = vpop.trf.xlu0  ;;  %v9778_v52 = vsel %vm15621_vm10, %v9739_v30, %v1851_v24  ;;  %8084 = vmatprep.mubr.msk.bf16.mxu0 %vm1260_vm13, %v9756_v46  ;;  %8113 = vmatpush3.bf16.msra.mxu0 %v1523_v56  ;;  %vm15251_vm0 = vcmp.eq.s32.totalorder %v9507_v26, 1  ;;  %v936_v21 = vsel %vm872_vm3, 1, %v15962_v38 }
  0xef   : > { %15971 = vst [vmem:[#allocation46_spill] sm:$0xff] %v9778_v52  ;;  %v1120_v23 = vrot.slane %v9774_v53, 7  ;;  %v1861_v4 = vrot.slane %v9774_v53, 1  ;;  %v618_v5 = vrot.slane %v338_v27, 4  ;;  %v9784_v13 = vpop.permute.xlu1 %525  ;;  %v679_v11 = vsel %vm15251_vm0, %v9686_v29, %v336_v60 }
  0xf0   : > { %15972 = vst [vmem:[#allocation47_spill] sm:$0xff] %v9784_v13  ;;  %998 = vperm.xlu1 %9168, %v9669_v1   ;;  %1731 = vperm.xlu0 %9167, %v1690_v2   ;;  %v9812_v39 = vsel %vm15621_vm10, %v1851_v24, %v9739_v30  ;;  %vm874_vm3 = vcmp.gt.s32.totalorder %v9417_v45, 0  ;;  %v9825_v24 = vpack.c.bf16 %v9675_v42, %v9745_v35  ;;  %vm898_vm2 = vcmp.lt.s32.totalorder %v9306_v12, 15 }
  0xf1   : > { %v619_v1 = vsel %vm15398_vm1, %v616_v14, %v618_v5  ;;  %v9805_v2 = vsel %vm15493_vm8, %v9737_v41, %v1120_v23  ;;  %15973 = vst [vmem:[#allocation48_spill] sm:$0xff] %v9812_v39  ;;  %v9816_v26 = vsel %vm15621_vm10, %v9739_v30, %v1861_v4  ;;  %v9836_v59 = vpack.c.bf16 %v833_v50, %v9697_v16 }
  0xf2   : > { %v835_v0 = vsel %vm15250_vm12, %v619_v1, %v679_v11  ;;  %v339_v56 = vpop.trf.xlu0  ;;  %15974 = vst [vmem:[#allocation49_spill] sm:$0xff] %v9816_v26  ;;  %15976 = vst [vmem:[#allocation51_spill] sm:$0xff] %v9825_v24  ;;  %v9831_v11 = vld [vmem:[%s15194_s2 + $0x4] sm:$0x3]  ;;  %vm875_vm5 = vcmp.gt.s32.totalorder %v9424_v47, 0  ;;  %vm900_vm12 = vcmp.lt.s32.totalorder %v9343_v25, 15 }
  0xf3   : > { %v1122_v29 = vrot.slane %v835_v0, 7  ;;  %v1863_v14 = vrot.slane %v835_v0, 1  ;;  %v620_v60 = vrot.slane %v339_v56, 4  ;;  %v9818_v46 = vpop.permute.xlu1 %528  ;;  %15977 = vst [vmem:[#allocation52_spill] sm:$0xff] %v9836_v59  ;;  %9140 = vmatprep.subr.msk.bf16.mxu0 %vm1309_vm14, %v9831_v11  ;;  %vm15260_vm0 = vcmp.eq.s32.totalorder %v9539_v44, 1 }
  0xf4   : > { %15975 = vst [vmem:[#allocation50_spill] sm:$0xff] %v9818_v46  ;;  %1001 = vperm.xlu1 %9168, %v936_v21   ;;  %1737 = vperm.xlu0 %9167, %v1692_v31   ;;  %v939_v12 = vsel %vm875_vm5, 1, %v15962_v38  ;;  %v1698_v40 = vsel %vm900_vm12, 1, %v15962_v38  ;;  %vm902_vm12 = vcmp.lt.s32.totalorder %v9381_v33, 15  ;;  %vm15261_vm5 = vcmp.eq.s32.totalorder %v9581_v9, 1 }
  0xf5   : > { %v621_v21 = vsel %vm15398_vm1, %v618_v5, %v620_v60  ;;  %v9840_v31 = vsel %vm15493_vm8, %v1120_v23, %v1122_v29  ;;  %8085 = vmatmul.mubr.msk.bf16.gmra.mrb[4].mxu0 %vm1260_vm13, %v9825_v24  ;;  %v9850_v7 = vsel %vm15621_vm10, %v1861_v4, %v1863_v14  ;;  %v1696_v4 = vsel %vm898_vm2, 1, %v15962_v38 }
  0xf6   : > { %v836_v42 = vsel %vm15252_vm4, %v621_v21, %v680_v34  ;;  %v340_v26 = vpop.trf.xlu0  ;;  %15978 = vst [vmem:[#allocation53_spill] sm:$0xff] %v9850_v7  ;;  %8088 = vmatprep.mubr.msk.bf16.mxu0 %vm1260_vm13, %v9836_v59  ;;  %v938_v34 = vsel %vm874_vm3, 1, %v15962_v38  ;;  %vm15259_vm4 = vcmp.eq.s32.totalorder %v9577_v62, 1  ;;  %v681_v5 = vsel %vm15260_vm0, %v9759_v36, %v338_v27 }
  0xf7   : > { %v1124_v16 = vrot.slane %v836_v42, 7  ;;  %v1865_v50 = vrot.slane %v836_v42, 1  ;;  %v622_v58 = vrot.slane %v340_v26, 4  ;;  %v9854_v23 = vpop.permute.xlu1 %531  ;;  %vm876_vm3 = vcmp.gt.s32.totalorder %v9436_v51, 0 }
  0xf8   : > { %15979 = vst [vmem:[#allocation54_spill] sm:$0xff] %v9854_v23  ;;  %1004 = vperm.xlu1 %9168, %v937_v43   ;;  %1743 = vperm.xlu0 %9167, %v1694_v20   ;;  %vm15262_vm2 = vcmp.eq.s32.totalorder %v9548_v49, 1  ;;  %vm15272_vm0 = vcmp.eq.s32.totalorder %v9566_v57, 1 }
  0xf9   : > { %v623_v25 = vsel %vm15398_vm1, %v620_v60, %v622_v58  ;;  %v9870_v55 = vsel %vm15493_vm8, %v1122_v29, %v1124_v16  ;;  %v9879_v59 = vsel %vm15621_vm10, %v1863_v14, %v1865_v50  ;;  %v9886_v29 = vpack.c.bf16 %v835_v0, %v9774_v53 }
  0xfa   : > { %v837_v20 = vsel %vm15259_vm4, %v623_v25, %v681_v5  ;;  %v341_v43 = vpop.trf.xlu0  ;;  %15980 = vst [vmem:[#allocation55_spill] sm:$0xff] %v9879_v59  ;;  %v682_v14 = vsel %vm15262_vm2, %v619_v1, %v339_v56  ;;  %vm877_vm4 = vcmp.gt.s32.totalorder %v9445_v54, 0  ;;  %vm15267_vm2 = vcmp.eq.s32.totalorder %v9585_v19, 1 }
  0xfb   : > { %v1126_v44 = vrot.slane %v837_v20, 7  ;;  %v1867_v36 = vrot.slane %v837_v20, 1  ;;  %v624_v27 = vrot.slane %v341_v43, 4  ;;  %v9881_v60 = vpop.permute.xlu1 %765  ;;  %15982 = vst [vmem:[#allocation57_spill] sm:$0xff] %v9886_v29  ;;  %v9888_v47 = vpack.c.bf16 %v837_v20, %v836_v42 }
  0xfc   : > { %15981 = vst [vmem:[#allocation56_spill] sm:$0xff] %v9881_v60  ;;  %1007 = vperm.xlu1 %9168, %v938_v34   ;;  %1749 = vperm.xlu0 %9167, %v1696_v4   ;;  %v683_v4 = vsel %vm15272_vm0, %v621_v21, %v340_v26 }
  0xfd   : > { %15983 = vst [vmem:[#allocation58_spill] sm:$0xff] %v9888_v47  ;;  %v625_v5 = vsel %vm15398_vm1, %v622_v58, %v624_v27  ;;  %v9896_v62 = vsel %vm15493_vm8, %v1124_v16, %v1126_v44  ;;  %8089 = vmatmul.mubr.msk.bf16.gmra.mrb[8].mxu0 %vm1260_vm13, %v9886_v29  ;;  %v9903_v42 = vsel %vm15621_vm10, %v1865_v50, %v1867_v36  ;;  %v940_v16 = vsel %vm876_vm3, 1, %v15962_v38 }
  0xfe   : > { %v838_v53 = vsel %vm15261_vm5, %v625_v5, %v682_v14  ;;  %v342_v0 = vpop.trf.xlu0  ;;  %15984 = vst [vmem:[#allocation59_spill] sm:$0xff] %v9903_v42  ;;  %8092 = vmatprep.mubr.msk.bf16.mxu0 %vm1260_vm13, %v9888_v47  ;;  %v1700_v50 = vsel %vm902_vm12, 1, %v15962_v38  ;;  %vm904_vm5 = vcmp.lt.s32.totalorder %v9395_v37, 15  ;;  %v941_v14 = vsel %vm877_vm4, 1, %v15962_v38 }
  0xff   : > { %v1128_v34 = vrot.slane %v838_v53, 7  ;;  %v1869_v1 = vrot.slane %v838_v53, 1  ;;  %v626_v56 = vrot.slane %v342_v0, 4  ;;  %v9907_v58 = vpop.permute.xlu1 %768  ;;  %v1702_v26 = vsel %vm904_vm5, 1, %v15962_v38 }
 0x100   : > { %15985 = vst [vmem:[#allocation60_spill] sm:$0xff] %v9907_v58  ;;  %1010 = vperm.xlu1 %9168, %v939_v12   ;;  %1755 = vperm.xlu0 %9167, %v1698_v40   ;;  %vm15270_vm3 = vcmp.eq.s32.totalorder %v9591_v32, 1  ;;  %vm878_vm12 = vcmp.gt.s32.totalorder %v9462_v61, 0  ;;  %vm906_vm4 = vcmp.lt.s32.totalorder %v9417_v45, 15  ;;  %vm879_vm5 = vcmp.gt.s32.totalorder %v9469_v63, 0 }
 0x101   : > { %v627_v54 = vsel %vm15398_vm1, %v624_v27, %v626_v56  ;;  %v9923_v20 = vsel %vm15493_vm8, %v1126_v44, %v1128_v34  ;;  %v9929_v33 = vsel %vm15621_vm10, %v1867_v36, %v1869_v1  ;;  %v684_v21 = vsel %vm15270_vm3, %v623_v25, %v341_v43  ;;  %v15991_v25 = vld [vmem:[#allocation31_spill] sm:$0xff] }
 0x102   : > { %v839_v40 = vsel %vm15267_vm2, %v627_v54, %v683_v4  ;;  %v359_v12 = vpop.trf.xlu0  ;;  %15986 = vst [vmem:[#allocation61_spill] sm:$0xff] %v9929_v33  ;;  %vm15271_vm2 = vcmp.eq.s32.totalorder %v9629_v48, 1  ;;  %vm15285_vm3 = vcmp.eq.s32.totalorder %v15991_v25, 1  ;;  %v942_v43 = vsel %vm878_vm12, 1, %v15962_v38 }
 0x103   : > { %v1130_v37 = vrot.slane %v839_v40, 7  ;;  %v1871_v9 = vrot.slane %v839_v40, 1  ;;  %v628_v49 = vrot.slane %v359_v12, 4  ;;  %v9931_v47 = vpop.permute.xlu1 %771  ;;  %v9935_v44 = vpack.c.bf16 %v839_v40, %v838_v53 }
 0x104   : > { %15987 = vst [vmem:[#allocation62_spill] sm:$0xff] %v9931_v47  ;;  %1013 = vperm.xlu1 %9168, %v940_v16   ;;  %1761 = vperm.xlu0 %9167, %v1700_v50   ;;  %v943_v48 = vsel %vm879_vm5, 1, %v15962_v38  ;;  %vm910_vm5 = vcmp.lt.s32.totalorder %v9462_v61, 15  ;;  %vm15305_vm15 = vcmp.eq.s32.totalorder %v9907_v58, 1 }
 0x105   : > { %15988 = vst [vmem:[#allocation63_spill] sm:$0xff] %v9935_v44  ;;  %v629_v36 = vsel %vm15398_vm1, %v626_v56, %v628_v49  ;;  %v9944_v27 = vsel %vm15493_vm8, %v1128_v34, %v1130_v37  ;;  %8093 = vmatmul.mubr.msk.bf16.gmra.mrb[12].mxu0 %vm1260_vm13, %v9935_v44  ;;  %v9951_v50 = vsel %vm15621_vm10, %v1869_v1, %v1871_v9  ;;  %v1704_v34 = vsel %vm906_vm4, 1, %v15962_v38  ;;  %v15992_v1 = vld [vmem:[#allocation37_spill] sm:$0xff] }
 0x106   : > { %v840_v53 = vsel %vm15271_vm2, %v629_v36, %v684_v21  ;;  %v360_v16 = vpop.trf.xlu0  ;;  %15989 = vst [vmem:[#allocation64_spill] sm:$0xff] %v9951_v50  ;;  %vm908_vm2 = vcmp.lt.s32.totalorder %v9436_v51, 15  ;;  %vm15279_vm0 = vcmp.eq.s32.totalorder %v15992_v1, 1  ;;  %v685_v56 = vsel %vm15285_vm3, %v625_v5, %v342_v0 }
 0x107   : > { %v1132_v4 = vrot.slane %v840_v53, 7  ;;  %v1873_v40 = vrot.slane %v840_v53, 1  ;;  %v630_v19 = vrot.slane %v360_v16, 4  ;;  %v9953_v32 = vpop.permute.xlu1 %774  ;;  %v1706_v5 = vsel %vm908_vm2, 1, %v15962_v38 }
 0x108   : > { %15990 = vst [vmem:[#allocation65_spill] sm:$0xff] %v9953_v32  ;;  %1016 = vperm.xlu1 %9168, %v941_v14   ;;  %1767 = vperm.xlu0 %9167, %v1702_v26  }
 0x109   : > { %v631_v63 = vsel %vm15398_vm1, %v628_v49, %v630_v19  ;;  %v9969_v14 = vsel %vm15493_vm8, %v1130_v37, %v1132_v4  ;;  %v9975_v45 = vsel %vm15621_vm10, %v1871_v9, %v1873_v40  ;;  %v15995_v49 = vld [vmem:[#allocation32_spill] sm:$0xff]  ;;  %v15997_v37 = vld [vmem:[#allocation2_spill] sm:$0xff] }
 0x10a   : > { %v841_v26 = vsel %vm15279_vm0, %v631_v63, %v685_v56  ;;  %v361_v21 = vpop.trf.xlu0  ;;  %15993 = vst [vmem:[#allocation66_spill] sm:$0xff] %v9975_v45  ;;  %vm15287_vm12 = vcmp.eq.s32.totalorder %v15995_v49, 1  ;;  %vm880_vm4 = vcmp.gt.s32.totalorder %v15997_v37, 0  ;;  %vm15286_vm0 = vcmp.eq.s32.totalorder %v9664_v28, 1 }
 0x10b   : > { %v1134_v51 = vrot.slane %v841_v26, 7  ;;  %v1875_v57 = vrot.slane %v841_v26, 1  ;;  %v632_v44 = vrot.slane %v361_v21, 4  ;;  %v9977_v29 = vpop.permute.xlu1 %534  ;;  %v9981_v0 = vpack.c.bf16 %v841_v26, %v840_v53 }
 0x10c   : > { %15994 = vst [vmem:[#allocation67_spill] sm:$0xff] %v9977_v29  ;;  %1019 = vperm.xlu1 %9168, %v942_v43   ;;  %1773 = vperm.xlu0 %9167, %v1704_v34   ;;  %v686_v9 = vsel %vm15287_vm12, %v627_v54, %v359_v12  ;;  %v16000_v54 = vld [vmem:[#allocation4_spill] sm:$0xff]  ;;  %v944_v12 = vsel %vm880_vm4, 1, %v15962_v38  ;;  %vm15293_vm12 = vcmp.eq.s32.totalorder %v9704_v17, 1  ;;  %vm15296_vm4 = vcmp.eq.s32.totalorder %v9741_v10, 1 }
 0x10d   : > { %15996 = vst [vmem:[#allocation68_spill] sm:$0xff] %v9981_v0  ;;  %v633_v56 = vsel %vm15398_vm1, %v630_v19, %v632_v44  ;;  %v9990_v1 = vsel %vm15493_vm8, %v1132_v4, %v1134_v51  ;;  %8096 = vmatprep.mubr.msk.bf16.mxu0 %vm1260_vm13, %v9981_v0  ;;  %v9997_v34 = vsel %vm15621_vm10, %v1873_v40, %v1875_v57  ;;  %vm881_vm2 = vcmp.gt.s32.totalorder %v16000_v54, 0  ;;  %v16001_v19 = vld [vmem:[#allocation33_spill] sm:$0xff] }
 0x10e   : > { %v842_v53 = vsel %vm15286_vm0, %v633_v56, %v686_v9  ;;  %v362_v43 = vpop.trf.xlu0  ;;  %15998 = vst [vmem:[#allocation2_spill] sm:$0xff] %v9997_v34  ;;  %vm15297_vm3 = vcmp.eq.s32.totalorder %v16001_v19, 1  ;;  %v1708_v4 = vsel %vm910_vm5, 1, %v15962_v38  ;;  %vm912_vm0 = vcmp.lt.s32.totalorder %v15997_v37, 15 }
 0x10f   : > { %v1136_v26 = vrot.slane %v842_v53, 7  ;;  %v1877_v25 = vrot.slane %v842_v53, 1  ;;  %v634_v24 = vrot.slane %v362_v43, 4  ;;  %v9999_v49 = vpop.permute.xlu1 %537  ;;  %v687_v40 = vsel %vm15297_vm3, %v629_v36, %v360_v16  ;;  %v16005_v16 = vld [vmem:[#allocation9_spill] sm:$0xff] }
 0x110   : > { %15999 = vst [vmem:[#allocation69_spill] sm:$0xff] %v9999_v49  ;;  %1022 = vperm.xlu1 %9168, %v943_v48   ;;  %1779 = vperm.xlu0 %9167, %v1706_v5   ;;  %v945_v28 = vsel %vm881_vm2, 1, %v15962_v38  ;;  %v1710_v36 = vsel %vm912_vm0, 1, %v15962_v38  ;;  %vm882_vm5 = vcmp.gt.s32.totalorder %v16005_v16, 0  ;;  %vm914_vm2 = vcmp.lt.s32.totalorder %v16005_v16, 15 }
 0x111   : > { %v635_v9 = vsel %vm15398_vm1, %v632_v44, %v634_v24  ;;  %v10015_v48 = vsel %vm15493_vm8, %v1134_v51, %v1136_v26  ;;  %v10021_v61 = vsel %vm15621_vm10, %v1875_v57, %v1877_v25  ;;  %v688_v57 = vsel %vm15296_vm4, %v631_v63, %v361_v21 }
 0x112   : > { %v843_v5 = vsel %vm15293_vm12, %v635_v9, %v687_v40  ;;  %v363_v54 = vpop.trf.xlu0  ;;  %16002 = vst [vmem:[#allocation4_spill] sm:$0xff] %v10021_v61  ;;  %vm15309_vm12 = vcmp.eq.s32.totalorder %v9881_v60, 1  ;;  %vm15311_vm3 = vcmp.eq.s32.totalorder %v9784_v13, 1 }
 0x113   : > { %v1138_v37 = vrot.slane %v843_v5, 7  ;;  %v1879_v0 = vrot.slane %v843_v5, 1  ;;  %v636_v34 = vrot.slane %v363_v54, 4  ;;  %v10023_v45 = vpop.permute.xlu1 %540  ;;  %v10027_v44 = vpack.c.bf16 %v843_v5, %v842_v53 }
 0x114   : > { %16003 = vst [vmem:[#allocation70_spill] sm:$0xff] %v10023_v45  ;;  %1025 = vperm.xlu1 %9168, %v944_v12   ;;  %1785 = vperm.xlu0 %9167, %v1708_v4   ;;  %v16006_v4 = vld [vmem:[#allocation12_spill] sm:$0xff] }
 0x115   : > { %16004 = vst [vmem:[#allocation71_spill] sm:$0xff] %v10027_v44  ;;  %v637_v51 = vsel %vm15398_vm1, %v634_v24, %v636_v34  ;;  %v10036_v40 = vsel %vm15493_vm8, %v1136_v26, %v1138_v37  ;;  %8097 = vmatmul.mubr.msk.bf16.gmra.mrb[16].mxu0 %vm1260_vm13, %v10027_v44  ;;  %vm883_vm0 = vcmp.gt.s32.totalorder %v16006_v4, 0  ;;  %v10044_v5 = vsel %vm15621_vm10, %v1877_v25, %v1879_v0  ;;  %v16009_v24 = vld [vmem:[#allocation34_spill] sm:$0xff]  ;;  %v16013_v4 = vld [vmem:[#allocation35_spill] sm:$0xff] }
 0x116   : > { %v844_v53 = vsel %vm15309_vm12, %v637_v51, %v688_v57  ;;  %v364_v12 = vpop.trf.xlu0  ;;  %16007 = vst [vmem:[#allocation9_spill] sm:$0xff] %v10044_v5  ;;  %vm916_vm4 = vcmp.lt.s32.totalorder %v16009_v24, 15  ;;  %v946_v26 = vsel %vm882_vm5, 1, %v15962_v38  ;;  %v1712_v25 = vsel %vm914_vm2, 1, %v15962_v38  ;;  %v10060_v57 = vld [vmem:[%s15193_s1 + $0xe8] sm:$0xff] }
 0x117   : > { %v1140_v17 = vrot.slane %v844_v53, 7  ;;  %v1881_v10 = vrot.slane %v844_v53, 1  ;;  %v638_v63 = vrot.slane %v364_v12, 4  ;;  %v10046_v21 = vpop.permute.xlu1 %543  ;;  %v689_v24 = vsel %vm15311_vm3, %v633_v56, %v362_v43 }
 0x118   : > { %16008 = vst [vmem:[#allocation12_spill] sm:$0xff] %v10046_v21  ;;  %1028 = vperm.xlu1 %9168, %v945_v28   ;;  %1791 = vperm.xlu0 %9167, %v1710_v36   ;;  %v947_v44 = vsel %vm883_vm0, 1, %v15962_v38  ;;  %v1714_v5 = vsel %vm916_vm4, 1, %v15962_v38  ;;  %vm885_vm5 = vcmp.gt.s32.totalorder %v10060_v57, 0  ;;  %vm15310_vm2 = vcmp.eq.s32.totalorder %v9818_v46, 1 }
 0x119   : > { %v639_v60 = vsel %vm15398_vm1, %v636_v34, %v638_v63  ;;  %v10066_v28 = vsel %vm15493_vm8, %v1138_v37, %v1140_v17  ;;  %v10069_v36 = vsel %vm15621_vm10, %v1879_v0, %v1881_v10  ;;  %v10083_v0 = vld [vmem:[%s15193_s1 + $0xf8] sm:$0xff]  ;;  %vm918_vm4 = vcmp.lt.s32.totalorder %v16013_v4, 15 }
 0x11a   : > { %16010 = vst [vmem:[#allocation34_spill] sm:$0xff] %v10069_v36  ;;  %v845_v16 = vsel %vm15305_vm15, %v639_v60, %v689_v24  ;;  %v365_v19 = vpop.trf.xlu0  ;;  %vm15323_vm15 = vcmp.eq.s32.totalorder %v9931_v47, 1  ;;  %v690_v24 = vsel %vm15310_vm2, %v635_v9, %v363_v54  ;;  %vm887_vm0 = vcmp.gt.s32.totalorder %v10083_v0, 0 }
 0x11b   : > { %v1142_v13 = vrot.slane %v845_v16, 7  ;;  %v1883_v56 = vrot.slane %v845_v16, 1  ;;  %v640_v43 = vrot.slane %v365_v19, 4  ;;  %v10077_v34 = vpop.permute.xlu1 %777  ;;  %v10087_v37 = vpack.c.bf16 %v845_v16, %v844_v53 }
 0x11c   : > { %16011 = vst [vmem:[#allocation72_spill] sm:$0xff] %v10077_v34  ;;  %1031 = vperm.xlu1 %9168, %v946_v26   ;;  %1797 = vperm.xlu0 %9167, %v1712_v25   ;;  %vm15324_vm2 = vcmp.eq.s32.totalorder %v9854_v23, 1  ;;  %vm15322_vm3 = vcmp.eq.s32.totalorder %v9953_v32, 1  ;;  %v951_v4 = vsel %vm887_vm0, 1, %v15962_v38  ;;  %v16020_v32 = vld [vmem:[#allocation20_spill] sm:$0xff] }
 0x11d   : > { %16012 = vst [vmem:[#allocation73_spill] sm:$0xff] %v10087_v37  ;;  %v641_v58 = vsel %vm15398_vm1, %v638_v63, %v640_v43  ;;  %v10094_v36 = vsel %vm15493_vm8, %v1140_v17, %v1142_v13  ;;  %v10097_v61 = vsel %vm15621_vm10, %v1881_v10, %v1883_v56  ;;  %8100 = vmatprep.mubr.msk.bf16.mxu0 %vm1260_vm13, %v10087_v37  ;;  %v16016_v63 = vld [vmem:[#allocation22_spill] sm:$0xff]  ;;  %v949_v10 = vsel %vm885_vm5, 1, %v15962_v38 }
 0x11e   : > { %16014 = vst [vmem:[#allocation35_spill] sm:$0xff] %v10097_v61  ;;  %v846_v53 = vsel %vm15323_vm15, %v641_v58, %v690_v24  ;;  %v366_v26 = vpop.trf.xlu0  ;;  %vm3984_vm12 = vcmp.ge.s32.totalorder %v16016_v63, 15  ;;  %v1716_v17 = vsel %vm918_vm4, 1, %v15962_v38  ;;  %v691_v24 = vsel %vm15324_vm2, %v637_v51, %v364_v12 }
 0x11f   : > { %v1144_v25 = vrot.slane %v846_v53, 7  ;;  %v1885_v16 = vrot.slane %v846_v53, 1  ;;  %v642_v9 = vrot.slane %v366_v26, 4  ;;  %v10104_v54 = vpop.permute.xlu1 %780  ;;  %v4012_v51 = vsel %vm3984_vm12, 1, %v15962_v38 }
 0x120   : > { %16015 = vst [vmem:[#allocation74_spill] sm:$0xff] %v10104_v54  ;;  %1034 = vperm.xlu1 %9168, %v947_v44   ;;  %1803 = vperm.xlu0 %9167, %v1714_v5   ;;  %vm15321_vm5 = vcmp.eq.s32.totalorder %v9977_v29, 1  ;;  %vm889_vm4 = vcmp.lt.s32.totalorder %v16020_v32, 15  ;;  %vm3956_vm0 = vcmp.lt.s32.totalorder %v16016_v63, 1  ;;  %vm15327_vm12 = vcmp.eq.s32.totalorder %v10077_v34, 1 }
 0x121   : > { %v10118_v47 = vsel %vm15398_vm1, %v640_v43, %v642_v9  ;;  %v10121_v46 = vsel %vm15493_vm8, %v1142_v13, %v1144_v25  ;;  %v10124_v44 = vsel %vm15621_vm10, %v1883_v56, %v1885_v16  ;;  %v692_v56 = vsel %vm15321_vm5, %v639_v60, %v365_v19 }
 0x122   : > { %16017 = vst [vmem:[#allocation22_spill] sm:$0xff] %v10124_v44  ;;  %v847_v5 = vsel %vm15322_vm3, %v10118_v47, %v691_v24  ;;  %v367_v37 = vpop.trf.xlu0  ;;  %vm15372_vm15 = vcmp.eq.s32.totalorder %v9999_v49, 1  ;;  %v1687_v34 = vsel %vm889_vm4, 1, %v15962_v38  ;;  %v4295_v29 = vsel %vm3956_vm0, 1, %v15962_v38 }
 0x123   : > { %v1146_v12 = vrot.slane %v847_v5, 7  ;;  %v1887_v43 = vrot.slane %v847_v5, 1  ;;  %v644_v13 = vrot.slane %v367_v37, 4  ;;  %v10134_v23 = vpop.permute.xlu1 %786  ;;  %v10138_v24 = vpack.c.bf16 %v847_v5, %v846_v53  ;;  %v16022_v53 = vld [vmem:[#allocation25_spill] sm:$0xff]  ;;  %v16024_v5 = vld [vmem:[#allocation26_spill] sm:$0xff] }
 0x124   : > { %16018 = vst [vmem:[#allocation75_spill] sm:$0xff] %v10134_v23  ;;  %1040 = vperm.xlu1 %9168, %v949_v10   ;;  %1809 = vperm.xlu0 %9167, %v1716_v17   ;;  %vm891_vm5 = vcmp.lt.s32.totalorder %v16022_v53, 15  ;;  %vm15338_vm2 = vcmp.eq.s32.totalorder %v16024_v5, 1 }
 0x125   : > { %16019 = vst [vmem:[#allocation76_spill] sm:$0xff] %v10138_v24  ;;  %v10144_v44 = vsel %vm15398_vm1, %v642_v9, %v644_v13  ;;  %v10147_v61 = vsel %vm15493_vm8, %v1144_v25, %v1146_v12  ;;  %v10150_v50 = vsel %vm15621_vm10, %v1885_v16, %v1887_v43  ;;  %8101 = vmatmul.mubr.msk.bf16.gmra.mrb[20].mxu0 %vm1260_vm13, %v10138_v24  ;;  %v9170_v9 = vld [vmem:[%s15193_s1 + $0x20] sm:$0xff]  ;;  %v1689_v32 = vsel %vm891_vm5, 1, %v15962_v38 }
 0x126   : > { %16021 = vst [vmem:[#allocation20_spill] sm:$0xff] %v10150_v50  ;;  %v848_v60 = vsel %vm15327_vm12, %v10144_v44, %v692_v56  ;;  %v368_v19 = vpop.trf.xlu0  ;;  %vm3986_vm3 = vcmp.ge.s32.totalorder %v9170_v9, 15  ;;  %v693_v56 = vsel %vm15372_vm15, %v641_v58, %v366_v26  ;;  %vm15332_vm12 = vcmp.eq.s32.totalorder %v10104_v54, 1  ;;  %v10208_v54 = vld [vmem:[%s15193_s1 + $0x30] sm:$0xff] }
 0x127   : > { %v1148_v25 = vrot.slane %v848_v60, 7  ;;  %v1889_v16 = vrot.slane %v848_v60, 1  ;;  %v646_v10 = vrot.slane %v368_v19, 4  ;;  %v10162_v17 = vpop.permute.xlu1 %546  ;;  %v4014_v63 = vsel %vm3986_vm3, 1, %v15962_v38 }
 0x128   : > { %16023 = vst [vmem:[#allocation25_spill] sm:$0xff] %v10162_v17  ;;  %1046 = vperm.xlu1 %9168, %v951_v4   ;;  %4041 = vperm.xlu0 %9167, %v4012_v51   ;;  %v10191_v4 = vld [vmem:[%s15193_s1 + $0x28] sm:$0xff]  ;;  %vm3958_vm0 = vcmp.lt.s32.totalorder %v9170_v9, 1  ;;  %vm3988_vm5 = vcmp.ge.s32.totalorder %v10208_v54, 15 }
 0x129   : > { %v647_v24 = vsel %vm15398_vm1, %v644_v13, %v646_v10  ;;  %v10176_v50 = vsel %vm15493_vm8, %v1146_v12, %v1148_v25  ;;  %v10179_v49 = vsel %vm15621_vm10, %v1887_v43, %v1889_v16  ;;  %vm893_vm4 = vcmp.lt.s32.totalorder %v10191_v4, 15 }
 0x12a   : > { %16025 = vst [vmem:[#allocation77_spill] sm:$0xff] %v10179_v49  ;;  %v849_v58 = vsel %vm15332_vm12, %v647_v24, %v693_v56  ;;  %v369_v26 = vpop.trf.xlu0  ;;  %vm15339_vm12 = vcmp.eq.s32.totalorder %v10023_v45, 1  ;;  %v10202_v56 = vld [vmem:[%s15193_s1 + $0x38] sm:$0xff]  ;;  %v4016_v9 = vsel %vm3988_vm5, 1, %v15962_v38 }
 0x12b   : > { %v1150_v51 = vrot.slane %v849_v58, 7  ;;  %v1891_v12 = vrot.slane %v849_v58, 1  ;;  %v648_v43 = vrot.slane %v369_v26, 4  ;;  %v10194_v13 = vpop.permute.xlu1 %549  ;;  %v10197_v53 = vpack.c.bf16 %v849_v58, %v848_v60 }
 0x12c   : > { %16026 = vst [vmem:[#allocation78_spill] sm:$0xff] %v10194_v13  ;;  %1722 = vperm.xlu1 %9168, %v1687_v34   ;;  %4324 = vperm.xlu0 %9167, %v4295_v29   ;;  %vm895_vm3 = vcmp.lt.s32.totalorder %v10202_v56, 15  ;;  %v694_v29 = vsel %vm15339_vm12, %v10118_v47, %v367_v37  ;;  %v1691_v47 = vsel %vm893_vm4, 1, %v15962_v38  ;;  %v4297_v37 = vsel %vm3958_vm0, 1, %v15962_v38 }
 0x12d   : > { %16027 = vst [vmem:[#allocation79_spill] sm:$0xff] %v10197_v53  ;;  %v10215_v34 = vsel %vm15398_vm1, %v646_v10, %v648_v43  ;;  %v10218_v60 = vsel %vm15493_vm8, %v1148_v25, %v1150_v51  ;;  %v10221_v58 = vsel %vm15621_vm10, %v1889_v16, %v1891_v12  ;;  %8104 = vmatprep.mubr.msk.bf16.mxu0 %vm1260_vm13, %v10197_v53  ;;  %v1693_v5 = vsel %vm895_vm3, 1, %v15962_v38 }
 0x12e   : > { %16028 = vst [vmem:[#allocation80_spill] sm:$0xff] %v10221_v58  ;;  %v850_v49 = vsel %vm15338_vm2, %v10215_v34, %v694_v29  ;;  %v370_v33 = vpop.trf.xlu0  ;;  %vm15347_vm2 = vcmp.eq.s32.totalorder %v10046_v21, 1  ;;  %vm15346_vm12 = vcmp.eq.s32.totalorder %v10134_v23, 1  ;;  %v10250_v29 = vld [vmem:[%s15193_s1 + $0x48] sm:$0xff]  ;;  %vm15371_vm0 = vcmp.eq.s32.totalorder %v10162_v17, 1 }
 0x12f   : > { %v10233_v25 = vrot.slane %v850_v49, 7  ;;  %v10235_v10 = vrot.slane %v850_v49, 1  ;;  %v821_v16 = vrot.slane %v370_v33, 4  ;;  %v10237_v45 = vpop.permute.xlu1 %789  ;;  %vm897_vm4 = vcmp.lt.s32.totalorder %v10250_v29, 15 }
 0x130   : > { %16031 = vst [vmem:[#allocation83_spill] sm:$0xff] %v10237_v45  ;;  %1728 = vperm.xlu1 %9168, %v1689_v32   ;;  %4047 = vperm.xlu0 %9167, %v4014_v63   ;;  %v695_v53 = vsel %vm15347_vm2, %v10144_v44, %v368_v19  ;;  %v10271_v44 = vld [vmem:[%s15193_s1 + $0x40] sm:$0xff]  ;;  %v10277_v19 = vld [vmem:[%s15193_s1 + $0x58] sm:$0xff]  ;;  %vm3960_vm2 = vcmp.lt.s32.totalorder %v10208_v54, 1 }
 0x131   : > { %16029 = vst [vmem:[#allocation81_spill] sm:$0xff] %v10233_v25  ;;  %16030 = vst [vmem:[#allocation82_spill] sm:$0xff] %v10235_v10  ;;  %v822_v58 = vsel %vm15398_vm1, %v648_v43, %v821_v16  ;;  %v10259_v32 = vsel %vm15493_vm8, %v1150_v51, %v10233_v25  ;;  %v10263_v63 = vsel %vm15621_vm10, %v1891_v12, %v10235_v10  ;;  %vm3990_vm3 = vcmp.ge.s32.totalorder %v10271_v44, 15 }
 0x132   : > { %16032 = vst [vmem:[#allocation84_spill] sm:$0xff] %v10263_v63  ;;  %v851_v42 = vsel %vm15346_vm12, %v822_v58, %v695_v53  ;;  %v371_v59 = vpop.trf.xlu0  ;;  %vm899_vm5 = vcmp.lt.s32.totalorder %v10277_v19, 15  ;;  %v696_v58 = vsel %vm15371_vm0, %v647_v24, %v369_v26  ;;  %vm15355_vm12 = vcmp.eq.s32.totalorder %v10237_v45, 1 }
 0x133   : > { %v1154_v51 = vrot.slane %v851_v42, 7  ;;  %v1895_v12 = vrot.slane %v851_v42, 1  ;;  %v823_v43 = vrot.slane %v371_v59, 4  ;;  %v10280_v23 = vpop.permute.xlu1 %792  ;;  %v10282_v53 = vpack.c.bf16 %v851_v42, %v850_v49 }
 0x134   : > { %16033 = vst [vmem:[#allocation85_spill] sm:$0xff] %v10280_v23  ;;  %1734 = vperm.xlu1 %9168, %v1691_v47   ;;  %4330 = vperm.xlu0 %9167, %v4297_v37   ;;  %v10288_v21 = vpack.c.bf16 %v850_v49, %v851_v42  ;;  %v15356_v47 = vmov 0.0   ;;  %v10334_v45 = vrot.slane %v9745_v35, 7 }
 0x135   : > { %16034 = vst [vmem:[#allocation86_spill] sm:$0xff] %v10282_v53  ;;  %v824_v63 = vsel %vm15398_vm1, %v821_v16, %v823_v43  ;;  %8105 = vmatmul.mubr.msk.bf16.gmra.mrb[24].mxu0 %vm1260_vm13, %v10282_v53  ;;  %v10295_v59 = vsel %vm15621_vm10, %v1895_v12, %v10235_v10  ;;  %v10299_v24 = vsel %vm15493_vm8, %v10233_v25, %v1154_v51  ;;  %v10308_v37 = vrot.slane %v15356_v47, 7 }
 0x136   : > { %16035 = vst [vmem:[#allocation87_spill] sm:$0xff] %v10288_v21  ;;  %16036 = vst [vmem:[#allocation88_spill] sm:$0xff] %v10295_v59  ;;  %v10303_v26 = vsel %vm15493_vm8, %v1154_v51, %v10233_v25  ;;  %v852_v42 = vsel %vm15355_vm12, %v824_v63, %v696_v58  ;;  %v372_v49 = vpop.trf.xlu0  ;;  %v10312_v16 = vsel %vm15621_vm10, %v10235_v10, %v1895_v12  ;;  %v1695_v63 = vsel %vm897_vm4, 1, %v15962_v38 }
 0x137   : > { %16037 = vst [vmem:[#allocation89_spill] sm:$0xff] %v10308_v37  ;;  %16038 = vst [vmem:[#allocation90_spill] sm:$0xff] %v10312_v16  ;;  %v10314_v17 = vrot.slane %v852_v42, 7  ;;  %v10316_v21 = vrot.slane %v852_v42, 1  ;;  %v825_v53 = vrot.slane %v372_v49, 4  ;;  %v10318_v59 = vpop.permute.xlu1 %953  ;;  %vm15370_vm12 = vcmp.eq.s32.totalorder %v10194_v13, 1 }
 0x138   : > { %16040 = vst [vmem:[#allocation92_spill] sm:$0xff] %v10318_v59  ;;  %1740 = vperm.xlu1 %9168, %v1693_v5   ;;  %4053 = vperm.xlu0 %9167, %v4016_v9   ;;  %v4018_v58 = vsel %vm3990_vm3, 1, %v15962_v38  ;;  %v1697_v47 = vsel %vm899_vm5, 1, %v15962_v38  ;;  %v4299_v49 = vsel %vm3960_vm2, 1, %v15962_v38  ;;  %v697_v5 = vsel %vm15370_vm12, %v10215_v34, %v370_v33  ;;  %v9187_v16 = vld [vmem:[%s15193_s1 + $0x80] sm:$0xff] }
 0x139   : > { %16039 = vst [vmem:[#allocation91_spill] sm:$0xff] %v10316_v21  ;;  %vm15364_vm4 = vcmp.eq.s32.totalorder %v10280_v23, 1  ;;  %v826_v9 = vsel %vm15398_vm1, %v823_v43, %v825_v53  ;;  %vm15416_vm3 = vcmp.eq.s32.totalorder %v10318_v59, 1  ;;  %v10348_v54 = vsel %vm15493_vm8, %v1154_v51, %v10314_v17  ;;  %v10370_v53 = vld [vmem:[%s15193_s1 + $0x68] sm:$0xff] }
 0x13a   : > { %v10343_v25 = vsel %vm15364_vm4, %v826_v9, %v697_v5  ;;  %v10352_v10 = vsel %vm15621_vm10, %v1895_v12, %v10316_v21  ;;  %v10359_v33 = vsel %vm15493_vm8, %v9700_v3, %v10334_v45  ;;  %vm901_vm2 = vcmp.lt.s32.totalorder %v10370_v53, 15 }
 0x13b   : > { %16041 = vst [vmem:[#allocation93_spill] sm:$0xff] %v10352_v10  ;;  %v10354_v13 = vpop.permute.xlu1 %956  ;;  %v10362_v34 = vpack.c.bf16 %v10343_v25, %v852_v42  ;;  %v10365_v43 = vpack.c.bf16 %v852_v42, %v10343_v25  ;;  %v1109_v5 = vsel %vm15493_vm8, %v10308_v37, %v9737_v41  ;;  %v10379_v9 = vsel %vm15621_vm10, %v10316_v21, %v1895_v12  ;;  %v10544_v10 = vld [vmem:[%s15193_s1 + $0xc8] sm:$0xff] }
 0x13c   : > { %16042 = vst [vmem:[#allocation94_spill] sm:$0xff] %v10354_v13  ;;  %vm15399_vm5 = vcmp.eq.s32.totalorder %v10354_v13, 1  ;;  %1746 = vperm.xlu1 %9168, %v1695_v63   ;;  %4059 = vperm.xlu0 %9167, %v4018_v58   ;;  %16045 = vst [vmem:[#allocation97_spill] sm:$0xff] %v10379_v9  ;;  %v10383_v42 = vsel %vm15493_vm8, %v10314_v17, %v1154_v51  ;;  %v1193_v23 = vsel %vm15416_vm3, %v10308_v37, 0.0  ;;  %v10405_v51 = vsel %vm15416_vm3, %v1109_v5, 0.0 }
 0x13d   : > { %16043 = vst [vmem:[#allocation95_spill] sm:$0xff] %v10362_v34  ;;  %16044 = vst [vmem:[#allocation96_spill] sm:$0xff] %v10365_v43  ;;  %v1194_v41 = vsel %vm15399_vm5, %v10308_v37, 0.0  ;;  %v10394_v63 = vsel %vm15399_vm5, %v9763_v6, 0.0  ;;  %v10399_v12 = vsel %vm15399_vm5, %v10359_v33, 0.0  ;;  %8108 = vmatprep.mubr.msk.bf16.mxu0 %vm1260_vm13, %v10362_v34  ;;  %v10410_v58 = vsel %vm15416_vm3, %v9717_v18, 0.0 }
 0x13e   : > { %16046 = vst [vmem:[#allocation98_spill] sm:$0xff] %v10394_v63  ;;  %16047 = vst [vmem:[#allocation99_spill] sm:$0xff] %v10399_v12  ;;  %8109 = vmatmul.mubr.msk.bf16.gmra.mrb[28].mxu0 %vm1260_vm13, %v10365_v43  ;;  %v10414_v37 = vpack.c.bf16 %v1194_v41, %v1193_v23  ;;  %vm3962_vm4 = vcmp.lt.s32.totalorder %v10271_v44, 1  ;;  %v1699_v23 = vsel %vm901_vm2, 1, %v15962_v38  ;;  %v10432_v44 = vld [vmem:[%s15193_s1 + $0x78] sm:$0xff]  ;;  %vm3970_vm3 = vcmp.lt.s32.totalorder %v9187_v16, 1 }
 0x13f   : > { %16048 = vst [vmem:[#allocation100_spill] sm:$0xff] %v10405_v51  ;;  %16049 = vst [vmem:[#allocation101_spill] sm:$0xff] %v10410_v58  ;;  %v10417_v13 = vpop.permute.xlu1 %959  ;;  %v4301_v41 = vsel %vm3962_vm4, 1, %v15962_v38  ;;  %vm903_vm12 = vcmp.lt.s32.totalorder %v10432_v44, 15  ;;  %v10485_v43 = vld [vmem:[%s15193_s1 + $0x98] sm:$0xff] }
 0x140   : > { %16050 = vst [vmem:[#allocation102_spill] sm:$0xff] %v10414_v37  ;;  %16051 = vst [vmem:[#allocation103_spill] sm:$0xff] %v10417_v13  ;;  %1752 = vperm.xlu1 %9168, %v1697_v47   ;;  %4336 = vperm.xlu0 %9167, %v4299_v49   ;;  %v9179_v47 = vld [vmem:[%s15193_s1 + $0x50] sm:$0xff]  ;;  %vm15693_vm15 = vcmp.eq.s32.totalorder %v10417_v13, 1  ;;  %v1701_v9 = vsel %vm903_vm12, 1, %v15962_v38  ;;  %vm907_vm4 = vcmp.lt.s32.totalorder %v10485_v43, 15 }
 0x141   : > { %8114 = vmatprep.mubr.msk.bf16.mxu0 %vm1260_vm13, %v10414_v37  ;;  %vm3992_vm0 = vcmp.ge.s32.totalorder %v9179_v47, 15  ;;  %v1195_v59 = vsel %vm15693_vm15, %v1109_v5, 0.0  ;;  %v10449_v37 = vsel %vm15693_vm15, %v9717_v18, 0.0  ;;  %v10464_v5 = vld [vmem:[%s15193_s1 + $0x88] sm:$0xff]  ;;  %vm3964_vm9 = vcmp.lt.s32.totalorder %v9179_v47, 1  ;;  %16065 = vst [vmem:[#allocation117_spill] sm:$0xff] %v10544_v10 }
 0x142   : > { %v4020_v34 = vsel %vm3992_vm0, 1, %v15962_v38  ;;  %16053 = vst [vmem:[#allocation105_spill] sm:$0xff] %v10449_v37  ;;  %vm905_vm12 = vcmp.lt.s32.totalorder %v10464_v5, 15 }
 0x143   : > { %v10439_v49 = vpop.permute.xlu1 %962  ;;  %v1703_v12 = vsel %vm905_vm12, 1, %v15962_v38 }
 0x144   : > { %16052 = vst [vmem:[#allocation104_spill] sm:$0xff] %v10439_v49  ;;  %vm15692_vm2 = vcmp.eq.s32.totalorder %v10439_v49, 1  ;;  %1758 = vperm.xlu1 %9168, %v1699_v23   ;;  %4342 = vperm.xlu0 %9167, %v4301_v41  }
 0x145   : > { %v1196_v58 = vsel %vm15692_vm2, %v9763_v6, 0.0  ;;  %v10457_v23 = vsel %vm15692_vm2, %v10359_v33, 0.0  ;;  %v9181_v6 = vld [vmem:[%s15193_s1 + $0x60] sm:$0xff] }
 0x146   : > { %16054 = vst [vmem:[#allocation106_spill] sm:$0xff] %v10457_v23  ;;  %v1226_v41 = vpack.c.bf16 %v1196_v58, %v1195_v59  ;;  %vm3994_vm0 = vcmp.ge.s32.totalorder %v9181_v6, 15  ;;  %v2035_v59 = vsel %vm1309_vm14, %v9831_v11, 0  ;;  %v10477_v58 = vld [vmem:[%s15194_s2 + $0x6] sm:$0x3]  ;;  %v9185_v23 = vld [vmem:[%s15193_s1 + $0x70] sm:$0xff] }
 0x147   : > { %v10470_v13 = vpop.permute.xlu1 %968  ;;  %16056 = vst [vmem:[#allocation108_spill] sm:$0xff] %v10477_v58  ;;  %v4022_v49 = vsel %vm3994_vm0, 1, %v15962_v38  ;;  %vm3966_vm0 = vcmp.lt.s32.totalorder %v9181_v6, 1 }
 0x148   : > { %16055 = vst [vmem:[#allocation107_spill] sm:$0xff] %v10470_v13  ;;  %1764 = vperm.xlu1 %9168, %v1701_v9   ;;  %4065 = vperm.xlu0 %9167, %v4020_v34   ;;  %v1705_v34 = vsel %vm907_vm4, 1, %v15962_v38  ;;  %v4303_v9 = vsel %vm3964_vm9, 1, %v15962_v38  ;;  %vm3996_vm4 = vcmp.ge.s32.totalorder %v9185_v23, 15 }
 0x149   : > { %8115 = vmatmul.mubr.msk.bf16.vlgmr.msra.gmra.mrb[0].mxu0 %vm1260_vm13, %v1226_v41  ;;  %v10497_v41 = vld [vmem:[%s15193_s1 + $0xa8] sm:$0xff]  ;;  %v4024_v51 = vsel %vm3996_vm4, 1, %v15962_v38  ;;  %vm15671_vm4 = vcmp.eq.s32.totalorder %v10470_v13, 1 }
 0x14a   : > { %8147 = vmatpush3.bf16.msra.mxu0 %v2035_v59  ;;  %vm909_vm12 = vcmp.lt.s32.totalorder %v10497_v41, 15 }
 0x14b   : > { %v10488_v11 = vpop.permute.xlu1 %971  ;;  %9141 = vmatprep.subr.msk.bf16.mxu0 %vm1309_vm14, %v10477_v58  ;;  %v1198_v58 = vsel %vm15671_vm4, %v10359_v33, 0.0 }
 0x14c   : > { %16057 = vst [vmem:[#allocation109_spill] sm:$0xff] %v10488_v11  ;;  %1770 = vperm.xlu1 %9168, %v1703_v12   ;;  %4071 = vperm.xlu0 %9167, %v4022_v49   ;;  %vm15486_vm6 = vcmp.eq.s32.totalorder %v10488_v11, 1  ;;  %v1707_v12 = vsel %vm909_vm12, 1, %v15962_v38  ;;  %v4305_v49 = vsel %vm3966_vm0, 1, %v15962_v38  ;;  %vm913_vm12 = vcmp.lt.s32.totalorder %v10544_v10, 15 }
 0x14d   : > { %v10509_v59 = vsel %vm15486_vm6, %v9721_v22, 0.0  ;;  %v10519_v37 = vsel %vm15486_vm6, %v9805_v2, 0.0  ;;  %vm3998_vm0 = vcmp.ge.s32.totalorder %v9187_v16, 15  ;;  %v1199_v33 = vsel %vm15486_vm6, %v10334_v45, 0.0 }
 0x14e   : > { %16059 = vst [vmem:[#allocation111_spill] sm:$0xff] %v10509_v59  ;;  %16061 = vst [vmem:[#allocation113_spill] sm:$0xff] %v10519_v37  ;;  %v4026_v37 = vsel %vm3998_vm0, 1, %v15962_v38  ;;  %vm917_vm0 = vcmp.lt.s32.totalorder %v10060_v57, 15  ;;  %vm4003_vm6 = vcmp.ge.s32.totalorder %v10497_v41, 15 }
 0x14f   : > { %v10501_v47 = vpop.permute.xlu1 %974 }
 0x150   : > { %16058 = vst [vmem:[#allocation110_spill] sm:$0xff] %v10501_v47  ;;  %vm15429_vm11 = vcmp.eq.s32.totalorder %v10501_v47, 1  ;;  %1776 = vperm.xlu1 %9168, %v1705_v34   ;;  %4348 = vperm.xlu0 %9167, %v4303_v9   ;;  %v10529_v9 = vld [vmem:[%s15193_s1 + $0xb8] sm:$0xff] }
 0x151   : > { %v10514_v6 = vsel %vm15429_vm11, %v9767_v8, 0.0  ;;  %v10524_v34 = vsel %vm15429_vm11, %v9840_v31, 0.0  ;;  %16063 = vst [vmem:[#allocation115_spill] sm:$0xff] %v10529_v9  ;;  %vm911_vm9 = vcmp.lt.s32.totalorder %v10529_v9, 15 }
 0x152   : > { %16060 = vst [vmem:[#allocation112_spill] sm:$0xff] %v10514_v6  ;;  %16062 = vst [vmem:[#allocation114_spill] sm:$0xff] %v10524_v34  ;;  %v1709_v63 = vsel %vm911_vm9, 1, %v15962_v38  ;;  %v10560_v34 = vld [vmem:[%s15193_s1 + $0xd8] sm:$0xff]  ;;  %vm3968_vm9 = vcmp.lt.s32.totalorder %v9185_v23, 1  ;;  %v1715_v23 = vsel %vm917_vm0, 1, %v15962_v38 }
 0x153   : > { %v10539_v21 = vpop.permute.xlu1 %977  ;;  %vm915_vm1 = vcmp.lt.s32.totalorder %v10560_v34, 15 }
 0x154   : > { %16064 = vst [vmem:[#allocation116_spill] sm:$0xff] %v10539_v21  ;;  %1782 = vperm.xlu1 %9168, %v1707_v12   ;;  %4354 = vperm.xlu0 %9167, %v4305_v49   ;;  %vm15418_vm7 = vcmp.eq.s32.totalorder %v10539_v21, 1  ;;  %v1711_v49 = vsel %vm913_vm12, 1, %v15962_v38  ;;  %v1713_v21 = vsel %vm915_vm1, 1, %v15962_v38 }
 0x155   : > { %v1201_v59 = vsel %vm15418_vm7, %v9721_v22, 0.0  ;;  %v10570_v6 = vsel %vm15418_vm7, %v9805_v2, 0.0 }
 0x157   : > { %v10553_v12 = vpop.permute.xlu1 %980 }
 0x158   : > { %16066 = vst [vmem:[#allocation118_spill] sm:$0xff] %v10553_v12  ;;  %vm15417_vm5 = vcmp.eq.s32.totalorder %v10553_v12, 1  ;;  %1788 = vperm.xlu1 %9168, %v1709_v63   ;;  %4077 = vperm.xlu0 %9167, %v4024_v51   ;;  %v10583_v63 = vsel %vm15418_vm7, %v9870_v55, 0.0  ;;  %v10605_v12 = vsel %vm15493_vm8, %v10334_v45, %v9700_v3 }
 0x159   : > { %v1202_v7 = vsel %vm15417_vm5, %v9767_v8, 0.0  ;;  %v10578_v10 = vsel %vm15417_vm5, %v9840_v31, 0.0  ;;  %16067 = vst [vmem:[#allocation119_spill] sm:$0xff] %v10583_v63  ;;  %v10588_v51 = vsel %vm15417_vm5, %v9896_v62, 0.0  ;;  %v1200_v3 = vsel %vm15429_vm11, %v10605_v12, 0.0  ;;  %v16133_v63 = vld [vmem:[#allocation115_spill] sm:$0xff] }
 0x15a   : > { %16068 = vst [vmem:[#allocation120_spill] sm:$0xff] %v10588_v51  ;;  %v1229_v39 = vpack.c.bf16 %v1202_v7, %v1201_v59  ;;  %v4307_v7 = vsel %vm3968_vm9, 1, %v15962_v38  ;;  %vm919_vm5 = vcmp.lt.s32.totalorder %v10083_v0, 15  ;;  %vm3959_vm11 = vcmp.lt.s32.totalorder %v10191_v4, 1  ;;  %v16143_v51 = vld [vmem:[#allocation53_spill] sm:$0xff] }
 0x15b   : > { %v10595_v15 = vpop.permute.xlu1 %983  ;;  %v10597_v52 = vpop.permute.xlu0 %965 }
 0x15c   : > { %16069 = vst [vmem:[#allocation121_spill] sm:$0xff] %v10595_v15  ;;  %16070 = vst [vmem:[#allocation122_spill] sm:$0xff] %v10597_v52  ;;  %vm15673_vm12 = vcmp.eq.s32.totalorder %v10597_v52, 1  ;;  %1794 = vperm.xlu1 %9168, %v1711_v49   ;;  %4083 = vperm.xlu0 %9167, %v4026_v37   ;;  %vm15420_vm1 = vcmp.eq.s32.totalorder %v10595_v15, 1 }
 0x15d   : > { %v1197_v59 = vsel %vm15673_vm12, %v9717_v18, 0.0  ;;  %v10624_v57 = vsel %vm15673_vm12, %v9721_v22, 0.0  ;;  %v10629_v18 = vsel %vm15671_vm4, %v9767_v8, 0.0  ;;  %v1228_v22 = vpack.c.bf16 %v1200_v3, %v1199_v33  ;;  %v9189_v8 = vld [vmem:[%s15193_s1 + $0x90] sm:$0xff] }
 0x15e   : > { %v1227_v37 = vpack.c.bf16 %v1198_v58, %v1197_v59  ;;  %16071 = vst [vmem:[#allocation123_spill] sm:$0xff] %v10624_v57  ;;  %16072 = vst [vmem:[#allocation124_spill] sm:$0xff] %v10629_v18  ;;  %v4309_v58 = vsel %vm3970_vm3, 1, %v15962_v38  ;;  %vm4000_vm7 = vcmp.ge.s32.totalorder %v9189_v8, 15  ;;  %v1203_v59 = vsel %vm15420_vm1, %v9805_v2, 0.0  ;;  %v9190_v2 = vld [vmem:[%s15193_s1 + $0x18] sm:$0xff] }
 0x15f   : > { %v10631_v16 = vpop.permute.xlu1 %986  ;;  %vm3985_vm3 = vcmp.ge.s32.totalorder %v9190_v2, 15 }
 0x160   : > { %16073 = vst [vmem:[#allocation125_spill] sm:$0xff] %v10631_v16  ;;  %vm15419_vm9 = vcmp.eq.s32.totalorder %v10631_v16, 1  ;;  %1800 = vperm.xlu1 %9168, %v1713_v21   ;;  %4360 = vperm.xlu0 %9167, %v4307_v7   ;;  %v10655_v21 = vsel %vm15420_vm1, %v9870_v55, 0.0  ;;  %v4013_v0 = vsel %vm3985_vm3, 1, %v15962_v38  ;;  %vm3987_vm3 = vcmp.ge.s32.totalorder %v10191_v4, 15 }
 0x161   : > { %8118 = vmatprep.mubr.msk.bf16.mxu0 %vm1260_vm13, %v1227_v37  ;;  %v1204_v49 = vsel %vm15419_vm9, %v9840_v31, 0.0  ;;  %v10660_v7 = vsel %vm15419_vm9, %v9896_v62, 0.0  ;;  %v10668_v31 = vsel %vm15420_vm1, %v9923_v20, 0.0  ;;  %v10673_v37 = vsel %vm15419_vm9, %v9944_v27, 0.0 }
 0x162   : > { %8119 = vmatmul.mubr.msk.bf16.gmra.mrb[4].mxu0 %vm1260_vm13, %v1228_v22  ;;  %v1230_v3 = vpack.c.bf16 %v1204_v49, %v1203_v59  ;;  %16074 = vst [vmem:[#allocation126_spill] sm:$0xff] %v10668_v31  ;;  %16075 = vst [vmem:[#allocation127_spill] sm:$0xff] %v10673_v37  ;;  %v1717_v22 = vsel %vm919_vm5, 1, %v15962_v38  ;;  %v4028_v59 = vsel %vm4000_vm7, 1, %v15962_v38  ;;  %vm3957_vm7 = vcmp.lt.s32.totalorder %v9190_v2, 1  ;;  %v9192_v2 = vld [vmem:[%s15193_s1 + $0xb0] sm:$0xff] }
 0x163   : > { %8122 = vmatprep.mubr.msk.bf16.mxu0 %vm1260_vm13, %v1229_v39  ;;  %v10676_v33 = vpop.permute.xlu1 %989  ;;  %v9191_v39 = vld [vmem:[%s15193_s1 + $0xa0] sm:$0xff]  ;;  %vm3972_vm5 = vcmp.lt.s32.totalorder %v9189_v8, 1 }
 0x164   : > { %16076 = vst [vmem:[#allocation128_spill] sm:$0xff] %v10676_v33  ;;  %1806 = vperm.xlu1 %9168, %v1715_v23   ;;  %4366 = vperm.xlu0 %9167, %v4309_v58   ;;  %vm4002_vm0 = vcmp.ge.s32.totalorder %v9191_v39, 15  ;;  %vm15428_vm9 = vcmp.eq.s32.totalorder %v10676_v33, 1 }
 0x165   : > { %v4030_v58 = vsel %vm4002_vm0, 1, %v15962_v38  ;;  %v1205_v49 = vsel %vm15428_vm9, %v9870_v55, 0.0  ;;  %v10706_v16 = vsel %vm15428_vm9, %v9923_v20, 0.0  ;;  %v10717_v55 = vsel %vm15428_vm9, %v9969_v14, 0.0 }
 0x166   : > { %16078 = vst [vmem:[#allocation130_spill] sm:$0xff] %v10717_v55  ;;  %vm3974_vm0 = vcmp.lt.s32.totalorder %v9191_v39, 1 }
 0x167   : > { %v10692_v23 = vpop.permute.xlu1 %992 }
 0x168   : > { %16077 = vst [vmem:[#allocation129_spill] sm:$0xff] %v10692_v23  ;;  %vm15425_vm1 = vcmp.eq.s32.totalorder %v10692_v23, 1  ;;  %1812 = vperm.xlu1 %9168, %v1717_v22   ;;  %4089 = vperm.xlu0 %9167, %v4028_v59   ;;  %v4311_v23 = vsel %vm3972_vm5, 1, %v15962_v38  ;;  %vm3989_vm5 = vcmp.ge.s32.totalorder %v10202_v56, 15 }
 0x169   : > { %v1206_v9 = vsel %vm15425_vm1, %v9896_v62, 0.0  ;;  %v10712_v59 = vsel %vm15425_vm1, %v9944_v27, 0.0  ;;  %v10722_v62 = vsel %vm15425_vm1, %v9990_v1, 0.0 }
 0x16a   : > { %8123 = vmatmul.mubr.msk.bf16.gmra.mrb[8].mxu0 %vm1260_vm13, %v1230_v3  ;;  %v1231_v22 = vpack.c.bf16 %v1206_v9, %v1205_v49  ;;  %16079 = vst [vmem:[#allocation131_spill] sm:$0xff] %v10722_v62  ;;  %v4296_v49 = vsel %vm3957_vm7, 1, %v15962_v38  ;;  %v4015_v9 = vsel %vm3987_vm3, 1, %v15962_v38  ;;  %vm4004_vm7 = vcmp.ge.s32.totalorder %v9192_v2, 15  ;;  %v9193_v3 = vld [vmem:[%s15193_s1 + $0xc0] sm:$0xff] }
 0x16b   : > { %v10724_v8 = vpop.permute.xlu1 %995  ;;  %vm4006_vm3 = vcmp.ge.s32.totalorder %v9193_v3, 15 }
 0x16c   : > { %16080 = vst [vmem:[#allocation132_spill] sm:$0xff] %v10724_v8  ;;  %4044 = vperm.xlu1 %9168, %v4013_v0   ;;  %4095 = vperm.xlu0 %9167, %v4030_v58   ;;  %vm15446_vm1 = vcmp.eq.s32.totalorder %v10724_v8, 1  ;;  %v4313_v0 = vsel %vm3974_vm0, 1, %v15962_v38  ;;  %v4034_v4 = vsel %vm4006_vm3, 1, %v15962_v38  ;;  %vm3978_vm3 = vcmp.lt.s32.totalorder %v9193_v3, 1 }
 0x16d   : > { %8126 = vmatprep.mubr.msk.bf16.mxu0 %vm1260_vm13, %v1231_v22  ;;  %v1207_v39 = vsel %vm15446_vm1, %v9923_v20, 0.0  ;;  %v10766_v20 = vsel %vm15446_vm1, %v10015_v48, 0.0 }
 0x16e   : > { %16082 = vst [vmem:[#allocation134_spill] sm:$0xff] %v10766_v20 }
 0x16f   : > { %v10736_v33 = vpop.permute.xlu1 %998 }
 0x170   : > { %16081 = vst [vmem:[#allocation133_spill] sm:$0xff] %v10736_v33  ;;  %vm15434_vm9 = vcmp.eq.s32.totalorder %v10736_v33, 1  ;;  %4327 = vperm.xlu1 %9168, %v4296_v49   ;;  %4372 = vperm.xlu0 %9167, %v4311_v23   ;;  %v10754_v23 = vsel %vm15446_vm1, %v9969_v14, 0.0  ;;  %vm3963_vm1 = vcmp.lt.s32.totalorder %v10250_v29, 1 }
 0x171   : > { %v1208_v58 = vsel %vm15434_vm9, %v9944_v27, 0.0  ;;  %v10759_v22 = vsel %vm15434_vm9, %v9990_v1, 0.0  ;;  %v10771_v27 = vsel %vm15434_vm9, %v10036_v40, 0.0 }
 0x172   : > { %v1232_v49 = vpack.c.bf16 %v1208_v58, %v1207_v39  ;;  %16083 = vst [vmem:[#allocation135_spill] sm:$0xff] %v10771_v27  ;;  %v4298_v39 = vsel %vm3959_vm11, 1, %v15962_v38  ;;  %v4032_v58 = vsel %vm4004_vm7, 1, %v15962_v38  ;;  %vm3991_vm11 = vcmp.ge.s32.totalorder %v10250_v29, 15 }
 0x173   : > { %v10773_v15 = vpop.permute.xlu1 %1001  ;;  %vm3976_vm7 = vcmp.lt.s32.totalorder %v9192_v2, 1  ;;  %v9194_v2 = vld [vmem:[%s15193_s1 + $0xd0] sm:$0xff] }
 0x174   : > { %16084 = vst [vmem:[#allocation136_spill] sm:$0xff] %v10773_v15  ;;  %4050 = vperm.xlu1 %9168, %v4015_v9   ;;  %4378 = vperm.xlu0 %9167, %v4313_v0   ;;  %vm15445_vm0 = vcmp.eq.s32.totalorder %v10773_v15, 1  ;;  %v4017_v0 = vsel %vm3989_vm5, 1, %v15962_v38  ;;  %vm3961_vm5 = vcmp.lt.s32.totalorder %v10202_v56, 1  ;;  %v4315_v8 = vsel %vm3976_vm7, 1, %v15962_v38 }
 0x175   : > { %8127 = vmatmul.mubr.msk.bf16.gmra.mrb[12].mxu0 %vm1260_vm13, %v1232_v49  ;;  %v1209_v49 = vsel %vm15445_vm0, %v9969_v14, 0.0  ;;  %v10803_v33 = vsel %vm15445_vm0, %v10015_v48, 0.0  ;;  %v10815_v14 = vsel %vm15445_vm0, %v10066_v28, 0.0  ;;  %v4317_v56 = vsel %vm3978_vm3, 1, %v15962_v38 }
 0x176   : > { %16086 = vst [vmem:[#allocation138_spill] sm:$0xff] %v10815_v14  ;;  %vm3993_vm7 = vcmp.ge.s32.totalorder %v10277_v19, 15 }
 0x177   : > { %v10788_v9 = vpop.permute.xlu1 %1004 }
 0x178   : > { %16085 = vst [vmem:[#allocation137_spill] sm:$0xff] %v10788_v9  ;;  %vm15442_vm9 = vcmp.eq.s32.totalorder %v10788_v9, 1  ;;  %4333 = vperm.xlu1 %9168, %v4298_v39   ;;  %4101 = vperm.xlu0 %9167, %v4032_v58  }
 0x179   : > { %v1210_v47 = vsel %vm15442_vm9, %v9990_v1, 0.0  ;;  %v10808_v39 = vsel %vm15442_vm9, %v10036_v40, 0.0  ;;  %v10820_v1 = vsel %vm15442_vm9, %v10094_v36, 0.0 }
 0x17a   : > { %v1233_v58 = vpack.c.bf16 %v1210_v47, %v1209_v49  ;;  %16087 = vst [vmem:[#allocation139_spill] sm:$0xff] %v10820_v1  ;;  %v10827_v47 = vpop.permute.xlu0 %1037  ;;  %v4019_v49 = vsel %vm3991_vm11, 1, %v15962_v38  ;;  %vm4008_vm11 = vcmp.ge.s32.totalorder %v9194_v2, 15 }
 0x17b   : > { %v10822_v11 = vpop.permute.xlu1 %1007  ;;  %16089 = vst [vmem:[#allocation141_spill] sm:$0xff] %v10827_v47  ;;  %v4036_v20 = vsel %vm4008_vm11, 1, %v15962_v38  ;;  %vm3980_vm11 = vcmp.lt.s32.totalorder %v9194_v2, 1 }
 0x17c   : > { %16088 = vst [vmem:[#allocation140_spill] sm:$0xff] %v10822_v11  ;;  %4056 = vperm.xlu1 %9168, %v4017_v0   ;;  %4107 = vperm.xlu0 %9167, %v4034_v4   ;;  %vm15481_vm9 = vcmp.eq.s32.totalorder %v10822_v11, 1  ;;  %v4300_v0 = vsel %vm3961_vm5, 1, %v15962_v38 }
 0x17d   : > { %8130 = vmatprep.mubr.msk.bf16.mxu0 %vm1260_vm13, %v1233_v58  ;;  %v1211_v3 = vsel %vm15481_vm9, %v10015_v48, 0.0  ;;  %v10866_v48 = vsel %vm15481_vm9, %v10121_v46, 0.0 }
 0x17e   : > { %16091 = vst [vmem:[#allocation143_spill] sm:$0xff] %v10866_v48  ;;  %v10873_v15 = vpop.permute.xlu0 %1043 }
 0x17f   : > { %v10836_v9 = vpop.permute.xlu1 %1010  ;;  %16093 = vst [vmem:[#allocation145_spill] sm:$0xff] %v10873_v15 }
 0x180   : > { %16090 = vst [vmem:[#allocation142_spill] sm:$0xff] %v10836_v9  ;;  %vm15452_vm0 = vcmp.eq.s32.totalorder %v10836_v9, 1  ;;  %4062 = vperm.xlu1 %9168, %v4019_v49   ;;  %4384 = vperm.xlu0 %9167, %v4315_v8   ;;  %v10854_v8 = vsel %vm15481_vm9, %v10066_v28, 0.0  ;;  %v9195_v9 = vld [vmem:[%s15193_s1 + $0xe0] sm:$0xff]  ;;  %vm15492_vm9 = vcmp.eq.s32.totalorder %v10873_v15, 1 }
 0x181   : > { %v1212_v4 = vsel %vm15452_vm0, %v10036_v40, 0.0  ;;  %v10859_v58 = vsel %vm15452_vm0, %v10094_v36, 0.0  ;;  %v10871_v40 = vsel %vm15452_vm0, %v10147_v61, 0.0  ;;  %vm4010_vm5 = vcmp.ge.s32.totalorder %v9195_v9, 15 }
 0x182   : > { %v1234_v49 = vpack.c.bf16 %v1212_v4, %v1211_v3  ;;  %16092 = vst [vmem:[#allocation144_spill] sm:$0xff] %v10871_v40  ;;  %v4302_v4 = vsel %vm3963_vm1, 1, %v15962_v38  ;;  %v4038_v29 = vsel %vm4010_vm5, 1, %v15962_v38  ;;  %vm3995_vm1 = vcmp.ge.s32.totalorder %v10370_v53, 15 }
 0x183   : > { %v10875_v14 = vpop.permute.xlu1 %1013  ;;  %vm3982_vm5 = vcmp.lt.s32.totalorder %v9195_v9, 1 }
 0x184   : > { %16094 = vst [vmem:[#allocation146_spill] sm:$0xff] %v10875_v14  ;;  %4339 = vperm.xlu1 %9168, %v4300_v0   ;;  %4390 = vperm.xlu0 %9167, %v4317_v56   ;;  %vm15462_vm3 = vcmp.eq.s32.totalorder %v10875_v14, 1  ;;  %v4021_v56 = vsel %vm3993_vm7, 1, %v15962_v38  ;;  %vm3965_vm7 = vcmp.lt.s32.totalorder %v10277_v19, 1 }
 0x185   : > { %8131 = vmatmul.mubr.msk.bf16.gmra.mrb[16].mxu0 %vm1260_vm13, %v1234_v49  ;;  %v10896_v49 = vpop.permute.xlu0 %1719  ;;  %v1213_v3 = vsel %vm15462_vm3, %v10066_v28, 0.0  ;;  %v10919_v28 = vsel %vm15462_vm3, %v10176_v50, 0.0 }
 0x186   : > { %16096 = vst [vmem:[#allocation148_spill] sm:$0xff] %v10896_v49  ;;  %16097 = vst [vmem:[#allocation149_spill] sm:$0xff] %v10919_v28 }
 0x187   : > { %v10890_v0 = vpop.permute.xlu1 %1016 }
 0x188   : > { %16095 = vst [vmem:[#allocation147_spill] sm:$0xff] %v10890_v0  ;;  %vm15459_vm0 = vcmp.eq.s32.totalorder %v10890_v0, 1  ;;  %4345 = vperm.xlu1 %9168, %v4302_v4   ;;  %4113 = vperm.xlu0 %9167, %v4036_v20   ;;  %v10907_v4 = vsel %vm15462_vm3, %v10121_v46, 0.0 }
 0x189   : > { %v1214_v11 = vsel %vm15459_vm0, %v10094_v36, 0.0  ;;  %v10912_v20 = vsel %vm15459_vm0, %v10147_v61, 0.0  ;;  %v10924_v36 = vsel %vm15459_vm0, %v10218_v60, 0.0  ;;  %v10938_v40 = vpop.permute.xlu0 %1725 }
 0x18a   : > { %v1235_v48 = vpack.c.bf16 %v1214_v11, %v1213_v3  ;;  %16098 = vst [vmem:[#allocation150_spill] sm:$0xff] %v10924_v36  ;;  %v4023_v11 = vsel %vm3995_vm1, 1, %v15962_v38  ;;  %v4319_v3 = vsel %vm3980_vm11, 1, %v15962_v38  ;;  %16100 = vst [vmem:[#allocation152_spill] sm:$0xff] %v10938_v40  ;;  %vm3967_vm1 = vcmp.lt.s32.totalorder %v10370_v53, 1 }
 0x18b   : > { %v10926_v1 = vpop.permute.xlu1 %1019  ;;  %vm3997_vm11 = vcmp.ge.s32.totalorder %v10432_v44, 15 }
 0x18c   : > { %16099 = vst [vmem:[#allocation151_spill] sm:$0xff] %v10926_v1  ;;  %4068 = vperm.xlu1 %9168, %v4021_v56   ;;  %4119 = vperm.xlu0 %9167, %v4038_v29   ;;  %vm15480_vm0 = vcmp.eq.s32.totalorder %v10926_v1, 1  ;;  %v4321_v56 = vsel %vm3982_vm5, 1, %v15962_v38 }
 0x18d   : > { %8134 = vmatprep.mubr.msk.bf16.mxu0 %vm1260_vm13, %v1235_v48  ;;  %v4304_v48 = vsel %vm3965_vm7, 1, %v15962_v38  ;;  %v1215_v19 = vsel %vm15480_vm0, %v10121_v46, 0.0  ;;  %v10955_v2 = vsel %vm15480_vm0, %v10176_v50, 0.0  ;;  %v10967_v46 = vsel %vm15480_vm0, %v10259_v32, 0.0 }
 0x18e   : > { %16102 = vst [vmem:[#allocation154_spill] sm:$0xff] %v10967_v46  ;;  %vm4001_vm0 = vcmp.ge.s32.totalorder %v10485_v43, 15 }
 0x18f   : > { %v10940_v0 = vpop.permute.xlu1 %1022 }
 0x190   : > { %16101 = vst [vmem:[#allocation153_spill] sm:$0xff] %v10940_v0  ;;  %vm15467_vm3 = vcmp.eq.s32.totalorder %v10940_v0, 1  ;;  %4074 = vperm.xlu1 %9168, %v4023_v11   ;;  %4396 = vperm.xlu0 %9167, %v4319_v3   ;;  %v4306_v3 = vsel %vm3967_vm1, 1, %v15962_v38  ;;  %vm3969_vm1 = vcmp.lt.s32.totalorder %v10432_v44, 1 }
 0x191   : > { %v1216_v9 = vsel %vm15467_vm3, %v10147_v61, 0.0  ;;  %v10960_v29 = vsel %vm15467_vm3, %v10218_v60, 0.0  ;;  %v10972_v61 = vsel %vm15467_vm3, %v10299_v24, 0.0  ;;  %vm3999_vm3 = vcmp.ge.s32.totalorder %v10464_v5, 15 }
 0x192   : > { %v1236_v11 = vpack.c.bf16 %v1216_v9, %v1215_v19  ;;  %16103 = vst [vmem:[#allocation155_spill] sm:$0xff] %v10972_v61  ;;  %v10979_v19 = vrot.slane %v10343_v25, 7  ;;  %v10981_v9 = vpop.permute.xlu0 %1731  ;;  %v4308_v46 = vsel %vm3969_vm1, 1, %v15962_v38  ;;  %vm3971_vm1 = vcmp.lt.s32.totalorder %v10464_v5, 1 }
 0x193   : > { %v10974_v27 = vpop.permute.xlu1 %1025  ;;  %16105 = vst [vmem:[#allocation157_spill] sm:$0xff] %v10981_v9 }
 0x194   : > { %16104 = vst [vmem:[#allocation156_spill] sm:$0xff] %v10974_v27  ;;  %4351 = vperm.xlu1 %9168, %v4304_v48   ;;  %4402 = vperm.xlu0 %9167, %v4321_v56   ;;  %vm15479_vm7 = vcmp.eq.s32.totalorder %v10974_v27, 1  ;;  %v4025_v48 = vsel %vm3997_vm11, 1, %v15962_v38  ;;  %v1159_v56 = vsel %vm15493_vm8, %v10314_v17, %v10979_v19 }
 0x195   : > { %8135 = vmatmul.mubr.msk.bf16.gmra.mrb[20].mxu0 %vm1260_vm13, %v1236_v11  ;;  %v1217_v53 = vsel %vm15479_vm7, %v10176_v50, 0.0  ;;  %v11018_v50 = vsel %vm15479_vm7, %v10348_v54, 0.0 }
 0x196   : > { %16107 = vst [vmem:[#allocation159_spill] sm:$0xff] %v11018_v50  ;;  %v11024_v61 = vpop.permute.xlu0 %1737 }
 0x197   : > { %v10989_v0 = vpop.permute.xlu1 %1028  ;;  %16109 = vst [vmem:[#allocation161_spill] sm:$0xff] %v11024_v61 }
 0x198   : > { %16106 = vst [vmem:[#allocation158_spill] sm:$0xff] %v10989_v0  ;;  %vm15474_vm5 = vcmp.eq.s32.totalorder %v10989_v0, 1  ;;  %4357 = vperm.xlu1 %9168, %v4306_v3   ;;  %v11006_v3 = vsel %vm15479_vm7, %v10259_v32, 0.0 }
 0x199   : > { %v1218_v11 = vsel %vm15474_vm5, %v10218_v60, 0.0  ;;  %v11011_v14 = vsel %vm15474_vm5, %v10299_v24, 0.0  ;;  %v11022_v60 = vsel %vm15474_vm5, %v1159_v56, 0.0 }
 0x19a   : > { %v1237_v1 = vpack.c.bf16 %v1218_v11, %v1217_v53  ;;  %16108 = vst [vmem:[#allocation160_spill] sm:$0xff] %v11022_v60  ;;  %v4027_v53 = vsel %vm3999_vm3, 1, %v15962_v38  ;;  %v11038_v0 = vpop.permute.xlu0 %1743  ;;  %vm15652_vm3 = vcmp.eq.s32.totalorder %v10827_v47, 1 }
 0x19b   : > { %v11026_v28 = vpop.permute.xlu1 %1031  ;;  %16112 = vst [vmem:[#allocation164_spill] sm:$0xff] %v11038_v0  ;;  %v1221_v5 = vsel %vm15652_vm3, %v10348_v54, 0.0 }
 0x19c   : > { %16110 = vst [vmem:[#allocation162_spill] sm:$0xff] %v11026_v28  ;;  %4080 = vperm.xlu1 %9168, %v4025_v48   ;;  %8138 = vmatprep.mubr.msk.bf16.mxu0 %vm1260_vm13, %v1237_v1  ;;  %vm15511_vm11 = vcmp.eq.s32.totalorder %v11026_v28, 1 }
 0x19d   : > { %v1219_v48 = vsel %vm15511_vm11, %v10259_v32, 0.0  ;;  %v11049_v44 = vsel %vm15511_vm11, %v10348_v54, 0.0  ;;  %v16116_v32 = vmov 0.0  }
 0x19e   : > { %v11082_v28 = vrot.slane %v16116_v32, 1  ;;  %v1223_v32 = vsel %vm15492_vm9, %v10979_v19, 0.0 }
 0x19f   : > { %v11034_v11 = vpop.permute.xlu1 %1034 }
 0x1a0   : > { %16111 = vst [vmem:[#allocation163_spill] sm:$0xff] %v11034_v11  ;;  %vm15532_vm5 = vcmp.eq.s32.totalorder %v11034_v11, 1  ;;  %4086 = vperm.xlu1 %9168, %v4027_v53   ;;  %16117 = vst [vmem:[#allocation168_spill] sm:$0xff] %v11082_v28  ;;  %v11084_v11 = vpop.permute.xlu0 %1749 }
 0x1a1   : > { %v1220_v1 = vsel %vm15532_vm5, %v10299_v24, 0.0  ;;  %v11053_v53 = vsel %vm15532_vm5, %v1159_v56, 0.0  ;;  %v4310_v24 = vsel %vm3971_vm1, 1, %v15962_v38  ;;  %16118 = vst [vmem:[#allocation169_spill] sm:$0xff] %v11084_v11 }
 0x1a2   : > { %v1238_v36 = vpack.c.bf16 %v1220_v1, %v1219_v48 }
 0x1a3   : > { %v11059_v27 = vpop.permute.xlu1 %1040 }
 0x1a4   : > { %16113 = vst [vmem:[#allocation165_spill] sm:$0xff] %v11059_v27  ;;  %vm15651_vm7 = vcmp.eq.s32.totalorder %v11059_v27, 1  ;;  %4363 = vperm.xlu1 %9168, %v4308_v46   ;;  %8139 = vmatmul.mubr.msk.bf16.gmra.mrb[24].mxu0 %vm1260_vm13, %v1238_v36  ;;  %v11074_v46 = vsel %vm15652_vm3, %v10383_v42, 0.0 }
 0x1a5   : > { %v1222_v48 = vsel %vm15651_vm7, %v1159_v56, 0.0  ;;  %16114 = vst [vmem:[#allocation166_spill] sm:$0xff] %v11074_v46  ;;  %v11079_v36 = vsel %vm15651_vm7, %v10303_v26, 0.0  ;;  %v4029_v56 = vsel %vm4001_vm0, 1, %v15962_v38  ;;  %vm15500_vm0 = vcmp.eq.s32.totalorder %v10896_v49, 1  ;;  %v16124_v46 = vld [vmem:[#allocation41_spill] sm:$0xff] }
 0x1a6   : > { %v1239_v1 = vpack.c.bf16 %v1222_v48, %v1221_v5  ;;  %16115 = vst [vmem:[#allocation167_spill] sm:$0xff] %v11079_v36  ;;  %v11095_v48 = vsel %vm15493_vm8, %v10979_v19, %v10314_v17  ;;  %v11119_v36 = vrot.slane %v9745_v35, 1  ;;  %vm3973_vm8 = vcmp.lt.s32.totalorder %v10485_v43, 1  ;;  %v16122_v35 = vld [vmem:[#allocation46_spill] sm:$0xff]  ;;  %v16125_v49 = vld [vmem:[#allocation40_spill] sm:$0xff] }
 0x1a7   : > { %v11086_v54 = vpop.permute.xlu1 %1046 }
 0x1a8   : > { %16119 = vst [vmem:[#allocation170_spill] sm:$0xff] %v11086_v54  ;;  %vm15494_vm1 = vcmp.eq.s32.totalorder %v11086_v54, 1  ;;  %4369 = vperm.xlu1 %9168, %v4310_v24   ;;  %8142 = vmatprep.mubr.msk.bf16.mxu0 %vm1260_vm13, %v1239_v1  ;;  %v11114_v24 = vsel %vm15492_vm9, %v10383_v42, 0.0  ;;  %v1850_v54 = vsel %vm15621_vm10, %v11082_v28, %v9739_v30  ;;  %v4031_v42 = vsel %vm4003_vm6, 1, %v15962_v38  ;;  %v11141_v30 = vpop.permute.xlu0 %1755 }
 0x1a9   : > { %v1224_v5 = vsel %vm15494_vm1, %v11095_v48, 0.0  ;;  %v11109_v17 = vsel %vm15494_vm1, %v10303_v26, 0.0  ;;  %v11129_v26 = vsel %vm15500_vm0, %v11082_v28, 0.0  ;;  %vm15650_vm1 = vcmp.eq.s32.totalorder %v10938_v40, 1  ;;  %16123 = vst [vmem:[#allocation46_spill] sm:$0xff] %v11141_v30  ;;  %v16141_v40 = vld [vmem:[#allocation117_spill] sm:$0xff] }
 0x1aa   : > { %v1240_v1 = vpack.c.bf16 %v1224_v5, %v1223_v32  ;;  %16121 = vst [vmem:[#allocation172_spill] sm:$0xff] %v11129_v26  ;;  %v11138_v5 = vsel %vm15500_vm0, %v16122_v35, 0.0  ;;  %v1858_v15 = vsel %vm15621_vm10, %v11119_v36, %v16125_v49  ;;  %vm3975_vm0 = vcmp.lt.s32.totalorder %v10497_v41, 1  ;;  %v16130_v41 = vld [vmem:[#allocation108_spill] sm:$0xff] }
 0x1ab   : > { %v11121_v50 = vpop.permute.xlu1 %1722  ;;  %v11167_v43 = vsel %vm15650_vm1, %v1858_v15, 0.0  ;;  %v2333_v55 = vsel %vm1309_vm14, %v16130_v41, 0  ;;  %v11185_v62 = vsel %vm15621_vm10, %v16125_v49, %v11119_v36  ;;  %v4314_v37 = vsel %vm3975_vm0, 1, %v15962_v38  ;;  %v16135_v41 = vld [vmem:[#allocation48_spill] sm:$0xff] }
 0x1ac   : > { %16120 = vst [vmem:[#allocation171_spill] sm:$0xff] %v11121_v50  ;;  %vm15501_vm9 = vcmp.eq.s32.totalorder %v11121_v50, 1  ;;  %4092 = vperm.xlu1 %9168, %v4029_v56   ;;  %8143 = vmatmul.mubr.msk.bf16.gmra.mrb[28].mxu0 %vm1260_vm13, %v1240_v1  ;;  %16127 = vst [vmem:[#allocation40_spill] sm:$0xff] %v11167_v43  ;;  %v11187_v31 = vpop.permute.xlu0 %1761  ;;  %vm15531_vm0 = vcmp.eq.s32.totalorder %v11024_v61, 1  ;;  %v16138_v43 = vld [vmem:[#allocation49_spill] sm:$0xff] }
 0x1ad   : > { %v1937_v32 = vsel %vm15501_vm9, %v1850_v54, 0.0  ;;  %v11148_v56 = vsel %vm15501_vm9, %v16124_v46, 0.0  ;;  %v1938_v54 = vsel %vm15650_vm1, %v16122_v35, 0.0  ;;  %vm15521_vm9 = vcmp.eq.s32.totalorder %v10981_v9, 1  ;;  %v16128_v35 = vld [vmem:[#allocation42_spill] sm:$0xff]  ;;  %16131 = vst [vmem:[#allocation108_spill] sm:$0xff] %v11187_v31 }
 0x1ae   : > { %v1968_v1 = vpack.c.bf16 %v1937_v32, %v11129_v26  ;;  %v4312_v32 = vsel %vm3973_vm8, 1, %v15962_v38  ;;  %vm4005_vm8 = vcmp.ge.s32.totalorder %v16133_v63, 15  ;;  %v1940_v49 = vsel %vm15521_vm9, %v11185_v62, 0.0 }
 0x1af   : > { %v11156_v60 = vpop.permute.xlu1 %1728  ;;  %v11210_v50 = vsel %vm15521_vm9, %v16135_v41, 0.0  ;;  %v4033_v18 = vsel %vm4005_vm8, 1, %v15962_v38  ;;  %vm15541_vm8 = vcmp.eq.s32.totalorder %v11038_v0, 1 }
 0x1b0   : > { %16126 = vst [vmem:[#allocation41_spill] sm:$0xff] %v11156_v60  ;;  %vm15649_vm6 = vcmp.eq.s32.totalorder %v11156_v60, 1  ;;  %4098 = vperm.xlu1 %9168, %v4031_v42   ;;  %8148 = vmatprep.mubr.msk.bf16.mxu0 %vm1260_vm13, %v1968_v1  ;;  %16136 = vst [vmem:[#allocation48_spill] sm:$0xff] %v11210_v50 }
 0x1b1   : > { %v1939_v26 = vsel %vm15649_vm6, %v16124_v46, 0.0  ;;  %v11176_v42 = vsel %vm15649_vm6, %v16128_v35, 0.0 }
 0x1b2   : > { %16129 = vst [vmem:[#allocation42_spill] sm:$0xff] %v11176_v42  ;;  %v1969_v1 = vpack.c.bf16 %v1939_v26, %v1938_v54  ;;  %v11196_v26 = vld [vmem:[%s15194_s2 + $0x8] sm:$0x3]  ;;  %v11205_v54 = vsel %vm15521_vm9, %v1858_v15, 0.0  ;;  %vm4007_vm9 = vcmp.ge.s32.totalorder %v16141_v40, 15 }
 0x1b3   : > { %v11189_v46 = vpop.permute.xlu1 %1734  ;;  %16134 = vst [vmem:[#allocation115_spill] sm:$0xff] %v11205_v54  ;;  %v16150_v54 = vld [vmem:[#allocation59_spill] sm:$0xff] }
 0x1b4   : > { %16132 = vst [vmem:[#allocation173_spill] sm:$0xff] %v11189_v46  ;;  %vm15522_vm11 = vcmp.eq.s32.totalorder %v11189_v46, 1  ;;  %4375 = vperm.xlu1 %9168, %v4312_v32   ;;  %8149 = vmatmul.mubr.msk.bf16.vlgmr.msra.gmra.mrb[0].mxu0 %vm1260_vm13, %v1969_v1  ;;  %v11253_v46 = vpop.permute.xlu0 %1767 }
 0x1b5   : > { %8181 = vmatpush3.bf16.msra.mxu0 %v2333_v55  ;;  %v1941_v32 = vsel %vm15522_vm11, %v11119_v36, 0.0  ;;  %v11219_v1 = vsel %vm15522_vm11, %v16128_v35, 0.0  ;;  %v11224_v42 = vsel %vm15522_vm11, %v16138_v43, 0.0  ;;  %v11250_v55 = vsel %vm15531_vm0, %v16143_v51, 0.0  ;;  %16145 = vst [vmem:[#allocation176_spill] sm:$0xff] %v11253_v46 }
 0x1b6   : > { %16137 = vst [vmem:[#allocation174_spill] sm:$0xff] %v11219_v1  ;;  %16139 = vst [vmem:[#allocation49_spill] sm:$0xff] %v11224_v42  ;;  %v1970_v9 = vpack.c.bf16 %v1941_v32, %v1940_v49  ;;  %9142 = vmatprep.subr.msk.bf16.mxu0 %vm1309_vm14, %v11196_v26  ;;  %v1942_v49 = vsel %vm15531_vm0, %v1858_v15, 0.0  ;;  %v11245_v32 = vsel %vm15531_vm0, %v16135_v41, 0.0  ;;  %vm3977_vm0 = vcmp.lt.s32.totalorder %v16133_v63, 1 }
 0x1b7   : > { %v11232_v57 = vpop.permute.xlu1 %1740  ;;  %16142 = vst [vmem:[#allocation117_spill] sm:$0xff] %v11245_v32  ;;  %16144 = vst [vmem:[#allocation53_spill] sm:$0xff] %v11250_v55  ;;  %v11291_v42 = vsel %vm15541_vm8, %v16150_v54, 0.0 }
 0x1b8   : > { %16140 = vst [vmem:[#allocation175_spill] sm:$0xff] %v11232_v57  ;;  %vm15549_vm11 = vcmp.eq.s32.totalorder %v11232_v57, 1  ;;  %4381 = vperm.xlu1 %9168, %v4314_v37   ;;  %8152 = vmatprep.mubr.msk.bf16.mxu0 %vm1260_vm13, %v1970_v9  ;;  %v16147_v9 = vld [vmem:[#allocation55_spill] sm:$0xff]  ;;  %16151 = vst [vmem:[#allocation59_spill] sm:$0xff] %v11291_v42  ;;  %v11311_v32 = vpop.permute.xlu0 %1773 }
 0x1b9   : > { %v1943_v37 = vsel %vm15549_vm11, %v16128_v35, 0.0  ;;  %v11261_v15 = vsel %vm15549_vm11, %v16138_v43, 0.0  ;;  %v11266_v50 = vsel %vm15549_vm11, %v16147_v9, 0.0  ;;  %v4035_v35 = vsel %vm4007_vm9, 1, %v15962_v38  ;;  %16154 = vst [vmem:[#allocation179_spill] sm:$0xff] %v11311_v32 }
 0x1ba   : > { %16146 = vst [vmem:[#allocation177_spill] sm:$0xff] %v11261_v15  ;;  %16148 = vst [vmem:[#allocation55_spill] sm:$0xff] %v11266_v50  ;;  %v1971_v61 = vpack.c.bf16 %v1943_v37, %v1942_v49  ;;  %v1944_v49 = vsel %vm15541_vm8, %v16135_v41, 0.0  ;;  %v11286_v37 = vsel %vm15541_vm8, %v16143_v51, 0.0  ;;  %vm15548_vm9 = vcmp.eq.s32.totalorder %v11084_v11, 1  ;;  %v16152_v41 = vld [vmem:[#allocation61_spill] sm:$0xff] }
 0x1bb   : > { %v11272_v1 = vpop.permute.xlu1 %1746  ;;  %v4316_v15 = vsel %vm3977_vm0, 1, %v15962_v38  ;;  %vm3979_vm8 = vcmp.lt.s32.totalorder %v16141_v40, 1  ;;  %v16157_v50 = vld [vmem:[#allocation64_spill] sm:$0xff]  ;;  %vm15559_vm0 = vcmp.eq.s32.totalorder %v11141_v30, 1 }
 0x1bc   : > { %16149 = vst [vmem:[#allocation178_spill] sm:$0xff] %v11272_v1  ;;  %vm15542_vm5 = vcmp.eq.s32.totalorder %v11272_v1, 1  ;;  %4104 = vperm.xlu1 %9168, %v4033_v18   ;;  %8153 = vmatmul.mubr.msk.bf16.gmra.mrb[4].mxu0 %vm1260_vm13, %v1971_v61  ;;  %v11332_v63 = vsel %vm15548_vm9, %v16157_v50, 0.0  ;;  %v16164_v1 = vld [vmem:[#allocation2_spill] sm:$0xff] }
 0x1bd   : > { %v1945_v18 = vsel %vm15542_vm5, %v16138_v43, 0.0  ;;  %v11300_v61 = vsel %vm15542_vm5, %v16147_v9, 0.0  ;;  %v11305_v57 = vsel %vm15542_vm5, %v16152_v41, 0.0  ;;  %16158 = vst [vmem:[#allocation64_spill] sm:$0xff] %v11332_v63  ;;  %v11369_v11 = vsel %vm15559_vm0, %v16164_v1, 0.0 }
 0x1be   : > { %16153 = vst [vmem:[#allocation61_spill] sm:$0xff] %v11305_v57  ;;  %v1972_v55 = vpack.c.bf16 %v1945_v18, %v1944_v49  ;;  %v1946_v49 = vsel %vm15548_vm9, %v16143_v51, 0.0  ;;  %v11327_v18 = vsel %vm15548_vm9, %v16150_v54, 0.0  ;;  %vm4009_vm9 = vcmp.ge.s32.totalorder %v10560_v34, 15  ;;  %16165 = vst [vmem:[#allocation2_spill] sm:$0xff] %v11369_v11  ;;  %v16171_v57 = vld [vmem:[#allocation9_spill] sm:$0xff] }
 0x1bf   : > { %v11313_v43 = vpop.permute.xlu1 %1752  ;;  %16156 = vst [vmem:[#allocation181_spill] sm:$0xff] %v11327_v18 }
 0x1c0   : > { %16155 = vst [vmem:[#allocation180_spill] sm:$0xff] %v11313_v43  ;;  %vm15570_vm5 = vcmp.eq.s32.totalorder %v11313_v43, 1  ;;  %4110 = vperm.xlu1 %9168, %v4035_v35   ;;  %8156 = vmatprep.mubr.msk.bf16.mxu0 %vm1260_vm13, %v1972_v55  ;;  %v16160_v55 = vld [vmem:[#allocation66_spill] sm:$0xff]  ;;  %v11372_v43 = vpop.permute.xlu0 %1779 }
 0x1c1   : > { %v1947_v40 = vsel %vm15570_vm5, %v16147_v9, 0.0  ;;  %v11341_v51 = vsel %vm15570_vm5, %v16152_v41, 0.0  ;;  %v11346_v35 = vsel %vm15570_vm5, %v16160_v55, 0.0  ;;  %v4318_v9 = vsel %vm3979_vm8, 1, %v15962_v38  ;;  %16166 = vst [vmem:[#allocation185_spill] sm:$0xff] %v11372_v43 }
 0x1c2   : > { %16159 = vst [vmem:[#allocation182_spill] sm:$0xff] %v11341_v51  ;;  %16161 = vst [vmem:[#allocation66_spill] sm:$0xff] %v11346_v35  ;;  %v1973_v0 = vpack.c.bf16 %v1947_v40, %v1946_v49  ;;  %v1948_v49 = vsel %vm15559_vm0, %v16150_v54, 0.0  ;;  %v11364_v40 = vsel %vm15559_vm0, %v16157_v50, 0.0  ;;  %vm15569_vm8 = vcmp.eq.s32.totalorder %v11187_v31, 1  ;;  %v9196_v51 = vld [vmem:[%s15193_s1 + $0xe8] sm:$0xff] }
 0x1c3   : > { %v11352_v42 = vpop.permute.xlu1 %1758  ;;  %16163 = vst [vmem:[#allocation184_spill] sm:$0xff] %v11364_v40  ;;  %vm4011_vm0 = vcmp.ge.s32.totalorder %v9196_v51, 15  ;;  %v11412_v35 = vsel %vm15569_vm8, %v16171_v57, 0.0 }
 0x1c4   : > { %16162 = vst [vmem:[#allocation183_spill] sm:$0xff] %v11352_v42  ;;  %vm15560_vm11 = vcmp.eq.s32.totalorder %v11352_v42, 1  ;;  %4387 = vperm.xlu1 %9168, %v4316_v15   ;;  %8157 = vmatmul.mubr.msk.bf16.gmra.mrb[8].mxu0 %vm1260_vm13, %v1973_v0  ;;  %v16168_v15 = vld [vmem:[#allocation4_spill] sm:$0xff]  ;;  %16172 = vst [vmem:[#allocation9_spill] sm:$0xff] %v11412_v35  ;;  %v11432_v40 = vpop.permute.xlu0 %1785 }
 0x1c5   : > { %v1949_v0 = vsel %vm15560_vm11, %v16152_v41, 0.0  ;;  %v11380_v54 = vsel %vm15560_vm11, %v16160_v55, 0.0  ;;  %v11385_v63 = vsel %vm15560_vm11, %v16168_v15, 0.0  ;;  %v4037_v41 = vsel %vm4009_vm9, 1, %v15962_v38  ;;  %16175 = vst [vmem:[#allocation188_spill] sm:$0xff] %v11432_v40  ;;  %v16184_v35 = vld [vmem:[#allocation20_spill] sm:$0xff] }
 0x1c6   : > { %16167 = vst [vmem:[#allocation186_spill] sm:$0xff] %v11380_v54  ;;  %16169 = vst [vmem:[#allocation4_spill] sm:$0xff] %v11385_v63  ;;  %v1974_v30 = vpack.c.bf16 %v1949_v0, %v1948_v49  ;;  %v1950_v49 = vsel %vm15569_vm8, %v16157_v50, 0.0  ;;  %v11407_v0 = vsel %vm15569_vm8, %v16164_v1, 0.0  ;;  %vm15577_vm9 = vcmp.eq.s32.totalorder %v11253_v46, 1  ;;  %v16178_v63 = vld [vmem:[#allocation35_spill] sm:$0xff] }
 0x1c7   : > { %v11391_v18 = vpop.permute.xlu1 %1764  ;;  %v4039_v54 = vsel %vm4011_vm0, 1, %v15962_v38  ;;  %vm3981_vm8 = vcmp.lt.s32.totalorder %v10560_v34, 1  ;;  %v11452_v31 = vsel %vm15577_vm9, %v16178_v63, 0.0  ;;  %vm15587_vm0 = vcmp.eq.s32.totalorder %v11311_v32, 1 }
 0x1c8   : > { %16170 = vst [vmem:[#allocation187_spill] sm:$0xff] %v11391_v18  ;;  %vm15578_vm11 = vcmp.eq.s32.totalorder %v11391_v18, 1  ;;  %4393 = vperm.xlu1 %9168, %v4318_v9   ;;  %8160 = vmatprep.mubr.msk.bf16.mxu0 %vm1260_vm13, %v1974_v30  ;;  %v16173_v9 = vld [vmem:[#allocation34_spill] sm:$0xff]  ;;  %16179 = vst [vmem:[#allocation35_spill] sm:$0xff] %v11452_v31  ;;  %v11488_v46 = vsel %vm15587_vm0, %v16184_v35, 0.0 }
 0x1c9   : > { %v1951_v30 = vsel %vm15578_vm11, %v16160_v55, 0.0  ;;  %v11421_v50 = vsel %vm15578_vm11, %v16168_v15, 0.0  ;;  %v11426_v42 = vsel %vm15578_vm11, %v16173_v9, 0.0  ;;  %16185 = vst [vmem:[#allocation20_spill] sm:$0xff] %v11488_v46 }
 0x1ca   : > { %16174 = vst [vmem:[#allocation34_spill] sm:$0xff] %v11426_v42  ;;  %v1975_v11 = vpack.c.bf16 %v1951_v30, %v1950_v49  ;;  %v1952_v49 = vsel %vm15577_vm9, %v16164_v1, 0.0  ;;  %v11447_v30 = vsel %vm15577_vm9, %v16171_v57, 0.0  ;;  %v16181_v1 = vld [vmem:[#allocation22_spill] sm:$0xff]  ;;  %vm3983_vm9 = vcmp.lt.s32.totalorder %v9196_v51, 1 }
 0x1cb   : > { %v11434_v55 = vpop.permute.xlu1 %1770  ;;  %16177 = vst [vmem:[#allocation190_spill] sm:$0xff] %v11447_v30  ;;  %v16190_v30 = vld [vmem:[#allocation80_spill] sm:$0xff] }
 0x1cc   : > { %16176 = vst [vmem:[#allocation189_spill] sm:$0xff] %v11434_v55  ;;  %vm15609_vm5 = vcmp.eq.s32.totalorder %v11434_v55, 1  ;;  %4116 = vperm.xlu1 %9168, %v4037_v41   ;;  %8161 = vmatmul.mubr.msk.bf16.gmra.mrb[12].mxu0 %vm1260_vm13, %v1975_v11  ;;  %v11491_v55 = vpop.permute.xlu0 %1791 }
 0x1cd   : > { %v1953_v34 = vsel %vm15609_vm5, %v16168_v15, 0.0  ;;  %v11461_v11 = vsel %vm15609_vm5, %v16173_v9, 0.0  ;;  %v11466_v41 = vsel %vm15609_vm5, %v16181_v1, 0.0  ;;  %v4320_v15 = vsel %vm3981_vm8, 1, %v15962_v38  ;;  %16186 = vst [vmem:[#allocation193_spill] sm:$0xff] %v11491_v55 }
 0x1ce   : > { %16180 = vst [vmem:[#allocation191_spill] sm:$0xff] %v11461_v11  ;;  %16182 = vst [vmem:[#allocation22_spill] sm:$0xff] %v11466_v41  ;;  %v1976_v18 = vpack.c.bf16 %v1953_v34, %v1952_v49  ;;  %v1954_v49 = vsel %vm15587_vm0, %v16171_v57, 0.0  ;;  %v11483_v34 = vsel %vm15587_vm0, %v16178_v63, 0.0  ;;  %vm15593_vm8 = vcmp.eq.s32.totalorder %v11372_v43, 1 }
 0x1cf   : > { %v11472_v42 = vpop.permute.xlu1 %1776  ;;  %v11527_v41 = vsel %vm15593_vm8, %v16190_v30, 0.0 }
 0x1d0   : > { %16183 = vst [vmem:[#allocation192_spill] sm:$0xff] %v11472_v42  ;;  %vm15607_vm11 = vcmp.eq.s32.totalorder %v11472_v42, 1  ;;  %4122 = vperm.xlu1 %9168, %v4039_v54   ;;  %8164 = vmatprep.mubr.msk.bf16.mxu0 %vm1260_vm13, %v1976_v18  ;;  %v16187_v54 = vld [vmem:[#allocation77_spill] sm:$0xff]  ;;  %16191 = vst [vmem:[#allocation80_spill] sm:$0xff] %v11527_v41  ;;  %v11547_v46 = vpop.permute.xlu0 %1797 }
 0x1d1   : > { %v1955_v18 = vsel %vm15607_vm11, %v16173_v9, 0.0  ;;  %v11499_v57 = vsel %vm15607_vm11, %v16181_v1, 0.0  ;;  %v11504_v31 = vsel %vm15607_vm11, %v16187_v54, 0.0  ;;  %v4322_v9 = vsel %vm3983_vm9, 1, %v15962_v38  ;;  %16194 = vst [vmem:[#allocation195_spill] sm:$0xff] %v11547_v46 }
 0x1d2   : > { %16188 = vst [vmem:[#allocation77_spill] sm:$0xff] %v11504_v31  ;;  %v1977_v32 = vpack.c.bf16 %v1955_v18, %v1954_v49  ;;  %v1956_v49 = vsel %vm15593_vm8, %v16178_v63, 0.0  ;;  %v11522_v18 = vsel %vm15593_vm8, %v16184_v35, 0.0  ;;  %vm15602_vm9 = vcmp.eq.s32.totalorder %v11432_v40, 1  ;;  %v16192_v63 = vld [vmem:[#allocation84_spill] sm:$0xff] }
 0x1d3   : > { %v11510_v11 = vpop.permute.xlu1 %1782 }
 0x1d4   : > { %16189 = vst [vmem:[#allocation194_spill] sm:$0xff] %v11510_v11  ;;  %vm15596_vm0 = vcmp.eq.s32.totalorder %v11510_v11, 1  ;;  %4399 = vperm.xlu1 %9168, %v4320_v15   ;;  %8165 = vmatmul.mubr.msk.bf16.gmra.mrb[16].mxu0 %vm1260_vm13, %v1977_v32  ;;  %v1958_v11 = vsel %vm15602_vm9, %v16184_v35, 0.0 }
 0x1d5   : > { %v1957_v38 = vsel %vm15596_vm0, %v16181_v1, 0.0  ;;  %v11536_v32 = vsel %vm15596_vm0, %v16187_v54, 0.0  ;;  %v11541_v51 = vsel %vm15596_vm0, %v16192_v63, 0.0  ;;  %vm15615_vm0 = vcmp.eq.s32.totalorder %v11491_v55, 1 }
 0x1d6   : > { %16193 = vst [vmem:[#allocation84_spill] sm:$0xff] %v11541_v51  ;;  %v1978_v15 = vpack.c.bf16 %v1957_v38, %v1956_v49  ;;  %v11559_v49 = vsel %vm15602_vm9, %v16190_v30, 0.0  ;;  %v16196_v38 = vld [vmem:[#allocation90_spill] sm:$0xff] }
 0x1d7   : > { %v11549_v1 = vpop.permute.xlu1 %1788  ;;  %v11564_v42 = vsel %vm15602_vm9, %v16196_v38, 0.0 }
 0x1d8   : > { %16195 = vst [vmem:[#allocation196_spill] sm:$0xff] %v11549_v1  ;;  %vm15605_vm8 = vcmp.eq.s32.totalorder %v11549_v1, 1  ;;  %4405 = vperm.xlu1 %9168, %v4322_v9   ;;  %8168 = vmatprep.mubr.msk.bf16.mxu0 %vm1260_vm13, %v1978_v15  ;;  %16197 = vst [vmem:[#allocation90_spill] sm:$0xff] %v11564_v42  ;;  %v16198_v15 = vld [vmem:[#allocation93_spill] sm:$0xff]  ;;  %v1960_v1 = vsel %vm15615_vm0, %v16190_v30, 0.0  ;;  %v16205_v42 = vld [vmem:[#allocation91_spill] sm:$0xff] }
 0x1d9   : > { %v1959_v9 = vsel %vm15605_vm8, %v16187_v54, 0.0  ;;  %v11573_v35 = vsel %vm15605_vm8, %v16192_v63, 0.0  ;;  %v11578_v43 = vsel %vm15605_vm8, %v16198_v15, 0.0  ;;  %v11587_v54 = vrot.slane %v10343_v25, 1  ;;  %v16207_v30 = vld [vmem:[#allocation97_spill] sm:$0xff] }
 0x1da   : > { %16199 = vst [vmem:[#allocation93_spill] sm:$0xff] %v11578_v43  ;;  %v1979_v41 = vpack.c.bf16 %v1959_v9, %v1958_v11  ;;  %vm15638_vm8 = vcmp.eq.s32.totalorder %v11547_v46, 1  ;;  %v11595_v11 = vpop.permute.xlu0 %1803  ;;  %v11603_v25 = vsel %vm15615_vm0, %v16196_v38, 0.0  ;;  %v16212_v46 = vld [vmem:[#allocation82_spill] sm:$0xff] }
 0x1db   : > { %v11584_v31 = vpop.permute.xlu1 %1794  ;;  %16201 = vst [vmem:[#allocation198_spill] sm:$0xff] %v11587_v54  ;;  %16202 = vst [vmem:[#allocation199_spill] sm:$0xff] %v11595_v11  ;;  %v1962_v43 = vsel %vm15638_vm8, %v16196_v38, 0.0  ;;  %vm15636_vm5 = vcmp.eq.s32.totalorder %v11595_v11, 1 }
 0x1dc   : > { %16200 = vst [vmem:[#allocation197_spill] sm:$0xff] %v11584_v31  ;;  %vm15629_vm9 = vcmp.eq.s32.totalorder %v11584_v31, 1  ;;  %8169 = vmatmul.mubr.msk.bf16.gmra.mrb[20].mxu0 %vm1260_vm13, %v1979_v41  ;;  %16203 = vst [vmem:[#allocation200_spill] sm:$0xff] %v11603_v25 }
 0x1dd   : > { %v1961_v9 = vsel %vm15629_vm9, %v16192_v63, 0.0  ;;  %v11608_v41 = vsel %vm15629_vm9, %v16198_v15, 0.0  ;;  %v1902_v63 = vsel %vm15621_vm10, %v11587_v54, %v16205_v42 }
 0x1de   : > { %v1980_v51 = vpack.c.bf16 %v1961_v9, %v1960_v1  ;;  %v11628_v9 = vsel %vm15638_vm8, %v1902_v63, 0.0  ;;  %v11637_v38 = vpop.permute.xlu0 %1809  ;;  %v11656_v31 = vsel %vm15636_vm5, %v1902_v63, 0.0 }
 0x1df   : > { %v11612_v40 = vpop.permute.xlu1 %1800  ;;  %16206 = vst [vmem:[#allocation91_spill] sm:$0xff] %v11628_v9  ;;  %16209 = vst [vmem:[#allocation202_spill] sm:$0xff] %v11637_v38  ;;  %v16213_v9 = vld [vmem:[#allocation88_spill] sm:$0xff] }
 0x1e0   : > { %16204 = vst [vmem:[#allocation201_spill] sm:$0xff] %v11612_v40  ;;  %vm15637_vm11 = vcmp.eq.s32.totalorder %v11612_v40, 1  ;;  %8172 = vmatprep.mubr.msk.bf16.mxu0 %vm1260_vm13, %v1980_v51 }
 0x1e1   : > { %v1963_v1 = vsel %vm15637_vm11, %v16198_v15, 0.0  ;;  %v11633_v55 = vsel %vm15637_vm11, %v16207_v30, 0.0  ;;  %v11644_v15 = vsel %vm15621_vm10, %v16205_v42, %v11587_v54 }
 0x1e2   : > { %16208 = vst [vmem:[#allocation97_spill] sm:$0xff] %v11633_v55  ;;  %v1981_v51 = vpack.c.bf16 %v1963_v1, %v1962_v43  ;;  %16211 = vst [vmem:[#allocation204_spill] sm:$0xff] %v11644_v15  ;;  %v2731_v43 = vsel %vm15621_vm10, %v16212_v46, %v11082_v28  ;;  %v1964_v1 = vsel %vm15636_vm5, %v11644_v15, 0.0  ;;  %v11669_v46 = vsel %vm15636_vm5, %v16213_v9, 0.0  ;;  %v16217_v15 = vld [vmem:[#allocation100_spill] sm:$0xff] }
 0x1e3   : > { %v11639_v25 = vpop.permute.xlu1 %1806  ;;  %16214 = vst [vmem:[#allocation82_spill] sm:$0xff] %v11669_v46  ;;  %vm15646_vm10 = vcmp.eq.s32.totalorder %v11637_v38, 1 }
 0x1e4   : > { %16210 = vst [vmem:[#allocation203_spill] sm:$0xff] %v11639_v25  ;;  %vm15635_vm0 = vcmp.eq.s32.totalorder %v11639_v25, 1  ;;  %8173 = vmatmul.mubr.msk.bf16.gmra.mrb[24].mxu0 %vm1260_vm13, %v1981_v51  ;;  %v1966_v25 = vsel %vm15646_vm10, %v1902_v63, 0.0  ;;  %v11689_v11 = vsel %vm15646_vm10, %v16213_v9, 0.0  ;;  %v16216_v63 = vld [vmem:[#allocation98_spill] sm:$0xff]  ;;  %v2238_v9 = vsel %vm15673_vm12, %v10334_v45, 0.0 }
 0x1e5   : > { %v1965_v42 = vsel %vm15635_vm0, %v11587_v54, 0.0  ;;  %v11664_v51 = vsel %vm15635_vm0, %v16207_v30, 0.0  ;;  %v11673_v28 = vsel %vm15635_vm0, %v2731_v43, 0.0  ;;  %v16218_v46 = vpack.c.bf16 %v16216_v63, %v16217_v15  ;;  %v16220_v15 = vld [vmem:[#allocation105_spill] sm:$0xff] }
 0x1e6   : > { %v1982_v55 = vpack.c.bf16 %v1965_v42, %v1964_v1 }
 0x1e7   : > { %v11680_v54 = vpop.permute.xlu1 %1812 }
 0x1e8   : > { %16215 = vst [vmem:[#allocation88_spill] sm:$0xff] %v11680_v54  ;;  %vm15645_vm9 = vcmp.eq.s32.totalorder %v11680_v54, 1  ;;  %8176 = vmatprep.mubr.msk.bf16.mxu0 %vm1260_vm13, %v1982_v55 }
 0x1e9   : > { %v1967_v1 = vsel %vm15645_vm9, %v16207_v30, 0.0  ;;  %v11696_v42 = vsel %vm15645_vm9, %v2731_v43, 0.0  ;;  %v2535_v30 = vsel %vm1309_vm14, %v11196_v26, 0  ;;  %v16222_v26 = vld [vmem:[#allocation112_spill] sm:$0xff] }
 0x1ea   : > { %v1983_v40 = vpack.c.bf16 %v1967_v1, %v1966_v25  ;;  %v2239_v25 = vsel %vm15671_vm4, %v10605_v12, 0.0  ;;  %v16219_v1 = vld [vmem:[#allocation106_spill] sm:$0xff] }
 0x1eb   : > { %v2268_v43 = vpack.c.bf16 %v2239_v25, %v2238_v9  ;;  %v16221_v63 = vpack.c.bf16 %v16219_v1, %v16220_v15  ;;  %v16225_v9 = vpack.c.bf16 %v10578_v10, %v10570_v6  ;;  %v16226_v25 = vpack.c.bf16 %v10660_v7, %v10655_v21  ;;  %v16248_v1 = vld [vmem:[#allocation86_spill] sm:$0xff]  ;;  %v16249_v15 = vld [vmem:[#allocation95_spill] sm:$0xff] }
 0x1ec   : > { %8177 = vmatmul.mubr.msk.bf16.gmra.mrb[28].mxu0 %vm1260_vm13, %v1983_v40  ;;  %v7547_v40 = vld [vmem:[%s15194_s2 + $0xa] sm:$0x3]  ;;  %v16229_v10 = vpack.c.bf16 %v10808_v39, %v10803_v33  ;;  %v16230_v6 = vpack.c.bf16 %v10859_v58, %v10854_v8  ;;  %v16232_v21 = vpack.c.bf16 %v10960_v29, %v10955_v2  ;;  %v16233_v7 = vpack.c.bf16 %v11011_v14, %v11006_v3  ;;  %v16236_v14 = vld [vmem:[#allocation44_spill] sm:$0xff]  ;;  %v7564_v58 = vld [vmem:[%s15194_s2 + $0xc] sm:$0x3] }
 0x1ed   : > { %8182 = vmatprep.mubr.msk.bf16.mxu0 %vm1260_vm13, %v16218_v46  ;;  %v16223_v46 = vld [vmem:[#allocation111_spill] sm:$0xff]  ;;  %v2263_v33 = vsel %vm15651_vm7, %v11095_v48, 0.0  ;;  %v16235_v39 = vpack.c.bf16 %v11109_v17, %v11114_v24  ;;  %v2833_v8 = vsel %vm1309_vm14, %v7547_v40, 0  ;;  %v16239_v2 = vld [vmem:[#allocation52_spill] sm:$0xff]  ;;  %v16240_v29 = vld [vmem:[#allocation57_spill] sm:$0xff] }
 0x1ee   : > { %v16224_v55 = vpack.c.bf16 %v16222_v26, %v16223_v46  ;;  %v16241_v3 = vld [vmem:[#allocation58_spill] sm:$0xff]  ;;  %v16244_v17 = vld [vmem:[#allocation71_spill] sm:$0xff]  ;;  %v16245_v24 = vld [vmem:[#allocation73_spill] sm:$0xff]  ;;  %v16252_v46 = vpack.c.bf16 %v11148_v56, %v11138_v5 }
 0x1ef   : > { %v16251_v26 = vld [vmem:[#allocation87_spill] sm:$0xff]  ;;  %v16254_v5 = vld [vmem:[#allocation174_spill] sm:$0xff] }
 0x1f0   : > { %v16255_v56 = vld [vmem:[#allocation115_spill] sm:$0xff] }
 0x1f4   : > { %8183 = vmatmul.mubr.msk.bf16.vlgmr.msra.gmra.mrb[0].mxu0 %vm1260_vm13, %v16221_v63  ;;  %v16250_v63 = vld [vmem:[#allocation96_spill] sm:$0xff] }
 0x1f5   : > { %8215 = vmatpush3.bf16.msra.mxu0 %v2535_v30  ;;  %8186 = vmatprep.mubr.msk.bf16.mxu0 %vm1260_vm13, %v2268_v43  ;;  %v16227_v30 = vpack.c.bf16 %v10712_v59, %v10706_v16  ;;  %v16228_v43 = vpack.c.bf16 %v10759_v22, %v10754_v23  ;;  %v16231_v16 = vpack.c.bf16 %v10912_v20, %v10907_v4  ;;  %v2262_v59 = vsel %vm15652_vm3, %v10979_v19, 0.0  ;;  %v16237_v4 = vld [vmem:[#allocation45_spill] sm:$0xff]  ;;  %v16238_v20 = vld [vmem:[#allocation51_spill] sm:$0xff] }
 0x1f6   : > { %9143 = vmatprep.subr.msk.bf16.mxu0 %vm1309_vm14, %v7547_v40  ;;  %v2280_v23 = vpack.c.bf16 %v2263_v33, %v2262_v59  ;;  %v16234_v22 = vpack.c.bf16 %v11053_v53, %v11049_v44  ;;  %v16242_v44 = vld [vmem:[#allocation63_spill] sm:$0xff]  ;;  %v16243_v53 = vld [vmem:[#allocation68_spill] sm:$0xff]  ;;  %v16260_v59 = vpack.c.bf16 %v11300_v61, %v11286_v37  ;;  %v16271_v61 = vpack.c.bf16 %v11499_v57, %v11483_v34 }
 0x1f7   : > { %v16247_v40 = vld [vmem:[#allocation79_spill] sm:$0xff]  ;;  %v16278_v57 = vld [vmem:[#allocation204_spill] sm:$0xff] }
 0x1fc   : > { %8187 = vmatmul.mubr.msk.bf16.gmra.mrb[4].mxu0 %vm1260_vm13, %v16224_v55  ;;  %v16246_v55 = vld [vmem:[#allocation76_spill] sm:$0xff] }
 0x1fd   : > { %8190 = vmatprep.mubr.msk.bf16.mxu0 %vm1260_vm13, %v16225_v9  ;;  %v2737_v9 = vsel %vm15649_vm6, %v11119_v36, 0.0 }
 0x204   : > { %8191 = vmatmul.mubr.msk.bf16.gmra.mrb[8].mxu0 %vm1260_vm13, %v16226_v25 }
 0x205   : > { %8194 = vmatprep.mubr.msk.bf16.mxu0 %vm1260_vm13, %v16227_v30  ;;  %v2736_v30 = vsel %vm15650_vm1, %v11185_v62, 0.0 }
 0x20c   : > { %8195 = vmatmul.mubr.msk.bf16.gmra.mrb[12].mxu0 %vm1260_vm13, %v16228_v43  ;;  %v2767_v43 = vpack.c.bf16 %v2737_v9, %v2736_v30  ;;  %v16268_v9 = vld [vmem:[#allocation191_spill] sm:$0xff]  ;;  %v16269_v30 = vld [vmem:[#allocation190_spill] sm:$0xff] }
 0x20d   : > { %8198 = vmatprep.mubr.msk.bf16.mxu0 %vm1260_vm13, %v16229_v10  ;;  %v3129_v10 = vsel %vm1309_vm14, %v7564_v58, 0  ;;  %v16270_v37 = vpack.c.bf16 %v16268_v9, %v16269_v30  ;;  %v16296_v9 = vld [vmem:[#allocation127_spill] sm:$0xff]  ;;  %v16297_v30 = vld [vmem:[#allocation126_spill] sm:$0xff] }
 0x214   : > { %8199 = vmatmul.mubr.msk.bf16.gmra.mrb[16].mxu0 %vm1260_vm13, %v16230_v6  ;;  %v7581_v6 = vld [vmem:[%s15194_s2 + $0xe] sm:$0x3] }
 0x215   : > { %8202 = vmatprep.mubr.msk.bf16.mxu0 %vm1260_vm13, %v16231_v16  ;;  %v16256_v16 = vpack.c.bf16 %v16254_v5, %v16255_v56  ;;  %v16276_v5 = vld [vmem:[#allocation198_spill] sm:$0xff] }
 0x216   : > { %v2761_v34 = vsel %vm15637_vm11, %v16276_v5, 0.0 }
 0x21c   : > { %8203 = vmatmul.mubr.msk.bf16.gmra.mrb[20].mxu0 %vm1260_vm13, %v16232_v21  ;;  %v16257_v21 = vld [vmem:[#allocation177_spill] sm:$0xff] }
 0x21d   : > { %8206 = vmatprep.mubr.msk.bf16.mxu0 %vm1260_vm13, %v16233_v7  ;;  %v16258_v7 = vld [vmem:[#allocation117_spill] sm:$0xff] }
 0x21e   : > { %v16259_v33 = vpack.c.bf16 %v16257_v21, %v16258_v7  ;;  %v16283_v21 = vld [vmem:[#allocation101_spill] sm:$0xff] }
 0x224   : > { %8207 = vmatmul.mubr.msk.bf16.gmra.mrb[24].mxu0 %vm1260_vm13, %v16234_v22  ;;  %v16262_v22 = vld [vmem:[#allocation181_spill] sm:$0xff] }
 0x225   : > { %8210 = vmatprep.mubr.msk.bf16.mxu0 %vm1260_vm13, %v2280_v23  ;;  %v16261_v23 = vld [vmem:[#allocation182_spill] sm:$0xff] }
 0x22c   : > { %8211 = vmatmul.mubr.msk.bf16.gmra.mrb[28].mxu0 %vm1260_vm13, %v16235_v39  ;;  %v16263_v39 = vpack.c.bf16 %v16261_v23, %v16262_v22  ;;  %v3327_v22 = vsel %vm1309_vm14, %v7581_v6, 0 }
 0x22d   : > { %8216 = vmatprep.mubr.msk.bf16.mxu0 %vm1260_vm13, %v16236_v14  ;;  %v16264_v14 = vld [vmem:[#allocation186_spill] sm:$0xff] }
 0x234   : > { %8217 = vmatmul.mubr.msk.bf16.vlgmr.msra.gmra.mrb[0].mxu0 %vm1260_vm13, %v16237_v4 }
 0x235   : > { %8249 = vmatpush3.bf16.msra.mxu0 %v2833_v8  ;;  %8220 = vmatprep.mubr.msk.bf16.mxu0 %vm1260_vm13, %v16238_v20  ;;  %v16265_v8 = vld [vmem:[#allocation184_spill] sm:$0xff] }
 0x236   : > { %9144 = vmatprep.subr.msk.bf16.mxu0 %vm1309_vm14, %v7564_v58  ;;  %v16266_v58 = vpack.c.bf16 %v16264_v14, %v16265_v8  ;;  %v16291_v8 = vld [vmem:[#allocation113_spill] sm:$0xff] }
 0x23c   : > { %8221 = vmatmul.mubr.msk.bf16.gmra.mrb[4].mxu0 %vm1260_vm13, %v16239_v2 }
 0x23d   : > { %8224 = vmatprep.mubr.msk.bf16.mxu0 %vm1260_vm13, %v16240_v29 }
 0x244   : > { %8225 = vmatmul.mubr.msk.bf16.gmra.mrb[8].mxu0 %vm1260_vm13, %v16241_v3 }
 0x245   : > { %8228 = vmatprep.mubr.msk.bf16.mxu0 %vm1260_vm13, %v16242_v44 }
 0x24c   : > { %8229 = vmatmul.mubr.msk.bf16.gmra.mrb[12].mxu0 %vm1260_vm13, %v16243_v53 }
 0x24d   : > { %8232 = vmatprep.mubr.msk.bf16.mxu0 %vm1260_vm13, %v16244_v17 }
 0x254   : > { %8233 = vmatmul.mubr.msk.bf16.gmra.mrb[16].mxu0 %vm1260_vm13, %v16245_v24 }
 0x255   : > { %8236 = vmatprep.mubr.msk.bf16.mxu0 %vm1260_vm13, %v16246_v55 }
 0x25c   : > { %8237 = vmatmul.mubr.msk.bf16.gmra.mrb[20].mxu0 %vm1260_vm13, %v16247_v40 }
 0x25d   : > { %8240 = vmatprep.mubr.msk.bf16.mxu0 %vm1260_vm13, %v16248_v1 }
 0x264   : > { %8241 = vmatmul.mubr.msk.bf16.gmra.mrb[24].mxu0 %vm1260_vm13, %v16249_v15 }
 0x265   : > { %8244 = vmatprep.mubr.msk.bf16.mxu0 %vm1260_vm13, %v16250_v63 }
 0x26c   : > { %8245 = vmatmul.mubr.msk.bf16.gmra.mrb[28].mxu0 %vm1260_vm13, %v16251_v26 }
 0x26d   : > { %8250 = vmatprep.mubr.msk.bf16.mxu0 %vm1260_vm13, %v16252_v46  ;;  %v16267_v46 = vpack.c.bf16 %v11421_v50, %v11407_v0  ;;  %v16273_v0 = vpack.c.bf16 %v11573_v35, %v11559_v49  ;;  %v16274_v50 = vld [vmem:[#allocation200_spill] sm:$0xff]  ;;  %v16280_v49 = vpack.c.bf16 %v11664_v51, %v11656_v31  ;;  %v16281_v35 = vpack.c.bf16 %v11696_v42, %v11689_v11 }
 0x26e   : > { %v3032_v31 = vsel %vm15693_vm15, %v10334_v45, 0.0  ;;  %v7597_v11 = vld [vmem:[%s15194_s2 + $0x10] sm:$0x3] }
 0x26f   : > { %v16287_v42 = vld [vmem:[#allocation124_spill] sm:$0xff] }
 0x274   : > { %8251 = vmatmul.mubr.msk.bf16.vlgmr.msra.gmra.mrb[0].mxu0 %vm1260_vm13, %v2767_v43  ;;  %v16272_v43 = vpack.c.bf16 %v11536_v32, %v11522_v18  ;;  %v2760_v18 = vsel %vm15638_vm8, %v16278_v57, 0.0 }
 0x275   : > { %8283 = vmatpush3.bf16.msra.mxu0 %v3129_v10  ;;  %8254 = vmatprep.mubr.msk.bf16.mxu0 %vm1260_vm13, %v16256_v16  ;;  %v16275_v10 = vpack.c.bf16 %v11608_v41, %v16274_v50  ;;  %v2779_v32 = vpack.c.bf16 %v2761_v34, %v2760_v18  ;;  %v16282_v41 = vld [vmem:[#allocation99_spill] sm:$0xff] }
 0x276   : > { %9145 = vmatprep.subr.msk.bf16.mxu0 %vm1309_vm14, %v7581_v6  ;;  %v16284_v7 = vpack.c.bf16 %v16282_v41, %v16283_v21  ;;  %v16293_v6 = vld [vmem:[#allocation120_spill] sm:$0xff]  ;;  %v16302_v50 = vld [vmem:[#allocation135_spill] sm:$0xff] }
 0x277   : > { %v16305_v18 = vld [vmem:[#allocation139_spill] sm:$0xff] }
 0x278   : > { %v16309_v41 = vld [vmem:[#allocation143_spill] sm:$0xff] }
 0x27c   : > { %8255 = vmatmul.mubr.msk.bf16.gmra.mrb[4].mxu0 %vm1260_vm13, %v16259_v33 }
 0x27d   : > { %8258 = vmatprep.mubr.msk.bf16.mxu0 %vm1260_vm13, %v16260_v59  ;;  %v3033_v59 = vsel %vm15692_vm2, %v10605_v12, 0.0  ;;  %v16290_v12 = vld [vmem:[#allocation114_spill] sm:$0xff] }
 0x27e   : > { %v3063_v51 = vpack.c.bf16 %v3033_v59, %v3032_v31  ;;  %v16292_v45 = vpack.c.bf16 %v16290_v12, %v16291_v8  ;;  %v16312_v59 = vld [vmem:[#allocation149_spill] sm:$0xff]  ;;  %v16320_v8 = vld [vmem:[#allocation163_spill] sm:$0xff] }
 0x27f   : > { %vm16321_vm0 = vcmp.eq.s32.totalorder %v16320_v8, 1 }
 0x284   : > { %8259 = vmatmul.mubr.msk.bf16.gmra.mrb[8].mxu0 %vm1260_vm13, %v16263_v39  ;;  %v16288_v39 = vld [vmem:[#allocation123_spill] sm:$0xff] }
 0x285   : > { %8262 = vmatprep.mubr.msk.bf16.mxu0 %vm1260_vm13, %v16266_v58  ;;  %v16289_v14 = vpack.c.bf16 %v16287_v42, %v16288_v39  ;;  %v16294_v58 = vld [vmem:[#allocation119_spill] sm:$0xff]  ;;  %v16317_v39 = vld [vmem:[#allocation160_spill] sm:$0xff] }
 0x28c   : > { %8263 = vmatmul.mubr.msk.bf16.gmra.mrb[12].mxu0 %vm1260_vm13, %v16267_v46  ;;  %v16295_v46 = vpack.c.bf16 %v16293_v6, %v16294_v58  ;;  %v16322_v6 = vld [vmem:[#allocation162_spill] sm:$0xff] }
 0x28d   : > { %8266 = vmatprep.mubr.msk.bf16.mxu0 %vm1260_vm13, %v16270_v37  ;;  %v16298_v37 = vpack.c.bf16 %v16296_v9, %v16297_v30  ;;  %vm16323_vm5 = vcmp.eq.s32.totalorder %v16322_v6, 1  ;;  %v16324_v9 = vld [vmem:[#allocation167_spill] sm:$0xff]  ;;  %v16325_v30 = vld [vmem:[#allocation166_spill] sm:$0xff] }
 0x28e   : > { %v3056_v58 = vsel %vm16323_vm5, %v10979_v19, 0.0 }
 0x294   : > { %8267 = vmatmul.mubr.msk.bf16.gmra.mrb[16].mxu0 %vm1260_vm13, %v16271_v61  ;;  %v16299_v61 = vld [vmem:[#allocation131_spill] sm:$0xff] }
 0x295   : > { %8270 = vmatprep.mubr.msk.bf16.mxu0 %vm1260_vm13, %v16272_v43  ;;  %v16300_v43 = vld [vmem:[#allocation130_spill] sm:$0xff] }
 0x29c   : > { %8271 = vmatmul.mubr.msk.bf16.gmra.mrb[20].mxu0 %vm1260_vm13, %v16273_v0  ;;  %v16301_v0 = vpack.c.bf16 %v16299_v61, %v16300_v43  ;;  %v16327_v61 = vld [vmem:[#allocation89_spill] sm:$0xff]  ;;  %v16328_v43 = vld [vmem:[#allocation170_spill] sm:$0xff] }
 0x29d   : > { %8274 = vmatprep.mubr.msk.bf16.mxu0 %vm1260_vm13, %v16275_v10  ;;  %v16303_v10 = vld [vmem:[#allocation134_spill] sm:$0xff]  ;;  %vm16329_vm11 = vcmp.eq.s32.totalorder %v16328_v43, 1 }
 0x29e   : > { %v16304_v34 = vpack.c.bf16 %v16302_v50, %v16303_v10  ;;  %v16331_v50 = vld [vmem:[#allocation81_spill] sm:$0xff] }
 0x29f   : > { %v16333_v10 = vld [vmem:[#allocation145_spill] sm:$0xff] }
 0x2a0   : > { %vm16334_vm8 = vcmp.eq.s32.totalorder %v16333_v10, 1 }
 0x2a4   : > { %8275 = vmatmul.mubr.msk.bf16.gmra.mrb[24].mxu0 %vm1260_vm13, %v2779_v32  ;;  %v16306_v32 = vld [vmem:[#allocation138_spill] sm:$0xff] }
 0x2a5   : > { %8278 = vmatprep.mubr.msk.bf16.mxu0 %vm1260_vm13, %v16280_v49  ;;  %v16307_v49 = vpack.c.bf16 %v16305_v18, %v16306_v32  ;;  %v3621_v18 = vsel %vm1309_vm14, %v7597_v11, 0  ;;  %v16352_v32 = vld [vmem:[#allocation66_spill] sm:$0xff] }
 0x2ac   : > { %8279 = vmatmul.mubr.msk.bf16.gmra.mrb[28].mxu0 %vm1260_vm13, %v16281_v35  ;;  %v16308_v35 = vld [vmem:[#allocation144_spill] sm:$0xff] }
 0x2ad   : > { %8284 = vmatprep.mubr.msk.bf16.mxu0 %vm1260_vm13, %v16284_v7  ;;  %v16310_v21 = vpack.c.bf16 %v16308_v35, %v16309_v41  ;;  %v16311_v7 = vld [vmem:[#allocation150_spill] sm:$0xff]  ;;  %v16355_v41 = vld [vmem:[#allocation4_spill] sm:$0xff] }
 0x2ae   : > { %v16313_v31 = vpack.c.bf16 %v16311_v7, %v16312_v59  ;;  %v16358_v59 = vld [vmem:[#allocation34_spill] sm:$0xff] }
 0x2b4   : > { %8285 = vmatmul.mubr.msk.bf16.vlgmr.msra.gmra.mrb[0].mxu0 %vm1260_vm13, %v3063_v51  ;;  %v16314_v51 = vld [vmem:[#allocation155_spill] sm:$0xff] }
 0x2b5   : > { %8317 = vmatpush3.bf16.msra.mxu0 %v3327_v22  ;;  %8288 = vmatprep.mubr.msk.bf16.mxu0 %vm1260_vm13, %v16289_v14  ;;  %v16315_v22 = vld [vmem:[#allocation154_spill] sm:$0xff]  ;;  %v16318_v14 = vld [vmem:[#allocation159_spill] sm:$0xff] }
 0x2b6   : > { %9146 = vmatprep.subr.msk.bf16.mxu0 %vm1309_vm14, %v7597_v11  ;;  %v16316_v42 = vpack.c.bf16 %v16314_v51, %v16315_v22  ;;  %v16319_v12 = vpack.c.bf16 %v16317_v39, %v16318_v14  ;;  %v16361_v22 = vld [vmem:[#allocation22_spill] sm:$0xff]  ;;  %v16364_v14 = vld [vmem:[#allocation77_spill] sm:$0xff] }
 0x2bc   : > { %8289 = vmatmul.mubr.msk.bf16.gmra.mrb[4].mxu0 %vm1260_vm13, %v16292_v45  ;;  %v3057_v45 = vsel %vm16321_vm0, %v11095_v48, 0.0  ;;  %vm16332_vm0 = vcmask 1040384  }
 0x2bd   : > { %8292 = vmatprep.mubr.msk.bf16.mxu0 %vm1260_vm13, %v16295_v46  ;;  %v3075_v46 = vpack.c.bf16 %v3057_v45, %v3056_v58  ;;  %v3028_v48 = vsel %vm16332_vm0, %v16331_v50, %v16327_v61  ;;  %v16367_v58 = vld [vmem:[#allocation84_spill] sm:$0xff]  ;;  %v16372_v50 = vld [vmem:[#allocation193_spill] sm:$0xff] }
 0x2be   : > { %v3060_v19 = vsel %vm16334_vm8, %v3028_v48, 0.0  ;;  %vm16373_vm0 = vcmp.eq.s32.totalorder %v16372_v50, 1 }
 0x2bf   : > { %v3546_v48 = vsel %vm16373_vm0, %v16278_v57, 0.0 }
 0x2c4   : > { %8293 = vmatmul.mubr.msk.bf16.gmra.mrb[8].mxu0 %vm1260_vm13, %v16298_v37  ;;  %v16326_v37 = vpack.c.bf16 %v16324_v9, %v16325_v30  ;;  %v16370_v30 = vld [vmem:[#allocation197_spill] sm:$0xff] }
 0x2c5   : > { %8296 = vmatprep.mubr.msk.bf16.mxu0 %vm1260_vm13, %v16301_v0  ;;  %v11963_v0 = vsel %vm16329_vm11, %v16327_v61, 0.0  ;;  %vm16371_vm8 = vcmp.eq.s32.totalorder %v16370_v30, 1 }
 0x2c6   : > { %16330 = vst [vmem:[#allocation98_spill] sm:$0xff] %v11963_v0 }
 0x2cc   : > { %8297 = vmatmul.mubr.msk.bf16.gmra.mrb[12].mxu0 %vm1260_vm13, %v16304_v34  ;;  %v3077_v34 = vpack.c.bf16 %v11963_v0, %v3060_v19 }
 0x2cd   : > { %8300 = vmatprep.mubr.msk.bf16.mxu0 %vm1260_vm13, %v16307_v49  ;;  %v16353_v49 = vld [vmem:[#allocation64_spill] sm:$0xff] }
 0x2ce   : > { %v16354_v35 = vpack.c.bf16 %v16352_v32, %v16353_v49 }
 0x2d4   : > { %8301 = vmatmul.mubr.msk.bf16.gmra.mrb[16].mxu0 %vm1260_vm13, %v16310_v21  ;;  %v16356_v21 = vld [vmem:[#allocation2_spill] sm:$0xff] }
 0x2d5   : > { %8304 = vmatprep.mubr.msk.bf16.mxu0 %vm1260_vm13, %v16313_v31  ;;  %v16357_v7 = vpack.c.bf16 %v16355_v41, %v16356_v21  ;;  %v16359_v31 = vld [vmem:[#allocation9_spill] sm:$0xff] }
 0x2d6   : > { %v16360_v51 = vpack.c.bf16 %v16358_v59, %v16359_v31 }
 0x2dc   : > { %8305 = vmatmul.mubr.msk.bf16.gmra.mrb[20].mxu0 %vm1260_vm13, %v16316_v42  ;;  %v16362_v42 = vld [vmem:[#allocation35_spill] sm:$0xff] }
 0x2dd   : > { %8308 = vmatprep.mubr.msk.bf16.mxu0 %vm1260_vm13, %v16319_v12  ;;  %v16363_v39 = vpack.c.bf16 %v16361_v22, %v16362_v42  ;;  %v16365_v12 = vld [vmem:[#allocation20_spill] sm:$0xff] }
 0x2de   : > { %v16366_v45 = vpack.c.bf16 %v16364_v14, %v16365_v12 }
 0x2e4   : > { %8309 = vmatmul.mubr.msk.bf16.gmra.mrb[24].mxu0 %vm1260_vm13, %v3075_v46  ;;  %v16368_v46 = vld [vmem:[#allocation80_spill] sm:$0xff] }
 0x2e5   : > { %8312 = vmatprep.mubr.msk.bf16.mxu0 %vm1260_vm13, %v16326_v37  ;;  %v16369_v9 = vpack.c.bf16 %v16367_v58, %v16368_v46  ;;  %v3547_v37 = vsel %vm16371_vm8, %v16276_v5, 0.0 }
 0x2e6   : > { %v3566_v19 = vpack.c.bf16 %v3547_v37, %v3546_v48 }
 0x2ec   : > { %8313 = vmatmul.mubr.msk.bf16.gmra.mrb[28].mxu0 %vm1260_vm13, %v3077_v34  ;;  %v16374_v34 = vld [vmem:[#allocation93_spill] sm:$0xff] }
 0x2ed   : > { %8318 = vmatprep.mubr.msk.bf16.mxu0 %vm1260_vm13, %v16237_v4  ;;  %v16335_v4 = vld [vmem:[#allocation171_spill] sm:$0xff] }
 0x2ee   : > { %vm16336_vm5 = vcmp.eq.s32.totalorder %v16335_v4, 1 }
 0x2f4   : > { %8319 = vmatmul.mubr.msk.bf16.vlgmr.msra.gmra.mrb[0].mxu0 %vm1260_vm13, %v16238_v20  ;;  %v3523_v20 = vsel %vm16336_vm5, %v11119_v36, 0.0  ;;  %v16346_v36 = vld [vmem:[#allocation55_spill] sm:$0xff] }
 0x2f5   : > { %8351 = vmatpush3.bf16.msra.mxu0 %v3621_v18  ;;  %8322 = vmatprep.mubr.msk.bf16.mxu0 %vm1260_vm13, %v16239_v2  ;;  %v16337_v2 = vld [vmem:[#allocation148_spill] sm:$0xff]  ;;  %v16375_v18 = vld [vmem:[#allocation90_spill] sm:$0xff] }
 0x2f6   : > { %vm16338_vm11 = vcmp.eq.s32.totalorder %v16337_v2, 1 }
 0x2fc   : > { %8323 = vmatmul.mubr.msk.bf16.gmra.mrb[4].mxu0 %vm1260_vm13, %v16240_v29  ;;  %v3522_v29 = vsel %vm16338_vm11, %v11185_v62, 0.0  ;;  %v16349_v62 = vld [vmem:[#allocation61_spill] sm:$0xff] }
 0x2fd   : > { %8326 = vmatprep.mubr.msk.bf16.mxu0 %vm1260_vm13, %v16241_v3  ;;  %v3554_v3 = vpack.c.bf16 %v3523_v20, %v3522_v29  ;;  %v16376_v20 = vpack.c.bf16 %v16374_v34, %v16375_v18  ;;  %v16377_v29 = vld [vmem:[#allocation97_spill] sm:$0xff]  ;;  %v12149_v18 = vld [vmem:[%s15195_s3] ss:$0 sm:$0xff] }
 0x304   : > { %8327 = vmatmul.mubr.msk.bf16.gmra.mrb[8].mxu0 %vm1260_vm13, %v16242_v44  ;;  %v16339_v44 = vmov 0.0|0.0  }
 0x305   : > { %8330 = vmatprep.mubr.msk.bf16.mxu0 %vm1260_vm13, %v16243_v53  ;;  %v16340_v53 = vld [vmem:[#allocation42_spill] sm:$0xff] }
 0x30c   : > { %8331 = vmatmul.mubr.msk.bf16.gmra.mrb[12].mxu0 %vm1260_vm13, %v16244_v17  ;;  %v16341_v17 = vld [vmem:[#allocation40_spill] sm:$0xff] }
 0x30d   : > { %8334 = vmatprep.mubr.msk.bf16.mxu0 %vm1260_vm13, %v16245_v24  ;;  %v16342_v24 = vpack.c.bf16 %v16340_v53, %v16341_v17  ;;  %v16380_v17 = vld [vmem:[#allocation82_spill] sm:$0xff] }
 0x30e   : > { %v16381_v5 = vpack.c.bf16 %v11673_v28, %v16380_v17 }
 0x314   : > { %8335 = vmatmul.mubr.msk.bf16.gmra.mrb[16].mxu0 %vm1260_vm13, %v16246_v55  ;;  %v16343_v55 = vld [vmem:[#allocation49_spill] sm:$0xff] }
 0x315   : > { %8338 = vmatprep.mubr.msk.bf16.mxu0 %vm1260_vm13, %v16247_v40  ;;  %v16344_v40 = vld [vmem:[#allocation48_spill] sm:$0xff] }
 0x31c   : > { %8339 = vmatmul.mubr.msk.bf16.gmra.mrb[20].mxu0 %vm1260_vm13, %v16248_v1  ;;  %v16345_v1 = vpack.c.bf16 %v16343_v55, %v16344_v40 }
 0x31d   : > { %8342 = vmatprep.mubr.msk.bf16.mxu0 %vm1260_vm13, %v16249_v15  ;;  %v16347_v15 = vld [vmem:[#allocation53_spill] sm:$0xff] }
 0x324   : > { %8343 = vmatmul.mubr.msk.bf16.gmra.mrb[24].mxu0 %vm1260_vm13, %v16250_v63  ;;  %v16348_v63 = vpack.c.bf16 %v16346_v36, %v16347_v15  ;;  %v12088_v36 = vld [vmem:[%s15197_s5] sm:$0x3]  ;;  %v12092_v15 = vpop.permute.xlu1 %4044 }
 0x325   : > { %8346 = vmatprep.mubr.msk.bf16.mxu0 %vm1260_vm13, %v16251_v26  ;;  %v16350_v26 = vld [vmem:[#allocation59_spill] sm:$0xff] }
 0x326   : > { %v16351_v11 = vpack.c.bf16 %v16349_v62, %v16350_v26 }
 0x328   : > { %v12096_v62 = vpop.permute.xlu1 %4327 }
 0x32c   : > { %8347 = vmatmul.mubr.bf16.gmra.mrb[28].mxu0 %v16339_v44 }
 0x32d   : > { %8352 = vmatprep.mubr.msk.bf16.mxu0 %vm1260_vm13, %v3554_v3  ;;  %v16378_v3 = vld [vmem:[#allocation91_spill] sm:$0xff] }
 0x32e   : > { %v16379_v53 = vpack.c.bf16 %v16377_v29, %v16378_v3  ;;  %v12156_v29 = vld [vmem:[%s15196_s4] ss:$0 sm:$0xff] }
 0x334   : > { %8353 = vmatmul.mubr.msk.bf16.vlgmr.msra.gmra.mrb[0].mxu0 %vm1260_vm13, %v16342_v24  ;;  %v16382_v24 = vld [vmem:[#allocation168_spill] sm:$0xff] }
 0x335   : > { %8356 = vmatprep.mubr.msk.bf16.mxu0 %vm1260_vm13, %v16345_v1  ;;  %v3553_v57 = vsel %vm15645_vm9, %v16382_v24, 0.0  ;;  %v3552_v55 = vsel %vm15646_vm10, %v16382_v24, 0.0  ;;  %v7616_v1 = vld [vmem:[%s15197_s5 + $0x2] sm:$0x3]  ;;  %vm4181_vm9 = vcmask 1045504  }
 0x336   : > { %v12076_v40 = vpack.c.bf16 %v3553_v57, %v3552_v55  ;;  %9147 = vmatprep.subr.msk.bf16.mxu1 %vm1309_vm14, %v7616_v1  ;;  %v4778_v28 = vsel %vm1309_vm14, %v7616_v1, 0 }
 0x337   : > { %8385 = vmatpush3.bf16.msra.mxu1 %v4778_v28 }
 0x338   : > { %16383 = vst [vmem:[#allocation100_spill] sm:$0xff] %v12076_v40  ;;  %9148 = vmatprep.subr.msk.bf16.mxu1 %vm1309_vm14, %v12088_v36 }
 0x33c   : > { %8357 = vmatmul.mubr.msk.bf16.gmra.mrb[4].mxu0 %vm1260_vm13, %v16348_v63  ;;  %v12094_v63 = vpop.permute.xlu0 %4041 }
 0x33d   : > { %8360 = vmatprep.mubr.msk.bf16.mxu0 %vm1260_vm13, %v16351_v11  ;;  %v12100_v11 = vpop.permute.xlu1 %4050  ;;  %vm4124_vm10 = vcmp.eq.s32.totalorder %v12094_v63, 1 }
 0x33e   : > { %vm4127_vm1 = vcmp.eq.s32.totalorder %v12100_v11, 1 }
 0x340   : > { %v12098_v26 = vpop.permute.xlu0 %4324 }
 0x341   : > { %v12104_v49 = vpop.permute.xlu1 %4333 }
 0x342   : > { %vm4410_vm7 = vcmp.eq.s32.totalorder %v12104_v49, 1 }
 0x344   : > { %8361 = vmatmul.mubr.msk.bf16.gmra.mrb[8].mxu0 %vm1260_vm13, %v16354_v35  ;;  %v12102_v32 = vpop.permute.xlu0 %4047 }
 0x345   : > { %8364 = vmatprep.mubr.msk.bf16.mxu0 %vm1260_vm13, %v16357_v7  ;;  %v12108_v41 = vpop.permute.xlu1 %4056  ;;  %vm4126_vm6 = vcmp.eq.s32.totalorder %v12102_v32, 1 }
 0x348   : > { %v12106_v35 = vpop.permute.xlu0 %4330 }
 0x349   : > { %v12112_v7 = vpop.permute.xlu1 %4062 }
 0x34c   : > { %8365 = vmatmul.mubr.msk.bf16.gmra.mrb[12].mxu0 %vm1260_vm13, %v16360_v51  ;;  %v12110_v21 = vpop.permute.xlu0 %4053 }
 0x34d   : > { %8368 = vmatprep.mubr.msk.bf16.mxu0 %vm1260_vm13, %v16363_v39  ;;  %v12116_v31 = vpop.permute.xlu1 %4339 }
 0x350   : > { %v12114_v59 = vpop.permute.xlu0 %4059 }
 0x351   : > { %v12120_v22 = vpop.permute.xlu1 %4345 }
 0x354   : > { %8369 = vmatmul.mubr.msk.bf16.gmra.mrb[16].mxu0 %vm1260_vm13, %v16366_v45  ;;  %v12118_v51 = vpop.permute.xlu0 %4336 }
 0x355   : > { %8372 = vmatprep.mubr.msk.bf16.mxu0 %vm1260_vm13, %v16369_v9  ;;  %v12124_v39 = vpop.permute.xlu1 %4068 }
 0x358   : > { %v12122_v42 = vpop.permute.xlu0 %4342 }
 0x359   : > { %v12128_v12 = vpop.permute.xlu1 %4074 }
 0x35c   : > { %8373 = vmatmul.mubr.msk.bf16.gmra.mrb[20].mxu0 %vm1260_vm13, %v16376_v20  ;;  %v12126_v14 = vpop.permute.xlu0 %4065 }
 0x35d   : > { %8376 = vmatprep.mubr.msk.bf16.mxu0 %vm1260_vm13, %v3566_v19  ;;  %v12132_v58 = vpop.permute.xlu1 %4351 }
 0x360   : > { %v12130_v45 = vpop.permute.xlu0 %4071 }
 0x361   : > { %v12136_v9 = vpop.permute.xlu1 %4357 }
 0x362   : > { %vm4418_vm4 = vcmp.eq.s32.totalorder %v12136_v9, 1 }
 0x364   : > { %8377 = vmatmul.mubr.msk.bf16.gmra.mrb[24].mxu0 %vm1260_vm13, %v16379_v53  ;;  %v12134_v46 = vpop.permute.xlu0 %4348 }
 0x365   : > { %8380 = vmatprep.mubr.msk.bf16.mxu0 %vm1260_vm13, %v16381_v5  ;;  %v12140_v48 = vpop.permute.xlu1 %4080 }
 0x368   : > { %v12138_v37 = vpop.permute.xlu0 %4354 }
 0x369   : > { %v12144_v34 = vpop.permute.xlu1 %4086 }
 0x36c   : > { %8381 = vmatmul.mubr.msk.bf16.gmra.mrb[28].mxu0 %vm1260_vm13, %v12076_v40  ;;  %v12142_v19 = vpop.permute.xlu0 %4077 }
 0x36d   : > { %v12160_v55 = vpop.permute.xlu1 %4363 }
 0x370   : > { %v12151_v20 = vpop.permute.xlu0 %4083 }
 0x371   : > { %v12171_v60 = vpop.permute.xlu1 %4369 }
 0x374   : > { %v12166_v2 = vpop.permute.xlu0 %4360 }
 0x407   : > { %v8354_v3 = vpop.f32.mrb[0].mxu0 }
 0x408   : > { %v3824_v53 = vadd.f32 %v8354_v3, %v12149_v18  ;;  %v3657_v17 = vpop.f32.mrb[1].mxu0 }
 0x409   : > { %v3822_v5 = vadd.f32 %v12149_v18, %v3657_v17  ;;  %v8355_v57 = vpop.f32.mrb[2].mxu0 }
 0x40a   : > { %vm3856_vm5 = vcmp.gt.f32.partialorder %v3824_v53, 0.0  ;;  %v3894_v1 = vmul.f32 %v12156_v29, %v3824_v53  ;;  %v3825_v28 = vadd.f32 %v8355_v57, %v12149_v18  ;;  %v3660_v40 = vpop.f32.mrb[3].mxu0 }
 0x40b   : > { %vm3854_vm11 = vcmp.gt.f32.partialorder %v3822_v5, 0.0  ;;  %v3892_v44 = vmul.f32 %v12156_v29, %v3822_v5  ;;  %v3823_v0 = vadd.f32 %v12149_v18, %v3660_v40 }
 0x40c   : > { %v3926_v3 = vsel %vm3856_vm5, %v3824_v53, %v3894_v1  ;;  %vm3857_vm8 = vcmp.gt.f32.partialorder %v3825_v28, 0.0  ;;  %v3895_v17 = vmul.f32 %v12156_v29, %v3825_v28  ;;  %vm4407_vm5 = vcmp.eq.s32.totalorder %v12098_v26, 1  ;;  %v12226_v26 = vld [vmem:[%s15197_s5 + $0x4] sm:$0x3] }
 0x40d   : > { %v3924_v54 = vsel %vm3854_vm11, %v3822_v5, %v3892_v44  ;;  %vm3855_vm0 = vcmp.gt.f32.partialorder %v3823_v0, 0.0  ;;  %v3893_v38 = vmul.f32 %v12156_v29, %v3823_v0  ;;  %v4185_v16 = vrot.slane %v3926_v3, 2 }
 0x40e   : > { %v3927_v56 = vsel %vm3857_vm8, %v3825_v28, %v3895_v17  ;;  %v4182_v40 = vrot.slane %v3924_v54, 2  ;;  %vm4125_vm11 = vcmp.eq.s32.totalorder %v12092_v15, 1 }
 0x40f   : > { %v4187_v57 = vrot.slane %v3927_v56, 2  ;;  %v3925_v30 = vsel %vm3855_vm0, %v3823_v0, %v3893_v38  ;;  %v8358_v50 = vpop.f32.mrb[4].mxu0  ;;  %v12178_v38 = vpop.permute.xlu0 %4366 }
 0x410   : > { %v4183_v25 = vrot.slane %v3925_v30, 2  ;;  %v3828_v53 = vadd.f32 %v8358_v50, %v12149_v18  ;;  %v3673_v1 = vpop.f32.mrb[5].mxu0 }
 0x411   : > { %v3826_v44 = vadd.f32 %v12149_v18, %v3673_v1  ;;  %v4188_v5 = vsel %vm4181_vm9, %v4185_v16, %v4187_v57  ;;  %v8359_v28 = vpop.f32.mrb[6].mxu0 }
 0x412   : > { %v4184_v0 = vsel %vm4181_vm9, %v4182_v40, %v4183_v25  ;;  %v4186_v17 = vsel %vm4181_vm9, %v4183_v25, %v4185_v16  ;;  %vm3860_vm8 = vcmp.gt.f32.partialorder %v3828_v53, 0.0  ;;  %v3898_v54 = vmul.f32 %v12156_v29, %v3828_v53  ;;  %v3676_v30 = vpop.f32.mrb[7].mxu0 }
 0x413   : > { %v4267_v50 = vsel %vm4124_vm10, %v4184_v0, %v3926_v3  ;;  %v12185_v4 = vsel %vm4125_vm11, %v4186_v17, %v3927_v56  ;;  %vm3858_vm0 = vcmp.gt.f32.partialorder %v3826_v44, 0.0  ;;  %v3896_v15 = vmul.f32 %v12156_v29, %v3826_v44  ;;  %v12195_v3 = vpop.permute.xlu1 %4092 }
 0x414   : > { %v12189_v1 = vsel %vm3860_vm8, %v3828_v53, %v3898_v54  ;;  %v3829_v40 = vadd.f32 %v8359_v28, %v12149_v18  ;;  %v3827_v25 = vadd.f32 %v12149_v18, %v3676_v30  ;;  %v4438_v16 = vrot.slane %v3927_v56, 6  ;;  %16384 = vst [vmem:[#allocation106_spill] sm:$0xff] %v12195_v3 }
 0x415   : > { %v3928_v63 = vsel %vm3858_vm0, %v3826_v44, %v3896_v15  ;;  %vm4130_vm11 = vcmp.eq.s32.totalorder %v12114_v59, 1  ;;  %vm4408_vm8 = vcmp.eq.s32.totalorder %v12096_v62, 1  ;;  %v4193_v32 = vrot.slane %v12189_v1, 2  ;;  %v12204_v44 = vpop.permute.xlu0 %4089 }
 0x416   : > { %v4189_v0 = vrot.slane %v3928_v63, 2  ;;  %v12197_v17 = vsel %vm4126_vm6, %v4188_v5, %v3928_v63  ;;  %v4439_v43 = vrot.slane %v3928_v63, 6  ;;  %vm3861_vm10 = vcmp.gt.f32.partialorder %v3829_v40, 0.0  ;;  %16385 = vst [vmem:[#allocation105_spill] sm:$0xff] %v12204_v44 }
 0x417   : > { %v3899_v53 = vmul.f32 %v12156_v29, %v3829_v40  ;;  %vm3859_vm3 = vcmp.gt.f32.partialorder %v3827_v25, 0.0  ;;  %v3897_v28 = vmul.f32 %v12156_v29, %v3827_v25  ;;  %v8362_v56 = vpop.f32.mrb[8].mxu0  ;;  %v4443_v54 = vrot.slane %v12189_v1, 6 }
 0x418   : > { %v4440_v5 = vsel %vm1309_vm14, %v4438_v16, %v4439_v43  ;;  %v4190_v30 = vsel %vm4181_vm9, %v4187_v57, %v4189_v0  ;;  %v3832_v15 = vadd.f32 %v8362_v56, %v12149_v18  ;;  %v3689_v63 = vpop.f32.mrb[9].mxu0  ;;  %vm4131_vm6 = vcmp.eq.s32.totalorder %v12112_v7, 1 }
 0x419   : > { %v12210_v24 = vsel %vm3861_vm10, %v3829_v40, %v3899_v53  ;;  %v3929_v10 = vsel %vm3859_vm3, %v3827_v25, %v3897_v28  ;;  %v3830_v27 = vadd.f32 %v12149_v18, %v3689_v63  ;;  %v8363_v47 = vpop.f32.mrb[10].mxu0  ;;  %v12215_v8 = vsel %vm4407_vm5, %v4440_v5, %v4267_v50  ;;  %v12228_v50 = vpop.permute.xlu1 %4098 }
 0x41a   : > { %v4195_v6 = vrot.slane %v12210_v24, 2  ;;  %v4445_v13 = vrot.slane %v12210_v24, 6  ;;  %v4191_v16 = vrot.slane %v3929_v10, 2  ;;  %v4270_v57 = vsel %vm4127_vm1, %v4190_v30, %v3929_v10  ;;  %v3692_v56 = vpop.f32.mrb[11].mxu0  ;;  %v12248_v52 = vpop.permute.xlu0 %4095 }
 0x41b   : > { %v4441_v40 = vrot.slane %v3929_v10, 6  ;;  %vm3864_vm3 = vcmp.gt.f32.partialorder %v3832_v15, 0.0  ;;  %v3902_v25 = vmul.f32 %v12156_v29, %v3832_v15  ;;  %vm3862_vm0 = vcmp.gt.f32.partialorder %v3830_v27, 0.0 }
 0x41c   : > { %v12231_v53 = vsel %vm4181_vm9, %v4189_v0, %v4191_v16  ;;  %v12234_v11 = vsel %vm4181_vm9, %v4191_v16, %v4193_v32  ;;  %v4446_v28 = vsel %vm1309_vm14, %v4443_v54, %v4445_v13  ;;  %v3900_v10 = vmul.f32 %v12156_v29, %v3830_v27 }
 0x41d   : > { %v4442_v5 = vsel %vm1309_vm14, %v4439_v43, %v4441_v40  ;;  %v12240_v30 = vsel %vm1309_vm14, %v4441_v40, %v4443_v54  ;;  %v12244_v63 = vsel %vm4410_vm7, %v4446_v28, %v4270_v57  ;;  %v4983_v0 = vsel %vm1309_vm14, %v12088_v36, 0  ;;  %v12275_v59 = vpop.permute.xlu1 %4375 }
 0x41e   : > { %16386 = vst [vmem:[#allocation112_spill] sm:$0xff] %v12244_v63  ;;  %vm4414_vm1 = vcmp.eq.s32.totalorder %v12120_v22, 1  ;;  %v12254_v43 = vsel %vm3864_vm3, %v3832_v15, %v3902_v25  ;;  %v12258_v54 = vsel %vm1309_vm14, %v12226_v26, 0  ;;  %v3932_v49 = vsel %vm3862_vm0, %v3830_v27, %v3900_v10  ;;  %16388 = vst [vmem:[#allocation44_spill] sm:$0xff] %v12275_v59  ;;  %v12291_v59 = vpop.permute.xlu0 %4372 }
 0x41f   : > { %16387 = vst [vmem:[#allocation111_spill] sm:$0xff] %v12258_v54  ;;  %v4196_v57 = vsel %vm4181_vm9, %v4193_v32, %v4195_v6  ;;  %v3833_v36 = vadd.f32 %v8363_v47, %v12149_v18  ;;  %v3831_v40 = vadd.f32 %v12149_v18, %v3692_v56  ;;  %v8366_v28 = vpop.f32.mrb[12].mxu0  ;;  %v4197_v23 = vrot.slane %v3932_v49, 2 }
 0x420   : > { %v12266_v33 = vsel %vm4130_vm11, %v4196_v57, %v3932_v49  ;;  %v4447_v15 = vrot.slane %v3932_v49, 6  ;;  %v4524_v25 = vsel %vm4408_vm8, %v4442_v5, %v12185_v4  ;;  %v3705_v16 = vpop.f32.mrb[13].mxu0  ;;  %vm4409_vm7 = vcmp.eq.s32.totalorder %v12106_v35, 1 }
 0x421   : > { %vm4128_vm5 = vcmp.eq.s32.totalorder %v12110_v21, 1  ;;  %vm3865_vm10 = vcmp.gt.f32.partialorder %v3833_v36, 0.0  ;;  %v3903_v27 = vmul.f32 %v12156_v29, %v3833_v36  ;;  %vm3863_vm3 = vcmp.gt.f32.partialorder %v3831_v40, 0.0  ;;  %v8367_v32 = vpop.f32.mrb[14].mxu0 }
 0x422   : > { %v3901_v47 = vmul.f32 %v12156_v29, %v3831_v40  ;;  %v4201_v56 = vrot.slane %v12254_v43, 2  ;;  %v4451_v10 = vrot.slane %v12254_v43, 6  ;;  %v12280_v4 = vsel %vm1309_vm14, %v4445_v13, %v4447_v15  ;;  %v3708_v5 = vpop.f32.mrb[15].mxu0 }
 0x423   : > { %v4198_v62 = vsel %vm4181_vm9, %v4195_v6, %v4197_v23  ;;  %vm4134_vm11 = vcmp.eq.s32.totalorder %v12130_v45, 1  ;;  %v12284_v49 = vsel %vm3865_vm10, %v3833_v36, %v3903_v27  ;;  %v12286_v54 = vrot.slane %v4524_v25, 7 }
 0x424   : > { %v3933_v57 = vsel %vm3863_vm3, %v3831_v40, %v3901_v47  ;;  %v12289_v61 = vpack.c.bf16 %v12215_v8, %v4524_v25  ;;  %v4453_v3 = vrot.slane %v12284_v49, 6  ;;  %v12297_v6 = vrot.slane %v12215_v8, 7 }
 0x425   : > { %16389 = vst [vmem:[#allocation45_spill] sm:$0xff] %v12286_v54  ;;  %v4199_v44 = vrot.slane %v3933_v57, 2  ;;  %v4274_v13 = vsel %vm4131_vm6, %v4198_v62, %v3933_v57  ;;  %v4203_v36 = vrot.slane %v12284_v49, 2  ;;  %v4449_v27 = vrot.slane %v3933_v57, 6 }
 0x426   : > { %16390 = vst [vmem:[#allocation51_spill] sm:$0xff] %v12289_v61  ;;  %16391 = vst [vmem:[#allocation52_spill] sm:$0xff] %v12297_v6  ;;  %8387 = vmatmul.mubr.msk.bf16.vlgmr.msra.gmra.mrb[0].mxu1 %vm1260_vm13, %v12289_v61  ;;  %v3836_v40 = vadd.f32 %v8366_v28, %v12149_v18  ;;  %v12304_v47 = vpack.c.bf16 %v4524_v25, %v12215_v8  ;;  %v4454_v62 = vsel %vm1309_vm14, %v4451_v10, %v4453_v3  ;;  %v12345_v61 = vpop.permute.xlu0 %4378 }
 0x427   : > { %v12307_v54 = vsel %vm4181_vm9, %v4197_v23, %v4199_v44  ;;  %v12310_v7 = vsel %vm4181_vm9, %v4199_v44, %v4201_v56  ;;  %8419 = vmatpush3.bf16.msra.mxu1 %v4983_v0  ;;  %v3834_v6 = vadd.f32 %v12149_v18, %v3705_v16  ;;  %vm4135_vm8 = vcmp.eq.s32.totalorder %v12128_v12, 1  ;;  %v8370_v44 = vpop.f32.mrb[16].mxu0  ;;  %v12331_v0 = vpop.permute.xlu1 %4381 }
 0x428   : > { %16392 = vst [vmem:[#allocation57_spill] sm:$0xff] %v12304_v47  ;;  %v12316_v57 = vsel %vm1309_vm14, %v4447_v15, %v4449_v27  ;;  %v12319_v28 = vsel %vm1309_vm14, %v4449_v27, %v4451_v10  ;;  %v12323_v23 = vsel %vm4414_vm1, %v4454_v62, %v4274_v13  ;;  %vm3868_vm6 = vcmp.gt.f32.partialorder %v3836_v40, 0.0  ;;  %8390 = vmatprep.mubr.msk.bf16.mxu1 %vm1260_vm13, %v12304_v47  ;;  %v3721_v10 = vpop.f32.mrb[17].mxu0 }
 0x429   : > { %16393 = vst [vmem:[#allocation58_spill] sm:$0xff] %v12323_v23  ;;  %9149 = vmatprep.subr.msk.bf16.mxu1 %vm1309_vm14, %v12226_v26  ;;  %vm4411_vm0 = vcmp.eq.s32.totalorder %v12118_v51, 1  ;;  %vm4129_vm10 = vcmp.eq.s32.totalorder %v12108_v41, 1  ;;  %v12333_v16 = vrot.slane %v4524_v25, 1  ;;  %v12336_v22 = vrot.slane %v12215_v8, 1  ;;  %v12343_v47 = vpop.f32.mrb[18].mxu0 }
 0x42a   : > { %v3906_v15 = vmul.f32 %v12156_v29, %v3836_v40  ;;  %vm3866_vm1 = vcmp.gt.f32.partialorder %v3834_v6, 0.0  ;;  %v3904_v13 = vmul.f32 %v12156_v29, %v3834_v6  ;;  %v4204_v27 = vsel %vm4181_vm9, %v4201_v56, %v4203_v36 }
 0x42b   : > { %16394 = vst [vmem:[#allocation63_spill] sm:$0xff] %v12333_v16  ;;  %16395 = vst [vmem:[#allocation68_spill] sm:$0xff] %v12336_v22  ;;  %v3837_v26 = vadd.f32 %v8367_v32, %v12149_v18  ;;  %v3835_v62 = vadd.f32 %v12149_v18, %v3708_v5  ;;  %vm4412_vm3 = vcmp.eq.s32.totalorder %v12116_v31, 1  ;;  %v12357_v32 = vsel %vm4409_vm7, %v12240_v30, %v12197_v17  ;;  %v12363_v5 = vpop.f32.mrb[19].mxu0 }
 0x42c   : > { %v12351_v25 = vsel %vm3868_vm6, %v3836_v40, %v3906_v15  ;;  %v4271_v56 = vsel %vm4128_vm5, %v12231_v53, %v12189_v1  ;;  %v3936_v8 = vsel %vm3866_vm1, %v3834_v6, %v3904_v13  ;;  %v3840_v40 = vadd.f32 %v8370_v44, %v12149_v18  ;;  %v12381_v6 = vpop.permute.xlu1 %4104 }
 0x42d   : > { %vm3869_vm12 = vcmp.gt.f32.partialorder %v3837_v26, 0.0  ;;  %v4205_v15 = vrot.slane %v3936_v8, 2  ;;  %v12370_v35 = vsel %vm4134_vm11, %v4204_v27, %v3936_v8  ;;  %v4455_v17 = vrot.slane %v3936_v8, 6  ;;  %16397 = vst [vmem:[#allocation73_spill] sm:$0xff] %v12381_v6  ;;  %v12395_v6 = vpop.permute.xlu0 %4101 }
 0x42e   : > { %v3907_v30 = vmul.f32 %v12156_v29, %v3837_v26  ;;  %v4209_v21 = vrot.slane %v12351_v25, 2  ;;  %vm3867_vm7 = vcmp.gt.f32.partialorder %v3835_v62, 0.0  ;;  %v3905_v1 = vmul.f32 %v12156_v29, %v3835_v62  ;;  %16398 = vst [vmem:[#allocation76_spill] sm:$0xff] %v12395_v6 }
 0x42f   : > { %v12377_v53 = vpack.c.bf16 %v12244_v63, %v12357_v32  ;;  %vm4413_vm5 = vcmp.eq.s32.totalorder %v12122_v42, 1  ;;  %vm4132_vm6 = vcmp.eq.s32.totalorder %v12126_v14, 1  ;;  %v4459_v45 = vrot.slane %v12351_v25, 6  ;;  %v8374_v63 = vpop.f32.mrb[20].mxu0 }
 0x430   : > { %v12385_v44 = vsel %vm1309_vm14, %v4453_v3, %v4455_v17  ;;  %v12387_v13 = vsel %vm3869_vm12, %v3837_v26, %v3907_v30  ;;  %v4206_v27 = vsel %vm4181_vm9, %v4203_v36, %v4205_v15  ;;  %v3937_v16 = vsel %vm3867_vm7, %v3835_v62, %v3905_v1  ;;  %v12400_v8 = vpop.f32.mrb[21].mxu0 }
 0x431   : > { %16396 = vst [vmem:[#allocation71_spill] sm:$0xff] %v12377_v53  ;;  %v15681_v22 = vrot.slane %v12387_v13, 6  ;;  %8391 = vmatmul.mubr.msk.bf16.gmra.mrb[4].mxu1 %vm1260_vm13, %v12377_v53  ;;  %vm3872_vm11 = vcmp.gt.f32.partialorder %v3840_v40, 0.0  ;;  %vm4138_vm1 = vcmp.eq.s32.totalorder %v12151_v20, 1  ;;  %v4207_v3 = vrot.slane %v3937_v16, 2 }
 0x432   : > { %v4278_v26 = vsel %vm4135_vm8, %v4206_v27, %v3937_v16  ;;  %v4457_v30 = vrot.slane %v3937_v16, 6  ;;  %v3910_v36 = vmul.f32 %v12156_v29, %v3840_v40  ;;  %v4272_v1 = vsel %vm4129_vm10, %v12234_v11, %v12210_v24  ;;  %v12415_v16 = vpop.f32.mrb[22].mxu0 }
 0x433   : > { %v4462_v62 = vsel %vm1309_vm14, %v4459_v45, %v15681_v22  ;;  %v12412_v53 = vsel %vm4411_vm0, %v12280_v4, %v4271_v56  ;;  %v3838_v12 = vadd.f32 %v12149_v18, %v3721_v10  ;;  %v12418_v27 = vsel %vm4181_vm9, %v4205_v15, %v4207_v3  ;;  %v12429_v41 = vpop.f32.mrb[23].mxu0  ;;  %v12446_v56 = vpop.permute.xlu1 %4110 }
 0x434   : > { %v12421_v6 = vsel %vm4181_vm9, %v4207_v3, %v4209_v21  ;;  %v12424_v22 = vsel %vm1309_vm14, %v4455_v17, %v4457_v30  ;;  %v12427_v24 = vsel %vm1309_vm14, %v4457_v30, %v4459_v45  ;;  %vm4133_vm12 = vcmp.eq.s32.totalorder %v12124_v39, 1 }
 0x435   : > { %v12434_v51 = vsel %vm4418_vm4, %v4462_v62, %v4278_v26  ;;  %v12438_v4 = vsel %vm3872_vm11, %v3840_v40, %v3910_v36  ;;  %v12443_v10 = vsel %vm4412_vm3, %v12316_v57, %v4272_v1  ;;  %vm4139_vm8 = vcmp.eq.s32.totalorder %v12144_v34, 1  ;;  %v12462_v26 = vpop.permute.xlu0 %4107 }
 0x436   : > { %16399 = vst [vmem:[#allocation79_spill] sm:$0xff] %v12434_v51  ;;  %vm4415_vm4 = vcmp.eq.s32.totalorder %v12134_v46, 1  ;;  %vm4416_vm0 = vcmp.eq.s32.totalorder %v12132_v58, 1  ;;  %vm4422_vm10 = vcmp.eq.s32.totalorder %v12171_v60, 1  ;;  %v4467_v57 = vrot.slane %v12438_v4, 6 }
 0x437   : > { %v12460_v3 = vpack.c.bf16 %v12443_v10, %v12412_v53  ;;  %vm3870_vm3 = vcmp.gt.f32.partialorder %v3838_v12, 0.0  ;;  %v3908_v30 = vmul.f32 %v12156_v29, %v3838_v12  ;;  %v16401_v36 = vrot.slane %v12387_v13, 2  ;;  %v12499_v14 = vpop.permute.xlu1 %4387 }
 0x438   : > { %v3841_v1 = vadd.f32 %v12343_v47, %v12149_v18  ;;  %v3839_v17 = vadd.f32 %v12149_v18, %v12363_v5  ;;  %v12479_v15 = vsel %vm4413_vm5, %v12319_v28, %v12266_v33  ;;  %v12485_v47 = vpop.f32.mrb[24].mxu0  ;;  %v3844_v40 = vadd.f32 %v8374_v63, %v12149_v18 }
 0x439   : > { %16400 = vst [vmem:[#allocation86_spill] sm:$0xff] %v12460_v3  ;;  %v4212_v62 = vsel %vm4181_vm9, %v4209_v21, %v16401_v36  ;;  %8394 = vmatprep.mubr.msk.bf16.mxu1 %vm1260_vm13, %v12460_v3  ;;  %v4275_v21 = vsel %vm4132_vm6, %v12307_v54, %v12254_v43  ;;  %v3940_v36 = vsel %vm3870_vm3, %v3838_v12, %v3908_v30  ;;  %v12489_v5 = vpop.f32.mrb[25].mxu0  ;;  %vm4417_vm6 = vcmp.eq.s32.totalorder %v12138_v37, 1  ;;  %v12521_v43 = vpop.permute.xlu0 %4384 }
 0x43a   : > { %vm3873_vm7 = vcmp.gt.f32.partialorder %v3841_v1, 0.0  ;;  %v3911_v9 = vmul.f32 %v12156_v29, %v3841_v1  ;;  %v4213_v45 = vrot.slane %v3940_v36, 2  ;;  %v12493_v33 = vsel %vm4138_vm1, %v4212_v62, %v3940_v36  ;;  %v12495_v28 = vpop.f32.mrb[26].mxu0 }
 0x43b   : > { %v4463_v42 = vrot.slane %v3940_v36, 6  ;;  %vm3871_vm5 = vcmp.gt.f32.partialorder %v3839_v17, 0.0  ;;  %vm4136_vm11 = vcmp.eq.s32.totalorder %v12142_v19, 1  ;;  %v3909_v54 = vmul.f32 %v12156_v29, %v3839_v17  ;;  %v12509_v12 = vpop.f32.mrb[27].mxu0  ;;  %v12569_v58 = vpop.permute.xlu1 %4393 }
 0x43c   : > { %v12502_v63 = vsel %vm3873_vm7, %v3841_v1, %v3911_v9  ;;  %v12507_v20 = vpack.c.bf16 %v12323_v23, %v12479_v15  ;;  %v16403_v30 = vrot.slane %v12387_v13, 6  ;;  %v16404_v9 = vrot.slane %v12387_v13, 2 }
 0x43d   : > { %v3941_v31 = vsel %vm3871_vm5, %v3839_v17, %v3909_v54  ;;  %vm3876_vm1 = vcmp.gt.f32.partialorder %v3844_v40, 0.0  ;;  %v3914_v3 = vmul.f32 %v12156_v29, %v3844_v40  ;;  %vm4142_vm3 = vcmp.eq.s32.totalorder %v12248_v52, 1 }
 0x43e   : > { %16402 = vst [vmem:[#allocation95_spill] sm:$0xff] %v12507_v20  ;;  %v12514_v62 = vsel %vm1309_vm14, %v16403_v30, %v4463_v42  ;;  %v4214_v1 = vsel %vm4181_vm9, %v16404_v9, %v4213_v45  ;;  %8395 = vmatmul.mubr.msk.bf16.gmra.mrb[8].mxu1 %vm1260_vm13, %v12507_v20  ;;  %v4276_v30 = vsel %vm4133_vm12, %v12310_v7, %v12284_v49  ;;  %v4215_v36 = vrot.slane %v3941_v31, 2 }
 0x43f   : > { %v4282_v11 = vsel %vm4139_vm8, %v4214_v1, %v3941_v31  ;;  %v4465_v23 = vrot.slane %v3941_v31, 6  ;;  %v16405_v9 = vrot.slane %v12502_v63, 6  ;;  %v12540_v20 = vsel %vm3876_vm1, %v3844_v40, %v3914_v3  ;;  %v12588_v1 = vpop.permute.xlu0 %4390 }
 0x440   : > { %v12545_v39 = vsel %vm4415_vm4, %v12385_v44, %v4275_v21  ;;  %v12550_v34 = vsel %vm4416_vm0, %v12424_v22, %v4276_v30  ;;  %vm4137_vm12 = vcmp.eq.s32.totalorder %v12140_v48, 1  ;;  %v12554_v49 = vsel %vm4181_vm9, %v4213_v45, %v4215_v36  ;;  %v12567_v44 = vpop.f32.mrb[28].mxu0 }
 0x441   : > { %v4470_v17 = vsel %vm1309_vm14, %v4467_v57, %v16405_v9  ;;  %v16406_v60 = vrot.slane %v12438_v4, 2  ;;  %v12565_v46 = vsel %vm1309_vm14, %v4465_v23, %v4467_v57  ;;  %v12575_v3 = vpop.f32.mrb[29].mxu0  ;;  %vm4419_vm8 = vcmp.eq.s32.totalorder %v12166_v2, 1 }
 0x442   : > { %v12538_v54 = vsel %vm4422_vm10, %v4470_v17, %v4282_v11  ;;  %v12562_v11 = vsel %vm1309_vm14, %v4463_v42, %v4465_v23  ;;  %vm4143_vm4 = vcmp.eq.s32.totalorder %v12228_v50, 1  ;;  %v4475_v57 = vrot.slane %v12540_v20, 6 }
 0x443   : > { %v12559_v7 = vsel %vm4181_vm9, %v4215_v36, %v16406_v60  ;;  %v12584_v42 = vpack.c.bf16 %v12550_v34, %v12545_v39  ;;  %v12586_v36 = vpop.f32.mrb[30].mxu0  ;;  %v3842_v9 = vadd.f32 %v12149_v18, %v12400_v8  ;;  %v16408_v17 = vrot.slane %v12502_v63, 2 }
 0x444   : > { %v3845_v40 = vadd.f32 %v12415_v16, %v12149_v18  ;;  %v12600_v22 = vpop.f32.mrb[31].mxu0  ;;  %vm4420_vm0 = vcmp.eq.s32.totalorder %v12160_v55, 1  ;;  %vm4426_vm10 = vcmp.eq.s32.totalorder %v12331_v0, 1  ;;  %v3843_v8 = vadd.f32 %v12149_v18, %v12429_v41  ;;  %v16420_v0 = vld [vmem:[#allocation76_spill] sm:$0xff] }
 0x445   : > { %16407 = vst [vmem:[#allocation96_spill] sm:$0xff] %v12584_v42  ;;  %v4220_v45 = vsel %vm4181_vm9, %v16406_v60, %v16408_v17  ;;  %8398 = vmatprep.mubr.msk.bf16.mxu1 %vm1260_vm13, %v12584_v42  ;;  %v12612_v17 = vsel %vm4417_vm6, %v12427_v24, %v12370_v35  ;;  %v3848_v16 = vadd.f32 %v12485_v47, %v12149_v18  ;;  %vm3874_vm7 = vcmp.gt.f32.partialorder %v3842_v9, 0.0  ;;  %v12629_v24 = vpop.permute.xlu1 %4116  ;;  %v12641_v42 = vpop.permute.xlu0 %4113 }
 0x446   : > { %v4279_v60 = vsel %vm4136_vm11, %v12418_v27, %v12351_v25  ;;  %v3912_v30 = vmul.f32 %v12156_v29, %v3842_v9  ;;  %vm3877_vm5 = vcmp.gt.f32.partialorder %v3845_v40, 0.0  ;;  %v3915_v41 = vmul.f32 %v12156_v29, %v3845_v40 }
 0x447   : > { %vm3875_vm1 = vcmp.gt.f32.partialorder %v3843_v8, 0.0  ;;  %v3913_v37 = vmul.f32 %v12156_v29, %v3843_v8  ;;  %v12626_v35 = vpack.c.bf16 %v12434_v51, %v12612_v17  ;;  %vm4421_vm6 = vcmp.eq.s32.totalorder %v12178_v38, 1 }
 0x448   : > { %v3944_v25 = vsel %vm3874_vm7, %v3842_v9, %v3912_v30  ;;  %v12632_v27 = vsel %vm3877_vm5, %v3845_v40, %v3915_v41  ;;  %vm3880_vm11 = vcmp.gt.f32.partialorder %v3848_v16, 0.0  ;;  %v3918_v40 = vmul.f32 %v12156_v29, %v3848_v16 }
 0x449   : > { %16409 = vst [vmem:[#allocation87_spill] sm:$0xff] %v12626_v35  ;;  %v4221_v47 = vrot.slane %v3944_v25, 2  ;;  %v12636_v21 = vsel %vm4142_vm3, %v4220_v45, %v3944_v25  ;;  %v4471_v31 = vrot.slane %v3944_v25, 6  ;;  %8399 = vmatmul.mubr.msk.bf16.gmra.mrb[12].mxu1 %vm1260_vm13, %v12626_v35  ;;  %v15694_v51 = vrot.slane %v12632_v27, 6  ;;  %v16410_v45 = vld [vmem:[#allocation105_spill] sm:$0xff] }
 0x44a   : > { %v3945_v30 = vsel %vm3875_vm1, %v3843_v8, %v3913_v37  ;;  %v4280_v52 = vsel %vm4137_vm12, %v12421_v6, %v12387_v13  ;;  %vm4140_vm3 = vcmp.eq.s32.totalorder %v16410_v45, 1  ;;  %v16411_v9 = vrot.slane %v12502_v63, 6 }
 0x44b   : > { %v16412_v25 = vrot.slane %v12502_v63, 2  ;;  %v4223_v23 = vrot.slane %v3945_v30, 2  ;;  %v4473_v8 = vrot.slane %v3945_v30, 6  ;;  %vm4146_vm7 = vcmp.eq.s32.totalorder %v12462_v26, 1 }
 0x44c   : > { %v12654_v41 = vsel %vm1309_vm14, %v16411_v9, %v4471_v31  ;;  %v4478_v48 = vsel %vm1309_vm14, %v4475_v57, %v15694_v51  ;;  %v12666_v6 = vsel %vm3880_vm11, %v3848_v16, %v3918_v40  ;;  %v12671_v13 = vsel %vm4419_vm8, %v12514_v62, %v4279_v60  ;;  %v12687_v16 = vpop.permute.xlu1 %4122  ;;  %v16421_v51 = vld [vmem:[#allocation73_spill] sm:$0xff] }
 0x44d   : > { %v4222_v19 = vsel %vm4181_vm9, %v16412_v25, %v4221_v47  ;;  %v12674_v9 = vsel %vm4181_vm9, %v4221_v47, %v4223_v23  ;;  %v16413_v25 = vrot.slane %v12540_v20, 2  ;;  %vm4147_vm8 = vcmp.eq.s32.totalorder %v12446_v56, 1 }
 0x44e   : > { %v4286_v37 = vsel %vm4143_vm4, %v4222_v19, %v3945_v30  ;;  %v12682_v19 = vsel %vm1309_vm14, %v4471_v31, %v4473_v8  ;;  %v12685_v30 = vsel %vm1309_vm14, %v4473_v8, %v4475_v57  ;;  %v16414_v31 = vld [vmem:[#allocation106_spill] sm:$0xff]  ;;  %v4483_v40 = vrot.slane %v12666_v6, 6  ;;  %v12706_v8 = vpop.permute.xlu0 %4119 }
 0x44f   : > { %v12679_v50 = vsel %vm4181_vm9, %v4223_v23, %v16413_v25  ;;  %v12691_v2 = vsel %vm4426_vm10, %v4478_v48, %v4286_v37  ;;  %v12698_v23 = vsel %vm4420_vm0, %v12562_v11, %v4280_v52  ;;  %vm4141_vm12 = vcmp.eq.s32.totalorder %v16414_v31, 1  ;;  %v16416_v48 = vld [vmem:[#allocation44_spill] sm:$0xff] }
 0x450   : > { %v12712_v11 = vpack.c.bf16 %v12698_v23, %v12671_v13  ;;  %v3846_v52 = vadd.f32 %v12149_v18, %v12489_v5  ;;  %vm4423_vm4 = vcmp.eq.s32.totalorder %v12291_v59, 1  ;;  %vm4430_vm10 = vcmp.eq.s32.totalorder %v12569_v58, 1  ;;  %v16488_v58 = vld [vmem:[#allocation58_spill] sm:$0xff] }
 0x451   : > { %v16417_v25 = vrot.slane %v12632_v27, 2  ;;  %v16418_v47 = vrot.slane %v12540_v20, 2  ;;  %v3849_v57 = vadd.f32 %v12495_v28, %v12149_v18  ;;  %v3847_v55 = vadd.f32 %v12149_v18, %v12509_v12 }
 0x452   : > { %16415 = vst [vmem:[#allocation174_spill] sm:$0xff] %v12712_v11  ;;  %v12732_v5 = vsel %vm4421_vm6, %v12565_v46, %v12493_v33  ;;  %8402 = vmatprep.mubr.msk.bf16.mxu1 %vm1260_vm13, %v12712_v11  ;;  %vm3878_vm5 = vcmp.gt.f32.partialorder %v3846_v52, 0.0  ;;  %v12744_v33 = vpop.permute.xlu1 %4399  ;;  %v3852_v37 = vadd.f32 %v12567_v44, %v12149_v18  ;;  %v4283_v62 = vsel %vm4140_vm3, %v12554_v49, %v12438_v4 }
 0x453   : > { %v4228_v60 = vsel %vm4181_vm9, %v16418_v47, %v16417_v25  ;;  %v3916_v47 = vmul.f32 %v12156_v29, %v3846_v52  ;;  %v12740_v28 = vpack.c.bf16 %v12538_v54, %v12732_v5  ;;  %vm3881_vm1 = vcmp.gt.f32.partialorder %v3849_v57, 0.0 }
 0x454   : > { %v3919_v12 = vmul.f32 %v12156_v29, %v3849_v57  ;;  %vm3879_vm11 = vcmp.gt.f32.partialorder %v3847_v55, 0.0  ;;  %v3917_v38 = vmul.f32 %v12156_v29, %v3847_v55  ;;  %vm4425_vm6 = vcmp.eq.s32.totalorder %v12345_v61, 1 }
 0x455   : > { %16419 = vst [vmem:[#allocation115_spill] sm:$0xff] %v12740_v28  ;;  %v3948_v25 = vsel %vm3878_vm5, %v3846_v52, %v3916_v47  ;;  %8403 = vmatmul.mubr.msk.bf16.gmra.mrb[16].mxu1 %vm1260_vm13, %v12740_v28  ;;  %vm4144_vm2 = vcmp.eq.s32.totalorder %v16420_v0, 1  ;;  %vm4429_vm15 = vcmp.eq.s32.totalorder %v12588_v1, 1  ;;  %vm4145_vm0 = vcmp.eq.s32.totalorder %v16421_v51, 1  ;;  %v12764_v28 = vpop.permute.xlu0 %4396 }
 0x456   : > { %v4229_v52 = vrot.slane %v3948_v25, 2  ;;  %v4289_v47 = vsel %vm4146_vm7, %v4228_v60, %v3948_v25  ;;  %v4479_v46 = vrot.slane %v3948_v25, 6  ;;  %v12762_v44 = vsel %vm3881_vm1, %v3849_v57, %v3919_v12 }
 0x457   : > { %v15701_v49 = vrot.slane %v12762_v44, 6  ;;  %v3949_v45 = vsel %vm3879_vm11, %v3847_v55, %v3917_v38  ;;  %vm3884_vm3 = vcmp.gt.f32.partialorder %v3852_v37, 0.0  ;;  %v16422_v11 = vrot.slane %v12632_v27, 6 }
 0x458   : > { %v16423_v26 = vrot.slane %v12632_v27, 2  ;;  %v4231_v25 = vrot.slane %v3949_v45, 2  ;;  %v4481_v57 = vrot.slane %v3949_v45, 6  ;;  %vm4427_vm7 = vcmp.eq.s32.totalorder %v12521_v43, 1 }
 0x459   : > { %v4480_v35 = vsel %vm1309_vm14, %v16422_v11, %v4479_v46  ;;  %v4486_v55 = vsel %vm1309_vm14, %v4483_v40, %v15701_v49  ;;  %v3922_v38 = vmul.f32 %v12156_v29, %v3852_v37  ;;  %v4284_v11 = vsel %vm4141_vm12, %v12559_v7, %v12502_v63  ;;  %v12798_v49 = vpop.permute.xlu1 %4405 }
 0x45a   : > { %v4230_v60 = vsel %vm4181_vm9, %v16423_v26, %v4229_v52  ;;  %vm4150_vm5 = vcmp.eq.s32.totalorder %v12706_v8, 1  ;;  %v12788_v26 = vsel %vm4181_vm9, %v4229_v52, %v4231_v25  ;;  %v16424_v4 = vrot.slane %v12666_v6, 2  ;;  %v16455_v52 = vld [vmem:[#allocation107_spill] sm:$0xff] }
 0x45b   : > { %v4290_v12 = vsel %vm4147_vm8, %v4230_v60, %v3949_v45  ;;  %v4482_v45 = vsel %vm1309_vm14, %v4479_v46, %v4481_v57  ;;  %v4484_v60 = vsel %vm1309_vm14, %v4481_v57, %v4483_v40  ;;  %vm4428_vm8 = vcmp.eq.s32.totalorder %v12499_v14, 1 }
 0x45c   : > { %v12793_v56 = vsel %vm4181_vm9, %v4231_v25, %v16424_v4  ;;  %v12802_v63 = vsel %vm4430_vm10, %v4486_v55, %v4290_v12  ;;  %v3954_v7 = vsel %vm3884_vm3, %v3852_v37, %v3922_v38  ;;  %v12808_v31 = vsel %vm4423_vm4, %v12654_v41, %v4283_v62  ;;  %v12819_v25 = vpop.permute.xlu0 %4402 }
 0x45d   : > { %vm16425_vm12 = vcmp.eq.s32.totalorder %v16416_v48, 1  ;;  %vm4151_vm10 = vcmp.eq.s32.totalorder %v12687_v16, 1  ;;  %v4491_v59 = vrot.slane %v3954_v7, 6  ;;  %vm4434_vm4 = vcmp.eq.s32.totalorder %v12798_v49, 1  ;;  %v16480_v7 = vld [vmem:[#allocation116_spill] sm:$0xff] }
 0x45e   : > { %v12813_v46 = vsel %vm16425_vm12, %v12682_v19, %v4284_v11  ;;  %v3850_v37 = vadd.f32 %v12149_v18, %v12575_v3  ;;  %v16427_v48 = vrot.slane %v12762_v44, 2  ;;  %v16428_v57 = vmov %v16424_v4 }
 0x45f   : > { %v12826_v19 = vpack.c.bf16 %v12813_v46, %v12808_v31  ;;  %v3853_v55 = vadd.f32 %v12586_v36, %v12149_v18  ;;  %v3851_v38 = vadd.f32 %v12149_v18, %v12600_v22  ;;  %v12846_v3 = vsel %vm4425_vm6, %v12685_v30, %v12636_v21 }
 0x460   : > { %v4236_v12 = vsel %vm4181_vm9, %v16428_v57, %v16427_v48  ;;  %v4287_v11 = vsel %vm4144_vm2, %v12674_v9, %v12540_v20  ;;  %v4288_v36 = vsel %vm4145_vm0, %v12679_v50, %v12632_v27  ;;  %v12858_v18 = vsel %vm4429_vm15, %v4484_v60, %v4289_v47 }
 0x461   : > { %16426 = vst [vmem:[#allocation177_spill] sm:$0xff] %v12826_v19  ;;  %8406 = vmatprep.mubr.msk.bf16.mxu1 %vm1260_vm13, %v12826_v19  ;;  %vm4148_vm1 = vcmp.eq.s32.totalorder %v12641_v42, 1  ;;  %vm4433_vm11 = vcmp.eq.s32.totalorder %v12819_v25, 1  ;;  %vm4149_vm6 = vcmp.eq.s32.totalorder %v12629_v24, 1  ;;  %vm3882_vm3 = vcmp.gt.f32.partialorder %v3850_v37, 0.0 }
 0x462   : > { %v3920_v61 = vmul.f32 %v12156_v29, %v3850_v37  ;;  %vm3885_vm12 = vcmp.gt.f32.partialorder %v3853_v55, 0.0  ;;  %v3923_v20 = vmul.f32 %v12156_v29, %v3853_v55  ;;  %vm4431_vm2 = vcmp.eq.s32.totalorder %v12764_v28, 1 }
 0x463   : > { %vm4432_vm0 = vcmp.eq.s32.totalorder %v12744_v33, 1  ;;  %vm3883_vm15 = vcmp.gt.f32.partialorder %v3851_v38, 0.0  ;;  %v3921_v22 = vmul.f32 %v12156_v29, %v3851_v38  ;;  %v12871_v21 = vpack.c.bf16 %v12691_v2, %v12846_v3 }
 0x464   : > { %v3952_v27 = vsel %vm3882_vm3, %v3850_v37, %v3920_v61  ;;  %v3955_v9 = vsel %vm3885_vm12, %v3853_v55, %v3923_v20  ;;  %v12876_v50 = vsel %vm4427_vm7, %v4480_v35, %v4287_v11  ;;  %v12886_v37 = vsel %vm4428_vm8, %v4482_v45, %v4288_v36 }
 0x465   : > { %16429 = vst [vmem:[#allocation117_spill] sm:$0xff] %v12871_v21  ;;  %v4237_v30 = vrot.slane %v3952_v27, 2  ;;  %v4293_v0 = vsel %vm4150_vm5, %v4236_v12, %v3952_v27  ;;  %v4487_v47 = vrot.slane %v3952_v27, 6  ;;  %v4493_v60 = vrot.slane %v3955_v9, 6  ;;  %8407 = vmatmul.mubr.msk.bf16.gmra.mrb[20].mxu1 %vm1260_vm13, %v12871_v21  ;;  %v16505_v21 = vld [vmem:[#allocation128_spill] sm:$0xff] }
 0x466   : > { %v3953_v29 = vsel %vm3883_vm15, %v3851_v38, %v3921_v22  ;;  %v16430_v43 = vrot.slane %v12762_v44, 6  ;;  %v16431_v57 = vmov %v16427_v48  ;;  %v12900_v14 = vpack.c.bf16 %v12886_v37, %v12876_v50 }
 0x467   : > { %v4494_v8 = vsel %vm1309_vm14, %v4491_v59, %v4493_v60  ;;  %v4238_v12 = vsel %vm4181_vm9, %v16431_v57, %v4237_v30  ;;  %v4489_v55 = vrot.slane %v3953_v29, 6  ;;  %v12919_v30 = vpack.c.bf16 %v12802_v63, %v12858_v18  ;;  %v16437_v60 = vld [vmem:[#allocation45_spill] sm:$0xff]  ;;  %v16445_v57 = vld [vmem:[#allocation103_spill] sm:$0xff] }
 0x468   : > { %v4488_v35 = vsel %vm1309_vm14, %v16430_v43, %v4487_v47  ;;  %v4294_v38 = vsel %vm4151_vm10, %v4238_v12, %v3953_v29  ;;  %16432 = vst [vmem:[#allocation182_spill] sm:$0xff] %v12900_v14  ;;  %8410 = vmatprep.mubr.msk.bf16.mxu1 %vm1260_vm13, %v12900_v14  ;;  %v4291_v49 = vsel %vm4148_vm1, %v12788_v26, %v12666_v6  ;;  %v16438_v29 = vld [vmem:[#allocation89_spill] sm:$0xff]  ;;  %vm16439_vm9 = vcmask 1040384  }
 0x469   : > { %v4490_v36 = vsel %vm1309_vm14, %v4487_v47, %v4489_v55  ;;  %v4492_v61 = vsel %vm1309_vm14, %v4489_v55, %v4491_v59  ;;  %v12907_v20 = vsel %vm4434_vm4, %v4494_v8, %v4294_v38  ;;  %16435 = vst [vmem:[#allocation184_spill] sm:$0xff] %v12919_v30  ;;  %v4292_v59 = vsel %vm4149_vm6, %v12793_v56, %v12762_v44  ;;  %vm16444_vm7 = vmmov %vm16439_vm9  ;;  %v16447_v55 = vld [vmem:[#allocation104_spill] sm:$0xff]  ;;  %v16465_v26 = vld [vmem:[#allocation109_spill] sm:$0xff] }
 0x46a   : > { %16433 = vst [vmem:[#allocation181_spill] sm:$0xff] %v12907_v20  ;;  %v12911_v16 = vrot.slane %v12907_v20, 7  ;;  %v12931_v47 = vsel %vm4433_vm11, %v4492_v61, %v4293_v0  ;;  %v12936_v43 = vsel %vm16439_vm9, %v16438_v29, %v16437_v60  ;;  %v12939_v8 = vrot.slane %v12907_v20, 1  ;;  %v16443_v0 = vld [vmem:[#allocation52_spill] sm:$0xff]  ;;  %vm16449_vm10 = vmmov %vm16444_vm7  ;;  %v16451_v61 = vld [vmem:[#allocation122_spill] sm:$0xff] }
 0x46b   : > { %16436 = vst [vmem:[#allocation191_spill] sm:$0xff] %v12931_v47  ;;  %v12943_v42 = vsel %vm4431_vm2, %v4488_v35, %v4291_v49  ;;  %v12947_v24 = vsel %vm4432_vm0, %v4490_v36, %v4292_v59  ;;  %v12951_v6 = vpack.c.bf16 %v12907_v20, %v12931_v47  ;;  %v12962_v56 = vrot.slane %v12931_v47, 7  ;;  %vm16460_vm3 = vmmov %vm16444_vm7 }
 0x46c   : > { %16434 = vst [vmem:[#allocation186_spill] sm:$0xff] %v12911_v16  ;;  %v12959_v28 = vpack.c.bf16 %v12947_v24, %v12943_v42  ;;  %v12969_v35 = vsel %vm16444_vm7, %v16437_v60, %v16443_v0  ;;  %vm16446_vm5 = vcmp.eq.s32.totalorder %v16445_v57, 1  ;;  %vm16448_vm8 = vcmp.eq.s32.totalorder %v16447_v55, 1  ;;  %vm16464_vm12 = vmmov %vm16460_vm3 }
 0x46d   : > { %16440 = vst [vmem:[#allocation190_spill] sm:$0xff] %v12951_v6  ;;  %8411 = vmatmul.mubr.msk.bf16.gmra.mrb[24].mxu1 %vm1260_vm13, %v12919_v30  ;;  %16442 = vst [vmem:[#allocation198_spill] sm:$0xff] %v12962_v56  ;;  %v4669_v12 = vsel %vm16446_vm5, %v12936_v43, 0.0  ;;  %v4670_v38 = vsel %vm16448_vm8, %v12969_v35, 0.0  ;;  %v12982_v36 = vsel %vm16449_vm10, %v16443_v0, %v16437_v60  ;;  %vm16452_vm4 = vcmp.eq.s32.totalorder %v16451_v61, 1 }
 0x46e   : > { %16441 = vst [vmem:[#allocation200_spill] sm:$0xff] %v12959_v28  ;;  %8414 = vmatprep.mubr.msk.bf16.mxu1 %vm1260_vm13, %v12959_v28  ;;  %16450 = vst [vmem:[#allocation204_spill] sm:$0xff] %v12982_v36  ;;  %v12987_v49 = vsel %vm16452_vm4, %v16443_v0, 0.0  ;;  %v4699_v25 = vpack.c.bf16 %v4670_v38, %v4669_v12  ;;  %vm16456_vm11 = vcmp.eq.s32.totalorder %v16455_v52, 1  ;;  %v16459_v45 = vrot.slane %v12357_v32, 7  ;;  %v16461_v38 = vld [vmem:[#allocation112_spill] sm:$0xff] }
 0x46f   : > { %vm16453_vm1 = vmmov %vm16446_vm5  ;;  %v4672_v44 = vsel %vm16456_vm11, %v12982_v36, 0.0  ;;  %v16462_v51 = vrot.slane %v16461_v38, 7  ;;  %vm16466_vm2 = vcmp.eq.s32.totalorder %v16465_v26, 1  ;;  %v16476_v22 = vrot.slane %v12443_v10, 7 }
 0x470   : > { %v12992_v59 = vsel %vm16453_vm1, %v16443_v0, 0.0  ;;  %vm16457_vm6 = vmmov %vm16448_vm8  ;;  %v13006_v48 = vsel %vm16460_vm3, %v16437_v60, %v16459_v45  ;;  %v4700_v1 = vpack.c.bf16 %v4672_v44, %v12987_v49  ;;  %v16463_v4 = vmov %v16459_v45  ;;  %v16467_v45 = vld [vmem:[#allocation110_spill] sm:$0xff] }
 0x471   : > { %16454 = vst [vmem:[#allocation99_spill] sm:$0xff] %v12992_v59  ;;  %v13000_v27 = vsel %vm16457_vm6, %v12982_v36, 0.0  ;;  %v13016_v33 = vsel %vm16464_vm12, %v16463_v4, %v16462_v51  ;;  %v13021_v40 = vsel %vm16466_vm2, %v13006_v48, 0.0  ;;  %vm16468_vm0 = vcmp.eq.s32.totalorder %v16467_v45, 1  ;;  %vm16469_vm15 = vmmov %vm16453_vm1  ;;  %v16507_v59 = vld [vmem:[#allocation129_spill] sm:$0xff] }
 0x472   : > { %16458 = vst [vmem:[#allocation101_spill] sm:$0xff] %v13000_v27  ;;  %v13026_v60 = vsel %vm16468_vm0, %v13016_v33, 0.0  ;;  %v13031_v44 = vsel %vm16469_vm15, %v13006_v48, 0.0  ;;  %vm16471_vm9 = vmmov %vm16457_vm6  ;;  %v16473_v51 = vrot.slane %v12412_v53, 7  ;;  %v16474_v49 = vrot.slane %v16461_v38, 7 }
 0x473   : > { %16470 = vst [vmem:[#allocation124_spill] sm:$0xff] %v13031_v44  ;;  %v13036_v4 = vsel %vm16471_vm9, %v13016_v33, 0.0  ;;  %vm16475_vm7 = vmmov %vm16460_vm3  ;;  %vm16481_vm8 = vcmp.eq.s32.totalorder %v16480_v7, 1  ;;  %v16484_v9 = vrot.slane %v12479_v15, 7  ;;  %v16485_v57 = vmov %v16476_v22 }
 0x474   : > { %16472 = vst [vmem:[#allocation123_spill] sm:$0xff] %v13036_v4  ;;  %v13043_v12 = vsel %vm16475_vm7, %v16474_v49, %v16473_v51  ;;  %v16477_v11 = vmov %v16473_v51  ;;  %vm16478_vm5 = vmmov %vm16460_vm3  ;;  %v16482_v51 = vld [vmem:[#allocation118_spill] sm:$0xff]  ;;  %v16493_v44 = vrot.slane %v12545_v39, 7  ;;  %v16501_v14 = vrot.slane %v12550_v34, 7 }
 0x475   : > { %v13054_v55 = vsel %vm16478_vm5, %v16477_v11, %v16476_v22  ;;  %v13059_v62 = vsel %vm16481_vm8, %v13043_v12, 0.0  ;;  %vm16483_vm10 = vcmp.eq.s32.totalorder %v16482_v51, 1  ;;  %vm16486_vm4 = vmmov %vm16460_vm3  ;;  %v16489_v11 = vrot.slane %v16488_v58, 7  ;;  %8415 = vmatmul.mubr.msk.bf16.gmra.mrb[28].mxu1 %vm1260_vm13, %v12951_v6  ;;  %v16504_v6 = vld [vmem:[#allocation102_spill] sm:$0xff]  ;;  %v16534_v51 = vld [vmem:[#allocation137_spill] sm:$0xff] }
 0x476   : > { %16479 = vst [vmem:[#allocation114_spill] sm:$0xff] %v13054_v55  ;;  %v13064_v49 = vsel %vm16483_vm10, %v13054_v55, 0.0  ;;  %v13071_v41 = vsel %vm16486_vm4, %v16485_v57, %v16484_v9  ;;  %v16490_v22 = vmov %v16484_v9  ;;  %vm16491_vm1 = vmmov %vm16460_vm3  ;;  %v16497_v57 = vld [vmem:[#allocation121_spill] sm:$0xff]  ;;  %8420 = vmatprep.mubr.msk.bf16.mxu1 %vm1260_vm13, %v16504_v6  ;;  %vm16506_vm2 = vcmp.eq.s32.totalorder %v16505_v21, 1  ;;  %v16512_v9 = vld [vmem:[#allocation79_spill] sm:$0xff] }
 0x477   : > { %16487 = vst [vmem:[#allocation113_spill] sm:$0xff] %v13071_v41  ;;  %v13078_v29 = vsel %vm16491_vm1, %v16490_v22, %v16489_v11  ;;  %v16494_v4 = vmov %v16489_v11  ;;  %vm16495_vm11 = vmmov %vm16491_vm1  ;;  %vm16498_vm6 = vcmp.eq.s32.totalorder %v16497_v57, 1  ;;  %v16499_v11 = vld [vmem:[#allocation125_spill] sm:$0xff]  ;;  %vm16508_vm0 = vcmp.eq.s32.totalorder %v16507_v59, 1  ;;  %v16517_v59 = vld [vmem:[#allocation132_spill] sm:$0xff] }
 0x478   : > { %16492 = vst [vmem:[#allocation120_spill] sm:$0xff] %v13078_v29  ;;  %v13085_v28 = vsel %vm16495_vm11, %v16494_v4, %v16493_v44  ;;  %v13094_v30 = vsel %vm16498_vm6, %v13071_v41, 0.0  ;;  %vm16500_vm3 = vcmp.eq.s32.totalorder %v16499_v11, 1  ;;  %vm16502_vm12 = vmmov %vm16491_vm1  ;;  %v16509_v36 = vrot.slane %v12612_v17, 7  ;;  %v16523_v6 = vld [vmem:[#allocation133_spill] sm:$0xff]  ;;  %v16557_v41 = vld [vmem:[#allocation147_spill] sm:$0xff] }
 0x479   : > { %16496 = vst [vmem:[#allocation119_spill] sm:$0xff] %v13085_v28  ;;  %v13099_v22 = vsel %vm16500_vm3, %v13078_v29, 0.0  ;;  %v13106_v4 = vsel %vm16502_vm12, %v16493_v44, %v16501_v14  ;;  %v13115_v19 = vsel %vm16506_vm2, %v13085_v28, 0.0  ;;  %vm16510_vm15 = vmmov %vm16491_vm1  ;;  %v16513_v0 = vrot.slane %v16512_v9, 7  ;;  %v16540_v29 = vld [vmem:[#allocation140_spill] sm:$0xff] }
 0x47a   : > { %16503 = vst [vmem:[#allocation127_spill] sm:$0xff] %v13106_v4  ;;  %v13120_v27 = vsel %vm16508_vm0, %v13106_v4, 0.0  ;;  %v13127_v44 = vsel %vm16510_vm15, %v16501_v14, %v16509_v36  ;;  %v16514_v20 = vmov %v16509_v36  ;;  %vm16515_vm9 = vmmov %vm16491_vm1  ;;  %vm16518_vm7 = vcmp.eq.s32.totalorder %v16517_v59, 1 }
 0x47b   : > { %16511 = vst [vmem:[#allocation126_spill] sm:$0xff] %v13127_v44  ;;  %v13136_v21 = vsel %vm16515_vm9, %v16514_v20, %v16513_v0  ;;  %v13141_v11 = vsel %vm16518_vm7, %v13127_v44, 0.0  ;;  %v16519_v4 = vrot.slane %v12671_v13, 7  ;;  %v16520_v36 = vmov %v16513_v0  ;;  %vm16521_vm5 = vmmov %vm16491_vm1  ;;  %v16529_v44 = vld [vmem:[#allocation136_spill] sm:$0xff] }
 0x47c   : > { %16516 = vst [vmem:[#allocation131_spill] sm:$0xff] %v13136_v21  ;;  %vm16524_vm8 = vcmp.eq.s32.totalorder %v16523_v6, 1  ;;  %v16525_v20 = vrot.slane %v12698_v23, 7  ;;  %vm16527_vm10 = vmmov %vm16491_vm1  ;;  %vm16530_vm4 = vcmp.eq.s32.totalorder %v16529_v44, 1  ;;  %vm16535_vm11 = vcmp.eq.s32.totalorder %v16534_v51, 1 }
 0x47d   : > { %v13148_v14 = vsel %vm16521_vm5, %v16520_v36, %v16519_v4  ;;  %v13153_v57 = vsel %vm16524_vm8, %v13136_v21, 0.0  ;;  %v16526_v0 = vmov %v16519_v4  ;;  %v16531_v4 = vrot.slane %v12732_v5, 7  ;;  %vm16538_vm6 = vmmov %vm16491_vm1  ;;  %v16543_v21 = vld [vmem:[#allocation142_spill] sm:$0xff]  ;;  %8421 = vmatmul.mubr.msk.bf16.vlgmr.msra.gmra.mrb[32].mxu1 %vm1260_vm13, %v4699_v25 }
 0x47e   : > { %16522 = vst [vmem:[#allocation130_spill] sm:$0xff] %v13148_v14  ;;  %v13160_v59 = vsel %vm16527_vm10, %v16526_v0, %v16525_v20  ;;  %v13165_v28 = vsel %vm16530_vm4, %v13148_v14, 0.0  ;;  %v16532_v36 = vmov %v16525_v20  ;;  %v16536_v0 = vrot.slane %v12538_v54, 7  ;;  %vm16548_vm2 = vmmov %vm16491_vm1  ;;  %8424 = vmatprep.mubr.msk.bf16.mxu1 %vm1260_vm13, %v4700_v1 }
 0x47f   : > { %16528 = vst [vmem:[#allocation135_spill] sm:$0xff] %v13160_v59  ;;  %v13172_v6 = vsel %vm16491_vm1, %v16532_v36, %v16531_v4  ;;  %v13179_v20 = vsel %vm16535_vm11, %v13160_v59, 0.0  ;;  %v16537_v44 = vmov %v16531_v4  ;;  %vm16541_vm3 = vcmp.eq.s32.totalorder %v16540_v29, 1  ;;  %vm16552_vm0 = vmmov %vm16491_vm1 }
 0x480   : > { %16533 = vst [vmem:[#allocation134_spill] sm:$0xff] %v13172_v6  ;;  %v13186_v14 = vsel %vm16538_vm6, %v16537_v44, %v16536_v0  ;;  %v13191_v4 = vsel %vm16541_vm3, %v13172_v6, 0.0  ;;  %vm16544_vm12 = vcmp.eq.s32.totalorder %v16543_v21, 1  ;;  %v16546_v59 = vrot.slane %v12808_v31, 7  ;;  %v16554_v21 = vld [vmem:[#allocation146_spill] sm:$0xff]  ;;  %vm16562_vm7 = vmmov %vm16552_vm0 }
 0x481   : > { %16539 = vst [vmem:[#allocation139_spill] sm:$0xff] %v13186_v14  ;;  %16542 = vst [vmem:[#allocation138_spill] sm:$0xff] %v13191_v4  ;;  %v13198_v51 = vsel %vm16544_vm12, %v13186_v14, 0.0  ;;  %v16547_v7 = vmov %v16536_v0  ;;  %v16550_v0 = vrot.slane %v12813_v46, 7  ;;  %vm16555_vm15 = vcmp.eq.s32.totalorder %v16554_v21, 1 }
 0x482   : > { %16545 = vst [vmem:[#allocation144_spill] sm:$0xff] %v13198_v51  ;;  %v13205_v44 = vsel %vm16548_vm2, %v16547_v7, %v16546_v59  ;;  %v16551_v29 = vmov %v16546_v59  ;;  %vm16558_vm9 = vcmp.eq.s32.totalorder %v16557_v41, 1  ;;  %v16560_v59 = vrot.slane %v12846_v3, 7  ;;  %vm16566_vm5 = vmmov %vm16552_vm0  ;;  %v16568_v41 = vld [vmem:[#allocation151_spill] sm:$0xff] }
 0x483   : > { %16549 = vst [vmem:[#allocation143_spill] sm:$0xff] %v13205_v44  ;;  %v13212_v6 = vsel %vm16552_vm0, %v16551_v29, %v16550_v0  ;;  %v13219_v14 = vsel %vm16555_vm15, %v13205_v44, 0.0  ;;  %v16561_v45 = vmov %v16550_v0  ;;  %v16564_v36 = vrot.slane %v12691_v2, 7  ;;  %vm16573_vm10 = vmmov %vm16552_vm0  ;;  %v13257_v0 = vld [vmem:[%s15197_s5 + $0x6] sm:$0x3] }
 0x484   : > { %16553 = vst [vmem:[#allocation150_spill] sm:$0xff] %v13212_v6  ;;  %16556 = vst [vmem:[#allocation149_spill] sm:$0xff] %v13219_v14  ;;  %v13224_v7 = vsel %vm16558_vm9, %v13212_v6, 0.0  ;;  %v13231_v29 = vsel %vm16562_vm7, %v16561_v45, %v16560_v59  ;;  %v16565_v21 = vmov %v16560_v59  ;;  %vm16569_vm8 = vcmp.eq.s32.totalorder %v16568_v41, 1 }
 0x485   : > { %16559 = vst [vmem:[#allocation155_spill] sm:$0xff] %v13224_v7  ;;  %16563 = vst [vmem:[#allocation154_spill] sm:$0xff] %v13231_v29  ;;  %v13240_v44 = vsel %vm16566_vm5, %v16565_v21, %v16564_v36  ;;  %v13245_v6 = vsel %vm16569_vm8, %v13231_v29, 0.0  ;;  %v16571_v4 = vrot.slane %v12876_v50, 7  ;;  %v16572_v45 = vmov %v16564_v36  ;;  %v16576_v21 = vld [vmem:[#allocation153_spill] sm:$0xff] }
 0x486   : > { %16567 = vst [vmem:[#allocation160_spill] sm:$0xff] %v13240_v44  ;;  %16570 = vst [vmem:[#allocation159_spill] sm:$0xff] %v13245_v6  ;;  %vm16577_vm4 = vcmp.eq.s32.totalorder %v16576_v21, 1  ;;  %v16579_v41 = vrot.slane %v12886_v37, 7  ;;  %v16585_v29 = vrot.slane %v12858_v18, 7  ;;  %v16603_v6 = vrot.slane %v12943_v42, 7 }
 0x487   : > { %v13252_v59 = vsel %vm16573_vm10, %v16572_v45, %v16571_v4  ;;  %16575 = vst [vmem:[#allocation166_spill] sm:$0xff] %v13257_v0  ;;  %v13263_v36 = vsel %vm16577_vm4, %v13240_v44, 0.0  ;;  %v16580_v14 = vmov %v16571_v4  ;;  %vm16581_vm1 = vmmov %vm16552_vm0  ;;  %v16582_v4 = vld [vmem:[#allocation156_spill] sm:$0xff]  ;;  %v16589_v44 = vld [vmem:[#allocation111_spill] sm:$0xff] }
 0x488   : > { %16574 = vst [vmem:[#allocation167_spill] sm:$0xff] %v13252_v59  ;;  %16578 = vst [vmem:[#allocation81_spill] sm:$0xff] %v13263_v36  ;;  %v13270_v7 = vsel %vm16581_vm1, %v16580_v14, %v16579_v41  ;;  %vm16583_vm11 = vcmp.eq.s32.totalorder %v16582_v4, 1  ;;  %v16586_v25 = vmov %v16579_v41  ;;  %8453 = vmatpush3.bf16.msra.mxu1 %v16589_v44  ;;  %v16590_v14 = vld [vmem:[#allocation158_spill] sm:$0xff]  ;;  %v16594_v51 = vmov %v16585_v29 }
 0x489   : > { %v13275_v45 = vsel %vm16583_vm11, %v13252_v59, 0.0  ;;  %vm16587_vm6 = vmmov %vm16552_vm0  ;;  %vm16591_vm3 = vcmp.eq.s32.totalorder %v16590_v14, 1  ;;  %v16593_v59 = vrot.slane %v12802_v63, 7  ;;  %9150 = vmatprep.subr.msk.bf16.mxu1 %vm1309_vm14, %v13257_v0  ;;  %v16629_v0 = vld [vmem:[#allocation170_spill] sm:$0xff] }
 0x48a   : > { %16584 = vst [vmem:[#allocation42_spill] sm:$0xff] %v13275_v45  ;;  %v13282_v21 = vsel %vm16587_vm6, %v16586_v25, %v16585_v29  ;;  %v13291_v4 = vsel %vm16591_vm3, %v13270_v7, 0.0  ;;  %vm16595_vm12 = vmmov %vm16552_vm0  ;;  %v16597_v29 = vld [vmem:[#allocation162_spill] sm:$0xff]  ;;  %v16600_v25 = vld [vmem:[#allocation163_spill] sm:$0xff]  ;;  %vm16630_vm11 = vcmp.eq.s32.totalorder %v16629_v0, 1 }
 0x48b   : > { %16588 = vst [vmem:[#allocation40_spill] sm:$0xff] %v13282_v21  ;;  %16592 = vst [vmem:[#allocation49_spill] sm:$0xff] %v13291_v4  ;;  %v13298_v55 = vsel %vm16595_vm12, %v16594_v51, %v16593_v59  ;;  %vm16598_vm2 = vcmp.eq.s32.totalorder %v16597_v29, 1  ;;  %vm16601_vm0 = vcmp.eq.s32.totalorder %v16600_v25, 1  ;;  %v16604_v36 = vmov %v16593_v59  ;;  %v16611_v45 = vld [vmem:[#allocation141_spill] sm:$0xff] }
 0x48c   : > { %16596 = vst [vmem:[#allocation48_spill] sm:$0xff] %v13298_v55  ;;  %v13303_v44 = vsel %vm16598_vm2, %v13282_v21, 0.0  ;;  %v13310_v41 = vsel %vm16601_vm0, %v13298_v55, 0.0  ;;  %vm16605_vm15 = vmmov %vm16581_vm1  ;;  %v16607_v59 = vrot.slane %v12947_v24, 7  ;;  %v16608_v29 = vmov %v16603_v6  ;;  %v16641_v0 = vld [vmem:[#allocation41_spill] sm:$0xff] }
 0x48d   : > { %16599 = vst [vmem:[#allocation55_spill] sm:$0xff] %v13303_v44  ;;  %16602 = vst [vmem:[#allocation53_spill] sm:$0xff] %v13310_v41  ;;  %v13317_v51 = vsel %vm16605_vm15, %v16604_v36, %v16603_v6  ;;  %vm16612_vm7 = vcmp.eq.s32.totalorder %v16611_v45, 1  ;;  %v16614_v6 = vld [vmem:[#allocation165_spill] sm:$0xff]  ;;  %v16626_v45 = vld [vmem:[#allocation168_spill] sm:$0xff]  ;;  %vm16642_vm2 = vcmp.eq.s32.totalorder %v16641_v0, 1 }
 0x48e   : > { %16606 = vst [vmem:[#allocation61_spill] sm:$0xff] %v13317_v51  ;;  %vm16609_vm9 = vmmov %vm16581_vm1  ;;  %v13333_v4 = vsel %vm16612_vm7, %v13317_v51, 0.0  ;;  %vm16615_vm5 = vcmp.eq.s32.totalorder %v16614_v6, 1  ;;  %v16622_v44 = vld [vmem:[#allocation145_spill] sm:$0xff]  ;;  %v16625_v6 = vld [vmem:[#allocation63_spill] sm:$0xff] }
 0x48f   : > { %v13324_v14 = vsel %vm16609_vm9, %v16608_v29, %v16607_v59  ;;  %16613 = vst [vmem:[#allocation66_spill] sm:$0xff] %v13333_v4  ;;  %v16617_v29 = vmov %v16607_v59  ;;  %vm16618_vm8 = vmmov %vm16581_vm1  ;;  %vm16623_vm4 = vcmp.eq.s32.totalorder %v16622_v44, 1 }
 0x490   : > { %16610 = vst [vmem:[#allocation59_spill] sm:$0xff] %v13324_v14  ;;  %v13338_v36 = vsel %vm16615_vm5, %v13324_v14, 0.0  ;;  %v13344_v59 = vsel %vm16618_vm8, %v16617_v29, %v12962_v56  ;;  %vm16620_vm10 = vmmov %vm16581_vm1  ;;  %vm16627_vm1 = vcmask 1046528   ;;  %v13363_v14 = vrot.slane %v12931_v47, 1  ;;  %v16638_v29 = vld [vmem:[#allocation152_spill] sm:$0xff] }
 0x491   : > { %16616 = vst [vmem:[#allocation64_spill] sm:$0xff] %v13338_v36  ;;  %16619 = vst [vmem:[#allocation4_spill] sm:$0xff] %v13344_v59  ;;  %v13351_v1 = vsel %vm16620_vm10, %v12962_v56, %v12911_v16  ;;  %v13356_v41 = vsel %vm16623_vm4, %v13344_v59, 0.0  ;;  %v5143_v25 = vsel %vm16627_vm1, %v16626_v45, %v16625_v6  ;;  %v16632_v36 = vld [vmem:[#allocation68_spill] sm:$0xff]  ;;  %v16635_v56 = vld [vmem:[#allocation171_spill] sm:$0xff]  ;;  %vm16639_vm12 = vcmp.eq.s32.totalorder %v16638_v29, 1 }
 0x492   : > { %16621 = vst [vmem:[#allocation2_spill] sm:$0xff] %v13351_v1  ;;  %16624 = vst [vmem:[#allocation34_spill] sm:$0xff] %v13356_v41  ;;  %v13368_v4 = vsel %vm16630_vm11, %v13351_v1, 0.0  ;;  %vm16636_vm3 = vcmp.eq.s32.totalorder %v16635_v56, 1  ;;  %v13389_v1 = vsel %vm16642_vm2, %v16632_v36, 0.0  ;;  %v16652_v59 = vpack.c.bf16 %v13026_v60, %v13021_v40 }
 0x493   : > { %16628 = vst [vmem:[#allocation9_spill] sm:$0xff] %v13363_v14  ;;  %16631 = vst [vmem:[#allocation22_spill] sm:$0xff] %v13368_v4  ;;  %v13379_v45 = vsel %vm16636_vm3, %v5143_v25, 0.0  ;;  %v16646_v25 = vrot.slane %v12357_v32, 1  ;;  %v16649_v4 = vrot.slane %v16461_v38, 1  ;;  %v16677_v38 = vrot.slane %v12443_v10, 1 }
 0x494   : > { %vm16633_vm6 = vmmov %vm16627_vm1  ;;  %16637 = vst [vmem:[#allocation77_spill] sm:$0xff] %v13379_v45  ;;  %8425 = vmatmul.mubr.msk.bf16.gmra.mrb[4].mxu1 %vm1260_vm13, %v16652_v59  ;;  %v16664_v59 = vrot.slane %v12412_v53, 1  ;;  %v16688_v60 = vrot.slane %v16488_v58, 1  ;;  %v16691_v10 = vrot.slane %v12545_v39, 1  ;;  %v16700_v58 = vld [vmem:[#allocation180_spill] sm:$0xff]  ;;  %v16843_v45 = vld [vmem:[#allocation118_spill] sm:$0xff] }
 0x495   : > { %v13373_v44 = vsel %vm16633_vm6, %v16625_v6, %v16632_v36  ;;  %16643 = vst [vmem:[#allocation84_spill] sm:$0xff] %v13389_v1  ;;  %vm16644_vm0 = vmmov %vm16627_vm1  ;;  %v16650_v56 = vmov %v16646_v25 }
 0x496   : > { %16634 = vst [vmem:[#allocation35_spill] sm:$0xff] %v13373_v44  ;;  %v13384_v47 = vsel %vm16639_vm12, %v13373_v44, 0.0  ;;  %v13396_v16 = vsel %vm16644_vm0, %v16632_v36, %v16625_v6  ;;  %vm16647_vm15 = vmmov %vm16644_vm0 }
 0x497   : > { %16640 = vst [vmem:[#allocation20_spill] sm:$0xff] %v13384_v47  ;;  %16645 = vst [vmem:[#allocation80_spill] sm:$0xff] %v13396_v16  ;;  %v13402_v41 = vsel %vm16647_vm15, %v16625_v6, %v16646_v25  ;;  %v16653_v47 = vld [vmem:[#allocation157_spill] sm:$0xff] }
 0x498   : > { %16648 = vst [vmem:[#allocation93_spill] sm:$0xff] %v13402_v41  ;;  %vm16651_vm9 = vmmov %vm16644_vm0  ;;  %vm16654_vm7 = vcmp.eq.s32.totalorder %v16653_v47, 1  ;;  %v16656_v6 = vld [vmem:[#allocation173_spill] sm:$0xff] }
 0x499   : > { %v13409_v44 = vsel %vm16651_vm9, %v16650_v56, %v16649_v4  ;;  %v13418_v1 = vsel %vm16654_vm7, %v13396_v16, 0.0  ;;  %vm16657_vm5 = vcmp.eq.s32.totalorder %v16656_v6, 1  ;;  %vm16659_vm8 = vmmov %vm16639_vm12  ;;  %v16663_v56 = vpack.c.bf16 %v13064_v49, %v13059_v62  ;;  %v16670_v62 = vld [vmem:[#allocation175_spill] sm:$0xff] }
 0x49a   : > { %16655 = vst [vmem:[#allocation90_spill] sm:$0xff] %v13418_v1  ;;  %v13423_v25 = vsel %vm16657_vm5, %v13402_v41, 0.0  ;;  %v13428_v32 = vsel %vm16659_vm8, %v13396_v16, 0.0  ;;  %vm16661_vm10 = vmmov %vm16642_vm2  ;;  %v16665_v16 = vmov %v16649_v4  ;;  %vm16671_vm11 = vcmp.eq.s32.totalorder %v16670_v62, 1  ;;  %v16682_v1 = vld [vmem:[#allocation164_spill] sm:$0xff] }
 0x49b   : > { %16658 = vst [vmem:[#allocation97_spill] sm:$0xff] %v13423_v25  ;;  %16660 = vst [vmem:[#allocation91_spill] sm:$0xff] %v13428_v32  ;;  %v13433_v40 = vsel %vm16661_vm10, %v13402_v41, 0.0  ;;  %8428 = vmatprep.mubr.msk.bf16.mxu1 %vm1260_vm13, %v16663_v56  ;;  %v16667_v41 = vld [vmem:[#allocation161_spill] sm:$0xff]  ;;  %v16679_v32 = vrot.slane %v12479_v15, 1  ;;  %vm16701_vm10 = vcmp.eq.s32.totalorder %v16700_v58, 1 }
 0x49c   : > { %16662 = vst [vmem:[#allocation82_spill] sm:$0xff] %v13433_v40  ;;  %vm16666_vm4 = vmmov %vm16644_vm0  ;;  %vm16668_vm1 = vcmp.eq.s32.totalorder %v16667_v41, 1  ;;  %v16680_v40 = vmov %v16677_v38  ;;  %v16706_v15 = vld [vmem:[#allocation46_spill] sm:$0xff]  ;;  %v16712_v58 = vrot.slane %v16512_v9, 1  ;;  %v16724_v9 = vld [vmem:[#allocation187_spill] sm:$0xff] }
 0x49d   : > { %v13448_v6 = vsel %vm16666_vm4, %v16665_v16, %v16664_v59  ;;  %v13453_v47 = vsel %vm16668_vm1, %v13409_v44, 0.0  ;;  %vm16673_vm6 = vmmov %vm16659_vm8  ;;  %v16689_v29 = vmov %v16679_v32  ;;  %vm16707_vm1 = vcmp.eq.s32.totalorder %v16706_v15, 1 }
 0x49e   : > { %16669 = vst [vmem:[#allocation105_spill] sm:$0xff] %v13453_v47  ;;  %v13458_v49 = vsel %vm16671_vm11, %v13448_v6, 0.0  ;;  %v13463_v56 = vsel %vm16673_vm6, %v13409_v44, 0.0  ;;  %vm16675_vm3 = vmmov %vm16642_vm2  ;;  %v16695_v47 = vmov %v16691_v10 }
 0x49f   : > { %16672 = vst [vmem:[#allocation106_spill] sm:$0xff] %v13458_v49  ;;  %16674 = vst [vmem:[#allocation44_spill] sm:$0xff] %v13463_v56  ;;  %v13468_v16 = vsel %vm16675_vm3, %v13448_v6, 0.0 }
 0x4a0   : > { %16676 = vst [vmem:[#allocation76_spill] sm:$0xff] %v13468_v16  ;;  %vm16678_vm12 = vmmov %vm16644_vm0  ;;  %v16694_v16 = vrot.slane %v12550_v34, 1 }
 0x4a1   : > { %v13475_v4 = vsel %vm16678_vm12, %v16664_v59, %v16677_v38  ;;  %vm16681_vm2 = vmmov %vm16644_vm0  ;;  %vm16683_vm0 = vcmp.eq.s32.totalorder %v16682_v1, 1  ;;  %v16685_v38 = vld [vmem:[#allocation178_spill] sm:$0xff] }
 0x4a2   : > { %v13486_v0 = vsel %vm16681_vm2, %v16680_v40, %v16679_v32  ;;  %v13491_v53 = vsel %vm16683_vm0, %v13475_v4, 0.0  ;;  %vm16686_vm15 = vcmp.eq.s32.totalorder %v16685_v38, 1  ;;  %vm16690_vm9 = vmmov %vm16681_vm2  ;;  %v16692_v32 = vmov %v16688_v60 }
 0x4a3   : > { %16684 = vst [vmem:[#allocation73_spill] sm:$0xff] %v13491_v53  ;;  %v13496_v59 = vsel %vm16686_vm15, %v13486_v0, 0.0  ;;  %v13503_v56 = vsel %vm16690_vm9, %v16689_v29, %v16688_v60  ;;  %vm16693_vm7 = vmmov %vm16681_vm2  ;;  %v16697_v60 = vld [vmem:[#allocation169_spill] sm:$0xff]  ;;  %v16704_v39 = vmov %v16694_v16  ;;  %vm16725_vm0 = vcmp.eq.s32.totalorder %v16724_v9, 1 }
 0x4a4   : > { %16687 = vst [vmem:[#allocation45_spill] sm:$0xff] %v13496_v59  ;;  %v13510_v40 = vsel %vm16693_vm7, %v16692_v32, %v16691_v10  ;;  %vm16696_vm5 = vmmov %vm16681_vm2  ;;  %vm16698_vm8 = vcmp.eq.s32.totalorder %v16697_v60, 1  ;;  %v16703_v32 = vrot.slane %v12612_v17, 1  ;;  %v16709_v59 = vld [vmem:[#allocation183_spill] sm:$0xff]  ;;  %v16721_v17 = vrot.slane %v12698_v23, 1 }
 0x4a5   : > { %v13517_v49 = vsel %vm16696_vm5, %v16695_v47, %v16694_v16  ;;  %v13524_v29 = vsel %vm16698_vm8, %v13503_v56, 0.0  ;;  %v13529_v10 = vsel %vm16701_vm10, %v13510_v40, 0.0  ;;  %vm16705_vm4 = vmmov %vm16681_vm2  ;;  %vm16710_vm11 = vcmp.eq.s32.totalorder %v16709_v59, 1  ;;  %v16718_v59 = vld [vmem:[#allocation108_spill] sm:$0xff] }
 0x4a6   : > { %16699 = vst [vmem:[#allocation103_spill] sm:$0xff] %v13524_v29  ;;  %16702 = vst [vmem:[#allocation104_spill] sm:$0xff] %v13529_v10  ;;  %v13536_v47 = vsel %vm16705_vm4, %v16704_v39, %v16703_v32  ;;  %v13543_v53 = vsel %vm16707_vm1, %v13517_v49, 0.0  ;;  %v16713_v34 = vmov %v16703_v32  ;;  %v16715_v16 = vrot.slane %v12671_v13, 1  ;;  %v16730_v13 = vld [vmem:[#allocation176_spill] sm:$0xff] }
 0x4a7   : > { %16708 = vst [vmem:[#allocation122_spill] sm:$0xff] %v13543_v53  ;;  %v13548_v25 = vsel %vm16710_vm11, %v13536_v47, 0.0  ;;  %vm16714_vm6 = vmmov %vm16681_vm2  ;;  %v16716_v29 = vmov %v16712_v58  ;;  %vm16719_vm12 = vcmp.eq.s32.totalorder %v16718_v59, 1  ;;  %v16723_v39 = vpack.c.bf16 %v13099_v22, %v13094_v30 }
 0x4a8   : > { %16711 = vst [vmem:[#allocation112_spill] sm:$0xff] %v13548_v25  ;;  %v13555_v32 = vsel %vm16714_vm6, %v16713_v34, %v16712_v58  ;;  %vm16717_vm3 = vmmov %vm16681_vm2  ;;  %v16722_v58 = vmov %v16715_v16  ;;  %v16728_v53 = vmov %v16721_v17  ;;  %vm16731_vm9 = vcmp.eq.s32.totalorder %v16730_v13, 1 }
 0x4a9   : > { %v13564_v10 = vsel %vm16717_vm3, %v16716_v29, %v16715_v16  ;;  %v13569_v15 = vsel %vm16719_vm12, %v13555_v32, 0.0  ;;  %v13576_v34 = vsel %vm16681_vm2, %v16722_v58, %v16721_v17  ;;  %8429 = vmatmul.mubr.msk.bf16.gmra.mrb[8].mxu1 %vm1260_vm13, %v16723_v39  ;;  %v16727_v16 = vrot.slane %v12732_v5, 1  ;;  %vm16729_vm15 = vmmov %vm16681_vm2 }
 0x4aa   : > { %16720 = vst [vmem:[#allocation58_spill] sm:$0xff] %v13569_v15  ;;  %v13585_v29 = vsel %vm16725_vm0, %v13564_v10, 0.0  ;;  %v13597_v17 = vsel %vm16731_vm9, %v13576_v34, 0.0  ;;  %v16733_v30 = vrot.slane %v12538_v54, 1  ;;  %vm16735_vm7 = vmmov %vm16681_vm2  ;;  %v16736_v58 = vpack.c.bf16 %v13120_v27, %v13115_v19 }
 0x4ab   : > { %16726 = vst [vmem:[#allocation102_spill] sm:$0xff] %v13585_v29  ;;  %v13592_v25 = vsel %vm16729_vm15, %v16728_v53, %v16727_v16  ;;  %16732 = vst [vmem:[#allocation79_spill] sm:$0xff] %v13597_v17  ;;  %v16734_v22 = vmov %v16727_v16  ;;  %v16737_v53 = vld [vmem:[#allocation189_spill] sm:$0xff]  ;;  %v16740_v13 = vrot.slane %v12808_v31, 1  ;;  %v16749_v15 = vrot.slane %v12813_v46, 1  ;;  %v16758_v31 = vld [vmem:[#allocation194_spill] sm:$0xff] }
 0x4ac   : > { %v13604_v39 = vsel %vm16735_vm7, %v16734_v22, %v16733_v30  ;;  %8432 = vmatprep.mubr.msk.bf16.mxu1 %vm1260_vm13, %v16736_v58  ;;  %vm16738_vm5 = vcmp.eq.s32.totalorder %v16737_v53, 1  ;;  %v16741_v5 = vmov %v16733_v30  ;;  %vm16742_vm8 = vmmov %vm16681_vm2  ;;  %v16743_v22 = vld [vmem:[#allocation179_spill] sm:$0xff]  ;;  %v16746_v58 = vld [vmem:[#allocation192_spill] sm:$0xff]  ;;  %vm16759_vm3 = vcmp.eq.s32.totalorder %v16758_v31, 1 }
 0x4ad   : > { %v13615_v16 = vsel %vm16738_vm5, %v13592_v25, 0.0  ;;  %v13622_v30 = vsel %vm16742_vm8, %v16741_v5, %v16740_v13  ;;  %vm16744_vm10 = vcmp.eq.s32.totalorder %v16743_v22, 1  ;;  %vm16747_vm4 = vcmp.eq.s32.totalorder %v16746_v58, 1  ;;  %vm16751_vm1 = vmmov %vm16681_vm2  ;;  %v16755_v17 = vld [vmem:[#allocation185_spill] sm:$0xff]  ;;  %v16769_v31 = vld [vmem:[#allocation188_spill] sm:$0xff] }
 0x4ae   : > { %16739 = vst [vmem:[#allocation111_spill] sm:$0xff] %v13615_v16  ;;  %v13627_v19 = vsel %vm16744_vm10, %v13604_v39, 0.0  ;;  %v13634_v23 = vsel %vm16747_vm4, %v13622_v30, 0.0  ;;  %v16750_v54 = vmov %v16740_v13  ;;  %v16752_v5 = vrot.slane %v12846_v3, 1  ;;  %vm16754_vm11 = vmmov %vm16751_vm1 }
 0x4af   : > { %16745 = vst [vmem:[#allocation63_spill] sm:$0xff] %v13627_v19  ;;  %16748 = vst [vmem:[#allocation68_spill] sm:$0xff] %v13634_v23  ;;  %v13641_v13 = vsel %vm16751_vm1, %v16750_v54, %v16749_v15  ;;  %v16753_v29 = vmov %v16749_v15  ;;  %vm16756_vm6 = vcmp.eq.s32.totalorder %v16755_v17, 1  ;;  %v16761_v54 = vrot.slane %v12691_v2, 1 }
 0x4b0   : > { %v13648_v22 = vsel %vm16754_vm11, %v16753_v29, %v16752_v5  ;;  %v13655_v16 = vsel %vm16756_vm6, %v13641_v13, 0.0  ;;  %v16762_v46 = vmov %v16752_v5  ;;  %vm16763_vm12 = vmmov %vm16751_vm1  ;;  %v16765_v27 = vrot.slane %v12876_v50, 1  ;;  %v16776_v5 = vld [vmem:[#allocation196_spill] sm:$0xff] }
 0x4b1   : > { %16757 = vst [vmem:[#allocation152_spill] sm:$0xff] %v13655_v16  ;;  %v13660_v15 = vsel %vm16759_vm3, %v13648_v22, 0.0  ;;  %v13667_v29 = vsel %vm16763_vm12, %v16762_v46, %v16761_v54  ;;  %v16766_v19 = vmov %v16761_v54  ;;  %vm16767_vm2 = vmmov %vm16751_vm1  ;;  %vm16770_vm0 = vcmp.eq.s32.totalorder %v16769_v31, 1 }
 0x4b2   : > { %16760 = vst [vmem:[#allocation41_spill] sm:$0xff] %v13660_v15  ;;  %16764 = vst [vmem:[#allocation161_spill] sm:$0xff] %v13667_v29  ;;  %v13676_v23 = vsel %vm16767_vm2, %v16766_v19, %v16765_v27  ;;  %v13681_v17 = vsel %vm16770_vm0, %v13667_v29, 0.0  ;;  %v16772_v3 = vrot.slane %v12886_v37, 1  ;;  %v16773_v54 = vmov %v16765_v27  ;;  %v16782_v15 = vld [vmem:[#allocation193_spill] sm:$0xff] }
 0x4b3   : > { %16768 = vst [vmem:[#allocation175_spill] sm:$0xff] %v13676_v23  ;;  %16771 = vst [vmem:[#allocation164_spill] sm:$0xff] %v13681_v17  ;;  %vm16777_vm9 = vcmp.eq.s32.totalorder %v16776_v5, 1  ;;  %v16779_v2 = vrot.slane %v12858_v18, 1  ;;  %vm16783_vm5 = vcmp.eq.s32.totalorder %v16782_v15, 1  ;;  %v16785_v50 = vrot.slane %v12802_v63, 1 }
 0x4b4   : > { %vm16774_vm15 = vmmov %vm16751_vm1  ;;  %v13693_v16 = vsel %vm16777_vm9, %v13676_v23, 0.0  ;;  %v16780_v19 = vmov %v16772_v3  ;;  %v16788_v37 = vld [vmem:[#allocation197_spill] sm:$0xff]  ;;  %v16794_v18 = vld [vmem:[#allocation195_spill] sm:$0xff] }
 0x4b5   : > { %v13688_v46 = vsel %vm16774_vm15, %v16773_v54, %v16772_v3  ;;  %16778 = vst [vmem:[#allocation169_spill] sm:$0xff] %v13693_v16  ;;  %vm16781_vm7 = vmmov %vm16751_vm1  ;;  %v16786_v3 = vmov %v16779_v2  ;;  %vm16789_vm10 = vcmp.eq.s32.totalorder %v16788_v37, 1  ;;  %v16792_v15 = vmov %v16785_v50  ;;  %v16797_v5 = vld [vmem:[#allocation201_spill] sm:$0xff] }
 0x4b6   : > { %16775 = vst [vmem:[#allocation178_spill] sm:$0xff] %v13688_v46  ;;  %v13700_v27 = vsel %vm16781_vm7, %v16780_v19, %v16779_v2  ;;  %v13705_v31 = vsel %vm16783_vm5, %v13688_v46, 0.0  ;;  %vm16787_vm8 = vmmov %vm16751_vm1  ;;  %v16791_v19 = vrot.slane %v12943_v42, 1  ;;  %vm16798_vm11 = vcmp.eq.s32.totalorder %v16797_v5, 1 }
 0x4b7   : > { %16784 = vst [vmem:[#allocation108_spill] sm:$0xff] %v13705_v31  ;;  %v13712_v54 = vsel %vm16787_vm8, %v16786_v3, %v16785_v50  ;;  %v13719_v2 = vsel %vm16789_vm10, %v13700_v27, 0.0  ;;  %vm16793_vm4 = vmmov %vm16751_vm1  ;;  %vm16795_vm1 = vcmp.eq.s32.totalorder %v16794_v18, 1  ;;  %v16800_v16 = vrot.slane %v12947_v24, 1  ;;  %v16818_v31 = vld [vmem:[#allocation88_spill] sm:$0xff] }
 0x4b8   : > { %16790 = vst [vmem:[#allocation187_spill] sm:$0xff] %v13719_v2  ;;  %v13726_v46 = vsel %vm16793_vm4, %v16792_v15, %v16791_v19  ;;  %v13731_v50 = vsel %vm16795_vm1, %v13712_v54, 0.0  ;;  %v16801_v63 = vmov %v16791_v19  ;;  %vm16802_vm6 = vmmov %vm16767_vm2  ;;  %v16805_v3 = vpack.c.bf16 %v13153_v57, %v13141_v11  ;;  %v16806_v2 = vld [vmem:[#allocation199_spill] sm:$0xff]  ;;  %v16825_v11 = vld [vmem:[#allocation94_spill] sm:$0xff] }
 0x4b9   : > { %16796 = vst [vmem:[#allocation205_spill] sm:$0xff] %v13731_v50  ;;  %v13738_v17 = vsel %vm16798_vm11, %v13726_v46, 0.0  ;;  %v13745_v15 = vsel %vm16802_vm6, %v16801_v63, %v16800_v16  ;;  %v16803_v19 = vmov %v16800_v16  ;;  %vm16804_vm3 = vmmov %vm16767_vm2  ;;  %vm16807_vm12 = vcmp.eq.s32.totalorder %v16806_v2, 1  ;;  %v16809_v16 = vld [vmem:[#allocation203_spill] sm:$0xff] }
 0x4ba   : > { %16799 = vst [vmem:[#allocation206_spill] sm:$0xff] %v13738_v17  ;;  %v13751_v18 = vsel %vm16804_vm3, %v16803_v19, %v13363_v14  ;;  %8433 = vmatmul.mubr.msk.bf16.gmra.mrb[12].mxu1 %vm1260_vm13, %v16805_v3  ;;  %v13762_v42 = vsel %vm16807_vm12, %v13745_v15, 0.0  ;;  %vm16810_vm2 = vcmp.eq.s32.totalorder %v16809_v16, 1  ;;  %vm16812_vm0 = vmmov %vm16804_vm3  ;;  %v16814_v57 = vpack.c.bf16 %v13179_v20, %v13165_v28  ;;  %v16815_v3 = vld [vmem:[#allocation202_spill] sm:$0xff]  ;;  %v16821_v17 = vld [vmem:[#allocation92_spill] sm:$0xff] }
 0x4bb   : > { %16808 = vst [vmem:[#allocation207_spill] sm:$0xff] %v13762_v42  ;;  %v13767_v24 = vsel %vm16810_vm2, %v13751_v18, 0.0  ;;  %v13772_v63 = vsel %vm16812_vm0, %v13363_v14, %v12939_v8  ;;  %vm16816_vm15 = vcmp.eq.s32.totalorder %v16815_v3, 1  ;;  %vm16819_vm9 = vcmp.eq.s32.totalorder %v16818_v31, 1  ;;  %v16842_v28 = vld [vmem:[#allocation120_spill] sm:$0xff] }
 0x4bc   : > { %16811 = vst [vmem:[#allocation208_spill] sm:$0xff] %v13767_v24  ;;  %16813 = vst [vmem:[#allocation209_spill] sm:$0xff] %v13772_v63  ;;  %8436 = vmatprep.mubr.msk.bf16.mxu1 %vm1260_vm13, %v16814_v57  ;;  %v13783_v19 = vsel %vm16816_vm15, %v13772_v63, 0.0  ;;  %v13788_v50 = vsel %vm16819_vm9, %v12939_v8, 0.0  ;;  %vm16822_vm7 = vcmp.eq.s32.totalorder %v16821_v17, 1  ;;  %vm16826_vm5 = vcmp.eq.s32.totalorder %v16825_v11, 1 }
 0x4bd   : > { %16817 = vst [vmem:[#allocation202_spill] sm:$0xff] %v13783_v19  ;;  %16820 = vst [vmem:[#allocation88_spill] sm:$0xff] %v13788_v50  ;;  %v13793_v14 = vsel %vm16822_vm7, %v12936_v43, 0.0  ;;  %v13802_v42 = vsel %vm16826_vm5, %v12969_v35, 0.0  ;;  %vm16828_vm8 = vcmp.eq.s32.totalorder %v16451_v61, 1  ;;  %vm16830_vm10 = vcmp.eq.s32.totalorder %v16455_v52, 1 }
 0x4be   : > { %16823 = vst [vmem:[#allocation92_spill] sm:$0xff] %v13793_v14  ;;  %16827 = vst [vmem:[#allocation94_spill] sm:$0xff] %v13802_v42  ;;  %v13807_v24 = vsel %vm16828_vm8, %v13006_v48, 0.0  ;;  %v13814_v20 = vsel %vm16830_vm10, %v13016_v33, 0.0  ;;  %vm16832_vm4 = vcmp.eq.s32.totalorder %v16465_v26, 1  ;;  %v16834_v35 = vld [vmem:[#allocation114_spill] sm:$0xff] }
 0x4bf   : > { %16829 = vst [vmem:[#allocation210_spill] sm:$0xff] %v13807_v24  ;;  %16831 = vst [vmem:[#allocation211_spill] sm:$0xff] %v13814_v20  ;;  %v13819_v57 = vsel %vm16832_vm4, %v13043_v12, 0.0  ;;  %v16835_v19 = vld [vmem:[#allocation110_spill] sm:$0xff]  ;;  %v16838_v14 = vld [vmem:[#allocation113_spill] sm:$0xff]  ;;  %vm16844_vm6 = vcmp.eq.s32.totalorder %v16843_v45, 1 }
 0x4c0   : > { %16833 = vst [vmem:[#allocation212_spill] sm:$0xff] %v13819_v57  ;;  %vm16836_vm1 = vcmp.eq.s32.totalorder %v16835_v19, 1  ;;  %v16839_v42 = vld [vmem:[#allocation116_spill] sm:$0xff]  ;;  %v13838_v26 = vsel %vm16844_vm6, %v16842_v28, 0.0  ;;  %v16846_v52 = vld [vmem:[#allocation119_spill] sm:$0xff]  ;;  %v16851_v43 = vld [vmem:[#allocation125_spill] sm:$0xff] }
 0x4c1   : > { %v13824_v50 = vsel %vm16836_vm1, %v16834_v35, 0.0  ;;  %vm16840_vm11 = vcmp.eq.s32.totalorder %v16839_v42, 1  ;;  %16845 = vst [vmem:[#allocation215_spill] sm:$0xff] %v13838_v26  ;;  %v16847_v35 = vld [vmem:[#allocation121_spill] sm:$0xff]  ;;  %v16850_v24 = vld [vmem:[#allocation127_spill] sm:$0xff]  ;;  %vm16852_vm12 = vcmp.eq.s32.totalorder %v16851_v43, 1 }
 0x4c2   : > { %16837 = vst [vmem:[#allocation213_spill] sm:$0xff] %v13824_v50  ;;  %v13833_v33 = vsel %vm16840_vm11, %v16838_v14, 0.0  ;;  %vm16848_vm3 = vcmp.eq.s32.totalorder %v16847_v35, 1  ;;  %v13850_v57 = vsel %vm16852_vm12, %v16850_v24, 0.0  ;;  %v16854_v50 = vld [vmem:[#allocation126_spill] sm:$0xff]  ;;  %v16855_v20 = vld [vmem:[#allocation128_spill] sm:$0xff] }
 0x4c3   : > { %16841 = vst [vmem:[#allocation214_spill] sm:$0xff] %v13833_v33  ;;  %v13845_v48 = vsel %vm16848_vm3, %v16846_v52, 0.0  ;;  %16853 = vst [vmem:[#allocation217_spill] sm:$0xff] %v13850_v57  ;;  %vm16856_vm2 = vcmp.eq.s32.totalorder %v16855_v20, 1  ;;  %v16858_v28 = vld [vmem:[#allocation131_spill] sm:$0xff]  ;;  %v16859_v19 = vld [vmem:[#allocation129_spill] sm:$0xff] }
 0x4c4   : > { %16849 = vst [vmem:[#allocation216_spill] sm:$0xff] %v13845_v48  ;;  %v13855_v42 = vsel %vm16856_vm2, %v16854_v50, 0.0  ;;  %vm16860_vm0 = vcmp.eq.s32.totalorder %v16859_v19, 1  ;;  %v16862_v26 = vld [vmem:[#allocation130_spill] sm:$0xff]  ;;  %v16863_v35 = vld [vmem:[#allocation132_spill] sm:$0xff]  ;;  %v16866_v43 = vld [vmem:[#allocation135_spill] sm:$0xff] }
 0x4c5   : > { %16857 = vst [vmem:[#allocation218_spill] sm:$0xff] %v13855_v42  ;;  %v13862_v33 = vsel %vm16860_vm0, %v16858_v28, 0.0  ;;  %vm16864_vm15 = vcmp.eq.s32.totalorder %v16863_v35, 1  ;;  %v16867_v24 = vld [vmem:[#allocation133_spill] sm:$0xff]  ;;  %v16870_v48 = vld [vmem:[#allocation134_spill] sm:$0xff]  ;;  %v16871_v57 = vld [vmem:[#allocation136_spill] sm:$0xff] }
 0x4c6   : > { %16861 = vst [vmem:[#allocation219_spill] sm:$0xff] %v13862_v33  ;;  %v13867_v52 = vsel %vm16864_vm15, %v16862_v26, 0.0  ;;  %vm16868_vm9 = vcmp.eq.s32.totalorder %v16867_v24, 1  ;;  %vm16872_vm7 = vcmp.eq.s32.totalorder %v16871_v57, 1  ;;  %v16874_v28 = vld [vmem:[#allocation139_spill] sm:$0xff]  ;;  %v16875_v35 = vld [vmem:[#allocation137_spill] sm:$0xff] }
 0x4c7   : > { %16865 = vst [vmem:[#allocation220_spill] sm:$0xff] %v13867_v52  ;;  %v13872_v14 = vsel %vm16868_vm9, %v16866_v43, 0.0  ;;  %v13881_v19 = vsel %vm16872_vm7, %v16870_v48, 0.0  ;;  %vm16876_vm5 = vcmp.eq.s32.totalorder %v16875_v35, 1  ;;  %v16878_v50 = vld [vmem:[#allocation144_spill] sm:$0xff]  ;;  %v16879_v24 = vld [vmem:[#allocation138_spill] sm:$0xff] }
 0x4c8   : > { %16869 = vst [vmem:[#allocation221_spill] sm:$0xff] %v13872_v14  ;;  %16873 = vst [vmem:[#allocation222_spill] sm:$0xff] %v13881_v19  ;;  %v13886_v26 = vsel %vm16876_vm5, %v16874_v28, 0.0  ;;  %v16880_v43 = vpack.c.bf16 %v16878_v50, %v16879_v24  ;;  %v16881_v42 = vld [vmem:[#allocation143_spill] sm:$0xff]  ;;  %v16882_v45 = vld [vmem:[#allocation140_spill] sm:$0xff]  ;;  %vm16930_vm7 = vcmask 1040384  }
 0x4c9   : > { %16877 = vst [vmem:[#allocation223_spill] sm:$0xff] %v13886_v26  ;;  %vm16883_vm8 = vcmp.eq.s32.totalorder %v16882_v45, 1  ;;  %v16885_v14 = vld [vmem:[#allocation150_spill] sm:$0xff]  ;;  %v16893_v50 = vld [vmem:[#allocation155_spill] sm:$0xff]  ;;  %v16894_v24 = vld [vmem:[#allocation149_spill] sm:$0xff] }
 0x4ca   : > { %8437 = vmatmul.mubr.msk.bf16.gmra.mrb[16].mxu1 %vm1260_vm13, %v16880_v43  ;;  %v13897_v52 = vsel %vm16883_vm8, %v16881_v42, 0.0  ;;  %v16886_v33 = vld [vmem:[#allocation142_spill] sm:$0xff]  ;;  %v16895_v43 = vpack.c.bf16 %v16893_v50, %v16894_v24  ;;  %v16896_v19 = vld [vmem:[#allocation160_spill] sm:$0xff]  ;;  %v16897_v26 = vld [vmem:[#allocation147_spill] sm:$0xff] }
 0x4cb   : > { %16884 = vst [vmem:[#allocation144_spill] sm:$0xff] %v13897_v52  ;;  %vm16887_vm10 = vcmp.eq.s32.totalorder %v16886_v33, 1  ;;  %v16889_v35 = vld [vmem:[#allocation154_spill] sm:$0xff]  ;;  %vm16898_vm1 = vcmp.eq.s32.totalorder %v16897_v26, 1  ;;  %v16900_v33 = vld [vmem:[#allocation167_spill] sm:$0xff] }
 0x4cc   : > { %v13902_v57 = vsel %vm16887_vm10, %v16885_v14, 0.0  ;;  %v16890_v28 = vld [vmem:[#allocation146_spill] sm:$0xff]  ;;  %8440 = vmatprep.mubr.msk.bf16.mxu1 %vm1260_vm13, %v16895_v43  ;;  %v13918_v45 = vsel %vm16898_vm1, %v16896_v19, 0.0  ;;  %v16901_v14 = vld [vmem:[#allocation151_spill] sm:$0xff]  ;;  %v16907_v43 = vld [vmem:[#allocation156_spill] sm:$0xff] }
 0x4cd   : > { %16888 = vst [vmem:[#allocation138_spill] sm:$0xff] %v13902_v57  ;;  %vm16891_vm4 = vcmp.eq.s32.totalorder %v16890_v28, 1  ;;  %16899 = vst [vmem:[#allocation155_spill] sm:$0xff] %v13918_v45  ;;  %vm16902_vm11 = vcmp.eq.s32.totalorder %v16901_v14, 1  ;;  %v16904_v28 = vld [vmem:[#allocation153_spill] sm:$0xff]  ;;  %vm16908_vm3 = vcmp.eq.s32.totalorder %v16907_v43, 1 }
 0x4ce   : > { %v13907_v48 = vsel %vm16891_vm4, %v16889_v35, 0.0  ;;  %v13923_v42 = vsel %vm16902_vm11, %v16900_v33, 0.0  ;;  %vm16905_vm6 = vcmp.eq.s32.totalorder %v16904_v28, 1  ;;  %v13937_v20 = vsel %vm16908_vm3, %v13282_v21, 0.0  ;;  %v16910_v52 = vld [vmem:[#allocation158_spill] sm:$0xff]  ;;  %v16917_v24 = vld [vmem:[#allocation163_spill] sm:$0xff] }
 0x4cf   : > { %16892 = vst [vmem:[#allocation224_spill] sm:$0xff] %v13907_v48  ;;  %16903 = vst [vmem:[#allocation149_spill] sm:$0xff] %v13923_v42  ;;  %v13928_v35 = vsel %vm16905_vm6, %v13270_v7, 0.0  ;;  %vm16911_vm12 = vcmp.eq.s32.totalorder %v16910_v52, 1  ;;  %v16913_v14 = vld [vmem:[#allocation162_spill] sm:$0xff]  ;;  %v16916_v48 = vld [vmem:[#allocation59_spill] sm:$0xff] }
 0x4d0   : > { %16906 = vst [vmem:[#allocation160_spill] sm:$0xff] %v13928_v35  ;;  %16909 = vst [vmem:[#allocation147_spill] sm:$0xff] %v13937_v20  ;;  %v13942_v57 = vsel %vm16911_vm12, %v13298_v55, 0.0  ;;  %vm16914_vm2 = vcmp.eq.s32.totalorder %v16913_v14, 1  ;;  %vm16918_vm0 = vcmp.eq.s32.totalorder %v16917_v24, 1  ;;  %v16920_v35 = vld [vmem:[#allocation4_spill] sm:$0xff] }
 0x4d1   : > { %16912 = vst [vmem:[#allocation167_spill] sm:$0xff] %v13942_v57  ;;  %v13949_v50 = vsel %vm16914_vm2, %v13317_v51, 0.0  ;;  %v13954_v42 = vsel %vm16918_vm0, %v16916_v48, 0.0  ;;  %v16921_v45 = vld [vmem:[#allocation141_spill] sm:$0xff]  ;;  %v16924_v55 = vld [vmem:[#allocation2_spill] sm:$0xff]  ;;  %vm16953_vm6 = vcmp.eq.s32.totalorder %v16667_v41, 1 }
 0x4d2   : > { %16915 = vst [vmem:[#allocation225_spill] sm:$0xff] %v13949_v50  ;;  %16919 = vst [vmem:[#allocation226_spill] sm:$0xff] %v13954_v42  ;;  %vm16922_vm15 = vcmp.eq.s32.totalorder %v16921_v45, 1  ;;  %v16925_v28 = vld [vmem:[#allocation165_spill] sm:$0xff]  ;;  %v16928_v57 = vld [vmem:[#allocation198_spill] sm:$0xff]  ;;  %vm16955_vm3 = vcmp.eq.s32.totalorder %v16670_v62, 1 }
 0x4d3   : > { %v13959_v43 = vsel %vm16922_vm15, %v16920_v35, 0.0  ;;  %vm16926_vm9 = vcmp.eq.s32.totalorder %v16925_v28, 1  ;;  %v16929_v14 = vld [vmem:[#allocation186_spill] sm:$0xff]  ;;  %v16931_v24 = vld [vmem:[#allocation145_spill] sm:$0xff]  ;;  %v16938_v28 = vld [vmem:[#allocation191_spill] sm:$0xff]  ;;  %vm16960_vm12 = vcmp.eq.s32.totalorder %v16682_v1, 1 }
 0x4d4   : > { %16923 = vst [vmem:[#allocation227_spill] sm:$0xff] %v13959_v43  ;;  %v13966_v20 = vsel %vm16926_vm9, %v16924_v55, 0.0  ;;  %v13971_v51 = vsel %vm16930_vm7, %v16929_v14, %v16928_v57  ;;  %vm16932_vm5 = vcmp.eq.s32.totalorder %v16931_v24, 1  ;;  %v16934_v52 = vld [vmem:[#allocation170_spill] sm:$0xff]  ;;  %v16937_v42 = vld [vmem:[#allocation181_spill] sm:$0xff]  ;;  %v16940_v35 = vld [vmem:[#allocation35_spill] sm:$0xff] }
 0x4d5   : > { %16927 = vst [vmem:[#allocation228_spill] sm:$0xff] %v13966_v20  ;;  %v13976_v48 = vsel %vm16932_vm5, %v16929_v14, 0.0  ;;  %vm16935_vm8 = vcmp.eq.s32.totalorder %v16934_v52, 1  ;;  %v13987_v55 = vpack.c.bf16 %v16938_v28, %v16937_v42  ;;  %v16941_v57 = vld [vmem:[#allocation148_spill] sm:$0xff]  ;;  %v16944_v14 = vld [vmem:[#allocation171_spill] sm:$0xff]  ;;  %v16947_v52 = vld [vmem:[#allocation157_spill] sm:$0xff] }
 0x4d6   : > { %16933 = vst [vmem:[#allocation229_spill] sm:$0xff] %v13976_v48  ;;  %v13983_v50 = vsel %vm16935_vm8, %v13971_v51, 0.0  ;;  %vm16942_vm10 = vcmp.eq.s32.totalorder %v16941_v57, 1  ;;  %vm16945_vm4 = vcmp.eq.s32.totalorder %v16944_v14, 1  ;;  %vm16948_vm1 = vcmp.eq.s32.totalorder %v16947_v52, 1  ;;  %v16950_v42 = vld [vmem:[#allocation173_spill] sm:$0xff] }
 0x4d7   : > { %16936 = vst [vmem:[#allocation170_spill] sm:$0xff] %v13983_v50  ;;  %16939 = vst [vmem:[#allocation181_spill] sm:$0xff] %v13987_v55  ;;  %v13992_v21 = vsel %vm16942_vm10, %v16940_v35, 0.0  ;;  %v13999_v45 = vsel %vm16945_vm4, %v16632_v36, 0.0  ;;  %v14004_v43 = vsel %vm16948_vm1, %v13409_v44, 0.0  ;;  %vm16951_vm11 = vcmp.eq.s32.totalorder %v16950_v42, 1 }
 0x4d8   : > { %16943 = vst [vmem:[#allocation191_spill] sm:$0xff] %v13992_v21  ;;  %16946 = vst [vmem:[#allocation35_spill] sm:$0xff] %v13999_v45  ;;  %v14009_v28 = vsel %vm16951_vm11, %v13448_v6, 0.0  ;;  %v14018_v36 = vsel %vm16953_vm6, %v13475_v4, 0.0  ;;  %v14023_v44 = vsel %vm16955_vm3, %v13486_v0, 0.0  ;;  %v16957_v55 = vld [vmem:[#allocation81_spill] sm:$0xff] }
 0x4d9   : > { %16949 = vst [vmem:[#allocation148_spill] sm:$0xff] %v14004_v43  ;;  %16952 = vst [vmem:[#allocation171_spill] sm:$0xff] %v14009_v28  ;;  %v16958_v48 = vld [vmem:[#allocation159_spill] sm:$0xff]  ;;  %v14034_v24 = vsel %vm16960_vm12, %v13503_v56, 0.0  ;;  %vm16962_vm2 = vcmp.eq.s32.totalorder %v16685_v38, 1  ;;  %vm16964_vm0 = vcmp.eq.s32.totalorder %v16697_v60, 1 }
 0x4da   : > { %16954 = vst [vmem:[#allocation157_spill] sm:$0xff] %v14018_v36  ;;  %16956 = vst [vmem:[#allocation173_spill] sm:$0xff] %v14023_v44  ;;  %v16959_v6 = vpack.c.bf16 %v16957_v55, %v16958_v48  ;;  %v14039_v43 = vsel %vm16962_vm2, %v13510_v40, 0.0  ;;  %v14044_v28 = vsel %vm16964_vm0, %v13517_v49, 0.0  ;;  %v16966_v55 = vld [vmem:[#allocation49_spill] sm:$0xff]  ;;  %v16967_v48 = vld [vmem:[#allocation42_spill] sm:$0xff] }
 0x4db   : > { %16961 = vst [vmem:[#allocation81_spill] sm:$0xff] %v14034_v24  ;;  %16963 = vst [vmem:[#allocation159_spill] sm:$0xff] %v14039_v43  ;;  %v16969_v36 = vld [vmem:[#allocation180_spill] sm:$0xff]  ;;  %v16972_v21 = vld [vmem:[#allocation46_spill] sm:$0xff]  ;;  %vm16978_vm5 = vcmp.eq.s32.totalorder %v16718_v59, 1  ;;  %vm16980_vm8 = vcmp.eq.s32.totalorder %v16724_v9, 1 }
 0x4dc   : > { %8441 = vmatmul.mubr.msk.bf16.gmra.mrb[20].mxu1 %vm1260_vm13, %v16959_v6  ;;  %16965 = vst [vmem:[#allocation230_spill] sm:$0xff] %v14044_v28  ;;  %v16968_v6 = vpack.c.bf16 %v16966_v55, %v16967_v48  ;;  %vm16970_vm15 = vcmp.eq.s32.totalorder %v16969_v36, 1  ;;  %vm16973_vm9 = vcmp.eq.s32.totalorder %v16972_v21, 1  ;;  %v16975_v50 = vld [vmem:[#allocation183_spill] sm:$0xff]  ;;  %v14079_v35 = vsel %vm16980_vm8, %v13592_v25, 0.0  ;;  %v16982_v43 = vld [vmem:[#allocation176_spill] sm:$0xff] }
 0x4dd   : > { %v14055_v44 = vsel %vm16970_vm15, %v13536_v47, 0.0  ;;  %v14060_v45 = vsel %vm16973_vm9, %v13555_v32, 0.0  ;;  %vm16976_vm7 = vcmp.eq.s32.totalorder %v16975_v50, 1  ;;  %16981 = vst [vmem:[#allocation183_spill] sm:$0xff] %v14079_v35  ;;  %vm16983_vm10 = vcmp.eq.s32.totalorder %v16982_v43, 1 }
 0x4de   : > { %8444 = vmatprep.mubr.msk.bf16.mxu1 %vm1260_vm13, %v16968_v6  ;;  %16971 = vst [vmem:[#allocation49_spill] sm:$0xff] %v14055_v44  ;;  %16974 = vst [vmem:[#allocation42_spill] sm:$0xff] %v14060_v45  ;;  %v14065_v20 = vsel %vm16976_vm7, %v13564_v10, 0.0  ;;  %v14074_v6 = vsel %vm16978_vm5, %v13576_v34, 0.0  ;;  %v14086_v55 = vsel %vm16983_vm10, %v13604_v39, 0.0  ;;  %vm16985_vm4 = vcmp.eq.s32.totalorder %v16737_v53, 1 }
 0x4df   : > { %16977 = vst [vmem:[#allocation180_spill] sm:$0xff] %v14065_v20  ;;  %16979 = vst [vmem:[#allocation46_spill] sm:$0xff] %v14074_v6  ;;  %v14091_v48 = vsel %vm16985_vm4, %v13622_v30, 0.0  ;;  %v16987_v45 = vld [vmem:[#allocation179_spill] sm:$0xff]  ;;  %vm16990_vm11 = vcmp.eq.s32.totalorder %v16746_v58, 1  ;;  %v16992_v6 = vld [vmem:[#allocation185_spill] sm:$0xff] }
 0x4e0   : > { %16984 = vst [vmem:[#allocation176_spill] sm:$0xff] %v14086_v55  ;;  %16986 = vst [vmem:[#allocation231_spill] sm:$0xff] %v14091_v48  ;;  %vm16988_vm1 = vcmp.eq.s32.totalorder %v16987_v45, 1  ;;  %v14103_v24 = vsel %vm16990_vm11, %v13648_v22, 0.0  ;;  %vm16993_vm6 = vcmp.eq.s32.totalorder %v16992_v6, 1  ;;  %v16995_v44 = vld [vmem:[#allocation194_spill] sm:$0xff] }
 0x4e1   : > { %v14096_v20 = vsel %vm16988_vm1, %v13641_v13, 0.0  ;;  %16991 = vst [vmem:[#allocation233_spill] sm:$0xff] %v14103_v24  ;;  %v14108_v35 = vsel %vm16993_vm6, %v13667_v29, 0.0  ;;  %vm16996_vm3 = vcmp.eq.s32.totalorder %v16995_v44, 1  ;;  %v16998_v55 = vld [vmem:[#allocation178_spill] sm:$0xff]  ;;  %v16999_v48 = vld [vmem:[#allocation188_spill] sm:$0xff] }
 0x4e2   : > { %16989 = vst [vmem:[#allocation232_spill] sm:$0xff] %v14096_v20  ;;  %16994 = vst [vmem:[#allocation234_spill] sm:$0xff] %v14108_v35  ;;  %v14113_v53 = vsel %vm16996_vm3, %v13676_v23, 0.0  ;;  %vm17000_vm12 = vcmp.eq.s32.totalorder %v16999_v48, 1  ;;  %v17002_v6 = vld [vmem:[#allocation196_spill] sm:$0xff]  ;;  %v17005_v23 = vld [vmem:[#allocation193_spill] sm:$0xff] }
 0x4e3   : > { %16997 = vst [vmem:[#allocation235_spill] sm:$0xff] %v14113_v53  ;;  %v14122_v58 = vsel %vm17000_vm12, %v16998_v55, 0.0  ;;  %vm17003_vm2 = vcmp.eq.s32.totalorder %v17002_v6, 1  ;;  %vm17006_vm0 = vcmp.eq.s32.totalorder %v17005_v23, 1  ;;  %vm17008_vm15 = vcmp.eq.s32.totalorder %v16788_v37, 1  ;;  %v17010_v35 = vld [vmem:[#allocation195_spill] sm:$0xff] }
 0x4e4   : > { %17001 = vst [vmem:[#allocation178_spill] sm:$0xff] %v14122_v58  ;;  %v14127_v29 = vsel %vm17003_vm2, %v13700_v27, 0.0  ;;  %v14134_v45 = vsel %vm17006_vm0, %v13712_v54, 0.0  ;;  %v14139_v28 = vsel %vm17008_vm15, %v13726_v46, 0.0  ;;  %vm17011_vm9 = vcmp.eq.s32.totalorder %v17010_v35, 1  ;;  %v17016_v24 = vld [vmem:[#allocation53_spill] sm:$0xff] }
 0x4e5   : > { %17004 = vst [vmem:[#allocation188_spill] sm:$0xff] %v14127_v29  ;;  %17007 = vst [vmem:[#allocation196_spill] sm:$0xff] %v14134_v45  ;;  %v14144_v53 = vsel %vm17011_vm9, %v13745_v15, 0.0  ;;  %vm17012_vm7 = vcmp.eq.s32.totalorder %v16797_v5, 1  ;;  %vm17013_vm5 = vcmp.eq.s32.totalorder %v16806_v2, 1  ;;  %vm17015_vm8 = vcmp.eq.s32.totalorder %v16809_v16, 1 }
 0x4e6   : > { %17009 = vst [vmem:[#allocation193_spill] sm:$0xff] %v14139_v28  ;;  %v14151_v44 = vsel %vm17012_vm7, %v13751_v18, 0.0  ;;  %v14156_v58 = vsel %vm17013_vm5, %v13772_v63, 0.0  ;;  %v14161_v29 = vsel %vm17015_vm8, %v12939_v8, 0.0  ;;  %v17017_v35 = vld [vmem:[#allocation55_spill] sm:$0xff]  ;;  %v17019_v28 = vld [vmem:[#allocation9_spill] sm:$0xff] }
 0x4e7   : > { %17014 = vst [vmem:[#allocation236_spill] sm:$0xff] %v14156_v58  ;;  %v17018_v37 = vpack.c.bf16 %v17016_v24, %v17017_v35  ;;  %vm17020_vm10 = vcmask 1046528   ;;  %v17021_v5 = vld [vmem:[#allocation168_spill] sm:$0xff]  ;;  %v17024_v24 = vld [vmem:[#allocation66_spill] sm:$0xff]  ;;  %vm17026_vm1 = vcmp.eq.s32.totalorder %v16815_v3, 1  ;;  %vm17028_vm11 = vcmp.eq.s32.totalorder %v16818_v31, 1 }
 0x4e8   : > { %v14174_v2 = vsel %vm17020_vm10, %v12939_v8, %v17019_v28  ;;  %vm17022_vm4 = vmmov %vm17020_vm10  ;;  %v17023_v63 = vld [vmem:[#allocation64_spill] sm:$0xff]  ;;  %vm17031_vm6 = vcmp.eq.s32.totalorder %v16821_v17, 1  ;;  %vm17034_vm3 = vcmp.eq.s32.totalorder %v16825_v11, 1  ;;  %vm17036_vm12 = vcmp.eq.s32.totalorder %v16451_v61, 1  ;;  %v17039_v17 = vld [vmem:[#allocation107_spill] sm:$0xff] }
 0x4e9   : > { %8445 = vmatmul.mubr.msk.bf16.gmra.mrb[24].mxu1 %vm1260_vm13, %v17018_v37  ;;  %v14179_v16 = vsel %vm17022_vm4, %v17019_v28, %v17021_v5  ;;  %v17025_v35 = vpack.c.bf16 %v17023_v63, %v17024_v24  ;;  %v14188_v37 = vsel %vm17026_vm1, %v14174_v2, 0.0  ;;  %v17030_v20 = vld [vmem:[#allocation52_spill] sm:$0xff]  ;;  %v14212_v31 = vsel %vm17036_vm12, %v13043_v12, 0.0  ;;  %v17043_v58 = vld [vmem:[#allocation109_spill] sm:$0xff]  ;;  %v17047_v24 = vld [vmem:[#allocation110_spill] sm:$0xff] }
 0x4ea   : > { %17027 = vst [vmem:[#allocation53_spill] sm:$0xff] %v14188_v37  ;;  %v14193_v45 = vsel %vm17028_vm11, %v14179_v16, 0.0  ;;  %v14198_v5 = vsel %vm17031_vm6, %v17030_v20, 0.0  ;;  %v17033_v28 = vld [vmem:[#allocation204_spill] sm:$0xff]  ;;  %17037 = vst [vmem:[#allocation64_spill] sm:$0xff] %v14212_v31  ;;  %vm17040_vm2 = vcmp.eq.s32.totalorder %v17039_v17, 1 }
 0x4eb   : > { %8448 = vmatprep.mubr.msk.bf16.mxu1 %vm1260_vm13, %v17025_v35  ;;  %17029 = vst [vmem:[#allocation55_spill] sm:$0xff] %v14193_v45  ;;  %17032 = vst [vmem:[#allocation9_spill] sm:$0xff] %v14198_v5  ;;  %v14203_v63 = vsel %vm17034_vm3, %v17033_v28, 0.0  ;;  %v17038_v35 = vld [vmem:[#allocation114_spill] sm:$0xff]  ;;  %v17042_v28 = vld [vmem:[#allocation113_spill] sm:$0xff]  ;;  %vm17044_vm0 = vcmp.eq.s32.totalorder %v17043_v58, 1 }
 0x4ec   : > { %17035 = vst [vmem:[#allocation168_spill] sm:$0xff] %v14203_v63  ;;  %v14217_v20 = vsel %vm17040_vm2, %v17038_v35, 0.0  ;;  %v14224_v3 = vsel %vm17044_vm0, %v17042_v28, 0.0  ;;  %v17046_v37 = vld [vmem:[#allocation120_spill] sm:$0xff]  ;;  %vm17048_vm15 = vcmp.eq.s32.totalorder %v17047_v24, 1  ;;  %v17050_v61 = vld [vmem:[#allocation119_spill] sm:$0xff] }
 0x4ed   : > { %17041 = vst [vmem:[#allocation66_spill] sm:$0xff] %v14217_v20  ;;  %17045 = vst [vmem:[#allocation52_spill] sm:$0xff] %v14224_v3  ;;  %v14229_v5 = vsel %vm17048_vm15, %v17046_v37, 0.0  ;;  %v17051_v12 = vld [vmem:[#allocation116_spill] sm:$0xff]  ;;  %v17054_v17 = vld [vmem:[#allocation127_spill] sm:$0xff]  ;;  %vm17099_vm15 = vcmp.eq.s32.totalorder %v16897_v26, 1 }
 0x4ee   : > { %17049 = vst [vmem:[#allocation204_spill] sm:$0xff] %v14229_v5  ;;  %vm17052_vm9 = vcmp.eq.s32.totalorder %v17051_v12, 1  ;;  %v17055_v11 = vld [vmem:[#allocation118_spill] sm:$0xff]  ;;  %v17059_v28 = vld [vmem:[#allocation121_spill] sm:$0xff]  ;;  %v17062_v37 = vld [vmem:[#allocation131_spill] sm:$0xff] }
 0x4ef   : > { %v14234_v63 = vsel %vm17052_vm9, %v17050_v61, 0.0  ;;  %vm17056_vm7 = vcmp.eq.s32.totalorder %v17055_v11, 1  ;;  %v17058_v58 = vld [vmem:[#allocation126_spill] sm:$0xff]  ;;  %vm17060_vm5 = vcmp.eq.s32.totalorder %v17059_v28, 1  ;;  %v17063_v24 = vld [vmem:[#allocation125_spill] sm:$0xff]  ;;  %v17067_v11 = vld [vmem:[#allocation128_spill] sm:$0xff] }
 0x4f0   : > { %17053 = vst [vmem:[#allocation114_spill] sm:$0xff] %v14234_v63  ;;  %v14241_v31 = vsel %vm17056_vm7, %v17054_v17, 0.0  ;;  %v14246_v20 = vsel %vm17060_vm5, %v17058_v58, 0.0  ;;  %vm17064_vm8 = vcmp.eq.s32.totalorder %v17063_v24, 1  ;;  %v17066_v35 = vld [vmem:[#allocation130_spill] sm:$0xff]  ;;  %vm17068_vm10 = vcmp.eq.s32.totalorder %v17067_v11, 1 }
 0x4f1   : > { %17057 = vst [vmem:[#allocation107_spill] sm:$0xff] %v14241_v31  ;;  %17061 = vst [vmem:[#allocation113_spill] sm:$0xff] %v14246_v20  ;;  %v14251_v45 = vsel %vm17064_vm8, %v17062_v37, 0.0  ;;  %v14260_v17 = vsel %vm17068_vm10, %v17066_v35, 0.0  ;;  %v17070_v3 = vld [vmem:[#allocation135_spill] sm:$0xff]  ;;  %v17071_v28 = vld [vmem:[#allocation129_spill] sm:$0xff] }
 0x4f2   : > { %17065 = vst [vmem:[#allocation109_spill] sm:$0xff] %v14251_v45  ;;  %17069 = vst [vmem:[#allocation120_spill] sm:$0xff] %v14260_v17  ;;  %vm17072_vm4 = vcmp.eq.s32.totalorder %v17071_v28, 1  ;;  %v17074_v24 = vld [vmem:[#allocation134_spill] sm:$0xff]  ;;  %v17075_v5 = vld [vmem:[#allocation132_spill] sm:$0xff] }
 0x4f3   : > { %v14265_v58 = vsel %vm17072_vm4, %v17070_v3, 0.0  ;;  %vm17076_vm1 = vcmp.eq.s32.totalorder %v17075_v5, 1  ;;  %v17077_v63 = vld [vmem:[#allocation139_spill] sm:$0xff]  ;;  %v17078_v12 = vld [vmem:[#allocation133_spill] sm:$0xff]  ;;  %v17081_v11 = vld [vmem:[#allocation136_spill] sm:$0xff] }
 0x4f4   : > { %17073 = vst [vmem:[#allocation110_spill] sm:$0xff] %v14265_v58  ;;  %v14272_v61 = vsel %vm17076_vm1, %v17074_v24, 0.0  ;;  %vm17079_vm11 = vcmp.eq.s32.totalorder %v17078_v12, 1  ;;  %v17080_v35 = vld [vmem:[#allocation143_spill] sm:$0xff]  ;;  %vm17082_vm6 = vcmp.eq.s32.totalorder %v17081_v11, 1  ;;  %v17083_v28 = vld [vmem:[#allocation150_spill] sm:$0xff] }
 0x4f5   : > { %v14277_v20 = vsel %vm17079_vm11, %v17077_v63, 0.0  ;;  %v14282_v45 = vsel %vm17082_vm6, %v17080_v35, 0.0  ;;  %v17084_v37 = vld [vmem:[#allocation137_spill] sm:$0xff]  ;;  %v17086_v5 = vld [vmem:[#allocation154_spill] sm:$0xff]  ;;  %v17087_v24 = vld [vmem:[#allocation140_spill] sm:$0xff]  ;;  %vm17129_vm6 = vcmp.eq.s32.totalorder %v16941_v57, 1 }
 0x4f6   : > { %vm17085_vm3 = vcmp.eq.s32.totalorder %v17084_v37, 1  ;;  %vm17088_vm12 = vcmp.eq.s32.totalorder %v17087_v24, 1  ;;  %v17090_v63 = vld [vmem:[#allocation142_spill] sm:$0xff]  ;;  %v17104_v37 = vld [vmem:[#allocation40_spill] sm:$0xff]  ;;  %v17110_v26 = vld [vmem:[#allocation61_spill] sm:$0xff] }
 0x4f7   : > { %v14289_v17 = vsel %vm17085_vm3, %v17083_v28, 0.0  ;;  %v14294_v58 = vsel %vm17088_vm12, %v17086_v5, 0.0  ;;  %vm17091_vm2 = vcmp.eq.s32.totalorder %v17090_v63, 1  ;;  %v17093_v35 = vld [vmem:[#allocation22_spill] sm:$0xff]  ;;  %v17101_v63 = vld [vmem:[#allocation77_spill] sm:$0xff]  ;;  %v17105_v28 = vld [vmem:[#allocation151_spill] sm:$0xff] }
 0x4f8   : > { %17089 = vst [vmem:[#allocation119_spill] sm:$0xff] %v14294_v58  ;;  %v14299_v12 = vsel %vm17091_vm2, %v16896_v19, 0.0  ;;  %v17094_v11 = vld [vmem:[#allocation34_spill] sm:$0xff]  ;;  %v14317_v19 = vsel %vm17099_vm15, %v13270_v7, 0.0  ;;  %vm17106_vm9 = vcmp.eq.s32.totalorder %v17105_v28, 1  ;;  %v17111_v7 = vld [vmem:[#allocation156_spill] sm:$0xff] }
 0x4f9   : > { %17092 = vst [vmem:[#allocation116_spill] sm:$0xff] %v14299_v12  ;;  %v17095_v31 = vpack.c.bf16 %v17093_v35, %v17094_v11  ;;  %v17096_v24 = vld [vmem:[#allocation146_spill] sm:$0xff]  ;;  %17100 = vst [vmem:[#allocation118_spill] sm:$0xff] %v14317_v19  ;;  %v17102_v35 = vld [vmem:[#allocation172_spill] sm:$0xff]  ;;  %v14328_v3 = vsel %vm17106_vm9, %v17104_v37, 0.0  ;;  %vm17112_vm5 = vcmp.eq.s32.totalorder %v17111_v7, 1 }
 0x4fa   : > { %vm17097_vm0 = vcmp.eq.s32.totalorder %v17096_v24, 1  ;;  %v17103_v11 = vpack.c.bf16 %v17101_v63, %v17102_v35  ;;  %v17108_v24 = vld [vmem:[#allocation153_spill] sm:$0xff]  ;;  %v14338_v12 = vsel %vm17112_vm5, %v17110_v26, 0.0  ;;  %v17114_v35 = vld [vmem:[#allocation59_spill] sm:$0xff]  ;;  %v17117_v37 = vld [vmem:[#allocation4_spill] sm:$0xff]  ;;  %vm17131_vm3 = vcmp.eq.s32.totalorder %v16944_v14, 1 }
 0x4fb   : > { %8449 = vmatmul.mubr.msk.bf16.gmra.mrb[36].mxu1 %vm1260_vm13, %v17095_v31  ;;  %v14312_v5 = vsel %vm17097_vm0, %v16900_v33, 0.0  ;;  %v17107_v33 = vld [vmem:[#allocation48_spill] sm:$0xff]  ;;  %vm17109_vm7 = vcmp.eq.s32.totalorder %v17108_v24, 1  ;;  %17113 = vst [vmem:[#allocation126_spill] sm:$0xff] %v14338_v12  ;;  %v17118_v28 = vld [vmem:[#allocation162_spill] sm:$0xff]  ;;  %v17121_v24 = vld [vmem:[#allocation163_spill] sm:$0xff] }
 0x4fc   : > { %17098 = vst [vmem:[#allocation127_spill] sm:$0xff] %v14312_v5  ;;  %8454 = vmatprep.mubr.msk.bf16.mxu1 %vm1260_vm13, %v17103_v11  ;;  %v14333_v58 = vsel %vm17109_vm7, %v17107_v33, 0.0  ;;  %v17115_v11 = vld [vmem:[#allocation158_spill] sm:$0xff]  ;;  %vm17119_vm10 = vcmp.eq.s32.totalorder %v17118_v28, 1  ;;  %vm17122_vm4 = vcmp.eq.s32.totalorder %v17121_v24, 1  ;;  %v17126_v28 = vld [vmem:[#allocation165_spill] sm:$0xff] }
 0x4fd   : > { %vm17116_vm8 = vcmp.eq.s32.totalorder %v17115_v11, 1  ;;  %v14350_v5 = vsel %vm17119_vm10, %v17117_v37, 0.0  ;;  %v17120_v33 = vld [vmem:[#allocation2_spill] sm:$0xff]  ;;  %v17124_v11 = vld [vmem:[#allocation141_spill] sm:$0xff]  ;;  %vm17127_vm11 = vcmp.eq.s32.totalorder %v17126_v28, 1  ;;  %v17128_v24 = vld [vmem:[#allocation80_spill] sm:$0xff] }
 0x4fe   : > { %v14345_v31 = vsel %vm17116_vm8, %v17114_v35, 0.0  ;;  %v14355_v19 = vsel %vm17122_vm4, %v17120_v33, 0.0  ;;  %v17123_v63 = vld [vmem:[#allocation186_spill] sm:$0xff]  ;;  %vm17125_vm1 = vcmp.eq.s32.totalorder %v17124_v11, 1  ;;  %v14369_v37 = vsel %vm17127_vm11, %v13971_v51, 0.0  ;;  %v17130_v12 = vld [vmem:[#allocation93_spill] sm:$0xff] }
 0x4ff   : > { %v14364_v35 = vsel %vm17125_vm1, %v17123_v63, 0.0  ;;  %v14376_v26 = vsel %vm17129_vm6, %v17128_v24, 0.0  ;;  %v14381_v7 = vsel %vm17131_vm3, %v17130_v12, 0.0  ;;  %vm17132_vm12 = vcmp.eq.s32.totalorder %v16947_v52, 1  ;;  %v17134_v57 = vld [vmem:[#allocation166_spill] sm:$0xff]  ;;  %v17288_v63 = vld [vmem:[#allocation115_spill] sm:$0xff] }
 0x500   : > { %v14388_v51 = vsel %vm17132_vm12, %v13475_v4, 0.0  ;;  %vm17133_vm2 = vcmp.eq.s32.totalorder %v16950_v42, 1  ;;  %v5620_v28 = vsel %vm1309_vm14, %v17134_v57, 0  ;;  %vm17135_vm0 = vcmp.eq.s32.totalorder %v16667_v41, 1  ;;  %v17287_v14 = vld [vmem:[#allocation174_spill] sm:$0xff] }
 0x501   : > { %v14393_v11 = vsel %vm17133_vm2, %v13486_v0, 0.0  ;;  %v14402_v12 = vsel %vm17135_vm0, %v13503_v56, 0.0  ;;  %vm17136_vm15 = vcmp.eq.s32.totalorder %v16670_v62, 1  ;;  %v7682_v0 = vld [vmem:[%s15197_s5 + $0x8] sm:$0x3]  ;;  %vm17137_vm9 = vcmp.eq.s32.totalorder %v16682_v1, 1 }
 0x502   : > { %v14407_v4 = vsel %vm17136_vm15, %v13510_v40, 0.0  ;;  %v14417_v42 = vsel %vm17137_vm9, %v13517_v49, 0.0  ;;  %vm17138_vm7 = vcmp.eq.s32.totalorder %v16685_v38, 1  ;;  %v17139_v62 = vld [vmem:[#allocation84_spill] sm:$0xff]  ;;  %vm17142_vm5 = vcmp.eq.s32.totalorder %v16697_v60, 1  ;;  %v17145_v38 = vld [vmem:[#allocation97_spill] sm:$0xff] }
 0x503   : > { %v14422_v41 = vsel %vm17138_vm7, %v13536_v47, 0.0  ;;  %v17140_v56 = vld [vmem:[#allocation20_spill] sm:$0xff]  ;;  %v14433_v57 = vsel %vm17142_vm5, %v13555_v32, 0.0  ;;  %vm17143_vm8 = vcmp.eq.s32.totalorder %v16969_v36, 1  ;;  %vm17144_vm10 = vcmp.eq.s32.totalorder %v16972_v21, 1  ;;  %v17146_v47 = vld [vmem:[#allocation90_spill] sm:$0xff] }
 0x504   : > { %v17141_v40 = vpack.c.bf16 %v17139_v62, %v17140_v56  ;;  %v14438_v1 = vsel %vm17143_vm8, %v13564_v10, 0.0  ;;  %v14443_v49 = vsel %vm17144_vm10, %v13576_v34, 0.0  ;;  %v17147_v62 = vpack.c.bf16 %v17145_v38, %v17146_v47  ;;  %v17158_v36 = vld [vmem:[#allocation179_spill] sm:$0xff]  ;;  %v17168_v47 = vld [vmem:[#allocation194_spill] sm:$0xff]  ;;  %v17248_v34 = vld [vmem:[#allocation216_spill] sm:$0xff] }
 0x505   : > { %vm17148_vm4 = vcmp.eq.s32.totalorder %v16975_v50, 1  ;;  %vm17149_vm1 = vcmp.eq.s32.totalorder %v16718_v59, 1  ;;  %vm17151_vm11 = vcmp.eq.s32.totalorder %v16724_v9, 1  ;;  %vm17152_vm6 = vcmp.eq.s32.totalorder %v16982_v43, 1  ;;  %v17154_v59 = vld [vmem:[#allocation189_spill] sm:$0xff]  ;;  %v17161_v56 = vld [vmem:[#allocation175_spill] sm:$0xff] }
 0x506   : > { %8455 = vmatmul.mubr.msk.bf16.vlgmr.msra.gmra.mrb[40].mxu1 %vm1260_vm13, %v17141_v40  ;;  %v14454_v32 = vsel %vm17148_vm4, %v13592_v25, 0.0  ;;  %v14459_v21 = vsel %vm17149_vm1, %v13604_v39, 0.0  ;;  %v14464_v10 = vsel %vm17151_vm11, %v13622_v30, 0.0  ;;  %v14474_v25 = vsel %vm17152_vm6, %v13641_v13, 0.0  ;;  %v17157_v30 = vld [vmem:[#allocation161_spill] sm:$0xff]  ;;  %v17162_v40 = vld [vmem:[#allocation192_spill] sm:$0xff] }
 0x507   : > { %8487 = vmatpush3.bf16.msra.mxu1 %v5620_v28  ;;  %8458 = vmatprep.mubr.msk.bf16.mxu1 %vm1260_vm13, %v17147_v62  ;;  %17150 = vst [vmem:[#allocation121_spill] sm:$0xff] %v14459_v21  ;;  %17153 = vst [vmem:[#allocation131_spill] sm:$0xff] %v14474_v25  ;;  %vm17155_vm3 = vcmp.eq.s32.totalorder %v17154_v59, 1  ;;  %vm17159_vm12 = vcmp.eq.s32.totalorder %v17158_v36, 1  ;;  %vm17163_vm2 = vcmp.eq.s32.totalorder %v17162_v40, 1  ;;  %v17165_v13 = vld [vmem:[#allocation185_spill] sm:$0xff] }
 0x508   : > { %9151 = vmatprep.subr.msk.bf16.mxu1 %vm1309_vm14, %v7682_v0  ;;  %v14479_v39 = vsel %vm17155_vm3, %v13648_v22, 0.0  ;;  %v14486_v28 = vsel %vm17159_vm12, %v17157_v30, 0.0  ;;  %v14491_v38 = vsel %vm17163_vm2, %v17161_v56, 0.0  ;;  %vm17166_vm0 = vcmp.eq.s32.totalorder %v17165_v13, 1  ;;  %v17181_v56 = vld [vmem:[#allocation195_spill] sm:$0xff]  ;;  %v17184_v13 = vld [vmem:[#allocation201_spill] sm:$0xff] }
 0x509   : > { %17156 = vst [vmem:[#allocation125_spill] sm:$0xff] %v14479_v39  ;;  %17160 = vst [vmem:[#allocation130_spill] sm:$0xff] %v14486_v28  ;;  %v14496_v43 = vsel %vm17166_vm0, %v16998_v55, 0.0  ;;  %vm17169_vm15 = vcmp.eq.s32.totalorder %v17168_v47, 1  ;;  %vm17171_vm9 = vcmp.eq.s32.totalorder %v16999_v48, 1  ;;  %vm17173_vm7 = vcmp.eq.s32.totalorder %v17002_v6, 1 }
 0x50a   : > { %17164 = vst [vmem:[#allocation128_spill] sm:$0xff] %v14491_v38  ;;  %17167 = vst [vmem:[#allocation135_spill] sm:$0xff] %v14496_v43  ;;  %v14503_v62 = vsel %vm17169_vm15, %v13700_v27, 0.0  ;;  %v14508_v59 = vsel %vm17171_vm9, %v13712_v54, 0.0  ;;  %v14513_v30 = vsel %vm17173_vm7, %v13726_v46, 0.0  ;;  %vm17175_vm5 = vcmp.eq.s32.totalorder %v17005_v23, 1 }
 0x50b   : > { %17170 = vst [vmem:[#allocation129_spill] sm:$0xff] %v14503_v62  ;;  %17172 = vst [vmem:[#allocation134_spill] sm:$0xff] %v14508_v59  ;;  %v14522_v27 = vsel %vm17175_vm5, %v13745_v15, 0.0  ;;  %v17177_v48 = vld [vmem:[#allocation197_spill] sm:$0xff]  ;;  %vm17182_vm10 = vcmp.eq.s32.totalorder %v17181_v56, 1  ;;  %vm17185_vm4 = vcmp.eq.s32.totalorder %v17184_v13, 1 }
 0x50c   : > { %17174 = vst [vmem:[#allocation132_spill] sm:$0xff] %v14513_v30  ;;  %17176 = vst [vmem:[#allocation139_spill] sm:$0xff] %v14522_v27  ;;  %vm17178_vm8 = vcmp.eq.s32.totalorder %v17177_v48, 1  ;;  %v17180_v6 = vld [vmem:[#allocation209_spill] sm:$0xff]  ;;  %v14539_v47 = vsel %vm17185_vm4, %v12939_v8, 0.0  ;;  %v17187_v23 = vld [vmem:[#allocation199_spill] sm:$0xff] }
 0x50d   : > { %v14527_v54 = vsel %vm17178_vm8, %v13751_v18, 0.0  ;;  %v14534_v40 = vsel %vm17182_vm10, %v17180_v6, 0.0  ;;  %17186 = vst [vmem:[#allocation136_spill] sm:$0xff] %v14539_v47  ;;  %vm17188_vm1 = vcmp.eq.s32.totalorder %v17187_v23, 1  ;;  %v17190_v48 = vld [vmem:[#allocation203_spill] sm:$0xff]  ;;  %v17193_v6 = vld [vmem:[#allocation106_spill] sm:$0xff] }
 0x50e   : > { %17179 = vst [vmem:[#allocation133_spill] sm:$0xff] %v14527_v54  ;;  %17183 = vst [vmem:[#allocation143_spill] sm:$0xff] %v14534_v40  ;;  %v14544_v15 = vsel %vm17188_vm1, %v14174_v2, 0.0  ;;  %vm17191_vm11 = vcmp.eq.s32.totalorder %v17190_v48, 1  ;;  %v17194_v56 = vld [vmem:[#allocation105_spill] sm:$0xff]  ;;  %v17199_v55 = vld [vmem:[#allocation104_spill] sm:$0xff] }
 0x50f   : > { %17189 = vst [vmem:[#allocation150_spill] sm:$0xff] %v14544_v15  ;;  %v14551_v46 = vsel %vm17191_vm11, %v14179_v16, 0.0  ;;  %v17195_v36 = vpack.c.bf16 %v17193_v6, %v17194_v56  ;;  %v17196_v13 = vld [vmem:[#allocation45_spill] sm:$0xff]  ;;  %v17200_v18 = vld [vmem:[#allocation103_spill] sm:$0xff]  ;;  %v17202_v16 = vld [vmem:[#allocation112_spill] sm:$0xff]  ;;  %vm17376_vm6 = vcmask 1040384  }
 0x510   : > { %17192 = vst [vmem:[#allocation137_spill] sm:$0xff] %v14551_v46  ;;  %v17197_v23 = vld [vmem:[#allocation73_spill] sm:$0xff]  ;;  %v17201_v22 = vpack.c.bf16 %v17199_v55, %v17200_v18  ;;  %v17203_v48 = vld [vmem:[#allocation122_spill] sm:$0xff]  ;;  %v17208_v8 = vld [vmem:[#allocation111_spill] sm:$0xff]  ;;  %vm17415_vm0 = vcmask 1043456  }
 0x511   : > { %8459 = vmatmul.mubr.msk.bf16.gmra.mrb[4].mxu1 %vm1260_vm13, %v17195_v36  ;;  %v17198_v2 = vpack.c.bf16 %v17196_v13, %v17197_v23  ;;  %v17204_v9 = vpack.c.bf16 %v17202_v16, %v17203_v48  ;;  %v17205_v6 = vld [vmem:[#allocation102_spill] sm:$0xff]  ;;  %v17209_v50 = vld [vmem:[#allocation79_spill] sm:$0xff]  ;;  %v17211_v23 = vld [vmem:[#allocation68_spill] sm:$0xff] }
 0x512   : > { %v17206_v36 = vld [vmem:[#allocation58_spill] sm:$0xff]  ;;  %v17210_v13 = vpack.c.bf16 %v17208_v8, %v17209_v50  ;;  %v17215_v18 = vld [vmem:[#allocation152_spill] sm:$0xff]  ;;  %v7733_v40 = vld [vmem:[%s15197_s5 + $0xe] sm:$0x3] }
 0x513   : > { %8462 = vmatprep.mubr.msk.bf16.mxu1 %vm1260_vm13, %v17198_v2  ;;  %v17207_v56 = vpack.c.bf16 %v17205_v6, %v17206_v36  ;;  %v17212_v2 = vld [vmem:[#allocation63_spill] sm:$0xff]  ;;  %v17218_v48 = vld [vmem:[#allocation164_spill] sm:$0xff]  ;;  %v17223_v8 = vld [vmem:[#allocation206_spill] sm:$0xff] }
 0x514   : > { %v17213_v55 = vpack.c.bf16 %v17211_v23, %v17212_v2  ;;  %v17220_v36 = vld [vmem:[#allocation187_spill] sm:$0xff]  ;;  %v17226_v2 = vld [vmem:[#allocation208_spill] sm:$0xff]  ;;  %v17291_v33 = vld [vmem:[#allocation182_spill] sm:$0xff] }
 0x515   : > { %v17254_v60 = vld [vmem:[#allocation220_spill] sm:$0xff]  ;;  %v17299_v47 = vld [vmem:[#allocation82_spill] sm:$0xff]  ;;  %v17300_v27 = vld [vmem:[#allocation91_spill] sm:$0xff] }
 0x516   : > { %v17301_v54 = vpack.c.bf16 %v17299_v47, %v17300_v27  ;;  %v17302_v59 = vld [vmem:[#allocation171_spill] sm:$0xff]  ;;  %v17303_v30 = vld [vmem:[#allocation148_spill] sm:$0xff]  ;;  %v17309_v62 = vld [vmem:[#allocation81_spill] sm:$0xff] }
 0x517   : > { %v17304_v43 = vpack.c.bf16 %v17302_v59, %v17303_v30  ;;  %v17311_v30 = vld [vmem:[#allocation49_spill] sm:$0xff]  ;;  %v17314_v39 = vld [vmem:[#allocation180_spill] sm:$0xff]  ;;  %vm17418_vm5 = vmmov %vm17415_vm0 }
 0x518   : > { %vm17421_vm10 = vmmov %vm17415_vm0 }
 0x519   : > { %8463 = vmatmul.mubr.msk.bf16.gmra.mrb[8].mxu1 %vm1260_vm13, %v17201_v22  ;;  %v17214_v22 = vld [vmem:[#allocation41_spill] sm:$0xff]  ;;  %vm17422_vm1 = vmmov %vm17415_vm0 }
 0x51a   : > { %8466 = vmatprep.mubr.msk.bf16.mxu1 %vm1260_vm13, %v17204_v9  ;;  %v17216_v16 = vpack.c.bf16 %v17214_v22, %v17215_v18  ;;  %v17217_v9 = vld [vmem:[#allocation169_spill] sm:$0xff]  ;;  %v17229_v18 = vld [vmem:[#allocation88_spill] sm:$0xff] }
 0x51b   : > { %v17219_v6 = vpack.c.bf16 %v17217_v9, %v17218_v48  ;;  %v17232_v48 = vld [vmem:[#allocation94_spill] sm:$0xff] }
 0x521   : > { %8467 = vmatmul.mubr.msk.bf16.gmra.mrb[12].mxu1 %vm1260_vm13, %v17207_v56  ;;  %v17221_v56 = vld [vmem:[#allocation108_spill] sm:$0xff] }
 0x522   : > { %8470 = vmatprep.mubr.msk.bf16.mxu1 %vm1260_vm13, %v17210_v13  ;;  %v17222_v50 = vpack.c.bf16 %v17220_v36, %v17221_v56  ;;  %v17224_v13 = vld [vmem:[#allocation205_spill] sm:$0xff]  ;;  %v5814_v56 = vsel %vm1309_vm14, %v7682_v0, 0 }
 0x523   : > { %v17225_v23 = vpack.c.bf16 %v17223_v8, %v17224_v13  ;;  %v17235_v8 = vld [vmem:[#allocation101_spill] sm:$0xff]  ;;  %v17236_v13 = vld [vmem:[#allocation99_spill] sm:$0xff] }
 0x529   : > { %8471 = vmatmul.mubr.msk.bf16.gmra.mrb[16].mxu1 %vm1260_vm13, %v17213_v55  ;;  %v17227_v55 = vld [vmem:[#allocation207_spill] sm:$0xff] }
 0x52a   : > { %8474 = vmatprep.mubr.msk.bf16.mxu1 %vm1260_vm13, %v17216_v16  ;;  %v17228_v22 = vpack.c.bf16 %v17226_v2, %v17227_v55  ;;  %v17230_v16 = vld [vmem:[#allocation202_spill] sm:$0xff]  ;;  %v8388_v2 = vpop.f32.mrb[0].mxu1  ;;  %v17238_v55 = vld [vmem:[#allocation211_spill] sm:$0xff] }
 0x52b   : > { %v17231_v9 = vpack.c.bf16 %v17229_v18, %v17230_v16  ;;  %v4814_v16 = vpop.f32.mrb[1].mxu1 }
 0x531   : > { %8475 = vmatmul.mubr.msk.bf16.gmra.mrb[20].mxu1 %vm1260_vm13, %v17219_v6  ;;  %v17233_v6 = vld [vmem:[#allocation92_spill] sm:$0xff] }
 0x532   : > { %8478 = vmatprep.mubr.msk.bf16.mxu1 %vm1260_vm13, %v17222_v50  ;;  %v17234_v36 = vpack.c.bf16 %v17232_v48, %v17233_v6  ;;  %v7699_v50 = vld [vmem:[%s15197_s5 + $0xa] sm:$0x3]  ;;  %v17241_v48 = vld [vmem:[#allocation213_spill] sm:$0xff]  ;;  %v17242_v6 = vld [vmem:[#allocation212_spill] sm:$0xff] }
 0x539   : > { %8479 = vmatmul.mubr.msk.bf16.gmra.mrb[24].mxu1 %vm1260_vm13, %v17225_v23  ;;  %v17237_v23 = vpack.c.bf16 %v17235_v8, %v17236_v13  ;;  %v17244_v8 = vld [vmem:[#allocation215_spill] sm:$0xff]  ;;  %v17245_v13 = vld [vmem:[#allocation214_spill] sm:$0xff] }
 0x53a   : > { %8482 = vmatprep.mubr.msk.bf16.mxu1 %vm1260_vm13, %v17228_v22  ;;  %v17239_v22 = vld [vmem:[#allocation210_spill] sm:$0xff] }
 0x53b   : > { %v17240_v18 = vpack.c.bf16 %v17238_v55, %v17239_v22  ;;  %v17250_v22 = vld [vmem:[#allocation219_spill] sm:$0xff] }
 0x541   : > { %8483 = vmatmul.mubr.msk.bf16.gmra.mrb[44].mxu1 %vm1260_vm13, %v17231_v9  ;;  %v8389_v9 = vpop.f32.mrb[2].mxu1 }
 0x542   : > { %8488 = vmatprep.mubr.msk.bf16.mxu1 %vm1260_vm13, %v17234_v36  ;;  %v4816_v0 = vpop.f32.mrb[3].mxu1  ;;  %v17243_v36 = vpack.c.bf16 %v17241_v48, %v17242_v6  ;;  %v17256_v6 = vld [vmem:[#allocation223_spill] sm:$0xff] }
 0x543   : > { %v17253_v0 = vld [vmem:[#allocation221_spill] sm:$0xff] }
 0x544   : > { %v17255_v48 = vpack.c.bf16 %v17253_v0, %v17254_v60  ;;  %v17268_v0 = vld [vmem:[#allocation167_spill] sm:$0xff] }
 0x549   : > { %8489 = vmatmul.mubr.msk.bf16.vlgmr.msra.gmra.mrb[48].mxu1 %vm1260_vm13, %v17237_v23  ;;  %v17246_v23 = vpack.c.bf16 %v17244_v8, %v17245_v13  ;;  %v17259_v13 = vld [vmem:[#allocation138_spill] sm:$0xff] }
 0x54a   : > { %8521 = vmatpush3.bf16.msra.mxu1 %v5814_v56  ;;  %8492 = vmatprep.mubr.msk.bf16.mxu1 %vm1260_vm13, %v17240_v18  ;;  %v17247_v56 = vld [vmem:[#allocation217_spill] sm:$0xff]  ;;  %v17251_v18 = vld [vmem:[#allocation218_spill] sm:$0xff] }
 0x54b   : > { %9152 = vmatprep.subr.msk.bf16.mxu1 %vm1309_vm14, %v7699_v50  ;;  %v17249_v55 = vpack.c.bf16 %v17247_v56, %v17248_v34  ;;  %v17252_v16 = vpack.c.bf16 %v17250_v22, %v17251_v18  ;;  %v17262_v56 = vld [vmem:[#allocation155_spill] sm:$0xff]  ;;  %v17265_v18 = vld [vmem:[#allocation160_spill] sm:$0xff] }
 0x551   : > { %8493 = vmatmul.mubr.msk.bf16.gmra.mrb[4].mxu1 %vm1260_vm13, %v17243_v36  ;;  %v17257_v36 = vld [vmem:[#allocation222_spill] sm:$0xff] }
 0x552   : > { %8496 = vmatprep.mubr.msk.bf16.mxu1 %vm1260_vm13, %v17246_v23  ;;  %v17258_v8 = vpack.c.bf16 %v17256_v6, %v17257_v36  ;;  %v17260_v23 = vld [vmem:[#allocation144_spill] sm:$0xff]  ;;  %v17271_v36 = vld [vmem:[#allocation226_spill] sm:$0xff] }
 0x553   : > { %v17261_v34 = vpack.c.bf16 %v17259_v13, %v17260_v23  ;;  %v17274_v23 = vld [vmem:[#allocation228_spill] sm:$0xff] }
 0x559   : > { %8497 = vmatmul.mubr.msk.bf16.gmra.mrb[8].mxu1 %vm1260_vm13, %v17249_v55  ;;  %v17263_v55 = vld [vmem:[#allocation224_spill] sm:$0xff] }
 0x55a   : > { %8500 = vmatprep.mubr.msk.bf16.mxu1 %vm1260_vm13, %v17252_v16  ;;  %v17264_v22 = vpack.c.bf16 %v17262_v56, %v17263_v55  ;;  %v17266_v16 = vld [vmem:[#allocation149_spill] sm:$0xff]  ;;  %v17277_v55 = vld [vmem:[#allocation170_spill] sm:$0xff] }
 0x55b   : > { %v17267_v60 = vpack.c.bf16 %v17265_v18, %v17266_v16  ;;  %v17280_v16 = vld [vmem:[#allocation51_spill] sm:$0xff] }
 0x561   : > { %8501 = vmatmul.mubr.msk.bf16.gmra.mrb[12].mxu1 %vm1260_vm13, %v17255_v48  ;;  %v17269_v48 = vld [vmem:[#allocation147_spill] sm:$0xff] }
 0x562   : > { %8504 = vmatprep.mubr.msk.bf16.mxu1 %vm1260_vm13, %v17258_v8  ;;  %v17270_v6 = vpack.c.bf16 %v17268_v0, %v17269_v48  ;;  %v17272_v8 = vld [vmem:[#allocation225_spill] sm:$0xff]  ;;  %v7716_v0 = vld [vmem:[%s15197_s5 + $0xc] sm:$0x3] }
 0x563   : > { %v17273_v13 = vpack.c.bf16 %v17271_v36, %v17272_v8  ;;  %v17281_v48 = vld [vmem:[#allocation57_spill] sm:$0xff]  ;;  %v17283_v36 = vld [vmem:[#allocation86_spill] sm:$0xff]  ;;  %v17284_v8 = vld [vmem:[#allocation95_spill] sm:$0xff]  ;;  %v6391_v46 = vsel %vm1309_vm14, %v7716_v0, 0 }
 0x569   : > { %8505 = vmatmul.mubr.msk.bf16.gmra.mrb[16].mxu1 %vm1260_vm13, %v17261_v34  ;;  %v17275_v34 = vld [vmem:[#allocation227_spill] sm:$0xff] }
 0x56a   : > { %8508 = vmatprep.mubr.msk.bf16.mxu1 %vm1260_vm13, %v17264_v22  ;;  %v17276_v56 = vpack.c.bf16 %v17274_v23, %v17275_v34  ;;  %v17278_v22 = vld [vmem:[#allocation229_spill] sm:$0xff] }
 0x56b   : > { %v17279_v18 = vpack.c.bf16 %v17277_v55, %v17278_v22  ;;  %v17286_v55 = vld [vmem:[#allocation87_spill] sm:$0xff] }
 0x571   : > { %8509 = vmatmul.mubr.msk.bf16.gmra.mrb[20].mxu1 %vm1260_vm13, %v17267_v60  ;;  %v6104_v60 = vsel %vm1309_vm14, %v7699_v50, 0  ;;  %v8416_v50 = vpop.f32.mrb[28].mxu1 }
 0x572   : > { %8512 = vmatprep.mubr.msk.bf16.mxu1 %vm1260_vm13, %v17270_v6  ;;  %v17282_v6 = vld [vmem:[#allocation71_spill] sm:$0xff]  ;;  %v17289_v50 = vld [vmem:[#allocation177_spill] sm:$0xff] }
 0x579   : > { %8513 = vmatmul.mubr.msk.bf16.gmra.mrb[24].mxu1 %vm1260_vm13, %v17273_v13  ;;  %v4924_v13 = vpop.f32.mrb[29].mxu1 }
 0x57a   : > { %8516 = vmatprep.mubr.msk.bf16.mxu1 %vm1260_vm13, %v17276_v56  ;;  %v8417_v23 = vpop.f32.mrb[30].mxu1  ;;  %v17285_v56 = vld [vmem:[#allocation96_spill] sm:$0xff] }
 0x57b   : > { %v4927_v34 = vpop.f32.mrb[31].mxu1  ;;  %v17290_v23 = vld [vmem:[#allocation117_spill] sm:$0xff] }
 0x57c   : > { %v8422_v22 = vpop.f32.mrb[32].mxu1 }
 0x581   : > { %8517 = vmatmul.mubr.msk.bf16.gmra.mrb[52].mxu1 %vm1260_vm13, %v17279_v18  ;;  %v5026_v18 = vadd.f32 %v8422_v22, %v8388_v2  ;;  %v17292_v2 = vld [vmem:[#allocation184_spill] sm:$0xff]  ;;  %v17295_v22 = vld [vmem:[#allocation181_spill] sm:$0xff] }
 0x582   : > { %8522 = vmatprep.mubr.msk.bf16.mxu1 %vm1260_vm13, %v17280_v16  ;;  %v5019_v16 = vpop.f32.mrb[33].mxu1 }
 0x583   : > { %v17296_v16 = vld [vmem:[#allocation35_spill] sm:$0xff] }
 0x589   : > { %8523 = vmatmul.mubr.msk.bf16.vlgmr.msra.gmra.mrb[56].mxu1 %vm1260_vm13, %v17281_v48 }
 0x58a   : > { %8555 = vmatpush3.bf16.msra.mxu1 %v6104_v60  ;;  %8526 = vmatprep.mubr.msk.bf16.mxu1 %vm1260_vm13, %v17282_v6  ;;  %v8423_v60 = vpop.f32.mrb[34].mxu1 }
 0x58b   : > { %9153 = vmatprep.subr.msk.bf16.mxu1 %vm1309_vm14, %v7716_v0  ;;  %v5029_v24 = vadd.f32 %v8423_v60, %v8389_v9  ;;  %v5021_v52 = vpop.f32.mrb[35].mxu1  ;;  %v17293_v9 = vld [vmem:[#allocation200_spill] sm:$0xff]  ;;  %v17297_v60 = vld [vmem:[#allocation191_spill] sm:$0xff] }
 0x58c   : > { %v17294_v52 = vld [vmem:[#allocation190_spill] sm:$0xff]  ;;  %v17298_v15 = vpack.c.bf16 %v17296_v16, %v17297_v60  ;;  %v17306_v16 = vld [vmem:[#allocation157_spill] sm:$0xff]  ;;  %v17308_v60 = vld [vmem:[#allocation159_spill] sm:$0xff] }
 0x58d   : > { %v17310_v28 = vpack.c.bf16 %v17308_v60, %v17309_v62 }
 0x591   : > { %8527 = vmatmul.mubr.msk.bf16.gmra.mrb[4].mxu1 %vm1260_vm13, %v17283_v36 }
 0x592   : > { %8530 = vmatprep.mubr.msk.bf16.mxu1 %vm1260_vm13, %v17284_v8 }
 0x599   : > { %8531 = vmatmul.mubr.msk.bf16.gmra.mrb[8].mxu1 %vm1260_vm13, %v17285_v56 }
 0x59a   : > { %8534 = vmatprep.mubr.msk.bf16.mxu1 %vm1260_vm13, %v17286_v55 }
 0x5a1   : > { %8535 = vmatmul.mubr.msk.bf16.gmra.mrb[12].mxu1 %vm1260_vm13, %v17287_v14 }
 0x5a2   : > { %8538 = vmatprep.mubr.msk.bf16.mxu1 %vm1260_vm13, %v17288_v63 }
 0x5a9   : > { %8539 = vmatmul.mubr.msk.bf16.gmra.mrb[16].mxu1 %vm1260_vm13, %v17289_v50 }
 0x5aa   : > { %8542 = vmatprep.mubr.msk.bf16.mxu1 %vm1260_vm13, %v17290_v23 }
 0x5b1   : > { %8543 = vmatmul.mubr.msk.bf16.gmra.mrb[20].mxu1 %vm1260_vm13, %v17291_v33 }
 0x5b2   : > { %8546 = vmatprep.mubr.msk.bf16.mxu1 %vm1260_vm13, %v17292_v2 }
 0x5b9   : > { %8547 = vmatmul.mubr.msk.bf16.gmra.mrb[24].mxu1 %vm1260_vm13, %v17293_v9 }
 0x5ba   : > { %8550 = vmatprep.mubr.msk.bf16.mxu1 %vm1260_vm13, %v17294_v52 }
 0x5c1   : > { %8551 = vmatmul.mubr.msk.bf16.gmra.mrb[60].mxu1 %vm1260_vm13, %v17295_v22 }
 0x5c2   : > { %8556 = vmatprep.mubr.msk.bf16.mxu1 %vm1260_vm13, %v17298_v15  ;;  %v17305_v15 = vld [vmem:[#allocation173_spill] sm:$0xff] }
 0x5c3   : > { %v17307_v0 = vpack.c.bf16 %v17305_v15, %v17306_v16  ;;  %v17315_v15 = vld [vmem:[#allocation42_spill] sm:$0xff] }
 0x5c4   : > { %v17316_v16 = vpack.c.bf16 %v17314_v39, %v17315_v15  ;;  %v17324_v39 = vld [vmem:[#allocation232_spill] sm:$0xff]  ;;  %v17327_v15 = vld [vmem:[#allocation234_spill] sm:$0xff] }
 0x5c9   : > { %8557 = vmatmul.mubr.msk.bf16.vlgmr.msra.gmra.mrb[64].mxu1 %vm1260_vm13, %v17301_v54 }
 0x5ca   : > { %8589 = vmatpush3.bf16.msra.mxu1 %v6391_v46  ;;  %8560 = vmatprep.mubr.msk.bf16.mxu1 %vm1260_vm13, %v17304_v43  ;;  %v17312_v43 = vld [vmem:[#allocation230_spill] sm:$0xff] }
 0x5cb   : > { %9154 = vmatprep.subr.msk.bf16.mxu1 %vm1309_vm14, %v7733_v40  ;;  %v17313_v25 = vpack.c.bf16 %v17311_v30, %v17312_v43 }
 0x5ce   : > { %v8450_v27 = vpop.f32.mrb[36].mxu1 }
 0x5cf   : > { %v5129_v54 = vpop.f32.mrb[37].mxu1 }
 0x5d0   : > { %v5130_v46 = vadd.f32 %v5129_v54, %v4924_v13  ;;  %v8451_v47 = vpop.f32.mrb[38].mxu1  ;;  %v17317_v13 = vld [vmem:[#allocation183_spill] sm:$0xff]  ;;  %v17318_v54 = vld [vmem:[#allocation46_spill] sm:$0xff] }
 0x5d1   : > { %8561 = vmatmul.mubr.msk.bf16.gmra.mrb[4].mxu1 %vm1260_vm13, %v17307_v0  ;;  %v5132_v38 = vpop.f32.mrb[39].mxu1  ;;  %v17319_v47 = vpack.c.bf16 %v17317_v13, %v17318_v54  ;;  %v17335_v54 = vpack.c.bf16 %v14151_v44, %v14144_v53  ;;  %v7749_v53 = vld [vmem:[%s15197_s5 + $0x10] sm:$0x3]  ;;  %v17344_v44 = vld [vmem:[#allocation123_spill] sm:$0xff] }
 0x5d2   : > { %8564 = vmatprep.mubr.msk.bf16.mxu1 %vm1260_vm13, %v17310_v28  ;;  %v5133_v59 = vadd.f32 %v5132_v38, %v4927_v34  ;;  %v17320_v38 = vld [vmem:[#allocation231_spill] sm:$0xff]  ;;  %v17321_v34 = vld [vmem:[#allocation176_spill] sm:$0xff] }
 0x5d3   : > { %v17322_v30 = vpack.c.bf16 %v17320_v38, %v17321_v34  ;;  %v17338_v34 = vld [vmem:[#allocation55_spill] sm:$0xff] }
 0x5d9   : > { %8565 = vmatmul.mubr.msk.bf16.gmra.mrb[8].mxu1 %vm1260_vm13, %v17313_v25  ;;  %v8456_v0 = vpop.f32.mrb[40].mxu1  ;;  %v17323_v25 = vld [vmem:[#allocation233_spill] sm:$0xff] }
 0x5da   : > { %8568 = vmatprep.mubr.msk.bf16.mxu1 %vm1260_vm13, %v17316_v16  ;;  %v5489_v62 = vadd.f32 %v8456_v0, %v5026_v18  ;;  %v5366_v60 = vpop.f32.mrb[41].mxu1  ;;  %v17325_v43 = vpack.c.bf16 %v17323_v25, %v17324_v39  ;;  %v17326_v18 = vld [vmem:[#allocation235_spill] sm:$0xff]  ;;  %v17341_v39 = vld [vmem:[#allocation168_spill] sm:$0xff] }
 0x5db   : > { %v8457_v28 = vpop.f32.mrb[42].mxu1  ;;  %v17328_v16 = vpack.c.bf16 %v17326_v18, %v17327_v15  ;;  %v17332_v60 = vld [vmem:[#allocation193_spill] sm:$0xff]  ;;  %v6581_v15 = vsel %vm1309_vm14, %v7733_v40, 0 }
 0x5dc   : > { %v5490_v27 = vadd.f32 %v8457_v28, %v5029_v24  ;;  %v5368_v21 = vpop.f32.mrb[43].mxu1  ;;  %v17329_v24 = vld [vmem:[#allocation188_spill] sm:$0xff] }
 0x5dd   : > { %v17330_v21 = vld [vmem:[#allocation178_spill] sm:$0xff]  ;;  %v17333_v28 = vld [vmem:[#allocation196_spill] sm:$0xff] }
 0x5de   : > { %v17331_v0 = vpack.c.bf16 %v17329_v24, %v17330_v21  ;;  %v17334_v13 = vpack.c.bf16 %v17332_v60, %v17333_v28  ;;  %v17347_v24 = vld [vmem:[#allocation66_spill] sm:$0xff]  ;;  %v17348_v21 = vld [vmem:[#allocation64_spill] sm:$0xff] }
 0x5df   : > { %v17350_v60 = vld [vmem:[#allocation204_spill] sm:$0xff] }
 0x5e0   : > { %v17351_v28 = vld [vmem:[#allocation52_spill] sm:$0xff] }
 0x5e1   : > { %8569 = vmatmul.mubr.msk.bf16.gmra.mrb[12].mxu1 %vm1260_vm13, %v17319_v47  ;;  %v17336_v47 = vld [vmem:[#allocation236_spill] sm:$0xff]  ;;  %v17352_v40 = vpack.c.bf16 %v17350_v60, %v17351_v28 }
 0x5e2   : > { %8572 = vmatprep.mubr.msk.bf16.mxu1 %vm1260_vm13, %v17322_v30  ;;  %v17337_v38 = vpack.c.bf16 %v14161_v29, %v17336_v47  ;;  %v17339_v30 = vld [vmem:[#allocation53_spill] sm:$0xff]  ;;  %v17345_v29 = vld [vmem:[#allocation124_spill] sm:$0xff] }
 0x5e3   : > { %v17340_v25 = vpack.c.bf16 %v17338_v34, %v17339_v30 }
 0x5e9   : > { %8573 = vmatmul.mubr.msk.bf16.gmra.mrb[16].mxu1 %vm1260_vm13, %v17325_v43  ;;  %v17342_v43 = vld [vmem:[#allocation9_spill] sm:$0xff] }
 0x5ea   : > { %8576 = vmatprep.mubr.msk.bf16.mxu1 %vm1260_vm13, %v17328_v16  ;;  %v17343_v18 = vpack.c.bf16 %v17341_v39, %v17342_v43  ;;  %v17346_v16 = vpack.c.bf16 %v17344_v44, %v17345_v29  ;;  %v17359_v29 = vld [vmem:[#allocation110_spill] sm:$0xff] }
 0x5f1   : > { %8577 = vmatmul.mubr.msk.bf16.gmra.mrb[20].mxu1 %vm1260_vm13, %v17331_v0  ;;  %v17349_v0 = vpack.c.bf16 %v17347_v24, %v17348_v21 }
 0x5f2   : > { %8580 = vmatprep.mubr.msk.bf16.mxu1 %vm1260_vm13, %v17334_v13  ;;  %v17353_v13 = vld [vmem:[#allocation107_spill] sm:$0xff] }
 0x5f9   : > { %8581 = vmatmul.mubr.msk.bf16.gmra.mrb[24].mxu1 %vm1260_vm13, %v17335_v54  ;;  %v17354_v54 = vld [vmem:[#allocation114_spill] sm:$0xff] }
 0x5fa   : > { %8584 = vmatprep.mubr.msk.bf16.mxu1 %vm1260_vm13, %v17337_v38  ;;  %v17355_v47 = vpack.c.bf16 %v17353_v13, %v17354_v54  ;;  %v17364_v54 = vld [vmem:[#allocation116_spill] sm:$0xff] }
 0x601   : > { %8585 = vmatmul.mubr.msk.bf16.gmra.mrb[68].mxu1 %vm1260_vm13, %v17340_v25 }
 0x602   : > { %8590 = vmatprep.mubr.msk.bf16.mxu1 %vm1260_vm13, %v17343_v18  ;;  %v17356_v18 = vld [vmem:[#allocation109_spill] sm:$0xff] }
 0x609   : > { %8591 = vmatmul.mubr.msk.bf16.vlgmr.msra.gmra.mrb[72].mxu1 %vm1260_vm13, %v17346_v16  ;;  %v17360_v16 = vld [vmem:[#allocation120_spill] sm:$0xff] }
 0x60a   : > { %8623 = vmatpush3.bf16.msra.mxu1 %v6581_v15  ;;  %8594 = vmatprep.mubr.msk.bf16.mxu1 %vm1260_vm13, %v17349_v0  ;;  %v17357_v15 = vld [vmem:[#allocation113_spill] sm:$0xff]  ;;  %v17361_v24 = vpack.c.bf16 %v17359_v29, %v17360_v16 }
 0x60b   : > { %9155 = vmatprep.subr.msk.bf16.mxu1 %vm1309_vm14, %v7749_v53  ;;  %v17358_v44 = vpack.c.bf16 %v17356_v18, %v17357_v15  ;;  %v17377_v15 = vpack.c.bf16 %v14369_v37, %v14364_v35 }
 0x611   : > { %8595 = vmatmul.mubr.msk.bf16.gmra.mrb[4].mxu1 %vm1260_vm13, %v17352_v40 }
 0x612   : > { %8598 = vmatprep.mubr.msk.bf16.mxu1 %vm1260_vm13, %v17355_v47  ;;  %v17365_v47 = vld [vmem:[#allocation119_spill] sm:$0xff] }
 0x614   : > { %v8484_v38 = vpop.f32.mrb[44].mxu1 }
 0x615   : > { %v5476_v34 = vpop.f32.mrb[45].mxu1  ;;  %v17366_v38 = vpack.c.bf16 %v17364_v54, %v17365_v47  ;;  %v17402_v47 = vld [vmem:[#allocation132_spill] sm:$0xff] }
 0x616   : > { %v5515_v30 = vadd.f32 %v5476_v34, %v5130_v46  ;;  %v8485_v25 = vpop.f32.mrb[46].mxu1  ;;  %v17362_v46 = vpack.c.bf16 %v14277_v20, %v14272_v61  ;;  %v17368_v34 = vld [vmem:[#allocation127_spill] sm:$0xff]  ;;  %v17370_v20 = vpack.c.bf16 %v14333_v58, %v14328_v3  ;;  %v17371_v61 = vld [vmem:[#allocation126_spill] sm:$0xff]  ;;  %v17378_v58 = vld [vmem:[#allocation145_spill] sm:$0xff] }
 0x617   : > { %v5479_v39 = vpop.f32.mrb[47].mxu1  ;;  %vm17379_vm3 = vcmp.eq.s32.totalorder %v17378_v58, 1 }
 0x618   : > { %v5516_v43 = vadd.f32 %v5479_v39, %v5133_v59  ;;  %v17363_v59 = vpack.c.bf16 %v14289_v17, %v14282_v45  ;;  %v17372_v45 = vpack.c.bf16 %v14345_v31, %v17371_v61  ;;  %v17373_v17 = vpack.c.bf16 %v14355_v19, %v14350_v5  ;;  %v17375_v39 = vld [vmem:[#allocation198_spill] sm:$0xff]  ;;  %v17409_v61 = vld [vmem:[#allocation143_spill] sm:$0xff] }
 0x619   : > { %8599 = vmatmul.mubr.msk.bf16.gmra.mrb[8].mxu1 %vm1260_vm13, %v17358_v44  ;;  %v17380_v31 = vld [vmem:[#allocation98_spill] sm:$0xff]  ;;  %v6861_v5 = vsel %vm1309_vm14, %v7749_v53, 0 }
 0x61a   : > { %8602 = vmatprep.mubr.msk.bf16.mxu1 %vm1260_vm13, %v17361_v24 }
 0x61c   : > { %v8490_v21 = vpop.f32.mrb[48].mxu1 }
 0x61d   : > { %v5779_v0 = vadd.f32 %v8490_v21, %v5489_v62  ;;  %v5656_v60 = vpop.f32.mrb[49].mxu1  ;;  %v17367_v62 = vld [vmem:[#allocation118_spill] sm:$0xff] }
 0x61e   : > { %v8491_v28 = vpop.f32.mrb[50].mxu1  ;;  %v17369_v25 = vpack.c.bf16 %v17367_v62, %v17368_v34  ;;  %v17391_v60 = vld [vmem:[#allocation121_spill] sm:$0xff]  ;;  %v17406_v34 = vld [vmem:[#allocation139_spill] sm:$0xff] }
 0x61f   : > { %v5780_v40 = vadd.f32 %v8491_v28, %v5490_v27  ;;  %v5658_v13 = vpop.f32.mrb[51].mxu1  ;;  %v17374_v27 = vld [vmem:[#allocation89_spill] sm:$0xff]  ;;  %v17392_v28 = vpack.c.bf16 %v14464_v10, %v17391_v60 }
 0x620   : > { %v6291_v18 = vsel %vm17376_vm6, %v17375_v39, %v17374_v27  ;;  %v17396_v13 = vld [vmem:[#allocation128_spill] sm:$0xff]  ;;  %v17405_v62 = vld [vmem:[#allocation133_spill] sm:$0xff]  ;;  %v17412_v27 = vld [vmem:[#allocation150_spill] sm:$0xff] }
 0x621   : > { %8603 = vmatmul.mubr.msk.bf16.gmra.mrb[12].mxu1 %vm1260_vm13, %v17362_v46  ;;  %v6323_v3 = vsel %vm17379_vm3, %v6291_v18, 0.0  ;;  %v17399_v46 = vld [vmem:[#allocation129_spill] sm:$0xff]  ;;  %v17414_v18 = vld [vmem:[#allocation100_spill] sm:$0xff] }
 0x622   : > { %8606 = vmatprep.mubr.msk.bf16.mxu1 %vm1260_vm13, %v17363_v59  ;;  %v6339_v44 = vpack.c.bf16 %v17380_v31, %v6323_v3  ;;  %v17400_v59 = vld [vmem:[#allocation135_spill] sm:$0xff] }
 0x623   : > { %v17401_v54 = vpack.c.bf16 %v17399_v46, %v17400_v59 }
 0x629   : > { %8607 = vmatmul.mubr.msk.bf16.gmra.mrb[16].mxu1 %vm1260_vm13, %v17366_v38  ;;  %v17403_v38 = vld [vmem:[#allocation134_spill] sm:$0xff] }
 0x62a   : > { %8610 = vmatprep.mubr.msk.bf16.mxu1 %vm1260_vm13, %v17369_v25  ;;  %v17404_v10 = vpack.c.bf16 %v17402_v47, %v17403_v38  ;;  %v17407_v25 = vpack.c.bf16 %v17405_v62, %v17406_v34 }
 0x631   : > { %8611 = vmatmul.mubr.msk.bf16.gmra.mrb[20].mxu1 %vm1260_vm13, %v17370_v20  ;;  %v17408_v20 = vld [vmem:[#allocation136_spill] sm:$0xff] }
 0x632   : > { %8614 = vmatprep.mubr.msk.bf16.mxu1 %vm1260_vm13, %v17372_v45  ;;  %v17410_v45 = vpack.c.bf16 %v17408_v20, %v17409_v61 }
 0x639   : > { %8615 = vmatmul.mubr.msk.bf16.gmra.mrb[24].mxu1 %vm1260_vm13, %v17373_v17  ;;  %v17411_v17 = vld [vmem:[#allocation137_spill] sm:$0xff] }
 0x63a   : > { %8618 = vmatprep.mubr.msk.bf16.mxu1 %vm1260_vm13, %v17377_v15  ;;  %v17413_v39 = vpack.c.bf16 %v17411_v17, %v17412_v27 }
 0x641   : > { %8619 = vmatmul.mubr.msk.bf16.gmra.mrb[76].mxu1 %vm1260_vm13, %v6339_v44 }
 0x642   : > { %8624 = vmatprep.mubr.msk.bf16.mxu1 %vm1260_vm13, %v17281_v48 }
 0x649   : > { %8625 = vmatmul.mubr.msk.bf16.vlgmr.msra.gmra.mrb[80].mxu1 %vm1260_vm13, %v17282_v6 }
 0x64a   : > { %8657 = vmatpush3.bf16.msra.mxu1 %v6861_v5  ;;  %8628 = vmatprep.mubr.msk.bf16.mxu1 %vm1260_vm13, %v17283_v36 }
 0x651   : > { %8629 = vmatmul.mubr.msk.bf16.gmra.mrb[4].mxu1 %vm1260_vm13, %v17284_v8 }
 0x652   : > { %8632 = vmatprep.mubr.msk.bf16.mxu1 %vm1260_vm13, %v17285_v56  ;;  %v17384_v56 = vld [vmem:[#allocation44_spill] sm:$0xff] }
 0x654   : > { %v8518_v19 = vpop.f32.mrb[52].mxu1 }
 0x655   : > { %v5766_v35 = vpop.f32.mrb[53].mxu1 }
 0x656   : > { %v5805_v37 = vadd.f32 %v5766_v35, %v5515_v30  ;;  %v8519_v29 = vpop.f32.mrb[54].mxu1 }
 0x657   : > { %v5769_v48 = vpop.f32.mrb[55].mxu1 }
 0x658   : > { %v5806_v16 = vadd.f32 %v5769_v48, %v5516_v43 }
 0x659   : > { %8633 = vmatmul.mubr.msk.bf16.gmra.mrb[8].mxu1 %vm1260_vm13, %v17286_v55 }
 0x65a   : > { %8636 = vmatprep.mubr.msk.bf16.mxu1 %vm1260_vm13, %v17287_v14  ;;  %v17382_v14 = vpack.c.bf16 %v14381_v7, %v14376_v26  ;;  %v17388_v26 = vpack.c.bf16 %v14422_v41, %v14417_v42 }
 0x65c   : > { %v8524_v6 = vpop.f32.mrb[56].mxu1 }
 0x65d   : > { %v5973_v36 = vadd.f32 %v8524_v6, %v5779_v0  ;;  %v5850_v53 = vpop.f32.mrb[57].mxu1 }
 0x65e   : > { %v8525_v24 = vpop.f32.mrb[58].mxu1 }
 0x65f   : > { %v5974_v8 = vadd.f32 %v8525_v24, %v5780_v40  ;;  %v5852_v21 = vpop.f32.mrb[59].mxu1  ;;  %v17393_v40 = vld [vmem:[#allocation125_spill] sm:$0xff] }
 0x661   : > { %8637 = vmatmul.mubr.msk.bf16.gmra.mrb[12].mxu1 %vm1260_vm13, %v17288_v63  ;;  %v17381_v63 = vmov 0.0|0.0  }
 0x662   : > { %8640 = vmatprep.mubr.msk.bf16.mxu1 %vm1260_vm13, %v17289_v50  ;;  %v17386_v50 = vpack.c.bf16 %v14393_v11, %v14388_v51  ;;  %v17389_v51 = vpack.c.bf16 %v14438_v1, %v14433_v57  ;;  %v17390_v11 = vpack.c.bf16 %v14454_v32, %v14443_v49  ;;  %v17394_v57 = vld [vmem:[#allocation131_spill] sm:$0xff]  ;;  %v17397_v49 = vld [vmem:[#allocation130_spill] sm:$0xff] }
 0x663   : > { %v17395_v1 = vpack.c.bf16 %v17393_v40, %v17394_v57  ;;  %v17398_v32 = vpack.c.bf16 %v17396_v13, %v17397_v49 }
 0x669   : > { %8641 = vmatmul.mubr.msk.bf16.gmra.mrb[16].mxu1 %vm1260_vm13, %v17290_v23  ;;  %v17387_v23 = vpack.c.bf16 %v14407_v4, %v14402_v12 }
 0x66a   : > { %8644 = vmatprep.mubr.msk.bf16.mxu1 %vm1260_vm13, %v17291_v33  ;;  %v17383_v33 = vld [vmem:[#allocation76_spill] sm:$0xff] }
 0x66b   : > { %v17385_v55 = vpack.c.bf16 %v17383_v33, %v17384_v56 }
 0x671   : > { %8645 = vmatmul.mubr.msk.bf16.gmra.mrb[20].mxu1 %vm1260_vm13, %v17292_v2 }
 0x672   : > { %8648 = vmatprep.mubr.msk.bf16.mxu1 %vm1260_vm13, %v17293_v9 }
 0x679   : > { %8649 = vmatmul.mubr.msk.bf16.gmra.mrb[24].mxu1 %vm1260_vm13, %v17294_v52 }
 0x67a   : > { %8652 = vmatprep.mubr.msk.bf16.mxu1 %vm1260_vm13, %v17295_v22 }
 0x681   : > { %8653 = vmatmul.mubr.bf16.gmra.mrb[84].mxu1 %v17381_v63 }
 0x682   : > { %8658 = vmatprep.mubr.msk.bf16.mxu1 %vm1260_vm13, %v17382_v14 }
 0x689   : > { %8659 = vmatmul.mubr.msk.bf16.vlgmr.msra.gmra.mrb[88].mxu1 %vm1260_vm13, %v17385_v55 }
 0x68a   : > { %8662 = vmatprep.mubr.msk.bf16.mxu1 %vm1260_vm13, %v17386_v50 }
 0x691   : > { %8663 = vmatmul.mubr.msk.bf16.gmra.mrb[4].mxu1 %vm1260_vm13, %v17387_v23 }
 0x692   : > { %8666 = vmatprep.mubr.msk.bf16.mxu1 %vm1260_vm13, %v17388_v26 }
 0x694   : > { %v8552_v7 = vpop.f32.mrb[60].mxu1 }
 0x695   : > { %v5960_v2 = vpop.f32.mrb[61].mxu1 }
 0x696   : > { %v5999_v9 = vadd.f32 %v5960_v2, %v5805_v37  ;;  %v8553_v52 = vpop.f32.mrb[62].mxu1 }
 0x697   : > { %v5963_v22 = vpop.f32.mrb[63].mxu1 }
 0x698   : > { %v6000_v30 = vadd.f32 %v5963_v22, %v5806_v16  ;;  %v14955_v22 = vld [vmem:[%s15198_s6] ss:$0 sm:$0xff] }
 0x699   : > { %8667 = vmatmul.mubr.msk.bf16.gmra.mrb[8].mxu1 %vm1260_vm13, %v17389_v51 }
 0x69a   : > { %8670 = vmatprep.mubr.msk.bf16.mxu1 %vm1260_vm13, %v17390_v11 }
 0x69c   : > { %v8558_v12 = vpop.f32.mrb[64].mxu1 }
 0x69d   : > { %v6263_v4 = vadd.f32 %v8558_v12, %v5973_v36  ;;  %v6140_v42 = vpop.f32.mrb[65].mxu1  ;;  %v14960_v12 = vld [vmem:[%s15199_s7] ss:$0 sm:$0xff] }
 0x69e   : > { %v8559_v41 = vpop.f32.mrb[66].mxu1 }
 0x69f   : > { %v6264_v43 = vadd.f32 %v8559_v41, %v5974_v8  ;;  %v6142_v0 = vpop.f32.mrb[67].mxu1 }
 0x6a1   : > { %8671 = vmatmul.mubr.msk.bf16.gmra.mrb[12].mxu1 %vm1260_vm13, %v17392_v28 }
 0x6a2   : > { %8674 = vmatprep.mubr.msk.bf16.mxu1 %vm1260_vm13, %v17395_v1 }
 0x6a9   : > { %8675 = vmatmul.mubr.msk.bf16.gmra.mrb[16].mxu1 %vm1260_vm13, %v17398_v32 }
 0x6aa   : > { %8678 = vmatprep.mubr.msk.bf16.mxu1 %vm1260_vm13, %v17401_v54 }
 0x6b1   : > { %8679 = vmatmul.mubr.msk.bf16.gmra.mrb[20].mxu1 %vm1260_vm13, %v17404_v10 }
 0x6b2   : > { %8682 = vmatprep.mubr.msk.bf16.mxu1 %vm1260_vm13, %v17407_v25 }
 0x6b9   : > { %8683 = vmatmul.mubr.msk.bf16.gmra.mrb[24].mxu1 %vm1260_vm13, %v17410_v45 }
 0x6ba   : > { %8686 = vmatprep.mubr.msk.bf16.mxu1 %vm1260_vm13, %v17413_v39  ;;  %v17416_v39 = vld [vmem:[#allocation16_spill] sm:$0xff] }
 0x6bb   : > { %vm17417_vm7 = vcmp.eq.s32.totalorder %v17416_v39, 1  ;;  %v17441_v39 = vld [vmem:[#allocation5_spill] sm:$0xff] }
 0x6c1   : > { %8687 = vmatmul.mubr.msk.bf16.gmra.mrb[92].mxu1 %vm1260_vm13, %v17414_v18 }
 0x6d4   : > { %v8586_v15 = vpop.f32.mrb[68].mxu1 }
 0x6d5   : > { %v6250_v58 = vpop.f32.mrb[69].mxu1 }
 0x6d6   : > { %v6289_v3 = vadd.f32 %v6250_v58, %v5999_v9  ;;  %v8587_v31 = vpop.f32.mrb[70].mxu1 }
 0x6d7   : > { %v6253_v44 = vpop.f32.mrb[71].mxu1 }
 0x6d8   : > { %v6290_v5 = vadd.f32 %v6253_v44, %v6000_v30 }
 0x6dc   : > { %v8592_v19 = vpop.f32.mrb[72].mxu1 }
 0x6dd   : > { %v6550_v35 = vadd.f32 %v8592_v19, %v6263_v4  ;;  %v6427_v37 = vpop.f32.mrb[73].mxu1 }
 0x6de   : > { %v8593_v29 = vpop.f32.mrb[74].mxu1 }
 0x6df   : > { %v6551_v48 = vadd.f32 %v8593_v29, %v6264_v43  ;;  %v6429_v16 = vpop.f32.mrb[75].mxu1  ;;  %v17419_v29 = vld [vmem:[#allocation6_spill] sm:$0xff] }
 0x6e0   : > { %vm17420_vm8 = vcmp.eq.s32.totalorder %v17419_v29, 1 }
 0x714   : > { %v8620_v6 = vpop.f32.mrb[76].mxu1 }
 0x715   : > { %v6537_v36 = vpop.f32.mrb[77].mxu1 }
 0x716   : > { %v6576_v53 = vadd.f32 %v6537_v36, %v6289_v3  ;;  %v8621_v24 = vpop.f32.mrb[78].mxu1 }
 0x717   : > { %v6540_v8 = vpop.f32.mrb[79].mxu1 }
 0x718   : > { %v6577_v21 = vadd.f32 %v6540_v8, %v6290_v5 }
 0x71c   : > { %v8626_v63 = vpop.f32.mrb[80].mxu1 }
 0x71d   : > { %v6740_v14 = vadd.f32 %v8626_v63, %v6550_v35  ;;  %v6617_v33 = vpop.f32.mrb[81].mxu1 }
 0x71e   : > { %v8627_v56 = vpop.f32.mrb[82].mxu1  ;;  %v17423_v33 = vld [vmem:[#allocation13_spill] sm:$0xff] }
 0x71f   : > { %v6741_v55 = vadd.f32 %v8627_v56, %v6551_v48  ;;  %v6619_v50 = vpop.f32.mrb[83].mxu1  ;;  %vm17424_vm6 = vcmp.eq.s32.totalorder %v17423_v33, 1 }
 0x754   : > { %v8654_v23 = vpop.f32.mrb[84].mxu1 }
 0x755   : > { %v6727_v26 = vpop.f32.mrb[85].mxu1 }
 0x756   : > { %v14948_v7 = vadd.f32 %v6727_v26, %v6576_v53  ;;  %v8655_v2 = vpop.f32.mrb[86].mxu1 }
 0x757   : > { %v6730_v9 = vpop.f32.mrb[87].mxu1 }
 0x758   : > { %v14950_v52 = vadd.f32 %v6730_v9, %v6577_v21 }
 0x75c   : > { %v8660_v30 = vpop.f32.mrb[88].mxu1 }
 0x75d   : > { %v7020_v51 = vadd.f32 %v8660_v30, %v6740_v14  ;;  %v6897_v11 = vpop.f32.mrb[89].mxu1 }
 0x75e   : > { %v8661_v4 = vpop.f32.mrb[90].mxu1 }
 0x75f   : > { %v7054_v42 = vadd.f32 %v14955_v22, %v7020_v51  ;;  %v7021_v41 = vadd.f32 %v8661_v4, %v6741_v55  ;;  %v6899_v43 = vpop.f32.mrb[91].mxu1  ;;  %v17426_v51 = vld [vmem:[#allocation8_spill] sm:$0xff] }
 0x761   : > { %vm7082_vm14 = vcmp.gt.f32.partialorder %v7054_v42, 0.0  ;;  %v7116_v0 = vmul.f32 %v14960_v12, %v7054_v42  ;;  %v7055_v60 = vadd.f32 %v14955_v22, %v7021_v41 }
 0x763   : > { %v7144_v28 = vsel %vm7082_vm14, %v7054_v42, %v7116_v0  ;;  %vm7083_vm13 = vcmp.gt.f32.partialorder %v7055_v60, 0.0  ;;  %v7117_v40 = vmul.f32 %v14960_v12, %v7055_v60  ;;  %vm17425_vm14 = vmmov %vm17415_vm0  ;;  %v17428_v42 = vld [vmem:[#allocation10_spill] sm:$0xff] }
 0x764   : > { %v8664_v57 = vpop.f32.mrb[4].mxu1  ;;  %v7197_v32 = vrot.slane %v7144_v28, 4  ;;  %v17430_v28 = vld [vmem:[#allocation7_spill] sm:$0xff] }
 0x765   : > { %v7145_v1 = vsel %vm7083_vm13, %v7055_v60, %v7117_v40  ;;  %v7058_v13 = vadd.f32 %v8664_v57, %v14955_v22  ;;  %v6911_v49 = vpop.f32.mrb[5].mxu1  ;;  %v17432_v57 = vld [vmem:[#allocation18_spill] sm:$0xff] }
 0x766   : > { %v7198_v46 = vrot.slane %v7145_v1, 4  ;;  %v7056_v59 = vadd.f32 %v14955_v22, %v6911_v49  ;;  %v8665_v54 = vpop.f32.mrb[6].mxu1 }
 0x767   : > { %vm7086_vm12 = vcmp.gt.f32.partialorder %v7058_v13, 0.0  ;;  %v7120_v47 = vmul.f32 %v14960_v12, %v7058_v13  ;;  %v7059_v38 = vadd.f32 %v8665_v54, %v14955_v22  ;;  %v6914_v10 = vpop.f32.mrb[7].mxu1 }
 0x768   : > { %vm7084_vm2 = vcmp.gt.f32.partialorder %v7056_v59, 0.0  ;;  %v7118_v62 = vmul.f32 %v14960_v12, %v7056_v59  ;;  %v7199_v34 = vsel %vm17415_vm0, %v7197_v32, %v7198_v46  ;;  %v7057_v25 = vadd.f32 %v14955_v22, %v6914_v10 }
 0x769   : > { %v7148_v20 = vsel %vm7086_vm12, %v7058_v13, %v7120_v47  ;;  %vm7087_vm15 = vcmp.gt.f32.partialorder %v7059_v38, 0.0  ;;  %v7121_v61 = vmul.f32 %v14960_v12, %v7059_v38  ;;  %vm17427_vm12 = vcmp.eq.s32.totalorder %v17426_v51, 1 }
 0x76a   : > { %v7146_v45 = vsel %vm7084_vm2, %v7056_v59, %v7118_v62  ;;  %vm7085_vm9 = vcmp.gt.f32.partialorder %v7057_v25, 0.0  ;;  %v7119_v17 = vmul.f32 %v14960_v12, %v7057_v25  ;;  %v7204_v58 = vrot.slane %v7148_v20, 4  ;;  %v17435_v59 = vld [vmem:[#allocation11_spill] sm:$0xff] }
 0x76b   : > { %v7200_v27 = vrot.slane %v7146_v45, 4  ;;  %v7270_v18 = vsel %vm17417_vm7, %v7199_v34, %v7146_v45  ;;  %v7149_v15 = vsel %vm7087_vm15, %v7059_v38, %v7121_v61  ;;  %vm17429_vm2 = vcmp.eq.s32.totalorder %v17428_v42, 1  ;;  %v17438_v62 = vld [vmem:[#allocation3_spill] sm:$0xff] }
 0x76c   : > { %v7206_v3 = vrot.slane %v7149_v15, 4  ;;  %v7147_v31 = vsel %vm7085_vm9, %v7057_v25, %v7119_v17  ;;  %v8668_v44 = vpop.f32.mrb[8].mxu1  ;;  %vm17431_vm0 = vcmp.eq.s32.totalorder %v17430_v28, 1  ;;  %vm17433_vm15 = vcmp.eq.s32.totalorder %v17432_v57, 1  ;;  %vm17434_vm9 = vmmov %vm17422_vm1  ;;  %v17461_v57 = vld [vmem:[#allocation27_spill] sm:$0xff] }
 0x76d   : > { %v7201_v5 = vsel %vm17418_vm5, %v7198_v46, %v7200_v27  ;;  %v7202_v19 = vrot.slane %v7147_v31, 4  ;;  %v7062_v35 = vadd.f32 %v8668_v44, %v14955_v22  ;;  %v6927_v37 = vpop.f32.mrb[9].mxu1  ;;  %vm17436_vm7 = vcmp.eq.s32.totalorder %v17435_v59, 1  ;;  %vm17437_vm5 = vmmov %vm17422_vm1 }
 0x76e   : > { %v7271_v48 = vsel %vm17420_vm8, %v7201_v5, %v7147_v31  ;;  %v7060_v16 = vadd.f32 %v14955_v22, %v6927_v37  ;;  %v7207_v6 = vsel %vm17421_vm10, %v7204_v58, %v7206_v3  ;;  %v8669_v36 = vpop.f32.mrb[10].mxu1  ;;  %vm17439_vm8 = vcmp.eq.s32.totalorder %v17438_v62, 1  ;;  %v17463_v62 = vld [vmem:[#allocation32_spill] sm:$0xff] }
 0x76f   : > { %vm7090_vm4 = vcmp.gt.f32.partialorder %v7062_v35, 0.0  ;;  %v7124_v53 = vmul.f32 %v14960_v12, %v7062_v35  ;;  %v7063_v24 = vadd.f32 %v8669_v36, %v14955_v22  ;;  %v6930_v8 = vpop.f32.mrb[11].mxu1  ;;  %v7205_v21 = vsel %vm17422_vm1, %v7202_v19, %v7204_v58 }
 0x770   : > { %vm7088_vm11 = vcmp.gt.f32.partialorder %v7060_v16, 0.0  ;;  %v7122_v63 = vmul.f32 %v14960_v12, %v7060_v16  ;;  %v7061_v14 = vadd.f32 %v14955_v22, %v6930_v8  ;;  %v7273_v56 = vsel %vm17424_vm6, %v7205_v21, %v7149_v15 }
 0x771   : > { %v7152_v55 = vsel %vm7090_vm4, %v7062_v35, %v7124_v53  ;;  %vm7091_vm3 = vcmp.gt.f32.partialorder %v7063_v24, 0.0  ;;  %v7125_v50 = vmul.f32 %v14960_v12, %v7063_v24  ;;  %v7203_v23 = vsel %vm17425_vm14, %v7200_v27, %v7202_v19  ;;  %vm17440_vm4 = vmmov %vm17422_vm1  ;;  %v17444_v35 = vld [vmem:[#allocation21_spill] sm:$0xff] }
 0x772   : > { %v7212_v26 = vrot.slane %v7152_v55, 4  ;;  %v7150_v2 = vsel %vm7088_vm11, %v7060_v16, %v7122_v63  ;;  %vm7089_vm13 = vcmp.gt.f32.partialorder %v7061_v14, 0.0  ;;  %v7123_v9 = vmul.f32 %v14960_v12, %v7061_v14 }
 0x773   : > { %v7208_v30 = vrot.slane %v7150_v2, 4  ;;  %v7274_v11 = vsel %vm17427_vm12, %v7207_v6, %v7150_v2  ;;  %v7153_v4 = vsel %vm7091_vm3, %v7063_v24, %v7125_v50  ;;  %v7272_v41 = vsel %vm17429_vm2, %v7203_v23, %v7148_v20  ;;  %vm17443_vm3 = vmmov %vm17440_vm4  ;;  %v17448_v24 = vld [vmem:[#allocation15_spill] sm:$0xff]  ;;  %v17455_v2 = vld [vmem:[#allocation24_spill] sm:$0xff] }
 0x774   : > { %v7214_v43 = vrot.slane %v7153_v4, 4  ;;  %v7151_v0 = vsel %vm7089_vm13, %v7061_v14, %v7123_v9  ;;  %v8672_v60 = vpop.f32.mrb[12].mxu1  ;;  %v14999_v40 = vsel %vm17431_vm0, %v7207_v6, %v7271_v48  ;;  %v15003_v1 = vsel %vm17433_vm15, %v7205_v21, %v7270_v18  ;;  %v17446_v48 = vld [vmem:[#allocation14_spill] sm:$0xff]  ;;  %v17450_v21 = vld [vmem:[#allocation17_spill] sm:$0xff]  ;;  %vm17452_vm15 = vmmov %vm17443_vm3 }
 0x775   : > { %v7209_v13 = vsel %vm17434_vm9, %v7206_v3, %v7208_v30  ;;  %v7210_v49 = vrot.slane %v7151_v0, 4  ;;  %v7066_v32 = vadd.f32 %v8672_v60, %v14955_v22  ;;  %v6943_v46 = vpop.f32.mrb[13].mxu1  ;;  %vm17442_vm11 = vcmp.eq.s32.totalorder %v17441_v39, 1  ;;  %v17453_v23 = vld [vmem:[#allocation19_spill] sm:$0xff]  ;;  %v17467_v39 = vld [vmem:[#allocation29_spill] sm:$0xff] }
 0x776   : > { %v7275_v54 = vsel %vm17436_vm7, %v7209_v13, %v7151_v0  ;;  %v7064_v47 = vadd.f32 %v14955_v22, %v6943_v46  ;;  %v7215_v38 = vsel %vm17437_vm5, %v7212_v26, %v7214_v43  ;;  %v8673_v10 = vpop.f32.mrb[14].mxu1  ;;  %v15013_v34 = vsel %vm17439_vm8, %v7209_v13, %v7272_v41  ;;  %vm17457_vm5 = vmmov %vm17443_vm3 }
 0x777   : > { %vm7094_vm10 = vcmp.gt.f32.partialorder %v7066_v32, 0.0  ;;  %v7128_v25 = vmul.f32 %v14960_v12, %v7066_v32  ;;  %v7067_v20 = vadd.f32 %v8673_v10, %v14955_v22  ;;  %v6946_v61 = vpop.f32.mrb[15].mxu1  ;;  %v7211_v45 = vsel %vm17440_vm4, %v7208_v30, %v7210_v49  ;;  %vm17460_vm4 = vmmov %vm17443_vm3 }
 0x778   : > { %vm7092_vm1 = vcmp.gt.f32.partialorder %v7064_v47, 0.0  ;;  %v7126_v17 = vmul.f32 %v14960_v12, %v7064_v47  ;;  %v7065_v27 = vadd.f32 %v14955_v22, %v6946_v61  ;;  %v15022_v18 = vsel %vm17442_vm11, %v7211_v45, %v7273_v56 }
 0x779   : > { %v7156_v15 = vsel %vm7094_vm10, %v7066_v32, %v7128_v25  ;;  %vm7095_vm6 = vcmp.gt.f32.partialorder %v7067_v20, 0.0  ;;  %v7129_v58 = vmul.f32 %v14960_v12, %v7067_v20  ;;  %7330 = vxpose.xlu0.b32.start [1/16] (narrow) %v15022_v18, 8  ;;  %v7213_v3 = vsel %vm17443_vm3, %v7210_v49, %v7212_v26 }
 0x77a   : > { %v7220_v31 = vrot.slane %v7156_v15, 4  ;;  %v7154_v44 = vsel %vm7092_vm1, %v7064_v47, %v7126_v17  ;;  %vm7093_vm14 = vcmp.gt.f32.partialorder %v7065_v27, 0.0  ;;  %v7127_v5 = vmul.f32 %v14960_v12, %v7065_v27 }
 0x77b   : > { %v7216_v19 = vrot.slane %v7154_v44, 4  ;;  %vm17445_vm13 = vcmp.eq.s32.totalorder %v17444_v35, 1  ;;  %v7157_v29 = vsel %vm7095_vm6, %v7067_v20, %v7129_v58  ;;  %vm17447_vm12 = vcmp.eq.s32.totalorder %v17446_v48, 1  ;;  %v17465_v20 = vld [vmem:[#allocation28_spill] sm:$0xff] }
 0x77c   : > { %v7278_v37 = vsel %vm17445_vm13, %v7215_v38, %v7154_v44  ;;  %v15032_v16 = vsel %vm17447_vm12, %v7213_v3, %v7274_v11  ;;  %v7222_v6 = vrot.slane %v7157_v29, 4  ;;  %v7155_v36 = vsel %vm7093_vm14, %v7065_v27, %v7127_v5  ;;  %v8676_v53 = vpop.f32.mrb[16].mxu1 }
 0x77d   : > { %vm17449_vm2 = vcmp.eq.s32.totalorder %v17448_v24, 1  ;;  %vm17451_vm0 = vcmp.eq.s32.totalorder %v17450_v21, 1  ;;  %v7217_v14 = vsel %vm17452_vm15, %v7214_v43, %v7216_v19  ;;  %v7218_v33 = vrot.slane %v7155_v36, 4  ;;  %7331 = vxpose.xlu0.b32.cont [2/16] (narrow) %v15013_v34, 8  ;;  %v6959_v50 = vpop.f32.mrb[17].mxu1  ;;  %vm17471_vm15 = vmmov %vm17443_vm3  ;;  %v17475_v21 = vld [vmem:[#allocation33_spill] sm:$0xff] }
 0x77e   : > { %v15036_v8 = vsel %vm17449_vm2, %v7215_v38, %v7275_v54  ;;  %v7276_v63 = vsel %vm17451_vm0, %v7211_v45, %v7152_v55  ;;  %v7070_v56 = vadd.f32 %v8676_v53, %v14955_v22  ;;  %vm17454_vm9 = vcmp.eq.s32.totalorder %v17453_v23, 1  ;;  %v8677_v51 = vpop.f32.mrb[18].mxu1  ;;  %v17458_v55 = vld [vmem:[#allocation23_spill] sm:$0xff] }
 0x77f   : > { %v7277_v26 = vsel %vm17454_vm9, %v7213_v3, %v7153_v4  ;;  %vm17456_vm7 = vcmp.eq.s32.totalorder %v17455_v2, 1  ;;  %v7068_v30 = vadd.f32 %v14955_v22, %v6959_v50  ;;  %v7223_v11 = vsel %vm17457_vm5, %v7220_v31, %v7222_v6  ;;  %v6962_v0 = vpop.f32.mrb[19].mxu1  ;;  %v17469_v3 = vld [vmem:[#allocation30_spill] sm:$0xff] }
 0x780   : > { %v7279_v9 = vsel %vm17456_vm7, %v7217_v14, %v7155_v36  ;;  %vm17459_vm8 = vcmp.eq.s32.totalorder %v17458_v55, 1  ;;  %vm7098_vm10 = vcmp.gt.f32.partialorder %v7070_v56, 0.0  ;;  %v7132_v41 = vmul.f32 %v14960_v12, %v7070_v56  ;;  %vm17474_vm7 = vmmov %vm17443_vm3 }
 0x781   : > { %v15051_v42 = vsel %vm17459_vm8, %v7217_v14, %v7276_v63  ;;  %v7071_v43 = vadd.f32 %v8677_v51, %v14955_v22  ;;  %v7219_v4 = vsel %vm17460_vm4, %v7216_v19, %v7218_v33  ;;  %vm7096_vm1 = vcmp.gt.f32.partialorder %v7068_v30, 0.0  ;;  %7332 = vxpose.xlu0.b32.cont [3/16] (narrow) %v14999_v40, 8  ;;  %vm17479_vm4 = vmmov %vm17443_vm3  ;;  %v17482_v51 = vld [vmem:[#allocation39_spill] sm:$0xff] }
 0x782   : > { %v7130_v60 = vmul.f32 %v14960_v12, %v7068_v30  ;;  %v7069_v28 = vadd.f32 %v14955_v22, %v6962_v0  ;;  %vm17462_vm11 = vcmp.eq.s32.totalorder %v17461_v57, 1  ;;  %v7160_v49 = vsel %vm7098_vm10, %v7070_v56, %v7132_v41 }
 0x783   : > { %v15060_v13 = vsel %vm17462_vm11, %v7219_v4, %v7277_v26  ;;  %vm7099_vm6 = vcmp.gt.f32.partialorder %v7071_v43, 0.0  ;;  %v7133_v32 = vmul.f32 %v14960_v12, %v7071_v43  ;;  %v7221_v46 = vsel %vm17443_vm3, %v7218_v33, %v7220_v31  ;;  %v17480_v26 = vld [vmem:[#allocation38_spill] sm:$0xff] }
 0x784   : > { %v7228_v59 = vrot.slane %v7160_v49, 4  ;;  %v7158_v54 = vsel %vm7096_vm1, %v7068_v30, %v7130_v60  ;;  %vm7097_vm14 = vcmp.gt.f32.partialorder %v7069_v28, 0.0  ;;  %v7131_v47 = vmul.f32 %v14960_v12, %v7069_v28  ;;  %v8680_v27 = vpop.f32.mrb[20].mxu1 }
 0x785   : > { %v7224_v38 = vrot.slane %v7158_v54, 4  ;;  %v7161_v10 = vsel %vm7099_vm6, %v7071_v43, %v7133_v32  ;;  %vm17464_vm13 = vcmp.eq.s32.totalorder %v17463_v62, 1  ;;  %vm17466_vm12 = vcmp.eq.s32.totalorder %v17465_v20, 1  ;;  %7333 = vxpose.xlu0.b32.cont [4/16] (narrow) %v15003_v1, 8  ;;  %v6975_v19 = vpop.f32.mrb[21].mxu1 }
 0x786   : > { %v7282_v25 = vsel %vm17464_vm13, %v7223_v11, %v7158_v54  ;;  %v15070_v61 = vsel %vm17466_vm12, %v7221_v46, %v7278_v37  ;;  %v7230_v45 = vrot.slane %v7161_v10, 4  ;;  %v7159_v17 = vsel %vm7097_vm14, %v7069_v28, %v7131_v47  ;;  %v17472_v37 = vld [vmem:[#allocation31_spill] sm:$0xff]  ;;  %v8681_v53 = vpop.f32.mrb[22].mxu1  ;;  %vm17484_vm13 = vmmov %vm17479_vm4  ;;  %v17489_v47 = vld [vmem:[#allocation50_spill] sm:$0xff] }
 0x787   : > { %vm17468_vm2 = vcmp.eq.s32.totalorder %v17467_v39, 1  ;;  %vm17470_vm0 = vcmp.eq.s32.totalorder %v17469_v3, 1  ;;  %v7226_v44 = vrot.slane %v7159_v17, 4  ;;  %v7074_v5 = vadd.f32 %v8680_v27, %v14955_v22  ;;  %v6978_v56 = vpop.f32.mrb[23].mxu1  ;;  %v17485_v28 = vld [vmem:[#allocation47_spill] sm:$0xff]  ;;  %v17492_v27 = vld [vmem:[#allocation37_spill] sm:$0xff] }
 0x788   : > { %v15074_v58 = vsel %vm17468_vm2, %v7223_v11, %v7279_v9  ;;  %v7280_v31 = vsel %vm17470_vm0, %v7219_v4, %v7156_v15  ;;  %v7225_v35 = vsel %vm17471_vm15, %v7222_v6, %v7224_v38  ;;  %vm17473_vm9 = vcmp.eq.s32.totalorder %v17472_v37, 1  ;;  %v17477_v15 = vld [vmem:[#allocation36_spill] sm:$0xff]  ;;  %vm17491_vm15 = vmmov %vm17479_vm4 }
 0x789   : > { %v7281_v48 = vsel %vm17473_vm9, %v7221_v46, %v7157_v29  ;;  %v7072_v36 = vadd.f32 %v14955_v22, %v6975_v19  ;;  %v7231_v24 = vsel %vm17474_vm7, %v7228_v59, %v7230_v45  ;;  %vm17476_vm5 = vcmp.eq.s32.totalorder %v17475_v21, 1  ;;  %7334 = vxpose.xlu0.b32.cont [5/16] (narrow) %v15003_v1, 8  ;;  %v17487_v1 = vld [vmem:[#allocation43_spill] sm:$0xff] }
 0x78a   : > { %v7283_v63 = vsel %vm17476_vm5, %v7225_v35, %v7159_v17  ;;  %vm17478_vm8 = vcmp.eq.s32.totalorder %v17477_v15, 1  ;;  %vm7102_vm10 = vcmp.gt.f32.partialorder %v7074_v5, 0.0  ;;  %v7136_v33 = vmul.f32 %v14960_v12, %v7074_v5  ;;  %vm17496_vm5 = vmmov %vm17479_vm4 }
 0x78b   : > { %v15089_v14 = vsel %vm17478_vm8, %v7225_v35, %v7280_v31  ;;  %v7075_v6 = vadd.f32 %v8681_v53, %v14955_v22  ;;  %v7229_v29 = vsel %vm17479_vm4, %v7226_v44, %v7228_v59  ;;  %vm7100_vm1 = vcmp.gt.f32.partialorder %v7072_v36, 0.0  ;;  %v17499_v53 = vld [vmem:[#allocation60_spill] sm:$0xff] }
 0x78c   : > { %v7134_v50 = vmul.f32 %v14960_v12, %v7072_v36  ;;  %v7073_v23 = vadd.f32 %v14955_v22, %v6978_v56  ;;  %vm17481_vm11 = vcmp.eq.s32.totalorder %v17480_v26, 1  ;;  %v7164_v9 = vsel %vm7102_vm10, %v7074_v5, %v7136_v33  ;;  %v8684_v59 = vpop.f32.mrb[24].mxu1  ;;  %v17497_v5 = vld [vmem:[#allocation54_spill] sm:$0xff] }
 0x78d   : > { %v7318_v2 = vsel %vm17481_vm11, %v7229_v29, %v7282_v25  ;;  %vm7103_vm6 = vcmp.gt.f32.partialorder %v7075_v6, 0.0  ;;  %v7137_v30 = vmul.f32 %v14960_v12, %v7075_v6  ;;  %vm17483_vm3 = vcmp.eq.s32.totalorder %v17482_v51, 1  ;;  %7335 = vxpose.xlu0.b32.cont [6/16] (narrow) %v14999_v40, 8  ;;  %v6991_v17 = vpop.f32.mrb[25].mxu1 }
 0x78e   : > { %7362 = vxpose.xlu1.b32.start [1/16] (narrow) %v7318_v2, 8  ;;  %v7319_v11 = vsel %vm17483_vm3, %v7231_v24, %v7283_v63  ;;  %v7236_v55 = vrot.slane %v7164_v9, 4  ;;  %v7162_v41 = vsel %vm7100_vm1, %v7072_v36, %v7134_v50  ;;  %vm7101_vm14 = vcmp.gt.f32.partialorder %v7073_v23, 0.0  ;;  %v8685_v3 = vpop.f32.mrb[26].mxu1  ;;  %vm17501_vm3 = vmmov %vm17479_vm4  ;;  %v17504_v2 = vld [vmem:[#allocation65_spill] sm:$0xff] }
 0x78f   : > { %v7135_v43 = vmul.f32 %v14960_v12, %v7073_v23  ;;  %v7232_v0 = vrot.slane %v7162_v41, 4  ;;  %v7165_v4 = vsel %vm7103_vm6, %v7075_v6, %v7137_v30  ;;  %v7227_v60 = vsel %vm17484_vm13, %v7224_v38, %v7226_v44  ;;  %v6994_v35 = vpop.f32.mrb[27].mxu1 }
 0x790   : > { %vm17486_vm12 = vcmp.eq.s32.totalorder %v17485_v28, 1  ;;  %v7238_v32 = vrot.slane %v7165_v4, 4  ;;  %vm17488_vm2 = vcmp.eq.s32.totalorder %v17487_v1, 1  ;;  %vm17490_vm0 = vcmp.eq.s32.totalorder %v17489_v47, 1  ;;  %v17513_v47 = vld [vmem:[#allocation72_spill] sm:$0xff] }
 0x791   : > { %v7285_v57 = vsel %vm17486_vm12, %v7229_v29, %v7161_v10  ;;  %v7163_v46 = vsel %vm7101_vm14, %v7073_v23, %v7135_v43  ;;  %v7284_v54 = vsel %vm17488_vm2, %v7227_v60, %v7160_v49  ;;  %v7286_v62 = vsel %vm17490_vm0, %v7231_v24, %v7162_v41  ;;  %v17494_v49 = vld [vmem:[#allocation56_spill] sm:$0xff]  ;;  %7336 = vxpose.xlu0.b32.cont [7/16] (narrow) %v15013_v34, 8  ;;  %v17502_v23 = vld [vmem:[#allocation62_spill] sm:$0xff]  ;;  %v17506_v34 = vld [vmem:[#allocation67_spill] sm:$0xff] }
 0x792   : > { %v7234_v25 = vrot.slane %v7163_v46, 4  ;;  %v7078_v20 = vadd.f32 %v8684_v59, %v14955_v22  ;;  %7363 = vxpose.xlu1.b32.cont [2/16] (narrow) %v7319_v11, 8  ;;  %v7233_v38 = vsel %vm17491_vm15, %v7230_v45, %v7232_v0  ;;  %vm17493_vm9 = vcmp.eq.s32.totalorder %v17492_v27, 1  ;;  %vm17510_vm15 = vmmov %vm17501_vm3 }
 0x793   : > { %v15115_v10 = vsel %vm17493_vm9, %v7227_v60, %v7281_v48  ;;  %v7076_v39 = vadd.f32 %v14955_v22, %v6991_v17  ;;  %vm17495_vm7 = vcmp.eq.s32.totalorder %v17494_v49, 1  ;;  %v7239_v44 = vsel %vm17496_vm5, %v7236_v55, %v7238_v32  ;;  %v17524_v49 = vld [vmem:[#allocation26_spill] sm:$0xff] }
 0x794   : > { %v7320_v31 = vsel %vm17495_vm7, %v7233_v38, %v7284_v54  ;;  %vm17498_vm8 = vcmp.eq.s32.totalorder %v17497_v5, 1  ;;  %vm7106_vm10 = vcmp.gt.f32.partialorder %v7078_v20, 0.0  ;;  %v7140_v40 = vmul.f32 %v14960_v12, %v7078_v20  ;;  %v8688_v41 = vpop.f32.mrb[92].mxu1 }
 0x795   : > { %v7287_v19 = vsel %vm17498_vm8, %v7233_v38, %v7163_v46  ;;  %v7079_v45 = vadd.f32 %v8685_v3, %v14955_v22  ;;  %v7235_v37 = vsel %vm17479_vm4, %v7232_v0, %v7234_v25  ;;  %vm7104_vm1 = vcmp.gt.f32.partialorder %v7076_v39, 0.0  ;;  %7337 = vxpose.xlu0.b32.cont [8/16] (narrow) %v15022_v18, 8  ;;  %v7007_v28 = vpop.f32.mrb[93].mxu1  ;;  %v17511_v46 = vld [vmem:[#allocation70_spill] sm:$0xff]  ;;  %vm17517_vm8 = vmmov %vm17501_vm3 }
 0x796   : > { %v7138_v48 = vmul.f32 %v14960_v12, %v7076_v39  ;;  %v7077_v36 = vadd.f32 %v14955_v22, %v6994_v35  ;;  %vm17500_vm11 = vcmp.eq.s32.totalorder %v17499_v53, 1  ;;  %v7168_v21 = vsel %vm7106_vm10, %v7078_v20, %v7140_v40  ;;  %7364 = vxpose.xlu1.b32.cont [3/16] (narrow) %v7320_v31, 8  ;;  %v8689_v54 = vpop.f32.mrb[94].mxu1  ;;  %vm17518_vm10 = vmmov %vm17501_vm3 }
 0x797   : > { %v7321_v24 = vsel %vm17500_vm11, %v7235_v37, %v7285_v57  ;;  %vm7107_vm6 = vcmp.gt.f32.partialorder %v7079_v45, 0.0  ;;  %v7141_v63 = vmul.f32 %v14960_v12, %v7079_v45  ;;  %v7237_v15 = vsel %vm17501_vm3, %v7234_v25, %v7236_v55  ;;  %v17508_v55 = vld [vmem:[#allocation69_spill] sm:$0xff]  ;;  %v7010_v20 = vpop.f32.mrb[95].mxu1  ;;  %vm17519_vm4 = vmmov %vm17501_vm3 }
 0x798   : > { %v7244_v33 = vrot.slane %v7168_v21, 4  ;;  %v7166_v6 = vsel %vm7104_vm1, %v7076_v39, %v7138_v48  ;;  %vm7105_vm14 = vcmp.gt.f32.partialorder %v7077_v36, 0.0  ;;  %v7139_v56 = vmul.f32 %v14960_v12, %v7077_v36  ;;  %v17522_v39 = vld [vmem:[#allocation74_spill] sm:$0xff] }
 0x799   : > { %v7240_v29 = vrot.slane %v7166_v6, 4  ;;  %v7169_v50 = vsel %vm7107_vm6, %v7079_v45, %v7141_v63  ;;  %vm17503_vm13 = vcmp.eq.s32.totalorder %v17502_v23, 1  ;;  %vm17505_vm12 = vcmp.eq.s32.totalorder %v17504_v2, 1  ;;  %7338 = vxpose.xlu0.b32.cont [9/16] (narrow) %v15032_v16, 8  ;;  %v17534_v63 = vld [vmem:[#allocation85_spill] sm:$0xff] }
 0x79a   : > { %v7322_v26 = vsel %vm17503_vm13, %v7237_v15, %v7286_v62  ;;  %v7323_v30 = vsel %vm17505_vm12, %v7239_v44, %v7287_v19  ;;  %v7297_v51 = vrot.slane %v7169_v50, 4  ;;  %v7167_v11 = vsel %vm7105_vm14, %v7077_v36, %v7139_v56  ;;  %7365 = vxpose.xlu1.b32.cont [4/16] (narrow) %v7321_v24, 8  ;;  %v17528_v19 = vld [vmem:[#allocation78_spill] sm:$0xff]  ;;  %v17531_v24 = vld [vmem:[#allocation83_spill] sm:$0xff] }
 0x79b   : > { %vm17507_vm2 = vcmp.eq.s32.totalorder %v17506_v34, 1  ;;  %vm17509_vm0 = vcmp.eq.s32.totalorder %v17508_v55, 1  ;;  %v7242_v60 = vrot.slane %v7167_v11, 4  ;;  %v7241_v57 = vsel %vm17510_vm15, %v7238_v32, %v7240_v29  ;;  %v17520_v32 = vld [vmem:[#allocation75_spill] sm:$0xff] }
 0x79c   : > { %v7288_v43 = vsel %vm17507_vm2, %v7235_v37, %v7164_v9  ;;  %v7289_v0 = vsel %vm17509_vm0, %v7237_v15, %v7165_v4  ;;  %vm17512_vm9 = vcmp.eq.s32.totalorder %v17511_v46, 1  ;;  %v7046_v1 = vadd.f32 %v7007_v28, %v14948_v7  ;;  %v17515_v9 = vld [vmem:[#allocation12_spill] sm:$0xff]  ;;  %vm17530_vm2 = vmmov %vm17519_vm4 }
 0x79d   : > { %v7290_v59 = vsel %vm17512_vm9, %v7239_v44, %v7166_v6  ;;  %vm17514_vm7 = vcmp.eq.s32.totalorder %v17513_v47, 1  ;;  %vm17516_vm5 = vcmp.eq.s32.totalorder %v17515_v9, 1  ;;  %v7298_v4 = vsel %vm17517_vm8, %v7244_v33, %v7297_v51  ;;  %v17526_v44 = vld [vmem:[#allocation25_spill] sm:$0xff]  ;;  %7339 = vxpose.xlu0.b32.cont [10/16] (narrow) %v15036_v8, 8  ;;  %vm17533_vm15 = vmmov %vm17530_vm2 }
 0x79e   : > { %v7324_v62 = vsel %vm17514_vm7, %v7241_v57, %v7288_v43  ;;  %v7291_v25 = vsel %vm17516_vm5, %v7241_v57, %v7167_v11  ;;  %v7243_v18 = vsel %vm17518_vm10, %v7240_v29, %v7242_v60  ;;  %v7245_v17 = vsel %vm17519_vm4, %v7242_v60, %v7244_v33  ;;  %7366 = vxpose.xlu1.b32.cont [5/16] (narrow) %v7322_v26, 8 }
 0x79f   : > { %vm17521_vm1 = vcmp.eq.s32.totalorder %v17520_v32, 1  ;;  %v7080_v27 = vadd.f32 %v14955_v22, %v7046_v1  ;;  %v7047_v7 = vadd.f32 %v7010_v20, %v14950_v52  ;;  %vm17523_vm11 = vcmp.eq.s32.totalorder %v17522_v39, 1 }
 0x7a0   : > { %v7327_v38 = vsel %vm17521_vm1, %v7298_v4, %v7291_v25  ;;  %v7325_v3 = vsel %vm17523_vm11, %v7243_v18, %v7289_v0  ;;  %vm17525_vm6 = vcmp.eq.s32.totalorder %v17524_v49, 1  ;;  %vm17527_vm3 = vcmp.eq.s32.totalorder %v17526_v44, 1 }
 0x7a1   : > { %v7326_v31 = vsel %vm17525_vm6, %v7245_v17, %v7290_v59  ;;  %v7292_v5 = vsel %vm17527_vm3, %v7243_v18, %v7168_v21  ;;  %vm17529_vm14 = vcmp.eq.s32.totalorder %v17528_v19, 1  ;;  %vm7108_vm13 = vcmp.gt.f32.partialorder %v7080_v27, 0.0  ;;  %7340 = vxpose.xlu0.b32.cont [11/16] (narrow) %v15051_v42, 8 }
 0x7a2   : > { %v7293_v40 = vsel %vm17529_vm14, %v7245_v17, %v7169_v50  ;;  %v7142_v45 = vmul.f32 %v14960_v12, %v7080_v27  ;;  %v7081_v52 = vadd.f32 %v14955_v22, %v7047_v7  ;;  %7367 = vxpose.xlu1.b32.cont [6/16] (narrow) %v7323_v30, 8  ;;  %vm17532_vm0 = vcmp.eq.s32.totalorder %v17531_v24, 1 }
 0x7a3   : > { %vm17535_vm9 = vcmp.eq.s32.totalorder %v17534_v63, 1 }
 0x7a4   : > { %v7170_v35 = vsel %vm7108_vm13, %v7080_v27, %v7142_v45  ;;  %vm7109_vm12 = vcmp.gt.f32.partialorder %v7081_v52, 0.0  ;;  %v7143_v37 = vmul.f32 %v14960_v12, %v7081_v52 }
 0x7a5   : > { %v7299_v48 = vrot.slane %v7170_v35, 4  ;;  %7341 = vxpose.xlu0.b32.cont [12/16] (narrow) %v15060_v13, 8  ;;  %v9197_v13 = vld [vmem:[%s9368_s12] sm:$0xff] }
 0x7a6   : > { %v7171_v16 = vsel %vm7109_vm12, %v7081_v52, %v7143_v37  ;;  %7368 = vxpose.xlu1.b32.cont [7/16] (narrow) %v7324_v62, 8 }
 0x7a7   : > { %v7301_v36 = vrot.slane %v7171_v16, 4  ;;  %v7300_v53 = vsel %vm17530_vm2, %v7297_v51, %v7299_v48 }
 0x7a8   : > { %v7328_v21 = vsel %vm17532_vm0, %v7300_v53, %v7292_v5 }
 0x7a9   : > { %v7302_v22 = vsel %vm17533_vm15, %v7299_v48, %v7301_v36  ;;  %7342 = vxpose.xlu0.b32.cont [13/16] (narrow) %v15070_v61, 8 }
 0x7aa   : > { %v7329_v15 = vsel %vm17535_vm9, %v7302_v22, %v7293_v40  ;;  %7369 = vxpose.xlu1.b32.cont [8/16] (narrow) %v7325_v3, 8 }
 0x7ad   : > { %7343 = vxpose.xlu0.b32.cont [14/16] (narrow) %v15074_v58, 8 }
 0x7ae   : > { %7370 = vxpose.xlu1.b32.cont [9/16] (narrow) %v7326_v31, 8 }
 0x7b1   : > { %7344 = vxpose.xlu0.b32.cont [15/16] (narrow) %v15089_v14, 8 }
 0x7b2   : > { %7371 = vxpose.xlu1.b32.cont [10/16] (narrow) %v7327_v38, 8 }
 0x7b5   : > { %7345 = vxpose.xlu0.b32.end [16/16] (narrow) %v15115_v10, 8 }
 0x7b6   : > { %7372 = vxpose.xlu1.b32.cont [11/16] (narrow) %v7328_v21, 8 }
 0x7ba   : > { %7373 = vxpose.xlu1.b32.cont [12/16] (narrow) %v7329_v15, 8 }
 0x7be   : > { %7374 = vxpose.xlu1.b32.cont [13/16] (narrow) %v7329_v15, 8 }
 0x7c2   : > { %7375 = vxpose.xlu1.b32.cont [14/16] (narrow) %v7328_v21, 8 }
 0x7c6   : > { %7376 = vxpose.xlu1.b32.cont [15/16] (narrow) %v7327_v38, 8 }
 0x7ca   : > { %7377 = vxpose.xlu1.b32.end [16/16] (narrow) %v7326_v31, 8 }
 0x7f9   : > { %v7346_v12 = vpop.trf.xlu0 }
 0x80e   : > { %v7378_v8 = vpop.trf.xlu1 }
 0x80f   : > { %v7396_v42 = vcombine.low %v7346_v12, %v7378_v8 }
 0x811   : > { %v7398_v61 = vadd.f32 %v9197_v13, %v7396_v42 }
 0x813   : > { %7399 = vst [vmem:[%s305_s10] sm:$0xff] %v7398_v61 }
 0x814 PF: > { %s18_s27 = sadd.s32 1, %s9204_s27  }
 0x815   : > { %p15_p4 = scmp.ge.s32.totalorder %s18_s27, 4  }
 0x817   :  { %17 = sbr.rel (!%p15_p4) target bundleno = 1 (0x1), region = 98 }

</bundles_post_ra>
